<compile_context>
chip_gen: v7x
topology: tpu7x:2x2x1
jax: 0.10.0
libtpu: 0.0.40
codegen_flags: <defaults>
</compile_context>

<pallas_src>
import functools
import math

import numpy as np

import jax
import jax.numpy as jnp
from jax.experimental import pallas as pl
from jax.experimental.pallas import tpu as pltpu


# ------------------- trace-time interp / mask helpers (PyTorch align_corners=False) --

def _taps_1d(out_size, in_size):
    """PyTorch F.interpolate(mode='bilinear', align_corners=False) 1-D taps."""
    taps = []
    scale = in_size / out_size
    for i in range(out_size):
        src = max((i + 0.5) * scale - 0.5, 0.0)
        i0 = min(int(math.floor(src)), in_size - 1)
        i1 = min(i0 + 1, in_size - 1)
        lam = src - i0
        taps.append(((i0, float(1.0 - lam)), (i1, float(lam))))
    return taps


def _col_matrix(in_w, out_w, out_padded):
    """(in_w+2, out_w[+2]) column-interp matrix acting on a zero-bordered padded row."""
    wout = out_w + 2 if out_padded else out_w
    m = np.zeros((in_w + 2, wout), np.float32)
    shift = 1 if out_padded else 0
    for wo, ((j0, a0), (j1, a1)) in enumerate(_taps_1d(out_w, in_w)):
        m[1 + j0, shift + wo] += a0
        m[1 + j1, shift + wo] += a1
    return m


def _row_matrix(in_h, out_h):
    """(out_h, in_h) row-interp matrix acting on unpadded input rows (final upsample)."""
    m = np.zeros((out_h, in_h), np.float32)
    for o, ((i0, a0), (i1, a1)) in enumerate(_taps_1d(out_h, in_h)):
        m[o, i0] += a0
        m[o, i1] += a1
    return m


def _row_taps(in_h, out_h):
    """Padded-output row taps for the x2 intermediate upsamples (zero border rows)."""
    return [None] + _taps_1d(out_h, in_h) + [None]


def _border_mask(h, w):
    m = np.zeros((h + 2, w + 2), np.float32)
    m[1:h + 1, 1:w + 1] = 1.0
    return m.reshape(1, -1)


# ------------------------------------------------------------------- fused kernel --

def _decoder_kernel(*args, sizes, row_taps):
    (f16, f8, f4,
     m16, m8, m4,
     mc_8, mc_4, mc_o, mr_o,
     w_c1, b_c1, w_c2, b_c2, w_cd, b_cd,
     w_u1s, b_u1s, w_u1a, b_u1a, w_u1b, b_u1b,
     w_u2s, b_u2s, w_u2a, b_u2a, w_u2b, b_u2b,
     w_pr, b_pr,
     out_ref, xe_buf, asm_buf) = args

    (H16, W16), (H8, W8), (H4, W4) = sizes
    rt_8, rt_4 = row_taps

    def conv(x, w_ref, b_ref, mask, H, W, relu_in):
        """3x3 'same' conv.  x: (Cin, (H+2)*(W+2)) canonical (zero-bordered) value."""
        cin = x.shape[0]
        wp = W + 2
        np_ = (H + 2) * wp
        g = wp + 1                                   # halo so all 9 taps are in-range
        if relu_in:
            x = jnp.maximum(x, 0.0)
        # stage with a zero halo: every tap is a plain shifted view, no per-tap masking
        xe_buf[0:cin, 0:g] = jnp.zeros((cin, g), jnp.float32)
        xe_buf[0:cin, g:g + np_] = x
        xe_buf[0:cin, g + np_:g + np_ + g] = jnp.zeros((cin, g), jnp.float32)
        acc = None
        for t in range(9):
            off = (t // 3) * wp + (t % 3)
            tap = xe_buf[0:cin, off:off + np_]       # (Cin, Np)
            part = jnp.dot(w_ref[t], tap, preferred_element_type=jnp.float32)
            acc = part if acc is None else acc + part
        # one mask multiply restores the zero border (garbage only lands on border lanes)
        return (acc + b_ref[...]) * mask

    def resblock(x, w1, b1, w2, b2, mask, H, W, wd=None, bd=None):
        r = conv(x, w1, b1, mask, H, W, True)
        r = conv(r, w2, b2, mask, H, W, True)
        if wd is not None:
            x = conv(x, wd, bd, mask, H, W, False)
        return x + r

    def upsample_x2(x, mcol_ref, taps_list, H, W):
        """Separable x2 bilinear on canonical-padded x; result assembled in asm_buf."""
        c = x.shape[0]
        wp = W + 2
        mcol = mcol_ref[...]
        wo = mcol.shape[1]
        cols = [
            jnp.dot(x[:, (h + 1) * wp:(h + 2) * wp], mcol,
                    preferred_element_type=jnp.float32)
            for h in range(H)
        ]
        zero_row = jnp.zeros((c, wo), jnp.float32)
        for ro, taps in enumerate(taps_list):
            if taps is None:                          # zero border row of padded output
                v = zero_row
            else:
                (h0, a0), (h1, a1) = taps
                v = cols[h0] if a0 == 1.0 else cols[h0] * a0
                if a1 != 0.0:
                    v = v + cols[h1] * a1
            asm_buf[0:c, ro * wo:(ro + 1) * wo] = v
        return asm_buf[0:c, 0:len(taps_list) * wo]

    mk16 = m16[...]
    mk8 = m8[...]
    mk4 = m4[...]

    # ---- compress: ResBlock(valuedim*2 -> headdim) at stride 16 ----
    x = resblock(f16[0], w_c1, b_c1, w_c2, b_c2, mk16, H16, W16, w_cd, b_cd)

    # ---- up_16_8: skip_conv(f8) + upsample(x), then ResBlock ----
    u = upsample_x2(x, mc_8, rt_8, H16, W16)
    skip = conv(f8[0], w_u1s, b_u1s, mk8, H8, W8, False)
    x = resblock(skip + u, w_u1a, b_u1a, w_u1b, b_u1b, mk8, H8, W8)

    # ---- up_8_4: skip_conv(f4) + upsample(x), then ResBlock ----
    u = upsample_x2(x, mc_4, rt_4, H8, W8)
    skip = conv(f4[0], w_u2s, b_u2s, mk4, H4, W4, False)
    x = resblock(skip + u, w_u2a, b_u2a, w_u2b, b_u2b, mk4, H4, W4)

    # ---- pred(relu(x)); final x4 bilinear as two dense matmuls -> single dense store ----
    p = conv(x, w_pr, b_pr, mk4, H4, W4, True)       # (1, (H4+2)*(W4+2))
    wp4 = W4 + 2
    rows2d = jnp.concatenate(
        [p[:, (h + 1) * wp4:(h + 2) * wp4] for h in range(H4)], axis=0)      # (H4, W4+2)
    cols2d = jnp.dot(rows2d, mc_o[...], preferred_element_type=jnp.float32)  # (H4, Wo)
    out = jnp.dot(mr_o[...], cols2d, preferred_element_type=jnp.float32)     # (Ho, Wo)
    out_ref[0, :, :] = out


# --------------------------------------------------------------------- module glue --

def init_params(key, valuedim, headdim):
    ks = jax.random.split(key, 10)

    def conv_p(k, cin, cout):
        kw, kb = jax.random.split(k)
        fan_in = float(cin * 9)
        # weight layout: (tap=ky*3+kx, Cout, Cin); bias: (Cout, 1)
        w = jax.random.normal(kw, (9, cout, cin), jnp.float32) / jnp.sqrt(fan_in)
        b = jax.random.normal(kb, (cout, 1), jnp.float32) * 0.01
        return w, b

    return {
        # compress = ResBlock(valuedim*2, headdim)  (has downsample conv)
        "c_conv1": conv_p(ks[0], valuedim * 2, headdim),
        "c_conv2": conv_p(ks[1], headdim, headdim),
        "c_down":  conv_p(ks[2], valuedim * 2, headdim),
        # up_16_8 = UpsampleBlock(32, headdim, headdim)
        "u1_skip":  conv_p(ks[3], 32, headdim),
        "u1_conv1": conv_p(ks[4], headdim, headdim),
        "u1_conv2": conv_p(ks[5], headdim, headdim),
        # up_8_4 = UpsampleBlock(24, headdim, headdim)
        "u2_skip":  conv_p(ks[6], 24, headdim),
        "u2_conv1": conv_p(ks[7], headdim, headdim),
        "u2_conv2": conv_p(ks[8], headdim, headdim),
        # pred = Conv2d(headdim, 1, 3, padding=1)
        "pred": conv_p(ks[9], headdim, 1),
    }


def decoder_mb2(params, f16, f8, f4):
    """f16/f8/f4: NCHW stride-16/8/4 features. Returns NCHW logits (B, 1, 4*H4, 4*W4)."""
    B, C16, H16, W16 = f16.shape
    _, C8, H8, W8 = f8.shape
    _, C4, H4, W4 = f4.shape
    assert (H8, W8) == (2 * H16, 2 * W16) and (H4, W4) == (2 * H8, 2 * W8)
    Ho, Wo = 4 * H4, 4 * W4
    headdim = params["c_conv1"][0].shape[1]

    # one-time zero-border ("canonical") padding of the three external inputs
    def canon(x):
        b, c, h, w = x.shape
        xp = jnp.pad(x, ((0, 0), (0, 0), (1, 1), (1, 1)))
        return xp.reshape(b, c, (h + 2) * (w + 2))

    feats = [canon(f16), canon(f8), canon(f4)]

    consts = [
        jnp.asarray(_border_mask(H16, W16)),
        jnp.asarray(_border_mask(H8, W8)),
        jnp.asarray(_border_mask(H4, W4)),
        jnp.asarray(_col_matrix(W16, W8, out_padded=True)),
        jnp.asarray(_col_matrix(W8, W4, out_padded=True)),
        jnp.asarray(_col_matrix(W4, Wo, out_padded=False)),
        jnp.asarray(_row_matrix(H4, Ho)),
    ]
    row_taps = (_row_taps(H16, H8), _row_taps(H8, H4))

    worder = ["c_conv1", "c_conv2", "c_down",
              "u1_skip", "u1_conv1", "u1_conv2",
              "u2_skip", "u2_conv1", "u2_conv2", "pred"]
    wargs = []
    for name in worder:
        w, b = params[name]
        wargs += [w, b]

    inputs = feats + consts + wargs

    def const_spec(a):
        zeros = (0,) * a.ndim
        return pl.BlockSpec(a.shape, lambda i, z=zeros: z)

    in_specs = [pl.BlockSpec((1,) + t.shape[1:], lambda i: (i, 0, 0)) for t in feats]
    in_specs += [const_spec(a) for a in consts]
    in_specs += [const_spec(a) for a in wargs]

    # reusable VMEM scratch: halo-staging buffer + canonical assembly buffer
    xe_rows = max(C16, C8, C4, headdim)
    xe_cols = max((h + 2) * (w + 2) + 2 * (w + 3)
                  for (h, w) in ((H16, W16), (H8, W8), (H4, W4)))
    np4 = (H4 + 2) * (W4 + 2)

    kernel = functools.partial(
        _decoder_kernel,
        sizes=((H16, W16), (H8, W8), (H4, W4)),
        row_taps=row_taps,
    )

    out = pl.pallas_call(
        kernel,
        out_shape=jax.ShapeDtypeStruct((B, Ho, Wo), jnp.float32),
        grid=(B,),
        in_specs=in_specs,
        out_specs=pl.BlockSpec((1, Ho, Wo), lambda i: (i, 0, 0)),
        scratch_shapes=[
            pltpu.VMEM((xe_rows, xe_cols), jnp.float32),
            pltpu.VMEM((headdim, np4), jnp.float32),
        ],
        compiler_params=pltpu.CompilerParams(
            dimension_semantics=("parallel",),
        ),
    )(*inputs)
    return out.reshape(B, 1, Ho, Wo)


if __name__ == "__main__":
    key = jax.random.PRNGKey(0)
    kp, k1, k2, k3 = jax.random.split(key, 4)

    valuedim, headdim = 32, 16   # small, structure-consistent with Decoder_MB2 (512/256)
    B = 2
    params = init_params(kp, valuedim, headdim)

    # stride-16 / stride-8 / stride-4 feature maps of a 64x64 image
    f16 = jax.random.normal(k1, (B, valuedim * 2, 4, 4), jnp.float32)
    f8 = jax.random.normal(k2, (B, 32, 8, 8), jnp.float32)
    f4 = jax.random.normal(k3, (B, 24, 16, 16), jnp.float32)

    out = jax.jit(lambda a, b, c: decoder_mb2(params, a, b, c))(f16, f8, f4)
    out = jax.block_until_ready(out)
    assert out.shape == (B, 1, 64, 64), out.shape
    assert bool(jnp.all(jnp.isfinite(out)))
    print("KERNEL_OK")
</pallas_src>

<mosaic_0001>
module attributes {stable_mosaic.version = 11 : i64} {
  func.func @_decoder_kernel(%arg0: i32, %arg1: memref<1x64x36xf32, #tpu.memory_space<vmem>>, %arg2: memref<1x32x100xf32, #tpu.memory_space<vmem>>, %arg3: memref<1x24x324xf32, #tpu.memory_space<vmem>>, %arg4: memref<1x36xf32, #tpu.memory_space<vmem>>, %arg5: memref<1x100xf32, #tpu.memory_space<vmem>>, %arg6: memref<1x324xf32, #tpu.memory_space<vmem>>, %arg7: memref<6x10xf32, #tpu.memory_space<vmem>>, %arg8: memref<10x18xf32, #tpu.memory_space<vmem>>, %arg9: memref<18x64xf32, #tpu.memory_space<vmem>>, %arg10: memref<64x16xf32, #tpu.memory_space<vmem>>, %arg11: memref<9x16x64xf32, #tpu.memory_space<vmem>>, %arg12: memref<16x1xf32, #tpu.memory_space<vmem>>, %arg13: memref<9x16x16xf32, #tpu.memory_space<vmem>>, %arg14: memref<16x1xf32, #tpu.memory_space<vmem>>, %arg15: memref<9x16x64xf32, #tpu.memory_space<vmem>>, %arg16: memref<16x1xf32, #tpu.memory_space<vmem>>, %arg17: memref<9x16x32xf32, #tpu.memory_space<vmem>>, %arg18: memref<16x1xf32, #tpu.memory_space<vmem>>, %arg19: memref<9x16x16xf32, #tpu.memory_space<vmem>>, %arg20: memref<16x1xf32, #tpu.memory_space<vmem>>, %arg21: memref<9x16x16xf32, #tpu.memory_space<vmem>>, %arg22: memref<16x1xf32, #tpu.memory_space<vmem>>, %arg23: memref<9x16x24xf32, #tpu.memory_space<vmem>>, %arg24: memref<16x1xf32, #tpu.memory_space<vmem>>, %arg25: memref<9x16x16xf32, #tpu.memory_space<vmem>>, %arg26: memref<16x1xf32, #tpu.memory_space<vmem>>, %arg27: memref<9x16x16xf32, #tpu.memory_space<vmem>>, %arg28: memref<16x1xf32, #tpu.memory_space<vmem>>, %arg29: memref<9x1x16xf32, #tpu.memory_space<vmem>>, %arg30: memref<1x1xf32, #tpu.memory_space<vmem>>, %arg31: memref<1x64x64xf32, #tpu.memory_space<vmem>>, %arg32: memref<64x362xf32, #tpu.memory_space<vmem>>, %arg33: memref<16x324xf32, #tpu.memory_space<vmem>>) attributes {dimension_semantics = [#tpu.dimension_semantics<parallel>], iteration_bounds = array<i64: 2>, scalar_prefetch = 0 : i64, scratch_operands = 2 : i64, tpu.core_type = #tpu.core_type<tc>, window_params = [{transform_indices = @transform_0, window_bounds = array<i64: 1, 64, 36>}, {transform_indices = @transform_1, window_bounds = array<i64: 1, 32, 100>}, {transform_indices = @transform_2, window_bounds = array<i64: 1, 24, 324>}, {pipeline_mode = #tpu.pipeline_mode<synchronous>, transform_indices = @transform_3, window_bounds = array<i64: 1, 36>}, {pipeline_mode = #tpu.pipeline_mode<synchronous>, transform_indices = @transform_4, window_bounds = array<i64: 1, 100>}, {pipeline_mode = #tpu.pipeline_mode<synchronous>, transform_indices = @transform_5, window_bounds = array<i64: 1, 324>}, {pipeline_mode = #tpu.pipeline_mode<synchronous>, transform_indices = @transform_6, window_bounds = array<i64: 6, 10>}, {pipeline_mode = #tpu.pipeline_mode<synchronous>, transform_indices = @transform_7, window_bounds = array<i64: 10, 18>}, {pipeline_mode = #tpu.pipeline_mode<synchronous>, transform_indices = @transform_8, window_bounds = array<i64: 18, 64>}, {pipeline_mode = #tpu.pipeline_mode<synchronous>, transform_indices = @transform_9, window_bounds = array<i64: 64, 16>}, {pipeline_mode = #tpu.pipeline_mode<synchronous>, transform_indices = @transform_10, window_bounds = array<i64: 9, 16, 64>}, {pipeline_mode = #tpu.pipeline_mode<synchronous>, transform_indices = @transform_11, window_bounds = array<i64: 16, 1>}, {pipeline_mode = #tpu.pipeline_mode<synchronous>, transform_indices = @transform_12, window_bounds = array<i64: 9, 16, 16>}, {pipeline_mode = #tpu.pipeline_mode<synchronous>, transform_indices = @transform_13, window_bounds = array<i64: 16, 1>}, {pipeline_mode = #tpu.pipeline_mode<synchronous>, transform_indices = @transform_14, window_bounds = array<i64: 9, 16, 64>}, {pipeline_mode = #tpu.pipeline_mode<synchronous>, transform_indices = @transform_15, window_bounds = array<i64: 16, 1>}, {pipeline_mode = #tpu.pipeline_mode<synchronous>, transform_indices = @transform_16, window_bounds = array<i64: 9, 16, 32>}, {pipeline_mode = #tpu.pipeline_mode<synchronous>, transform_indices = @transform_17, window_bounds = array<i64: 16, 1>}, {pipeline_mode = #tpu.pipeline_mode<synchronous>, transform_indices = @transform_18, window_bounds = array<i64: 9, 16, 16>}, {pipeline_mode = #tpu.pipeline_mode<synchronous>, transform_indices = @transform_19, window_bounds = array<i64: 16, 1>}, {pipeline_mode = #tpu.pipeline_mode<synchronous>, transform_indices = @transform_20, window_bounds = array<i64: 9, 16, 16>}, {pipeline_mode = #tpu.pipeline_mode<synchronous>, transform_indices = @transform_21, window_bounds = array<i64: 16, 1>}, {pipeline_mode = #tpu.pipeline_mode<synchronous>, transform_indices = @transform_22, window_bounds = array<i64: 9, 16, 24>}, {pipeline_mode = #tpu.pipeline_mode<synchronous>, transform_indices = @transform_23, window_bounds = array<i64: 16, 1>}, {pipeline_mode = #tpu.pipeline_mode<synchronous>, transform_indices = @transform_24, window_bounds = array<i64: 9, 16, 16>}, {pipeline_mode = #tpu.pipeline_mode<synchronous>, transform_indices = @transform_25, window_bounds = array<i64: 16, 1>}, {pipeline_mode = #tpu.pipeline_mode<synchronous>, transform_indices = @transform_26, window_bounds = array<i64: 9, 16, 16>}, {pipeline_mode = #tpu.pipeline_mode<synchronous>, transform_indices = @transform_27, window_bounds = array<i64: 16, 1>}, {pipeline_mode = #tpu.pipeline_mode<synchronous>, transform_indices = @transform_28, window_bounds = array<i64: 9, 1, 16>}, {pipeline_mode = #tpu.pipeline_mode<synchronous>, transform_indices = @transform_29, window_bounds = array<i64: 1, 1>}, {transform_indices = @transform_30, window_bounds = array<i64: 1, 64, 64>}]} {
    %c0 = arith.constant 0 : index
    %c0_0 = arith.constant 0 : index
    %0 = vector.load %arg4[%c0, %c0_0] : memref<1x36xf32, #tpu.memory_space<vmem>>, vector<1x36xf32>
    %c0_1 = arith.constant 0 : index
    %c0_2 = arith.constant 0 : index
    %1 = vector.load %arg5[%c0_1, %c0_2] : memref<1x100xf32, #tpu.memory_space<vmem>>, vector<1x100xf32>
    %c0_3 = arith.constant 0 : index
    %c0_4 = arith.constant 0 : index
    %2 = vector.load %arg6[%c0_3, %c0_4] : memref<1x324xf32, #tpu.memory_space<vmem>>, vector<1x324xf32>
    %c0_5 = arith.constant 0 : index
    %c0_6 = arith.constant 0 : index
    %c0_7 = arith.constant 0 : index
    %3 = vector.load %arg1[%c0_5, %c0_6, %c0_7] : memref<1x64x36xf32, #tpu.memory_space<vmem>>, vector<1x64x36xf32>
    %4 = vector.shape_cast %3 : vector<1x64x36xf32> to vector<64x36xf32>
    %cst = arith.constant 0.000000e+00 : f32
    %5 = vector.broadcast %cst : f32 to vector<64x36xf32>
    %6 = arith.maximumf %4, %5 : vector<64x36xf32>
    %cst_8 = arith.constant 0.000000e+00 : f32
    %7 = vector.broadcast %cst_8 : f32 to vector<64x7xf32>
    %c0_9 = arith.constant 0 : index
    %c0_10 = arith.constant 0 : index
    %8 = vector.load %arg32[%c0_9, %c0_10] : memref<64x362xf32, #tpu.memory_space<vmem>>, vector<64x7xf32>
    tpu.vector_store %arg32[%c0_9, %c0_10], %7 {strides = array<i32>} : memref<64x362xf32, #tpu.memory_space<vmem>>, vector<64x7xf32>,
    %c0_11 = arith.constant 0 : index
    %c7 = arith.constant 7 : index
    %9 = vector.load %arg32[%c0_11, %c7] : memref<64x362xf32, #tpu.memory_space<vmem>>, vector<64x36xf32>
    tpu.vector_store %arg32[%c0_11, %c7], %6 {strides = array<i32>} : memref<64x362xf32, #tpu.memory_space<vmem>>, vector<64x36xf32>,
    %cst_12 = arith.constant 0.000000e+00 : f32
    %10 = vector.broadcast %cst_12 : f32 to vector<64x7xf32>
    %c0_13 = arith.constant 0 : index
    %c43 = arith.constant 43 : index
    %11 = vector.load %arg32[%c0_13, %c43] : memref<64x362xf32, #tpu.memory_space<vmem>>, vector<64x7xf32>
    tpu.vector_store %arg32[%c0_13, %c43], %10 {strides = array<i32>} : memref<64x362xf32, #tpu.memory_space<vmem>>, vector<64x7xf32>,
    %c0_14 = arith.constant 0 : index
    %c0_15 = arith.constant 0 : index
    %12 = vector.load %arg32[%c0_14, %c0_15] : memref<64x362xf32, #tpu.memory_space<vmem>>, vector<64x36xf32>
    %c0_16 = arith.constant 0 : index
    %c0_17 = arith.constant 0 : index
    %c0_18 = arith.constant 0 : index
    %13 = vector.load %arg11[%c0_16, %c0_17, %c0_18] : memref<9x16x64xf32, #tpu.memory_space<vmem>>, vector<1x16x64xf32>
    %14 = vector.shape_cast %13 : vector<1x16x64xf32> to vector<16x64xf32>
    %cst_19 = arith.constant dense<0.000000e+00> : vector<16x36xf32>
    %15 = tpu.matmul %14, %12, %cst_19 {dimension_numbers = #tpu.dot_dimension_numbers<[1], [0], [0], [1], [0, 0, 1, 1], [], []>} : vector<16x64xf32>, vector<64x36xf32>, vector<16x36xf32> -> vector<16x36xf32>
    %c0_20 = arith.constant 0 : index
    %c1 = arith.constant 1 : index
    %16 = vector.load %arg32[%c0_20, %c1] : memref<64x362xf32, #tpu.memory_space<vmem>>, vector<64x36xf32>
    %c1_21 = arith.constant 1 : index
    %c0_22 = arith.constant 0 : index
    %c0_23 = arith.constant 0 : index
    %17 = vector.load %arg11[%c1_21, %c0_22, %c0_23] : memref<9x16x64xf32, #tpu.memory_space<vmem>>, vector<1x16x64xf32>
    %18 = vector.shape_cast %17 : vector<1x16x64xf32> to vector<16x64xf32>
    %cst_24 = arith.constant dense<0.000000e+00> : vector<16x36xf32>
    %19 = tpu.matmul %18, %16, %cst_24 {dimension_numbers = #tpu.dot_dimension_numbers<[1], [0], [0], [1], [0, 0, 1, 1], [], []>} : vector<16x64xf32>, vector<64x36xf32>, vector<16x36xf32> -> vector<16x36xf32>
    %20 = arith.addf %15, %19 : vector<16x36xf32>
    %c0_25 = arith.constant 0 : index
    %c2 = arith.constant 2 : index
    %21 = vector.load %arg32[%c0_25, %c2] : memref<64x362xf32, #tpu.memory_space<vmem>>, vector<64x36xf32>
    %c2_26 = arith.constant 2 : index
    %c0_27 = arith.constant 0 : index
    %c0_28 = arith.constant 0 : index
    %22 = vector.load %arg11[%c2_26, %c0_27, %c0_28] : memref<9x16x64xf32, #tpu.memory_space<vmem>>, vector<1x16x64xf32>
    %23 = vector.shape_cast %22 : vector<1x16x64xf32> to vector<16x64xf32>
    %cst_29 = arith.constant dense<0.000000e+00> : vector<16x36xf32>
    %24 = tpu.matmul %23, %21, %cst_29 {dimension_numbers = #tpu.dot_dimension_numbers<[1], [0], [0], [1], [0, 0, 1, 1], [], []>} : vector<16x64xf32>, vector<64x36xf32>, vector<16x36xf32> -> vector<16x36xf32>
    %25 = arith.addf %20, %24 : vector<16x36xf32>
    %c0_30 = arith.constant 0 : index
    %c6 = arith.constant 6 : index
    %26 = vector.load %arg32[%c0_30, %c6] : memref<64x362xf32, #tpu.memory_space<vmem>>, vector<64x36xf32>
    %c3 = arith.constant 3 : index
    %c0_31 = arith.constant 0 : index
    %c0_32 = arith.constant 0 : index
    %27 = vector.load %arg11[%c3, %c0_31, %c0_32] : memref<9x16x64xf32, #tpu.memory_space<vmem>>, vector<1x16x64xf32>
    %28 = vector.shape_cast %27 : vector<1x16x64xf32> to vector<16x64xf32>
    %cst_33 = arith.constant dense<0.000000e+00> : vector<16x36xf32>
    %29 = tpu.matmul %28, %26, %cst_33 {dimension_numbers = #tpu.dot_dimension_numbers<[1], [0], [0], [1], [0, 0, 1, 1], [], []>} : vector<16x64xf32>, vector<64x36xf32>, vector<16x36xf32> -> vector<16x36xf32>
    %30 = arith.addf %25, %29 : vector<16x36xf32>
    %c0_34 = arith.constant 0 : index
    %c7_35 = arith.constant 7 : index
    %31 = vector.load %arg32[%c0_34, %c7_35] : memref<64x362xf32, #tpu.memory_space<vmem>>, vector<64x36xf32>
    %c4 = arith.constant 4 : index
    %c0_36 = arith.constant 0 : index
    %c0_37 = arith.constant 0 : index
    %32 = vector.load %arg11[%c4, %c0_36, %c0_37] : memref<9x16x64xf32, #tpu.memory_space<vmem>>, vector<1x16x64xf32>
    %33 = vector.shape_cast %32 : vector<1x16x64xf32> to vector<16x64xf32>
    %cst_38 = arith.constant dense<0.000000e+00> : vector<16x36xf32>
    %34 = tpu.matmul %33, %31, %cst_38 {dimension_numbers = #tpu.dot_dimension_numbers<[1], [0], [0], [1], [0, 0, 1, 1], [], []>} : vector<16x64xf32>, vector<64x36xf32>, vector<16x36xf32> -> vector<16x36xf32>
    %35 = arith.addf %30, %34 : vector<16x36xf32>
    %c0_39 = arith.constant 0 : index
    %c8 = arith.constant 8 : index
    %36 = vector.load %arg32[%c0_39, %c8] : memref<64x362xf32, #tpu.memory_space<vmem>>, vector<64x36xf32>
    %c5 = arith.constant 5 : index
    %c0_40 = arith.constant 0 : index
    %c0_41 = arith.constant 0 : index
    %37 = vector.load %arg11[%c5, %c0_40, %c0_41] : memref<9x16x64xf32, #tpu.memory_space<vmem>>, vector<1x16x64xf32>
    %38 = vector.shape_cast %37 : vector<1x16x64xf32> to vector<16x64xf32>
    %cst_42 = arith.constant dense<0.000000e+00> : vector<16x36xf32>
    %39 = tpu.matmul %38, %36, %cst_42 {dimension_numbers = #tpu.dot_dimension_numbers<[1], [0], [0], [1], [0, 0, 1, 1], [], []>} : vector<16x64xf32>, vector<64x36xf32>, vector<16x36xf32> -> vector<16x36xf32>
    %40 = arith.addf %35, %39 : vector<16x36xf32>
    %c0_43 = arith.constant 0 : index
    %c12 = arith.constant 12 : index
    %41 = vector.load %arg32[%c0_43, %c12] : memref<64x362xf32, #tpu.memory_space<vmem>>, vector<64x36xf32>
    %c6_44 = arith.constant 6 : index
    %c0_45 = arith.constant 0 : index
    %c0_46 = arith.constant 0 : index
    %42 = vector.load %arg11[%c6_44, %c0_45, %c0_46] : memref<9x16x64xf32, #tpu.memory_space<vmem>>, vector<1x16x64xf32>
    %43 = vector.shape_cast %42 : vector<1x16x64xf32> to vector<16x64xf32>
    %cst_47 = arith.constant dense<0.000000e+00> : vector<16x36xf32>
    %44 = tpu.matmul %43, %41, %cst_47 {dimension_numbers = #tpu.dot_dimension_numbers<[1], [0], [0], [1], [0, 0, 1, 1], [], []>} : vector<16x64xf32>, vector<64x36xf32>, vector<16x36xf32> -> vector<16x36xf32>
    %45 = arith.addf %40, %44 : vector<16x36xf32>
    %c0_48 = arith.constant 0 : index
    %c13 = arith.constant 13 : index
    %46 = vector.load %arg32[%c0_48, %c13] : memref<64x362xf32, #tpu.memory_space<vmem>>, vector<64x36xf32>
    %c7_49 = arith.constant 7 : index
    %c0_50 = arith.constant 0 : index
    %c0_51 = arith.constant 0 : index
    %47 = vector.load %arg11[%c7_49, %c0_50, %c0_51] : memref<9x16x64xf32, #tpu.memory_space<vmem>>, vector<1x16x64xf32>
    %48 = vector.shape_cast %47 : vector<1x16x64xf32> to vector<16x64xf32>
    %cst_52 = arith.constant dense<0.000000e+00> : vector<16x36xf32>
    %49 = tpu.matmul %48, %46, %cst_52 {dimension_numbers = #tpu.dot_dimension_numbers<[1], [0], [0], [1], [0, 0, 1, 1], [], []>} : vector<16x64xf32>, vector<64x36xf32>, vector<16x36xf32> -> vector<16x36xf32>
    %50 = arith.addf %45, %49 : vector<16x36xf32>
    %c0_53 = arith.constant 0 : index
    %c14 = arith.constant 14 : index
    %51 = vector.load %arg32[%c0_53, %c14] : memref<64x362xf32, #tpu.memory_space<vmem>>, vector<64x36xf32>
    %c8_54 = arith.constant 8 : index
    %c0_55 = arith.constant 0 : index
    %c0_56 = arith.constant 0 : index
    %52 = vector.load %arg11[%c8_54, %c0_55, %c0_56] : memref<9x16x64xf32, #tpu.memory_space<vmem>>, vector<1x16x64xf32>
    %53 = vector.shape_cast %52 : vector<1x16x64xf32> to vector<16x64xf32>
    %cst_57 = arith.constant dense<0.000000e+00> : vector<16x36xf32>
    %54 = tpu.matmul %53, %51, %cst_57 {dimension_numbers = #tpu.dot_dimension_numbers<[1], [0], [0], [1], [0, 0, 1, 1], [], []>} : vector<16x64xf32>, vector<64x36xf32>, vector<16x36xf32> -> vector<16x36xf32>
    %55 = arith.addf %50, %54 : vector<16x36xf32>
    %c0_58 = arith.constant 0 : index
    %c0_59 = arith.constant 0 : index
    %56 = vector.load %arg12[%c0_58, %c0_59] : memref<16x1xf32, #tpu.memory_space<vmem>>, vector<16x1xf32>
    %57 = vector.broadcast %56 : vector<16x1xf32> to vector<16x36xf32>
    %58 = arith.addf %55, %57 : vector<16x36xf32>
    %59 = vector.broadcast %0 : vector<1x36xf32> to vector<16x36xf32>
    %60 = arith.mulf %58, %59 : vector<16x36xf32>
    %cst_60 = arith.constant 0.000000e+00 : f32
    %61 = vector.broadcast %cst_60 : f32 to vector<16x36xf32>
    %62 = arith.maximumf %60, %61 : vector<16x36xf32>
    %cst_61 = arith.constant 0.000000e+00 : f32
    %63 = vector.broadcast %cst_61 : f32 to vector<16x7xf32>
    %c0_62 = arith.constant 0 : index
    %c0_63 = arith.constant 0 : index
    %64 = vector.load %arg32[%c0_62, %c0_63] : memref<64x362xf32, #tpu.memory_space<vmem>>, vector<16x7xf32>
    tpu.vector_store %arg32[%c0_62, %c0_63], %63 {strides = array<i32>} : memref<64x362xf32, #tpu.memory_space<vmem>>, vector<16x7xf32>,
    %c0_64 = arith.constant 0 : index
    %c7_65 = arith.constant 7 : index
    %65 = vector.load %arg32[%c0_64, %c7_65] : memref<64x362xf32, #tpu.memory_space<vmem>>, vector<16x36xf32>
    tpu.vector_store %arg32[%c0_64, %c7_65], %62 {strides = array<i32>} : memref<64x362xf32, #tpu.memory_space<vmem>>, vector<16x36xf32>,
    %cst_66 = arith.constant 0.000000e+00 : f32
    %66 = vector.broadcast %cst_66 : f32 to vector<16x7xf32>
    %c0_67 = arith.constant 0 : index
    %c43_68 = arith.constant 43 : index
    %67 = vector.load %arg32[%c0_67, %c43_68] : memref<64x362xf32, #tpu.memory_space<vmem>>, vector<16x7xf32>
    tpu.vector_store %arg32[%c0_67, %c43_68], %66 {strides = array<i32>} : memref<64x362xf32, #tpu.memory_space<vmem>>, vector<16x7xf32>,
    %c0_69 = arith.constant 0 : index
    %c0_70 = arith.constant 0 : index
    %68 = vector.load %arg32[%c0_69, %c0_70] : memref<64x362xf32, #tpu.memory_space<vmem>>, vector<16x36xf32>
    %c0_71 = arith.constant 0 : index
    %c0_72 = arith.constant 0 : index
    %c0_73 = arith.constant 0 : index
    %69 = vector.load %arg13[%c0_71, %c0_72, %c0_73] : memref<9x16x16xf32, #tpu.memory_space<vmem>>, vector<1x16x16xf32>
    %70 = vector.shape_cast %69 : vector<1x16x16xf32> to vector<16x16xf32>
    %cst_74 = arith.constant dense<0.000000e+00> : vector<16x36xf32>
    %71 = tpu.matmul %70, %68, %cst_74 {dimension_numbers = #tpu.dot_dimension_numbers<[1], [0], [0], [1], [0, 0, 1, 1], [], []>} : vector<16x16xf32>, vector<16x36xf32>, vector<16x36xf32> -> vector<16x36xf32>
    %c0_75 = arith.constant 0 : index
    %c1_76 = arith.constant 1 : index
    %72 = vector.load %arg32[%c0_75, %c1_76] : memref<64x362xf32, #tpu.memory_space<vmem>>, vector<16x36xf32>
    %c1_77 = arith.constant 1 : index
    %c0_78 = arith.constant 0 : index
    %c0_79 = arith.constant 0 : index
    %73 = vector.load %arg13[%c1_77, %c0_78, %c0_79] : memref<9x16x16xf32, #tpu.memory_space<vmem>>, vector<1x16x16xf32>
    %74 = vector.shape_cast %73 : vector<1x16x16xf32> to vector<16x16xf32>
    %cst_80 = arith.constant dense<0.000000e+00> : vector<16x36xf32>
    %75 = tpu.matmul %74, %72, %cst_80 {dimension_numbers = #tpu.dot_dimension_numbers<[1], [0], [0], [1], [0, 0, 1, 1], [], []>} : vector<16x16xf32>, vector<16x36xf32>, vector<16x36xf32> -> vector<16x36xf32>
    %76 = arith.addf %71, %75 : vector<16x36xf32>
    %c0_81 = arith.constant 0 : index
    %c2_82 = arith.constant 2 : index
    %77 = vector.load %arg32[%c0_81, %c2_82] : memref<64x362xf32, #tpu.memory_space<vmem>>, vector<16x36xf32>
    %c2_83 = arith.constant 2 : index
    %c0_84 = arith.constant 0 : index
    %c0_85 = arith.constant 0 : index
    %78 = vector.load %arg13[%c2_83, %c0_84, %c0_85] : memref<9x16x16xf32, #tpu.memory_space<vmem>>, vector<1x16x16xf32>
    %79 = vector.shape_cast %78 : vector<1x16x16xf32> to vector<16x16xf32>
    %cst_86 = arith.constant dense<0.000000e+00> : vector<16x36xf32>
    %80 = tpu.matmul %79, %77, %cst_86 {dimension_numbers = #tpu.dot_dimension_numbers<[1], [0], [0], [1], [0, 0, 1, 1], [], []>} : vector<16x16xf32>, vector<16x36xf32>, vector<16x36xf32> -> vector<16x36xf32>
    %81 = arith.addf %76, %80 : vector<16x36xf32>
    %c0_87 = arith.constant 0 : index
    %c6_88 = arith.constant 6 : index
    %82 = vector.load %arg32[%c0_87, %c6_88] : memref<64x362xf32, #tpu.memory_space<vmem>>, vector<16x36xf32>
    %c3_89 = arith.constant 3 : index
    %c0_90 = arith.constant 0 : index
    %c0_91 = arith.constant 0 : index
    %83 = vector.load %arg13[%c3_89, %c0_90, %c0_91] : memref<9x16x16xf32, #tpu.memory_space<vmem>>, vector<1x16x16xf32>
    %84 = vector.shape_cast %83 : vector<1x16x16xf32> to vector<16x16xf32>
    %cst_92 = arith.constant dense<0.000000e+00> : vector<16x36xf32>
    %85 = tpu.matmul %84, %82, %cst_92 {dimension_numbers = #tpu.dot_dimension_numbers<[1], [0], [0], [1], [0, 0, 1, 1], [], []>} : vector<16x16xf32>, vector<16x36xf32>, vector<16x36xf32> -> vector<16x36xf32>
    %86 = arith.addf %81, %85 : vector<16x36xf32>
    %c0_93 = arith.constant 0 : index
    %c7_94 = arith.constant 7 : index
    %87 = vector.load %arg32[%c0_93, %c7_94] : memref<64x362xf32, #tpu.memory_space<vmem>>, vector<16x36xf32>
    %c4_95 = arith.constant 4 : index
    %c0_96 = arith.constant 0 : index
    %c0_97 = arith.constant 0 : index
    %88 = vector.load %arg13[%c4_95, %c0_96, %c0_97] : memref<9x16x16xf32, #tpu.memory_space<vmem>>, vector<1x16x16xf32>
    %89 = vector.shape_cast %88 : vector<1x16x16xf32> to vector<16x16xf32>
    %cst_98 = arith.constant dense<0.000000e+00> : vector<16x36xf32>
    %90 = tpu.matmul %89, %87, %cst_98 {dimension_numbers = #tpu.dot_dimension_numbers<[1], [0], [0], [1], [0, 0, 1, 1], [], []>} : vector<16x16xf32>, vector<16x36xf32>, vector<16x36xf32> -> vector<16x36xf32>
    %91 = arith.addf %86, %90 : vector<16x36xf32>
    %c0_99 = arith.constant 0 : index
    %c8_100 = arith.constant 8 : index
    %92 = vector.load %arg32[%c0_99, %c8_100] : memref<64x362xf32, #tpu.memory_space<vmem>>, vector<16x36xf32>
    %c5_101 = arith.constant 5 : index
    %c0_102 = arith.constant 0 : index
    %c0_103 = arith.constant 0 : index
    %93 = vector.load %arg13[%c5_101, %c0_102, %c0_103] : memref<9x16x16xf32, #tpu.memory_space<vmem>>, vector<1x16x16xf32>
    %94 = vector.shape_cast %93 : vector<1x16x16xf32> to vector<16x16xf32>
    %cst_104 = arith.constant dense<0.000000e+00> : vector<16x36xf32>
    %95 = tpu.matmul %94, %92, %cst_104 {dimension_numbers = #tpu.dot_dimension_numbers<[1], [0], [0], [1], [0, 0, 1, 1], [], []>} : vector<16x16xf32>, vector<16x36xf32>, vector<16x36xf32> -> vector<16x36xf32>
    %96 = arith.addf %91, %95 : vector<16x36xf32>
    %c0_105 = arith.constant 0 : index
    %c12_106 = arith.constant 12 : index
    %97 = vector.load %arg32[%c0_105, %c12_106] : memref<64x362xf32, #tpu.memory_space<vmem>>, vector<16x36xf32>
    %c6_107 = arith.constant 6 : index
    %c0_108 = arith.constant 0 : index
    %c0_109 = arith.constant 0 : index
    %98 = vector.load %arg13[%c6_107, %c0_108, %c0_109] : memref<9x16x16xf32, #tpu.memory_space<vmem>>, vector<1x16x16xf32>
    %99 = vector.shape_cast %98 : vector<1x16x16xf32> to vector<16x16xf32>
    %cst_110 = arith.constant dense<0.000000e+00> : vector<16x36xf32>
    %100 = tpu.matmul %99, %97, %cst_110 {dimension_numbers = #tpu.dot_dimension_numbers<[1], [0], [0], [1], [0, 0, 1, 1], [], []>} : vector<16x16xf32>, vector<16x36xf32>, vector<16x36xf32> -> vector<16x36xf32>
    %101 = arith.addf %96, %100 : vector<16x36xf32>
    %c0_111 = arith.constant 0 : index
    %c13_112 = arith.constant 13 : index
    %102 = vector.load %arg32[%c0_111, %c13_112] : memref<64x362xf32, #tpu.memory_space<vmem>>, vector<16x36xf32>
    %c7_113 = arith.constant 7 : index
    %c0_114 = arith.constant 0 : index
    %c0_115 = arith.constant 0 : index
    %103 = vector.load %arg13[%c7_113, %c0_114, %c0_115] : memref<9x16x16xf32, #tpu.memory_space<vmem>>, vector<1x16x16xf32>
    %104 = vector.shape_cast %103 : vector<1x16x16xf32> to vector<16x16xf32>
    %cst_116 = arith.constant dense<0.000000e+00> : vector<16x36xf32>
    %105 = tpu.matmul %104, %102, %cst_116 {dimension_numbers = #tpu.dot_dimension_numbers<[1], [0], [0], [1], [0, 0, 1, 1], [], []>} : vector<16x16xf32>, vector<16x36xf32>, vector<16x36xf32> -> vector<16x36xf32>
    %106 = arith.addf %101, %105 : vector<16x36xf32>
    %c0_117 = arith.constant 0 : index
    %c14_118 = arith.constant 14 : index
    %107 = vector.load %arg32[%c0_117, %c14_118] : memref<64x362xf32, #tpu.memory_space<vmem>>, vector<16x36xf32>
    %c8_119 = arith.constant 8 : index
    %c0_120 = arith.constant 0 : index
    %c0_121 = arith.constant 0 : index
    %108 = vector.load %arg13[%c8_119, %c0_120, %c0_121] : memref<9x16x16xf32, #tpu.memory_space<vmem>>, vector<1x16x16xf32>
    %109 = vector.shape_cast %108 : vector<1x16x16xf32> to vector<16x16xf32>
    %cst_122 = arith.constant dense<0.000000e+00> : vector<16x36xf32>
    %110 = tpu.matmul %109, %107, %cst_122 {dimension_numbers = #tpu.dot_dimension_numbers<[1], [0], [0], [1], [0, 0, 1, 1], [], []>} : vector<16x16xf32>, vector<16x36xf32>, vector<16x36xf32> -> vector<16x36xf32>
    %111 = arith.addf %106, %110 : vector<16x36xf32>
    %c0_123 = arith.constant 0 : index
    %c0_124 = arith.constant 0 : index
    %112 = vector.load %arg14[%c0_123, %c0_124] : memref<16x1xf32, #tpu.memory_space<vmem>>, vector<16x1xf32>
    %113 = vector.broadcast %112 : vector<16x1xf32> to vector<16x36xf32>
    %114 = arith.addf %111, %113 : vector<16x36xf32>
    %115 = vector.broadcast %0 : vector<1x36xf32> to vector<16x36xf32>
    %116 = arith.mulf %114, %115 : vector<16x36xf32>
    %cst_125 = arith.constant 0.000000e+00 : f32
    %117 = vector.broadcast %cst_125 : f32 to vector<64x7xf32>
    %c0_126 = arith.constant 0 : index
    %c0_127 = arith.constant 0 : index
    %118 = vector.load %arg32[%c0_126, %c0_127] : memref<64x362xf32, #tpu.memory_space<vmem>>, vector<64x7xf32>
    tpu.vector_store %arg32[%c0_126, %c0_127], %117 {strides = array<i32>} : memref<64x362xf32, #tpu.memory_space<vmem>>, vector<64x7xf32>,
    %c0_128 = arith.constant 0 : index
    %c7_129 = arith.constant 7 : index
    %119 = vector.load %arg32[%c0_128, %c7_129] : memref<64x362xf32, #tpu.memory_space<vmem>>, vector<64x36xf32>
    tpu.vector_store %arg32[%c0_128, %c7_129], %4 {strides = array<i32>} : memref<64x362xf32, #tpu.memory_space<vmem>>, vector<64x36xf32>,
    %cst_130 = arith.constant 0.000000e+00 : f32
    %120 = vector.broadcast %cst_130 : f32 to vector<64x7xf32>
    %c0_131 = arith.constant 0 : index
    %c43_132 = arith.constant 43 : index
    %121 = vector.load %arg32[%c0_131, %c43_132] : memref<64x362xf32, #tpu.memory_space<vmem>>, vector<64x7xf32>
    tpu.vector_store %arg32[%c0_131, %c43_132], %120 {strides = array<i32>} : memref<64x362xf32, #tpu.memory_space<vmem>>, vector<64x7xf32>,
    %c0_133 = arith.constant 0 : index
    %c0_134 = arith.constant 0 : index
    %122 = vector.load %arg32[%c0_133, %c0_134] : memref<64x362xf32, #tpu.memory_space<vmem>>, vector<64x36xf32>
    %c0_135 = arith.constant 0 : index
    %c0_136 = arith.constant 0 : index
    %c0_137 = arith.constant 0 : index
    %123 = vector.load %arg15[%c0_135, %c0_136, %c0_137] : memref<9x16x64xf32, #tpu.memory_space<vmem>>, vector<1x16x64xf32>
    %124 = vector.shape_cast %123 : vector<1x16x64xf32> to vector<16x64xf32>
    %cst_138 = arith.constant dense<0.000000e+00> : vector<16x36xf32>
    %125 = tpu.matmul %124, %122, %cst_138 {dimension_numbers = #tpu.dot_dimension_numbers<[1], [0], [0], [1], [0, 0, 1, 1], [], []>} : vector<16x64xf32>, vector<64x36xf32>, vector<16x36xf32> -> vector<16x36xf32>
    %c0_139 = arith.constant 0 : index
    %c1_140 = arith.constant 1 : index
    %126 = vector.load %arg32[%c0_139, %c1_140] : memref<64x362xf32, #tpu.memory_space<vmem>>, vector<64x36xf32>
    %c1_141 = arith.constant 1 : index
    %c0_142 = arith.constant 0 : index
    %c0_143 = arith.constant 0 : index
    %127 = vector.load %arg15[%c1_141, %c0_142, %c0_143] : memref<9x16x64xf32, #tpu.memory_space<vmem>>, vector<1x16x64xf32>
    %128 = vector.shape_cast %127 : vector<1x16x64xf32> to vector<16x64xf32>
    %cst_144 = arith.constant dense<0.000000e+00> : vector<16x36xf32>
    %129 = tpu.matmul %128, %126, %cst_144 {dimension_numbers = #tpu.dot_dimension_numbers<[1], [0], [0], [1], [0, 0, 1, 1], [], []>} : vector<16x64xf32>, vector<64x36xf32>, vector<16x36xf32> -> vector<16x36xf32>
    %130 = arith.addf %125, %129 : vector<16x36xf32>
    %c0_145 = arith.constant 0 : index
    %c2_146 = arith.constant 2 : index
    %131 = vector.load %arg32[%c0_145, %c2_146] : memref<64x362xf32, #tpu.memory_space<vmem>>, vector<64x36xf32>
    %c2_147 = arith.constant 2 : index
    %c0_148 = arith.constant 0 : index
    %c0_149 = arith.constant 0 : index
    %132 = vector.load %arg15[%c2_147, %c0_148, %c0_149] : memref<9x16x64xf32, #tpu.memory_space<vmem>>, vector<1x16x64xf32>
    %133 = vector.shape_cast %132 : vector<1x16x64xf32> to vector<16x64xf32>
    %cst_150 = arith.constant dense<0.000000e+00> : vector<16x36xf32>
    %134 = tpu.matmul %133, %131, %cst_150 {dimension_numbers = #tpu.dot_dimension_numbers<[1], [0], [0], [1], [0, 0, 1, 1], [], []>} : vector<16x64xf32>, vector<64x36xf32>, vector<16x36xf32> -> vector<16x36xf32>
    %135 = arith.addf %130, %134 : vector<16x36xf32>
    %c0_151 = arith.constant 0 : index
    %c6_152 = arith.constant 6 : index
    %136 = vector.load %arg32[%c0_151, %c6_152] : memref<64x362xf32, #tpu.memory_space<vmem>>, vector<64x36xf32>
    %c3_153 = arith.constant 3 : index
    %c0_154 = arith.constant 0 : index
    %c0_155 = arith.constant 0 : index
    %137 = vector.load %arg15[%c3_153, %c0_154, %c0_155] : memref<9x16x64xf32, #tpu.memory_space<vmem>>, vector<1x16x64xf32>
    %138 = vector.shape_cast %137 : vector<1x16x64xf32> to vector<16x64xf32>
    %cst_156 = arith.constant dense<0.000000e+00> : vector<16x36xf32>
    %139 = tpu.matmul %138, %136, %cst_156 {dimension_numbers = #tpu.dot_dimension_numbers<[1], [0], [0], [1], [0, 0, 1, 1], [], []>} : vector<16x64xf32>, vector<64x36xf32>, vector<16x36xf32> -> vector<16x36xf32>
    %140 = arith.addf %135, %139 : vector<16x36xf32>
    %c0_157 = arith.constant 0 : index
    %c7_158 = arith.constant 7 : index
    %141 = vector.load %arg32[%c0_157, %c7_158] : memref<64x362xf32, #tpu.memory_space<vmem>>, vector<64x36xf32>
    %c4_159 = arith.constant 4 : index
    %c0_160 = arith.constant 0 : index
    %c0_161 = arith.constant 0 : index
    %142 = vector.load %arg15[%c4_159, %c0_160, %c0_161] : memref<9x16x64xf32, #tpu.memory_space<vmem>>, vector<1x16x64xf32>
    %143 = vector.shape_cast %142 : vector<1x16x64xf32> to vector<16x64xf32>
    %cst_162 = arith.constant dense<0.000000e+00> : vector<16x36xf32>
    %144 = tpu.matmul %143, %141, %cst_162 {dimension_numbers = #tpu.dot_dimension_numbers<[1], [0], [0], [1], [0, 0, 1, 1], [], []>} : vector<16x64xf32>, vector<64x36xf32>, vector<16x36xf32> -> vector<16x36xf32>
    %145 = arith.addf %140, %144 : vector<16x36xf32>
    %c0_163 = arith.constant 0 : index
    %c8_164 = arith.constant 8 : index
    %146 = vector.load %arg32[%c0_163, %c8_164] : memref<64x362xf32, #tpu.memory_space<vmem>>, vector<64x36xf32>
    %c5_165 = arith.constant 5 : index
    %c0_166 = arith.constant 0 : index
    %c0_167 = arith.constant 0 : index
    %147 = vector.load %arg15[%c5_165, %c0_166, %c0_167] : memref<9x16x64xf32, #tpu.memory_space<vmem>>, vector<1x16x64xf32>
    %148 = vector.shape_cast %147 : vector<1x16x64xf32> to vector<16x64xf32>
    %cst_168 = arith.constant dense<0.000000e+00> : vector<16x36xf32>
    %149 = tpu.matmul %148, %146, %cst_168 {dimension_numbers = #tpu.dot_dimension_numbers<[1], [0], [0], [1], [0, 0, 1, 1], [], []>} : vector<16x64xf32>, vector<64x36xf32>, vector<16x36xf32> -> vector<16x36xf32>
    %150 = arith.addf %145, %149 : vector<16x36xf32>
    %c0_169 = arith.constant 0 : index
    %c12_170 = arith.constant 12 : index
    %151 = vector.load %arg32[%c0_169, %c12_170] : memref<64x362xf32, #tpu.memory_space<vmem>>, vector<64x36xf32>
    %c6_171 = arith.constant 6 : index
    %c0_172 = arith.constant 0 : index
    %c0_173 = arith.constant 0 : index
    %152 = vector.load %arg15[%c6_171, %c0_172, %c0_173] : memref<9x16x64xf32, #tpu.memory_space<vmem>>, vector<1x16x64xf32>
    %153 = vector.shape_cast %152 : vector<1x16x64xf32> to vector<16x64xf32>
    %cst_174 = arith.constant dense<0.000000e+00> : vector<16x36xf32>
    %154 = tpu.matmul %153, %151, %cst_174 {dimension_numbers = #tpu.dot_dimension_numbers<[1], [0], [0], [1], [0, 0, 1, 1], [], []>} : vector<16x64xf32>, vector<64x36xf32>, vector<16x36xf32> -> vector<16x36xf32>
    %155 = arith.addf %150, %154 : vector<16x36xf32>
    %c0_175 = arith.constant 0 : index
    %c13_176 = arith.constant 13 : index
    %156 = vector.load %arg32[%c0_175, %c13_176] : memref<64x362xf32, #tpu.memory_space<vmem>>, vector<64x36xf32>
    %c7_177 = arith.constant 7 : index
    %c0_178 = arith.constant 0 : index
    %c0_179 = arith.constant 0 : index
    %157 = vector.load %arg15[%c7_177, %c0_178, %c0_179] : memref<9x16x64xf32, #tpu.memory_space<vmem>>, vector<1x16x64xf32>
    %158 = vector.shape_cast %157 : vector<1x16x64xf32> to vector<16x64xf32>
    %cst_180 = arith.constant dense<0.000000e+00> : vector<16x36xf32>
    %159 = tpu.matmul %158, %156, %cst_180 {dimension_numbers = #tpu.dot_dimension_numbers<[1], [0], [0], [1], [0, 0, 1, 1], [], []>} : vector<16x64xf32>, vector<64x36xf32>, vector<16x36xf32> -> vector<16x36xf32>
    %160 = arith.addf %155, %159 : vector<16x36xf32>
    %c0_181 = arith.constant 0 : index
    %c14_182 = arith.constant 14 : index
    %161 = vector.load %arg32[%c0_181, %c14_182] : memref<64x362xf32, #tpu.memory_space<vmem>>, vector<64x36xf32>
    %c8_183 = arith.constant 8 : index
    %c0_184 = arith.constant 0 : index
    %c0_185 = arith.constant 0 : index
    %162 = vector.load %arg15[%c8_183, %c0_184, %c0_185] : memref<9x16x64xf32, #tpu.memory_space<vmem>>, vector<1x16x64xf32>
    %163 = vector.shape_cast %162 : vector<1x16x64xf32> to vector<16x64xf32>
    %cst_186 = arith.constant dense<0.000000e+00> : vector<16x36xf32>
    %164 = tpu.matmul %163, %161, %cst_186 {dimension_numbers = #tpu.dot_dimension_numbers<[1], [0], [0], [1], [0, 0, 1, 1], [], []>} : vector<16x64xf32>, vector<64x36xf32>, vector<16x36xf32> -> vector<16x36xf32>
    %165 = arith.addf %160, %164 : vector<16x36xf32>
    %c0_187 = arith.constant 0 : index
    %c0_188 = arith.constant 0 : index
    %166 = vector.load %arg16[%c0_187, %c0_188] : memref<16x1xf32, #tpu.memory_space<vmem>>, vector<16x1xf32>
    %167 = vector.broadcast %166 : vector<16x1xf32> to vector<16x36xf32>
    %168 = arith.addf %165, %167 : vector<16x36xf32>
    %169 = vector.broadcast %0 : vector<1x36xf32> to vector<16x36xf32>
    %170 = arith.mulf %168, %169 : vector<16x36xf32>
    %171 = arith.addf %170, %116 : vector<16x36xf32>
    %c0_189 = arith.constant 0 : index
    %c0_190 = arith.constant 0 : index
    %172 = vector.load %arg7[%c0_189, %c0_190] : memref<6x10xf32, #tpu.memory_space<vmem>>, vector<6x10xf32>
    %173 = vector.extract_strided_slice %171 {offsets = [0, 6], sizes = [16, 6], strides = [1, 1]} : vector<16x36xf32> to vector<16x6xf32>
    %cst_191 = arith.constant dense<0.000000e+00> : vector<16x10xf32>
    %174 = tpu.matmul %173, %172, %cst_191 {dimension_numbers = #tpu.dot_dimension_numbers<[1], [0], [0], [1], [0, 0, 1, 1], [], []>} : vector<16x6xf32>, vector<6x10xf32>, vector<16x10xf32> -> vector<16x10xf32>
    %175 = vector.extract_strided_slice %171 {offsets = [0, 12], sizes = [16, 6], strides = [1, 1]} : vector<16x36xf32> to vector<16x6xf32>
    %cst_192 = arith.constant dense<0.000000e+00> : vector<16x10xf32>
    %176 = tpu.matmul %175, %172, %cst_192 {dimension_numbers = #tpu.dot_dimension_numbers<[1], [0], [0], [1], [0, 0, 1, 1], [], []>} : vector<16x6xf32>, vector<6x10xf32>, vector<16x10xf32> -> vector<16x10xf32>
    %177 = vector.extract_strided_slice %171 {offsets = [0, 18], sizes = [16, 6], strides = [1, 1]} : vector<16x36xf32> to vector<16x6xf32>
    %cst_193 = arith.constant dense<0.000000e+00> : vector<16x10xf32>
    %178 = tpu.matmul %177, %172, %cst_193 {dimension_numbers = #tpu.dot_dimension_numbers<[1], [0], [0], [1], [0, 0, 1, 1], [], []>} : vector<16x6xf32>, vector<6x10xf32>, vector<16x10xf32> -> vector<16x10xf32>
    %179 = vector.extract_strided_slice %171 {offsets = [0, 24], sizes = [16, 6], strides = [1, 1]} : vector<16x36xf32> to vector<16x6xf32>
    %cst_194 = arith.constant dense<0.000000e+00> : vector<16x10xf32>
    %180 = tpu.matmul %179, %172, %cst_194 {dimension_numbers = #tpu.dot_dimension_numbers<[1], [0], [0], [1], [0, 0, 1, 1], [], []>} : vector<16x6xf32>, vector<6x10xf32>, vector<16x10xf32> -> vector<16x10xf32>
    %cst_195 = arith.constant 0.000000e+00 : f32
    %181 = vector.broadcast %cst_195 : f32 to vector<16x10xf32>
    %c0_196 = arith.constant 0 : index
    %c0_197 = arith.constant 0 : index
    %182 = vector.load %arg33[%c0_196, %c0_197] : memref<16x324xf32, #tpu.memory_space<vmem>>, vector<16x10xf32>
    tpu.vector_store %arg33[%c0_196, %c0_197], %181 {strides = array<i32>} : memref<16x324xf32, #tpu.memory_space<vmem>>, vector<16x10xf32>,
    %c0_198 = arith.constant 0 : index
    %c10 = arith.constant 10 : index
    %183 = vector.load %arg33[%c0_198, %c10] : memref<16x324xf32, #tpu.memory_space<vmem>>, vector<16x10xf32>
    tpu.vector_store %arg33[%c0_198, %c10], %174 {strides = array<i32>} : memref<16x324xf32, #tpu.memory_space<vmem>>, vector<16x10xf32>,
    %cst_199 = arith.constant 7.500000e-01 : f32
    %184 = vector.broadcast %cst_199 : f32 to vector<16x10xf32>
    %185 = arith.mulf %174, %184 : vector<16x10xf32>
    %cst_200 = arith.constant 2.500000e-01 : f32
    %186 = vector.broadcast %cst_200 : f32 to vector<16x10xf32>
    %187 = arith.mulf %176, %186 : vector<16x10xf32>
    %188 = arith.addf %185, %187 : vector<16x10xf32>
    %c0_201 = arith.constant 0 : index
    %c20 = arith.constant 20 : index
    %189 = vector.load %arg33[%c0_201, %c20] : memref<16x324xf32, #tpu.memory_space<vmem>>, vector<16x10xf32>
    tpu.vector_store %arg33[%c0_201, %c20], %188 {strides = array<i32>} : memref<16x324xf32, #tpu.memory_space<vmem>>, vector<16x10xf32>,
    %cst_202 = arith.constant 2.500000e-01 : f32
    %190 = vector.broadcast %cst_202 : f32 to vector<16x10xf32>
    %191 = arith.mulf %174, %190 : vector<16x10xf32>
    %cst_203 = arith.constant 7.500000e-01 : f32
    %192 = vector.broadcast %cst_203 : f32 to vector<16x10xf32>
    %193 = arith.mulf %176, %192 : vector<16x10xf32>
    %194 = arith.addf %191, %193 : vector<16x10xf32>
    %c0_204 = arith.constant 0 : index
    %c30 = arith.constant 30 : index
    %195 = vector.load %arg33[%c0_204, %c30] : memref<16x324xf32, #tpu.memory_space<vmem>>, vector<16x10xf32>
    tpu.vector_store %arg33[%c0_204, %c30], %194 {strides = array<i32>} : memref<16x324xf32, #tpu.memory_space<vmem>>, vector<16x10xf32>,
    %cst_205 = arith.constant 7.500000e-01 : f32
    %196 = vector.broadcast %cst_205 : f32 to vector<16x10xf32>
    %197 = arith.mulf %176, %196 : vector<16x10xf32>
    %cst_206 = arith.constant 2.500000e-01 : f32
    %198 = vector.broadcast %cst_206 : f32 to vector<16x10xf32>
    %199 = arith.mulf %178, %198 : vector<16x10xf32>
    %200 = arith.addf %197, %199 : vector<16x10xf32>
    %c0_207 = arith.constant 0 : index
    %c40 = arith.constant 40 : index
    %201 = vector.load %arg33[%c0_207, %c40] : memref<16x324xf32, #tpu.memory_space<vmem>>, vector<16x10xf32>
    tpu.vector_store %arg33[%c0_207, %c40], %200 {strides = array<i32>} : memref<16x324xf32, #tpu.memory_space<vmem>>, vector<16x10xf32>,
    %cst_208 = arith.constant 2.500000e-01 : f32
    %202 = vector.broadcast %cst_208 : f32 to vector<16x10xf32>
    %203 = arith.mulf %176, %202 : vector<16x10xf32>
    %cst_209 = arith.constant 7.500000e-01 : f32
    %204 = vector.broadcast %cst_209 : f32 to vector<16x10xf32>
    %205 = arith.mulf %178, %204 : vector<16x10xf32>
    %206 = arith.addf %203, %205 : vector<16x10xf32>
    %c0_210 = arith.constant 0 : index
    %c50 = arith.constant 50 : index
    %207 = vector.load %arg33[%c0_210, %c50] : memref<16x324xf32, #tpu.memory_space<vmem>>, vector<16x10xf32>
    tpu.vector_store %arg33[%c0_210, %c50], %206 {strides = array<i32>} : memref<16x324xf32, #tpu.memory_space<vmem>>, vector<16x10xf32>,
    %cst_211 = arith.constant 7.500000e-01 : f32
    %208 = vector.broadcast %cst_211 : f32 to vector<16x10xf32>
    %209 = arith.mulf %178, %208 : vector<16x10xf32>
    %cst_212 = arith.constant 2.500000e-01 : f32
    %210 = vector.broadcast %cst_212 : f32 to vector<16x10xf32>
    %211 = arith.mulf %180, %210 : vector<16x10xf32>
    %212 = arith.addf %209, %211 : vector<16x10xf32>
    %c0_213 = arith.constant 0 : index
    %c60 = arith.constant 60 : index
    %213 = vector.load %arg33[%c0_213, %c60] : memref<16x324xf32, #tpu.memory_space<vmem>>, vector<16x10xf32>
    tpu.vector_store %arg33[%c0_213, %c60], %212 {strides = array<i32>} : memref<16x324xf32, #tpu.memory_space<vmem>>, vector<16x10xf32>,
    %cst_214 = arith.constant 2.500000e-01 : f32
    %214 = vector.broadcast %cst_214 : f32 to vector<16x10xf32>
    %215 = arith.mulf %178, %214 : vector<16x10xf32>
    %cst_215 = arith.constant 7.500000e-01 : f32
    %216 = vector.broadcast %cst_215 : f32 to vector<16x10xf32>
    %217 = arith.mulf %180, %216 : vector<16x10xf32>
    %218 = arith.addf %215, %217 : vector<16x10xf32>
    %c0_216 = arith.constant 0 : index
    %c70 = arith.constant 70 : index
    %219 = vector.load %arg33[%c0_216, %c70] : memref<16x324xf32, #tpu.memory_space<vmem>>, vector<16x10xf32>
    tpu.vector_store %arg33[%c0_216, %c70], %218 {strides = array<i32>} : memref<16x324xf32, #tpu.memory_space<vmem>>, vector<16x10xf32>,
    %cst_217 = arith.constant 7.500000e-01 : f32
    %220 = vector.broadcast %cst_217 : f32 to vector<16x10xf32>
    %221 = arith.mulf %180, %220 : vector<16x10xf32>
    %cst_218 = arith.constant 2.500000e-01 : f32
    %222 = vector.broadcast %cst_218 : f32 to vector<16x10xf32>
    %223 = arith.mulf %180, %222 : vector<16x10xf32>
    %224 = arith.addf %221, %223 : vector<16x10xf32>
    %c0_219 = arith.constant 0 : index
    %c80 = arith.constant 80 : index
    %225 = vector.load %arg33[%c0_219, %c80] : memref<16x324xf32, #tpu.memory_space<vmem>>, vector<16x10xf32>
    tpu.vector_store %arg33[%c0_219, %c80], %224 {strides = array<i32>} : memref<16x324xf32, #tpu.memory_space<vmem>>, vector<16x10xf32>,
    %c0_220 = arith.constant 0 : index
    %c90 = arith.constant 90 : index
    %226 = vector.load %arg33[%c0_220, %c90] : memref<16x324xf32, #tpu.memory_space<vmem>>, vector<16x10xf32>
    tpu.vector_store %arg33[%c0_220, %c90], %181 {strides = array<i32>} : memref<16x324xf32, #tpu.memory_space<vmem>>, vector<16x10xf32>,
    %c0_221 = arith.constant 0 : index
    %c0_222 = arith.constant 0 : index
    %227 = vector.load %arg33[%c0_221, %c0_222] : memref<16x324xf32, #tpu.memory_space<vmem>>, vector<16x100xf32>
    %c0_223 = arith.constant 0 : index
    %c0_224 = arith.constant 0 : index
    %c0_225 = arith.constant 0 : index
    %228 = vector.load %arg2[%c0_223, %c0_224, %c0_225] : memref<1x32x100xf32, #tpu.memory_space<vmem>>, vector<1x32x100xf32>
    %229 = vector.shape_cast %228 : vector<1x32x100xf32> to vector<32x100xf32>
    %cst_226 = arith.constant 0.000000e+00 : f32
    %230 = vector.broadcast %cst_226 : f32 to vector<32x11xf32>
    %c0_227 = arith.constant 0 : index
    %c0_228 = arith.constant 0 : index
    %231 = vector.load %arg32[%c0_227, %c0_228] : memref<64x362xf32, #tpu.memory_space<vmem>>, vector<32x11xf32>
    tpu.vector_store %arg32[%c0_227, %c0_228], %230 {strides = array<i32>} : memref<64x362xf32, #tpu.memory_space<vmem>>, vector<32x11xf32>,
    %c0_229 = arith.constant 0 : index
    %c11 = arith.constant 11 : index
    %232 = vector.load %arg32[%c0_229, %c11] : memref<64x362xf32, #tpu.memory_space<vmem>>, vector<32x100xf32>
    tpu.vector_store %arg32[%c0_229, %c11], %229 {strides = array<i32>} : memref<64x362xf32, #tpu.memory_space<vmem>>, vector<32x100xf32>,
    %cst_230 = arith.constant 0.000000e+00 : f32
    %233 = vector.broadcast %cst_230 : f32 to vector<32x11xf32>
    %c0_231 = arith.constant 0 : index
    %c111 = arith.constant 111 : index
    %234 = vector.load %arg32[%c0_231, %c111] : memref<64x362xf32, #tpu.memory_space<vmem>>, vector<32x11xf32>
    tpu.vector_store %arg32[%c0_231, %c111], %233 {strides = array<i32>} : memref<64x362xf32, #tpu.memory_space<vmem>>, vector<32x11xf32>,
    %c0_232 = arith.constant 0 : index
    %c0_233 = arith.constant 0 : index
    %235 = vector.load %arg32[%c0_232, %c0_233] : memref<64x362xf32, #tpu.memory_space<vmem>>, vector<32x100xf32>
    %c0_234 = arith.constant 0 : index
    %c0_235 = arith.constant 0 : index
    %c0_236 = arith.constant 0 : index
    %236 = vector.load %arg17[%c0_234, %c0_235, %c0_236] : memref<9x16x32xf32, #tpu.memory_space<vmem>>, vector<1x16x32xf32>
    %237 = vector.shape_cast %236 : vector<1x16x32xf32> to vector<16x32xf32>
    %cst_237 = arith.constant dense<0.000000e+00> : vector<16x100xf32>
    %238 = tpu.matmul %237, %235, %cst_237 {dimension_numbers = #tpu.dot_dimension_numbers<[1], [0], [0], [1], [0, 0, 1, 1], [], []>} : vector<16x32xf32>, vector<32x100xf32>, vector<16x100xf32> -> vector<16x100xf32>
    %c0_238 = arith.constant 0 : index
    %c1_239 = arith.constant 1 : index
    %239 = vector.load %arg32[%c0_238, %c1_239] : memref<64x362xf32, #tpu.memory_space<vmem>>, vector<32x100xf32>
    %c1_240 = arith.constant 1 : index
    %c0_241 = arith.constant 0 : index
    %c0_242 = arith.constant 0 : index
    %240 = vector.load %arg17[%c1_240, %c0_241, %c0_242] : memref<9x16x32xf32, #tpu.memory_space<vmem>>, vector<1x16x32xf32>
    %241 = vector.shape_cast %240 : vector<1x16x32xf32> to vector<16x32xf32>
    %cst_243 = arith.constant dense<0.000000e+00> : vector<16x100xf32>
    %242 = tpu.matmul %241, %239, %cst_243 {dimension_numbers = #tpu.dot_dimension_numbers<[1], [0], [0], [1], [0, 0, 1, 1], [], []>} : vector<16x32xf32>, vector<32x100xf32>, vector<16x100xf32> -> vector<16x100xf32>
    %243 = arith.addf %238, %242 : vector<16x100xf32>
    %c0_244 = arith.constant 0 : index
    %c2_245 = arith.constant 2 : index
    %244 = vector.load %arg32[%c0_244, %c2_245] : memref<64x362xf32, #tpu.memory_space<vmem>>, vector<32x100xf32>
    %c2_246 = arith.constant 2 : index
    %c0_247 = arith.constant 0 : index
    %c0_248 = arith.constant 0 : index
    %245 = vector.load %arg17[%c2_246, %c0_247, %c0_248] : memref<9x16x32xf32, #tpu.memory_space<vmem>>, vector<1x16x32xf32>
    %246 = vector.shape_cast %245 : vector<1x16x32xf32> to vector<16x32xf32>
    %cst_249 = arith.constant dense<0.000000e+00> : vector<16x100xf32>
    %247 = tpu.matmul %246, %244, %cst_249 {dimension_numbers = #tpu.dot_dimension_numbers<[1], [0], [0], [1], [0, 0, 1, 1], [], []>} : vector<16x32xf32>, vector<32x100xf32>, vector<16x100xf32> -> vector<16x100xf32>
    %248 = arith.addf %243, %247 : vector<16x100xf32>
    %c0_250 = arith.constant 0 : index
    %c10_251 = arith.constant 10 : index
    %249 = vector.load %arg32[%c0_250, %c10_251] : memref<64x362xf32, #tpu.memory_space<vmem>>, vector<32x100xf32>
    %c3_252 = arith.constant 3 : index
    %c0_253 = arith.constant 0 : index
    %c0_254 = arith.constant 0 : index
    %250 = vector.load %arg17[%c3_252, %c0_253, %c0_254] : memref<9x16x32xf32, #tpu.memory_space<vmem>>, vector<1x16x32xf32>
    %251 = vector.shape_cast %250 : vector<1x16x32xf32> to vector<16x32xf32>
    %cst_255 = arith.constant dense<0.000000e+00> : vector<16x100xf32>
    %252 = tpu.matmul %251, %249, %cst_255 {dimension_numbers = #tpu.dot_dimension_numbers<[1], [0], [0], [1], [0, 0, 1, 1], [], []>} : vector<16x32xf32>, vector<32x100xf32>, vector<16x100xf32> -> vector<16x100xf32>
    %253 = arith.addf %248, %252 : vector<16x100xf32>
    %c0_256 = arith.constant 0 : index
    %c11_257 = arith.constant 11 : index
    %254 = vector.load %arg32[%c0_256, %c11_257] : memref<64x362xf32, #tpu.memory_space<vmem>>, vector<32x100xf32>
    %c4_258 = arith.constant 4 : index
    %c0_259 = arith.constant 0 : index
    %c0_260 = arith.constant 0 : index
    %255 = vector.load %arg17[%c4_258, %c0_259, %c0_260] : memref<9x16x32xf32, #tpu.memory_space<vmem>>, vector<1x16x32xf32>
    %256 = vector.shape_cast %255 : vector<1x16x32xf32> to vector<16x32xf32>
    %cst_261 = arith.constant dense<0.000000e+00> : vector<16x100xf32>
    %257 = tpu.matmul %256, %254, %cst_261 {dimension_numbers = #tpu.dot_dimension_numbers<[1], [0], [0], [1], [0, 0, 1, 1], [], []>} : vector<16x32xf32>, vector<32x100xf32>, vector<16x100xf32> -> vector<16x100xf32>
    %258 = arith.addf %253, %257 : vector<16x100xf32>
    %c0_262 = arith.constant 0 : index
    %c12_263 = arith.constant 12 : index
    %259 = vector.load %arg32[%c0_262, %c12_263] : memref<64x362xf32, #tpu.memory_space<vmem>>, vector<32x100xf32>
    %c5_264 = arith.constant 5 : index
    %c0_265 = arith.constant 0 : index
    %c0_266 = arith.constant 0 : index
    %260 = vector.load %arg17[%c5_264, %c0_265, %c0_266] : memref<9x16x32xf32, #tpu.memory_space<vmem>>, vector<1x16x32xf32>
    %261 = vector.shape_cast %260 : vector<1x16x32xf32> to vector<16x32xf32>
    %cst_267 = arith.constant dense<0.000000e+00> : vector<16x100xf32>
    %262 = tpu.matmul %261, %259, %cst_267 {dimension_numbers = #tpu.dot_dimension_numbers<[1], [0], [0], [1], [0, 0, 1, 1], [], []>} : vector<16x32xf32>, vector<32x100xf32>, vector<16x100xf32> -> vector<16x100xf32>
    %263 = arith.addf %258, %262 : vector<16x100xf32>
    %c0_268 = arith.constant 0 : index
    %c20_269 = arith.constant 20 : index
    %264 = vector.load %arg32[%c0_268, %c20_269] : memref<64x362xf32, #tpu.memory_space<vmem>>, vector<32x100xf32>
    %c6_270 = arith.constant 6 : index
    %c0_271 = arith.constant 0 : index
    %c0_272 = arith.constant 0 : index
    %265 = vector.load %arg17[%c6_270, %c0_271, %c0_272] : memref<9x16x32xf32, #tpu.memory_space<vmem>>, vector<1x16x32xf32>
    %266 = vector.shape_cast %265 : vector<1x16x32xf32> to vector<16x32xf32>
    %cst_273 = arith.constant dense<0.000000e+00> : vector<16x100xf32>
    %267 = tpu.matmul %266, %264, %cst_273 {dimension_numbers = #tpu.dot_dimension_numbers<[1], [0], [0], [1], [0, 0, 1, 1], [], []>} : vector<16x32xf32>, vector<32x100xf32>, vector<16x100xf32> -> vector<16x100xf32>
    %268 = arith.addf %263, %267 : vector<16x100xf32>
    %c0_274 = arith.constant 0 : index
    %c21 = arith.constant 21 : index
    %269 = vector.load %arg32[%c0_274, %c21] : memref<64x362xf32, #tpu.memory_space<vmem>>, vector<32x100xf32>
    %c7_275 = arith.constant 7 : index
    %c0_276 = arith.constant 0 : index
    %c0_277 = arith.constant 0 : index
    %270 = vector.load %arg17[%c7_275, %c0_276, %c0_277] : memref<9x16x32xf32, #tpu.memory_space<vmem>>, vector<1x16x32xf32>
    %271 = vector.shape_cast %270 : vector<1x16x32xf32> to vector<16x32xf32>
    %cst_278 = arith.constant dense<0.000000e+00> : vector<16x100xf32>
    %272 = tpu.matmul %271, %269, %cst_278 {dimension_numbers = #tpu.dot_dimension_numbers<[1], [0], [0], [1], [0, 0, 1, 1], [], []>} : vector<16x32xf32>, vector<32x100xf32>, vector<16x100xf32> -> vector<16x100xf32>
    %273 = arith.addf %268, %272 : vector<16x100xf32>
    %c0_279 = arith.constant 0 : index
    %c22 = arith.constant 22 : index
    %274 = vector.load %arg32[%c0_279, %c22] : memref<64x362xf32, #tpu.memory_space<vmem>>, vector<32x100xf32>
    %c8_280 = arith.constant 8 : index
    %c0_281 = arith.constant 0 : index
    %c0_282 = arith.constant 0 : index
    %275 = vector.load %arg17[%c8_280, %c0_281, %c0_282] : memref<9x16x32xf32, #tpu.memory_space<vmem>>, vector<1x16x32xf32>
    %276 = vector.shape_cast %275 : vector<1x16x32xf32> to vector<16x32xf32>
    %cst_283 = arith.constant dense<0.000000e+00> : vector<16x100xf32>
    %277 = tpu.matmul %276, %274, %cst_283 {dimension_numbers = #tpu.dot_dimension_numbers<[1], [0], [0], [1], [0, 0, 1, 1], [], []>} : vector<16x32xf32>, vector<32x100xf32>, vector<16x100xf32> -> vector<16x100xf32>
    %278 = arith.addf %273, %277 : vector<16x100xf32>
    %c0_284 = arith.constant 0 : index
    %c0_285 = arith.constant 0 : index
    %279 = vector.load %arg18[%c0_284, %c0_285] : memref<16x1xf32, #tpu.memory_space<vmem>>, vector<16x1xf32>
    %280 = vector.broadcast %279 : vector<16x1xf32> to vector<16x100xf32>
    %281 = arith.addf %278, %280 : vector<16x100xf32>
    %282 = vector.broadcast %1 : vector<1x100xf32> to vector<16x100xf32>
    %283 = arith.mulf %281, %282 : vector<16x100xf32>
    %284 = arith.addf %283, %227 : vector<16x100xf32>
    %cst_286 = arith.constant 0.000000e+00 : f32
    %285 = vector.broadcast %cst_286 : f32 to vector<16x100xf32>
    %286 = arith.maximumf %284, %285 : vector<16x100xf32>
    %cst_287 = arith.constant 0.000000e+00 : f32
    %287 = vector.broadcast %cst_287 : f32 to vector<16x11xf32>
    %c0_288 = arith.constant 0 : index
    %c0_289 = arith.constant 0 : index
    %288 = vector.load %arg32[%c0_288, %c0_289] : memref<64x362xf32, #tpu.memory_space<vmem>>, vector<16x11xf32>
    tpu.vector_store %arg32[%c0_288, %c0_289], %287 {strides = array<i32>} : memref<64x362xf32, #tpu.memory_space<vmem>>, vector<16x11xf32>,
    %c0_290 = arith.constant 0 : index
    %c11_291 = arith.constant 11 : index
    %289 = vector.load %arg32[%c0_290, %c11_291] : memref<64x362xf32, #tpu.memory_space<vmem>>, vector<16x100xf32>
    tpu.vector_store %arg32[%c0_290, %c11_291], %286 {strides = array<i32>} : memref<64x362xf32, #tpu.memory_space<vmem>>, vector<16x100xf32>,
    %cst_292 = arith.constant 0.000000e+00 : f32
    %290 = vector.broadcast %cst_292 : f32 to vector<16x11xf32>
    %c0_293 = arith.constant 0 : index
    %c111_294 = arith.constant 111 : index
    %291 = vector.load %arg32[%c0_293, %c111_294] : memref<64x362xf32, #tpu.memory_space<vmem>>, vector<16x11xf32>
    tpu.vector_store %arg32[%c0_293, %c111_294], %290 {strides = array<i32>} : memref<64x362xf32, #tpu.memory_space<vmem>>, vector<16x11xf32>,
    %c0_295 = arith.constant 0 : index
    %c0_296 = arith.constant 0 : index
    %292 = vector.load %arg32[%c0_295, %c0_296] : memref<64x362xf32, #tpu.memory_space<vmem>>, vector<16x100xf32>
    %c0_297 = arith.constant 0 : index
    %c0_298 = arith.constant 0 : index
    %c0_299 = arith.constant 0 : index
    %293 = vector.load %arg19[%c0_297, %c0_298, %c0_299] : memref<9x16x16xf32, #tpu.memory_space<vmem>>, vector<1x16x16xf32>
    %294 = vector.shape_cast %293 : vector<1x16x16xf32> to vector<16x16xf32>
    %cst_300 = arith.constant dense<0.000000e+00> : vector<16x100xf32>
    %295 = tpu.matmul %294, %292, %cst_300 {dimension_numbers = #tpu.dot_dimension_numbers<[1], [0], [0], [1], [0, 0, 1, 1], [], []>} : vector<16x16xf32>, vector<16x100xf32>, vector<16x100xf32> -> vector<16x100xf32>
    %c0_301 = arith.constant 0 : index
    %c1_302 = arith.constant 1 : index
    %296 = vector.load %arg32[%c0_301, %c1_302] : memref<64x362xf32, #tpu.memory_space<vmem>>, vector<16x100xf32>
    %c1_303 = arith.constant 1 : index
    %c0_304 = arith.constant 0 : index
    %c0_305 = arith.constant 0 : index
    %297 = vector.load %arg19[%c1_303, %c0_304, %c0_305] : memref<9x16x16xf32, #tpu.memory_space<vmem>>, vector<1x16x16xf32>
    %298 = vector.shape_cast %297 : vector<1x16x16xf32> to vector<16x16xf32>
    %cst_306 = arith.constant dense<0.000000e+00> : vector<16x100xf32>
    %299 = tpu.matmul %298, %296, %cst_306 {dimension_numbers = #tpu.dot_dimension_numbers<[1], [0], [0], [1], [0, 0, 1, 1], [], []>} : vector<16x16xf32>, vector<16x100xf32>, vector<16x100xf32> -> vector<16x100xf32>
    %300 = arith.addf %295, %299 : vector<16x100xf32>
    %c0_307 = arith.constant 0 : index
    %c2_308 = arith.constant 2 : index
    %301 = vector.load %arg32[%c0_307, %c2_308] : memref<64x362xf32, #tpu.memory_space<vmem>>, vector<16x100xf32>
    %c2_309 = arith.constant 2 : index
    %c0_310 = arith.constant 0 : index
    %c0_311 = arith.constant 0 : index
    %302 = vector.load %arg19[%c2_309, %c0_310, %c0_311] : memref<9x16x16xf32, #tpu.memory_space<vmem>>, vector<1x16x16xf32>
    %303 = vector.shape_cast %302 : vector<1x16x16xf32> to vector<16x16xf32>
    %cst_312 = arith.constant dense<0.000000e+00> : vector<16x100xf32>
    %304 = tpu.matmul %303, %301, %cst_312 {dimension_numbers = #tpu.dot_dimension_numbers<[1], [0], [0], [1], [0, 0, 1, 1], [], []>} : vector<16x16xf32>, vector<16x100xf32>, vector<16x100xf32> -> vector<16x100xf32>
    %305 = arith.addf %300, %304 : vector<16x100xf32>
    %c0_313 = arith.constant 0 : index
    %c10_314 = arith.constant 10 : index
    %306 = vector.load %arg32[%c0_313, %c10_314] : memref<64x362xf32, #tpu.memory_space<vmem>>, vector<16x100xf32>
    %c3_315 = arith.constant 3 : index
    %c0_316 = arith.constant 0 : index
    %c0_317 = arith.constant 0 : index
    %307 = vector.load %arg19[%c3_315, %c0_316, %c0_317] : memref<9x16x16xf32, #tpu.memory_space<vmem>>, vector<1x16x16xf32>
    %308 = vector.shape_cast %307 : vector<1x16x16xf32> to vector<16x16xf32>
    %cst_318 = arith.constant dense<0.000000e+00> : vector<16x100xf32>
    %309 = tpu.matmul %308, %306, %cst_318 {dimension_numbers = #tpu.dot_dimension_numbers<[1], [0], [0], [1], [0, 0, 1, 1], [], []>} : vector<16x16xf32>, vector<16x100xf32>, vector<16x100xf32> -> vector<16x100xf32>
    %310 = arith.addf %305, %309 : vector<16x100xf32>
    %c0_319 = arith.constant 0 : index
    %c11_320 = arith.constant 11 : index
    %311 = vector.load %arg32[%c0_319, %c11_320] : memref<64x362xf32, #tpu.memory_space<vmem>>, vector<16x100xf32>
    %c4_321 = arith.constant 4 : index
    %c0_322 = arith.constant 0 : index
    %c0_323 = arith.constant 0 : index
    %312 = vector.load %arg19[%c4_321, %c0_322, %c0_323] : memref<9x16x16xf32, #tpu.memory_space<vmem>>, vector<1x16x16xf32>
    %313 = vector.shape_cast %312 : vector<1x16x16xf32> to vector<16x16xf32>
    %cst_324 = arith.constant dense<0.000000e+00> : vector<16x100xf32>
    %314 = tpu.matmul %313, %311, %cst_324 {dimension_numbers = #tpu.dot_dimension_numbers<[1], [0], [0], [1], [0, 0, 1, 1], [], []>} : vector<16x16xf32>, vector<16x100xf32>, vector<16x100xf32> -> vector<16x100xf32>
    %315 = arith.addf %310, %314 : vector<16x100xf32>
    %c0_325 = arith.constant 0 : index
    %c12_326 = arith.constant 12 : index
    %316 = vector.load %arg32[%c0_325, %c12_326] : memref<64x362xf32, #tpu.memory_space<vmem>>, vector<16x100xf32>
    %c5_327 = arith.constant 5 : index
    %c0_328 = arith.constant 0 : index
    %c0_329 = arith.constant 0 : index
    %317 = vector.load %arg19[%c5_327, %c0_328, %c0_329] : memref<9x16x16xf32, #tpu.memory_space<vmem>>, vector<1x16x16xf32>
    %318 = vector.shape_cast %317 : vector<1x16x16xf32> to vector<16x16xf32>
    %cst_330 = arith.constant dense<0.000000e+00> : vector<16x100xf32>
    %319 = tpu.matmul %318, %316, %cst_330 {dimension_numbers = #tpu.dot_dimension_numbers<[1], [0], [0], [1], [0, 0, 1, 1], [], []>} : vector<16x16xf32>, vector<16x100xf32>, vector<16x100xf32> -> vector<16x100xf32>
    %320 = arith.addf %315, %319 : vector<16x100xf32>
    %c0_331 = arith.constant 0 : index
    %c20_332 = arith.constant 20 : index
    %321 = vector.load %arg32[%c0_331, %c20_332] : memref<64x362xf32, #tpu.memory_space<vmem>>, vector<16x100xf32>
    %c6_333 = arith.constant 6 : index
    %c0_334 = arith.constant 0 : index
    %c0_335 = arith.constant 0 : index
    %322 = vector.load %arg19[%c6_333, %c0_334, %c0_335] : memref<9x16x16xf32, #tpu.memory_space<vmem>>, vector<1x16x16xf32>
    %323 = vector.shape_cast %322 : vector<1x16x16xf32> to vector<16x16xf32>
    %cst_336 = arith.constant dense<0.000000e+00> : vector<16x100xf32>
    %324 = tpu.matmul %323, %321, %cst_336 {dimension_numbers = #tpu.dot_dimension_numbers<[1], [0], [0], [1], [0, 0, 1, 1], [], []>} : vector<16x16xf32>, vector<16x100xf32>, vector<16x100xf32> -> vector<16x100xf32>
    %325 = arith.addf %320, %324 : vector<16x100xf32>
    %c0_337 = arith.constant 0 : index
    %c21_338 = arith.constant 21 : index
    %326 = vector.load %arg32[%c0_337, %c21_338] : memref<64x362xf32, #tpu.memory_space<vmem>>, vector<16x100xf32>
    %c7_339 = arith.constant 7 : index
    %c0_340 = arith.constant 0 : index
    %c0_341 = arith.constant 0 : index
    %327 = vector.load %arg19[%c7_339, %c0_340, %c0_341] : memref<9x16x16xf32, #tpu.memory_space<vmem>>, vector<1x16x16xf32>
    %328 = vector.shape_cast %327 : vector<1x16x16xf32> to vector<16x16xf32>
    %cst_342 = arith.constant dense<0.000000e+00> : vector<16x100xf32>
    %329 = tpu.matmul %328, %326, %cst_342 {dimension_numbers = #tpu.dot_dimension_numbers<[1], [0], [0], [1], [0, 0, 1, 1], [], []>} : vector<16x16xf32>, vector<16x100xf32>, vector<16x100xf32> -> vector<16x100xf32>
    %330 = arith.addf %325, %329 : vector<16x100xf32>
    %c0_343 = arith.constant 0 : index
    %c22_344 = arith.constant 22 : index
    %331 = vector.load %arg32[%c0_343, %c22_344] : memref<64x362xf32, #tpu.memory_space<vmem>>, vector<16x100xf32>
    %c8_345 = arith.constant 8 : index
    %c0_346 = arith.constant 0 : index
    %c0_347 = arith.constant 0 : index
    %332 = vector.load %arg19[%c8_345, %c0_346, %c0_347] : memref<9x16x16xf32, #tpu.memory_space<vmem>>, vector<1x16x16xf32>
    %333 = vector.shape_cast %332 : vector<1x16x16xf32> to vector<16x16xf32>
    %cst_348 = arith.constant dense<0.000000e+00> : vector<16x100xf32>
    %334 = tpu.matmul %333, %331, %cst_348 {dimension_numbers = #tpu.dot_dimension_numbers<[1], [0], [0], [1], [0, 0, 1, 1], [], []>} : vector<16x16xf32>, vector<16x100xf32>, vector<16x100xf32> -> vector<16x100xf32>
    %335 = arith.addf %330, %334 : vector<16x100xf32>
    %c0_349 = arith.constant 0 : index
    %c0_350 = arith.constant 0 : index
    %336 = vector.load %arg20[%c0_349, %c0_350] : memref<16x1xf32, #tpu.memory_space<vmem>>, vector<16x1xf32>
    %337 = vector.broadcast %336 : vector<16x1xf32> to vector<16x100xf32>
    %338 = arith.addf %335, %337 : vector<16x100xf32>
    %339 = vector.broadcast %1 : vector<1x100xf32> to vector<16x100xf32>
    %340 = arith.mulf %338, %339 : vector<16x100xf32>
    %cst_351 = arith.constant 0.000000e+00 : f32
    %341 = vector.broadcast %cst_351 : f32 to vector<16x100xf32>
    %342 = arith.maximumf %340, %341 : vector<16x100xf32>
    %cst_352 = arith.constant 0.000000e+00 : f32
    %343 = vector.broadcast %cst_352 : f32 to vector<16x11xf32>
    %c0_353 = arith.constant 0 : index
    %c0_354 = arith.constant 0 : index
    %344 = vector.load %arg32[%c0_353, %c0_354] : memref<64x362xf32, #tpu.memory_space<vmem>>, vector<16x11xf32>
    tpu.vector_store %arg32[%c0_353, %c0_354], %343 {strides = array<i32>} : memref<64x362xf32, #tpu.memory_space<vmem>>, vector<16x11xf32>,
    %c0_355 = arith.constant 0 : index
    %c11_356 = arith.constant 11 : index
    %345 = vector.load %arg32[%c0_355, %c11_356] : memref<64x362xf32, #tpu.memory_space<vmem>>, vector<16x100xf32>
    tpu.vector_store %arg32[%c0_355, %c11_356], %342 {strides = array<i32>} : memref<64x362xf32, #tpu.memory_space<vmem>>, vector<16x100xf32>,
    %cst_357 = arith.constant 0.000000e+00 : f32
    %346 = vector.broadcast %cst_357 : f32 to vector<16x11xf32>
    %c0_358 = arith.constant 0 : index
    %c111_359 = arith.constant 111 : index
    %347 = vector.load %arg32[%c0_358, %c111_359] : memref<64x362xf32, #tpu.memory_space<vmem>>, vector<16x11xf32>
    tpu.vector_store %arg32[%c0_358, %c111_359], %346 {strides = array<i32>} : memref<64x362xf32, #tpu.memory_space<vmem>>, vector<16x11xf32>,
    %c0_360 = arith.constant 0 : index
    %c0_361 = arith.constant 0 : index
    %348 = vector.load %arg32[%c0_360, %c0_361] : memref<64x362xf32, #tpu.memory_space<vmem>>, vector<16x100xf32>
    %c0_362 = arith.constant 0 : index
    %c0_363 = arith.constant 0 : index
    %c0_364 = arith.constant 0 : index
    %349 = vector.load %arg21[%c0_362, %c0_363, %c0_364] : memref<9x16x16xf32, #tpu.memory_space<vmem>>, vector<1x16x16xf32>
    %350 = vector.shape_cast %349 : vector<1x16x16xf32> to vector<16x16xf32>
    %cst_365 = arith.constant dense<0.000000e+00> : vector<16x100xf32>
    %351 = tpu.matmul %350, %348, %cst_365 {dimension_numbers = #tpu.dot_dimension_numbers<[1], [0], [0], [1], [0, 0, 1, 1], [], []>} : vector<16x16xf32>, vector<16x100xf32>, vector<16x100xf32> -> vector<16x100xf32>
    %c0_366 = arith.constant 0 : index
    %c1_367 = arith.constant 1 : index
    %352 = vector.load %arg32[%c0_366, %c1_367] : memref<64x362xf32, #tpu.memory_space<vmem>>, vector<16x100xf32>
    %c1_368 = arith.constant 1 : index
    %c0_369 = arith.constant 0 : index
    %c0_370 = arith.constant 0 : index
    %353 = vector.load %arg21[%c1_368, %c0_369, %c0_370] : memref<9x16x16xf32, #tpu.memory_space<vmem>>, vector<1x16x16xf32>
    %354 = vector.shape_cast %353 : vector<1x16x16xf32> to vector<16x16xf32>
    %cst_371 = arith.constant dense<0.000000e+00> : vector<16x100xf32>
    %355 = tpu.matmul %354, %352, %cst_371 {dimension_numbers = #tpu.dot_dimension_numbers<[1], [0], [0], [1], [0, 0, 1, 1], [], []>} : vector<16x16xf32>, vector<16x100xf32>, vector<16x100xf32> -> vector<16x100xf32>
    %356 = arith.addf %351, %355 : vector<16x100xf32>
    %c0_372 = arith.constant 0 : index
    %c2_373 = arith.constant 2 : index
    %357 = vector.load %arg32[%c0_372, %c2_373] : memref<64x362xf32, #tpu.memory_space<vmem>>, vector<16x100xf32>
    %c2_374 = arith.constant 2 : index
    %c0_375 = arith.constant 0 : index
    %c0_376 = arith.constant 0 : index
    %358 = vector.load %arg21[%c2_374, %c0_375, %c0_376] : memref<9x16x16xf32, #tpu.memory_space<vmem>>, vector<1x16x16xf32>
    %359 = vector.shape_cast %358 : vector<1x16x16xf32> to vector<16x16xf32>
    %cst_377 = arith.constant dense<0.000000e+00> : vector<16x100xf32>
    %360 = tpu.matmul %359, %357, %cst_377 {dimension_numbers = #tpu.dot_dimension_numbers<[1], [0], [0], [1], [0, 0, 1, 1], [], []>} : vector<16x16xf32>, vector<16x100xf32>, vector<16x100xf32> -> vector<16x100xf32>
    %361 = arith.addf %356, %360 : vector<16x100xf32>
    %c0_378 = arith.constant 0 : index
    %c10_379 = arith.constant 10 : index
    %362 = vector.load %arg32[%c0_378, %c10_379] : memref<64x362xf32, #tpu.memory_space<vmem>>, vector<16x100xf32>
    %c3_380 = arith.constant 3 : index
    %c0_381 = arith.constant 0 : index
    %c0_382 = arith.constant 0 : index
    %363 = vector.load %arg21[%c3_380, %c0_381, %c0_382] : memref<9x16x16xf32, #tpu.memory_space<vmem>>, vector<1x16x16xf32>
    %364 = vector.shape_cast %363 : vector<1x16x16xf32> to vector<16x16xf32>
    %cst_383 = arith.constant dense<0.000000e+00> : vector<16x100xf32>
    %365 = tpu.matmul %364, %362, %cst_383 {dimension_numbers = #tpu.dot_dimension_numbers<[1], [0], [0], [1], [0, 0, 1, 1], [], []>} : vector<16x16xf32>, vector<16x100xf32>, vector<16x100xf32> -> vector<16x100xf32>
    %366 = arith.addf %361, %365 : vector<16x100xf32>
    %c0_384 = arith.constant 0 : index
    %c11_385 = arith.constant 11 : index
    %367 = vector.load %arg32[%c0_384, %c11_385] : memref<64x362xf32, #tpu.memory_space<vmem>>, vector<16x100xf32>
    %c4_386 = arith.constant 4 : index
    %c0_387 = arith.constant 0 : index
    %c0_388 = arith.constant 0 : index
    %368 = vector.load %arg21[%c4_386, %c0_387, %c0_388] : memref<9x16x16xf32, #tpu.memory_space<vmem>>, vector<1x16x16xf32>
    %369 = vector.shape_cast %368 : vector<1x16x16xf32> to vector<16x16xf32>
    %cst_389 = arith.constant dense<0.000000e+00> : vector<16x100xf32>
    %370 = tpu.matmul %369, %367, %cst_389 {dimension_numbers = #tpu.dot_dimension_numbers<[1], [0], [0], [1], [0, 0, 1, 1], [], []>} : vector<16x16xf32>, vector<16x100xf32>, vector<16x100xf32> -> vector<16x100xf32>
    %371 = arith.addf %366, %370 : vector<16x100xf32>
    %c0_390 = arith.constant 0 : index
    %c12_391 = arith.constant 12 : index
    %372 = vector.load %arg32[%c0_390, %c12_391] : memref<64x362xf32, #tpu.memory_space<vmem>>, vector<16x100xf32>
    %c5_392 = arith.constant 5 : index
    %c0_393 = arith.constant 0 : index
    %c0_394 = arith.constant 0 : index
    %373 = vector.load %arg21[%c5_392, %c0_393, %c0_394] : memref<9x16x16xf32, #tpu.memory_space<vmem>>, vector<1x16x16xf32>
    %374 = vector.shape_cast %373 : vector<1x16x16xf32> to vector<16x16xf32>
    %cst_395 = arith.constant dense<0.000000e+00> : vector<16x100xf32>
    %375 = tpu.matmul %374, %372, %cst_395 {dimension_numbers = #tpu.dot_dimension_numbers<[1], [0], [0], [1], [0, 0, 1, 1], [], []>} : vector<16x16xf32>, vector<16x100xf32>, vector<16x100xf32> -> vector<16x100xf32>
    %376 = arith.addf %371, %375 : vector<16x100xf32>
    %c0_396 = arith.constant 0 : index
    %c20_397 = arith.constant 20 : index
    %377 = vector.load %arg32[%c0_396, %c20_397] : memref<64x362xf32, #tpu.memory_space<vmem>>, vector<16x100xf32>
    %c6_398 = arith.constant 6 : index
    %c0_399 = arith.constant 0 : index
    %c0_400 = arith.constant 0 : index
    %378 = vector.load %arg21[%c6_398, %c0_399, %c0_400] : memref<9x16x16xf32, #tpu.memory_space<vmem>>, vector<1x16x16xf32>
    %379 = vector.shape_cast %378 : vector<1x16x16xf32> to vector<16x16xf32>
    %cst_401 = arith.constant dense<0.000000e+00> : vector<16x100xf32>
    %380 = tpu.matmul %379, %377, %cst_401 {dimension_numbers = #tpu.dot_dimension_numbers<[1], [0], [0], [1], [0, 0, 1, 1], [], []>} : vector<16x16xf32>, vector<16x100xf32>, vector<16x100xf32> -> vector<16x100xf32>
    %381 = arith.addf %376, %380 : vector<16x100xf32>
    %c0_402 = arith.constant 0 : index
    %c21_403 = arith.constant 21 : index
    %382 = vector.load %arg32[%c0_402, %c21_403] : memref<64x362xf32, #tpu.memory_space<vmem>>, vector<16x100xf32>
    %c7_404 = arith.constant 7 : index
    %c0_405 = arith.constant 0 : index
    %c0_406 = arith.constant 0 : index
    %383 = vector.load %arg21[%c7_404, %c0_405, %c0_406] : memref<9x16x16xf32, #tpu.memory_space<vmem>>, vector<1x16x16xf32>
    %384 = vector.shape_cast %383 : vector<1x16x16xf32> to vector<16x16xf32>
    %cst_407 = arith.constant dense<0.000000e+00> : vector<16x100xf32>
    %385 = tpu.matmul %384, %382, %cst_407 {dimension_numbers = #tpu.dot_dimension_numbers<[1], [0], [0], [1], [0, 0, 1, 1], [], []>} : vector<16x16xf32>, vector<16x100xf32>, vector<16x100xf32> -> vector<16x100xf32>
    %386 = arith.addf %381, %385 : vector<16x100xf32>
    %c0_408 = arith.constant 0 : index
    %c22_409 = arith.constant 22 : index
    %387 = vector.load %arg32[%c0_408, %c22_409] : memref<64x362xf32, #tpu.memory_space<vmem>>, vector<16x100xf32>
    %c8_410 = arith.constant 8 : index
    %c0_411 = arith.constant 0 : index
    %c0_412 = arith.constant 0 : index
    %388 = vector.load %arg21[%c8_410, %c0_411, %c0_412] : memref<9x16x16xf32, #tpu.memory_space<vmem>>, vector<1x16x16xf32>
    %389 = vector.shape_cast %388 : vector<1x16x16xf32> to vector<16x16xf32>
    %cst_413 = arith.constant dense<0.000000e+00> : vector<16x100xf32>
    %390 = tpu.matmul %389, %387, %cst_413 {dimension_numbers = #tpu.dot_dimension_numbers<[1], [0], [0], [1], [0, 0, 1, 1], [], []>} : vector<16x16xf32>, vector<16x100xf32>, vector<16x100xf32> -> vector<16x100xf32>
    %391 = arith.addf %386, %390 : vector<16x100xf32>
    %c0_414 = arith.constant 0 : index
    %c0_415 = arith.constant 0 : index
    %392 = vector.load %arg22[%c0_414, %c0_415] : memref<16x1xf32, #tpu.memory_space<vmem>>, vector<16x1xf32>
    %393 = vector.broadcast %392 : vector<16x1xf32> to vector<16x100xf32>
    %394 = arith.addf %391, %393 : vector<16x100xf32>
    %395 = vector.broadcast %1 : vector<1x100xf32> to vector<16x100xf32>
    %396 = arith.mulf %394, %395 : vector<16x100xf32>
    %397 = arith.addf %284, %396 : vector<16x100xf32>
    %c0_416 = arith.constant 0 : index
    %c0_417 = arith.constant 0 : index
    %398 = vector.load %arg8[%c0_416, %c0_417] : memref<10x18xf32, #tpu.memory_space<vmem>>, vector<10x18xf32>
    %399 = vector.extract_strided_slice %397 {offsets = [0, 10], sizes = [16, 10], strides = [1, 1]} : vector<16x100xf32> to vector<16x10xf32>
    %cst_418 = arith.constant dense<0.000000e+00> : vector<16x18xf32>
    %400 = tpu.matmul %399, %398, %cst_418 {dimension_numbers = #tpu.dot_dimension_numbers<[1], [0], [0], [1], [0, 0, 1, 1], [], []>} : vector<16x10xf32>, vector<10x18xf32>, vector<16x18xf32> -> vector<16x18xf32>
    %401 = vector.extract_strided_slice %397 {offsets = [0, 20], sizes = [16, 10], strides = [1, 1]} : vector<16x100xf32> to vector<16x10xf32>
    %cst_419 = arith.constant dense<0.000000e+00> : vector<16x18xf32>
    %402 = tpu.matmul %401, %398, %cst_419 {dimension_numbers = #tpu.dot_dimension_numbers<[1], [0], [0], [1], [0, 0, 1, 1], [], []>} : vector<16x10xf32>, vector<10x18xf32>, vector<16x18xf32> -> vector<16x18xf32>
    %403 = vector.extract_strided_slice %397 {offsets = [0, 30], sizes = [16, 10], strides = [1, 1]} : vector<16x100xf32> to vector<16x10xf32>
    %cst_420 = arith.constant dense<0.000000e+00> : vector<16x18xf32>
    %404 = tpu.matmul %403, %398, %cst_420 {dimension_numbers = #tpu.dot_dimension_numbers<[1], [0], [0], [1], [0, 0, 1, 1], [], []>} : vector<16x10xf32>, vector<10x18xf32>, vector<16x18xf32> -> vector<16x18xf32>
    %405 = vector.extract_strided_slice %397 {offsets = [0, 40], sizes = [16, 10], strides = [1, 1]} : vector<16x100xf32> to vector<16x10xf32>
    %cst_421 = arith.constant dense<0.000000e+00> : vector<16x18xf32>
    %406 = tpu.matmul %405, %398, %cst_421 {dimension_numbers = #tpu.dot_dimension_numbers<[1], [0], [0], [1], [0, 0, 1, 1], [], []>} : vector<16x10xf32>, vector<10x18xf32>, vector<16x18xf32> -> vector<16x18xf32>
    %407 = vector.extract_strided_slice %397 {offsets = [0, 50], sizes = [16, 10], strides = [1, 1]} : vector<16x100xf32> to vector<16x10xf32>
    %cst_422 = arith.constant dense<0.000000e+00> : vector<16x18xf32>
    %408 = tpu.matmul %407, %398, %cst_422 {dimension_numbers = #tpu.dot_dimension_numbers<[1], [0], [0], [1], [0, 0, 1, 1], [], []>} : vector<16x10xf32>, vector<10x18xf32>, vector<16x18xf32> -> vector<16x18xf32>
    %409 = vector.extract_strided_slice %397 {offsets = [0, 60], sizes = [16, 10], strides = [1, 1]} : vector<16x100xf32> to vector<16x10xf32>
    %cst_423 = arith.constant dense<0.000000e+00> : vector<16x18xf32>
    %410 = tpu.matmul %409, %398, %cst_423 {dimension_numbers = #tpu.dot_dimension_numbers<[1], [0], [0], [1], [0, 0, 1, 1], [], []>} : vector<16x10xf32>, vector<10x18xf32>, vector<16x18xf32> -> vector<16x18xf32>
    %411 = vector.extract_strided_slice %397 {offsets = [0, 70], sizes = [16, 10], strides = [1, 1]} : vector<16x100xf32> to vector<16x10xf32>
    %cst_424 = arith.constant dense<0.000000e+00> : vector<16x18xf32>
    %412 = tpu.matmul %411, %398, %cst_424 {dimension_numbers = #tpu.dot_dimension_numbers<[1], [0], [0], [1], [0, 0, 1, 1], [], []>} : vector<16x10xf32>, vector<10x18xf32>, vector<16x18xf32> -> vector<16x18xf32>
    %413 = vector.extract_strided_slice %397 {offsets = [0, 80], sizes = [16, 10], strides = [1, 1]} : vector<16x100xf32> to vector<16x10xf32>
    %cst_425 = arith.constant dense<0.000000e+00> : vector<16x18xf32>
    %414 = tpu.matmul %413, %398, %cst_425 {dimension_numbers = #tpu.dot_dimension_numbers<[1], [0], [0], [1], [0, 0, 1, 1], [], []>} : vector<16x10xf32>, vector<10x18xf32>, vector<16x18xf32> -> vector<16x18xf32>
    %cst_426 = arith.constant 0.000000e+00 : f32
    %415 = vector.broadcast %cst_426 : f32 to vector<16x18xf32>
    %c0_427 = arith.constant 0 : index
    %c0_428 = arith.constant 0 : index
    %416 = vector.load %arg33[%c0_427, %c0_428] : memref<16x324xf32, #tpu.memory_space<vmem>>, vector<16x18xf32>
    tpu.vector_store %arg33[%c0_427, %c0_428], %415 {strides = array<i32>} : memref<16x324xf32, #tpu.memory_space<vmem>>, vector<16x18xf32>,
    %c0_429 = arith.constant 0 : index
    %c18 = arith.constant 18 : index
    %417 = vector.load %arg33[%c0_429, %c18] : memref<16x324xf32, #tpu.memory_space<vmem>>, vector<16x18xf32>
    tpu.vector_store %arg33[%c0_429, %c18], %400 {strides = array<i32>} : memref<16x324xf32, #tpu.memory_space<vmem>>, vector<16x18xf32>,
    %cst_430 = arith.constant 7.500000e-01 : f32
    %418 = vector.broadcast %cst_430 : f32 to vector<16x18xf32>
    %419 = arith.mulf %400, %418 : vector<16x18xf32>
    %cst_431 = arith.constant 2.500000e-01 : f32
    %420 = vector.broadcast %cst_431 : f32 to vector<16x18xf32>
    %421 = arith.mulf %402, %420 : vector<16x18xf32>
    %422 = arith.addf %419, %421 : vector<16x18xf32>
    %c0_432 = arith.constant 0 : index
    %c36 = arith.constant 36 : index
    %423 = vector.load %arg33[%c0_432, %c36] : memref<16x324xf32, #tpu.memory_space<vmem>>, vector<16x18xf32>
    tpu.vector_store %arg33[%c0_432, %c36], %422 {strides = array<i32>} : memref<16x324xf32, #tpu.memory_space<vmem>>, vector<16x18xf32>,
    %cst_433 = arith.constant 2.500000e-01 : f32
    %424 = vector.broadcast %cst_433 : f32 to vector<16x18xf32>
    %425 = arith.mulf %400, %424 : vector<16x18xf32>
    %cst_434 = arith.constant 7.500000e-01 : f32
    %426 = vector.broadcast %cst_434 : f32 to vector<16x18xf32>
    %427 = arith.mulf %402, %426 : vector<16x18xf32>
    %428 = arith.addf %425, %427 : vector<16x18xf32>
    %c0_435 = arith.constant 0 : index
    %c54 = arith.constant 54 : index
    %429 = vector.load %arg33[%c0_435, %c54] : memref<16x324xf32, #tpu.memory_space<vmem>>, vector<16x18xf32>
    tpu.vector_store %arg33[%c0_435, %c54], %428 {strides = array<i32>} : memref<16x324xf32, #tpu.memory_space<vmem>>, vector<16x18xf32>,
    %cst_436 = arith.constant 7.500000e-01 : f32
    %430 = vector.broadcast %cst_436 : f32 to vector<16x18xf32>
    %431 = arith.mulf %402, %430 : vector<16x18xf32>
    %cst_437 = arith.constant 2.500000e-01 : f32
    %432 = vector.broadcast %cst_437 : f32 to vector<16x18xf32>
    %433 = arith.mulf %404, %432 : vector<16x18xf32>
    %434 = arith.addf %431, %433 : vector<16x18xf32>
    %c0_438 = arith.constant 0 : index
    %c72 = arith.constant 72 : index
    %435 = vector.load %arg33[%c0_438, %c72] : memref<16x324xf32, #tpu.memory_space<vmem>>, vector<16x18xf32>
    tpu.vector_store %arg33[%c0_438, %c72], %434 {strides = array<i32>} : memref<16x324xf32, #tpu.memory_space<vmem>>, vector<16x18xf32>,
    %cst_439 = arith.constant 2.500000e-01 : f32
    %436 = vector.broadcast %cst_439 : f32 to vector<16x18xf32>
    %437 = arith.mulf %402, %436 : vector<16x18xf32>
    %cst_440 = arith.constant 7.500000e-01 : f32
    %438 = vector.broadcast %cst_440 : f32 to vector<16x18xf32>
    %439 = arith.mulf %404, %438 : vector<16x18xf32>
    %440 = arith.addf %437, %439 : vector<16x18xf32>
    %c0_441 = arith.constant 0 : index
    %c90_442 = arith.constant 90 : index
    %441 = vector.load %arg33[%c0_441, %c90_442] : memref<16x324xf32, #tpu.memory_space<vmem>>, vector<16x18xf32>
    tpu.vector_store %arg33[%c0_441, %c90_442], %440 {strides = array<i32>} : memref<16x324xf32, #tpu.memory_space<vmem>>, vector<16x18xf32>,
    %cst_443 = arith.constant 7.500000e-01 : f32
    %442 = vector.broadcast %cst_443 : f32 to vector<16x18xf32>
    %443 = arith.mulf %404, %442 : vector<16x18xf32>
    %cst_444 = arith.constant 2.500000e-01 : f32
    %444 = vector.broadcast %cst_444 : f32 to vector<16x18xf32>
    %445 = arith.mulf %406, %444 : vector<16x18xf32>
    %446 = arith.addf %443, %445 : vector<16x18xf32>
    %c0_445 = arith.constant 0 : index
    %c108 = arith.constant 108 : index
    %447 = vector.load %arg33[%c0_445, %c108] : memref<16x324xf32, #tpu.memory_space<vmem>>, vector<16x18xf32>
    tpu.vector_store %arg33[%c0_445, %c108], %446 {strides = array<i32>} : memref<16x324xf32, #tpu.memory_space<vmem>>, vector<16x18xf32>,
    %cst_446 = arith.constant 2.500000e-01 : f32
    %448 = vector.broadcast %cst_446 : f32 to vector<16x18xf32>
    %449 = arith.mulf %404, %448 : vector<16x18xf32>
    %cst_447 = arith.constant 7.500000e-01 : f32
    %450 = vector.broadcast %cst_447 : f32 to vector<16x18xf32>
    %451 = arith.mulf %406, %450 : vector<16x18xf32>
    %452 = arith.addf %449, %451 : vector<16x18xf32>
    %c0_448 = arith.constant 0 : index
    %c126 = arith.constant 126 : index
    %453 = vector.load %arg33[%c0_448, %c126] : memref<16x324xf32, #tpu.memory_space<vmem>>, vector<16x18xf32>
    tpu.vector_store %arg33[%c0_448, %c126], %452 {strides = array<i32>} : memref<16x324xf32, #tpu.memory_space<vmem>>, vector<16x18xf32>,
    %cst_449 = arith.constant 7.500000e-01 : f32
    %454 = vector.broadcast %cst_449 : f32 to vector<16x18xf32>
    %455 = arith.mulf %406, %454 : vector<16x18xf32>
    %cst_450 = arith.constant 2.500000e-01 : f32
    %456 = vector.broadcast %cst_450 : f32 to vector<16x18xf32>
    %457 = arith.mulf %408, %456 : vector<16x18xf32>
    %458 = arith.addf %455, %457 : vector<16x18xf32>
    %c0_451 = arith.constant 0 : index
    %c144 = arith.constant 144 : index
    %459 = vector.load %arg33[%c0_451, %c144] : memref<16x324xf32, #tpu.memory_space<vmem>>, vector<16x18xf32>
    tpu.vector_store %arg33[%c0_451, %c144], %458 {strides = array<i32>} : memref<16x324xf32, #tpu.memory_space<vmem>>, vector<16x18xf32>,
    %cst_452 = arith.constant 2.500000e-01 : f32
    %460 = vector.broadcast %cst_452 : f32 to vector<16x18xf32>
    %461 = arith.mulf %406, %460 : vector<16x18xf32>
    %cst_453 = arith.constant 7.500000e-01 : f32
    %462 = vector.broadcast %cst_453 : f32 to vector<16x18xf32>
    %463 = arith.mulf %408, %462 : vector<16x18xf32>
    %464 = arith.addf %461, %463 : vector<16x18xf32>
    %c0_454 = arith.constant 0 : index
    %c162 = arith.constant 162 : index
    %465 = vector.load %arg33[%c0_454, %c162] : memref<16x324xf32, #tpu.memory_space<vmem>>, vector<16x18xf32>
    tpu.vector_store %arg33[%c0_454, %c162], %464 {strides = array<i32>} : memref<16x324xf32, #tpu.memory_space<vmem>>, vector<16x18xf32>,
    %cst_455 = arith.constant 7.500000e-01 : f32
    %466 = vector.broadcast %cst_455 : f32 to vector<16x18xf32>
    %467 = arith.mulf %408, %466 : vector<16x18xf32>
    %cst_456 = arith.constant 2.500000e-01 : f32
    %468 = vector.broadcast %cst_456 : f32 to vector<16x18xf32>
    %469 = arith.mulf %410, %468 : vector<16x18xf32>
    %470 = arith.addf %467, %469 : vector<16x18xf32>
    %c0_457 = arith.constant 0 : index
    %c180 = arith.constant 180 : index
    %471 = vector.load %arg33[%c0_457, %c180] : memref<16x324xf32, #tpu.memory_space<vmem>>, vector<16x18xf32>
    tpu.vector_store %arg33[%c0_457, %c180], %470 {strides = array<i32>} : memref<16x324xf32, #tpu.memory_space<vmem>>, vector<16x18xf32>,
    %cst_458 = arith.constant 2.500000e-01 : f32
    %472 = vector.broadcast %cst_458 : f32 to vector<16x18xf32>
    %473 = arith.mulf %408, %472 : vector<16x18xf32>
    %cst_459 = arith.constant 7.500000e-01 : f32
    %474 = vector.broadcast %cst_459 : f32 to vector<16x18xf32>
    %475 = arith.mulf %410, %474 : vector<16x18xf32>
    %476 = arith.addf %473, %475 : vector<16x18xf32>
    %c0_460 = arith.constant 0 : index
    %c198 = arith.constant 198 : index
    %477 = vector.load %arg33[%c0_460, %c198] : memref<16x324xf32, #tpu.memory_space<vmem>>, vector<16x18xf32>
    tpu.vector_store %arg33[%c0_460, %c198], %476 {strides = array<i32>} : memref<16x324xf32, #tpu.memory_space<vmem>>, vector<16x18xf32>,
    %cst_461 = arith.constant 7.500000e-01 : f32
    %478 = vector.broadcast %cst_461 : f32 to vector<16x18xf32>
    %479 = arith.mulf %410, %478 : vector<16x18xf32>
    %cst_462 = arith.constant 2.500000e-01 : f32
    %480 = vector.broadcast %cst_462 : f32 to vector<16x18xf32>
    %481 = arith.mulf %412, %480 : vector<16x18xf32>
    %482 = arith.addf %479, %481 : vector<16x18xf32>
    %c0_463 = arith.constant 0 : index
    %c216 = arith.constant 216 : index
    %483 = vector.load %arg33[%c0_463, %c216] : memref<16x324xf32, #tpu.memory_space<vmem>>, vector<16x18xf32>
    tpu.vector_store %arg33[%c0_463, %c216], %482 {strides = array<i32>} : memref<16x324xf32, #tpu.memory_space<vmem>>, vector<16x18xf32>,
    %cst_464 = arith.constant 2.500000e-01 : f32
    %484 = vector.broadcast %cst_464 : f32 to vector<16x18xf32>
    %485 = arith.mulf %410, %484 : vector<16x18xf32>
    %cst_465 = arith.constant 7.500000e-01 : f32
    %486 = vector.broadcast %cst_465 : f32 to vector<16x18xf32>
    %487 = arith.mulf %412, %486 : vector<16x18xf32>
    %488 = arith.addf %485, %487 : vector<16x18xf32>
    %c0_466 = arith.constant 0 : index
    %c234 = arith.constant 234 : index
    %489 = vector.load %arg33[%c0_466, %c234] : memref<16x324xf32, #tpu.memory_space<vmem>>, vector<16x18xf32>
    tpu.vector_store %arg33[%c0_466, %c234], %488 {strides = array<i32>} : memref<16x324xf32, #tpu.memory_space<vmem>>, vector<16x18xf32>,
    %cst_467 = arith.constant 7.500000e-01 : f32
    %490 = vector.broadcast %cst_467 : f32 to vector<16x18xf32>
    %491 = arith.mulf %412, %490 : vector<16x18xf32>
    %cst_468 = arith.constant 2.500000e-01 : f32
    %492 = vector.broadcast %cst_468 : f32 to vector<16x18xf32>
    %493 = arith.mulf %414, %492 : vector<16x18xf32>
    %494 = arith.addf %491, %493 : vector<16x18xf32>
    %c0_469 = arith.constant 0 : index
    %c252 = arith.constant 252 : index
    %495 = vector.load %arg33[%c0_469, %c252] : memref<16x324xf32, #tpu.memory_space<vmem>>, vector<16x18xf32>
    tpu.vector_store %arg33[%c0_469, %c252], %494 {strides = array<i32>} : memref<16x324xf32, #tpu.memory_space<vmem>>, vector<16x18xf32>,
    %cst_470 = arith.constant 2.500000e-01 : f32
    %496 = vector.broadcast %cst_470 : f32 to vector<16x18xf32>
    %497 = arith.mulf %412, %496 : vector<16x18xf32>
    %cst_471 = arith.constant 7.500000e-01 : f32
    %498 = vector.broadcast %cst_471 : f32 to vector<16x18xf32>
    %499 = arith.mulf %414, %498 : vector<16x18xf32>
    %500 = arith.addf %497, %499 : vector<16x18xf32>
    %c0_472 = arith.constant 0 : index
    %c270 = arith.constant 270 : index
    %501 = vector.load %arg33[%c0_472, %c270] : memref<16x324xf32, #tpu.memory_space<vmem>>, vector<16x18xf32>
    tpu.vector_store %arg33[%c0_472, %c270], %500 {strides = array<i32>} : memref<16x324xf32, #tpu.memory_space<vmem>>, vector<16x18xf32>,
    %cst_473 = arith.constant 7.500000e-01 : f32
    %502 = vector.broadcast %cst_473 : f32 to vector<16x18xf32>
    %503 = arith.mulf %414, %502 : vector<16x18xf32>
    %cst_474 = arith.constant 2.500000e-01 : f32
    %504 = vector.broadcast %cst_474 : f32 to vector<16x18xf32>
    %505 = arith.mulf %414, %504 : vector<16x18xf32>
    %506 = arith.addf %503, %505 : vector<16x18xf32>
    %c0_475 = arith.constant 0 : index
    %c288 = arith.constant 288 : index
    %507 = vector.load %arg33[%c0_475, %c288] : memref<16x324xf32, #tpu.memory_space<vmem>>, vector<16x18xf32>
    tpu.vector_store %arg33[%c0_475, %c288], %506 {strides = array<i32>} : memref<16x324xf32, #tpu.memory_space<vmem>>, vector<16x18xf32>,
    %c0_476 = arith.constant 0 : index
    %c306 = arith.constant 306 : index
    %508 = vector.load %arg33[%c0_476, %c306] : memref<16x324xf32, #tpu.memory_space<vmem>>, vector<16x18xf32>
    tpu.vector_store %arg33[%c0_476, %c306], %415 {strides = array<i32>} : memref<16x324xf32, #tpu.memory_space<vmem>>, vector<16x18xf32>,
    %c0_477 = arith.constant 0 : index
    %c0_478 = arith.constant 0 : index
    %509 = vector.load %arg33[%c0_477, %c0_478] : memref<16x324xf32, #tpu.memory_space<vmem>>, vector<16x324xf32>
    %c0_479 = arith.constant 0 : index
    %c0_480 = arith.constant 0 : index
    %c0_481 = arith.constant 0 : index
    %510 = vector.load %arg3[%c0_479, %c0_480, %c0_481] : memref<1x24x324xf32, #tpu.memory_space<vmem>>, vector<1x24x324xf32>
    %511 = vector.shape_cast %510 : vector<1x24x324xf32> to vector<24x324xf32>
    %cst_482 = arith.constant 0.000000e+00 : f32
    %512 = vector.broadcast %cst_482 : f32 to vector<24x19xf32>
    %c0_483 = arith.constant 0 : index
    %c0_484 = arith.constant 0 : index
    %513 = vector.load %arg32[%c0_483, %c0_484] : memref<64x362xf32, #tpu.memory_space<vmem>>, vector<24x19xf32>
    tpu.vector_store %arg32[%c0_483, %c0_484], %512 {strides = array<i32>} : memref<64x362xf32, #tpu.memory_space<vmem>>, vector<24x19xf32>,
    %c0_485 = arith.constant 0 : index
    %c19 = arith.constant 19 : index
    %514 = vector.load %arg32[%c0_485, %c19] : memref<64x362xf32, #tpu.memory_space<vmem>>, vector<24x324xf32>
    tpu.vector_store %arg32[%c0_485, %c19], %511 {strides = array<i32>} : memref<64x362xf32, #tpu.memory_space<vmem>>, vector<24x324xf32>,
    %cst_486 = arith.constant 0.000000e+00 : f32
    %515 = vector.broadcast %cst_486 : f32 to vector<24x19xf32>
    %c0_487 = arith.constant 0 : index
    %c343 = arith.constant 343 : index
    %516 = vector.load %arg32[%c0_487, %c343] : memref<64x362xf32, #tpu.memory_space<vmem>>, vector<24x19xf32>
    tpu.vector_store %arg32[%c0_487, %c343], %515 {strides = array<i32>} : memref<64x362xf32, #tpu.memory_space<vmem>>, vector<24x19xf32>,
    %c0_488 = arith.constant 0 : index
    %c0_489 = arith.constant 0 : index
    %517 = vector.load %arg32[%c0_488, %c0_489] : memref<64x362xf32, #tpu.memory_space<vmem>>, vector<24x324xf32>
    %c0_490 = arith.constant 0 : index
    %c0_491 = arith.constant 0 : index
    %c0_492 = arith.constant 0 : index
    %518 = vector.load %arg23[%c0_490, %c0_491, %c0_492] : memref<9x16x24xf32, #tpu.memory_space<vmem>>, vector<1x16x24xf32>
    %519 = vector.shape_cast %518 : vector<1x16x24xf32> to vector<16x24xf32>
    %cst_493 = arith.constant dense<0.000000e+00> : vector<16x324xf32>
    %520 = tpu.matmul %519, %517, %cst_493 {dimension_numbers = #tpu.dot_dimension_numbers<[1], [0], [0], [1], [0, 0, 1, 1], [], []>} : vector<16x24xf32>, vector<24x324xf32>, vector<16x324xf32> -> vector<16x324xf32>
    %c0_494 = arith.constant 0 : index
    %c1_495 = arith.constant 1 : index
    %521 = vector.load %arg32[%c0_494, %c1_495] : memref<64x362xf32, #tpu.memory_space<vmem>>, vector<24x324xf32>
    %c1_496 = arith.constant 1 : index
    %c0_497 = arith.constant 0 : index
    %c0_498 = arith.constant 0 : index
    %522 = vector.load %arg23[%c1_496, %c0_497, %c0_498] : memref<9x16x24xf32, #tpu.memory_space<vmem>>, vector<1x16x24xf32>
    %523 = vector.shape_cast %522 : vector<1x16x24xf32> to vector<16x24xf32>
    %cst_499 = arith.constant dense<0.000000e+00> : vector<16x324xf32>
    %524 = tpu.matmul %523, %521, %cst_499 {dimension_numbers = #tpu.dot_dimension_numbers<[1], [0], [0], [1], [0, 0, 1, 1], [], []>} : vector<16x24xf32>, vector<24x324xf32>, vector<16x324xf32> -> vector<16x324xf32>
    %525 = arith.addf %520, %524 : vector<16x324xf32>
    %c0_500 = arith.constant 0 : index
    %c2_501 = arith.constant 2 : index
    %526 = vector.load %arg32[%c0_500, %c2_501] : memref<64x362xf32, #tpu.memory_space<vmem>>, vector<24x324xf32>
    %c2_502 = arith.constant 2 : index
    %c0_503 = arith.constant 0 : index
    %c0_504 = arith.constant 0 : index
    %527 = vector.load %arg23[%c2_502, %c0_503, %c0_504] : memref<9x16x24xf32, #tpu.memory_space<vmem>>, vector<1x16x24xf32>
    %528 = vector.shape_cast %527 : vector<1x16x24xf32> to vector<16x24xf32>
    %cst_505 = arith.constant dense<0.000000e+00> : vector<16x324xf32>
    %529 = tpu.matmul %528, %526, %cst_505 {dimension_numbers = #tpu.dot_dimension_numbers<[1], [0], [0], [1], [0, 0, 1, 1], [], []>} : vector<16x24xf32>, vector<24x324xf32>, vector<16x324xf32> -> vector<16x324xf32>
    %530 = arith.addf %525, %529 : vector<16x324xf32>
    %c0_506 = arith.constant 0 : index
    %c18_507 = arith.constant 18 : index
    %531 = vector.load %arg32[%c0_506, %c18_507] : memref<64x362xf32, #tpu.memory_space<vmem>>, vector<24x324xf32>
    %c3_508 = arith.constant 3 : index
    %c0_509 = arith.constant 0 : index
    %c0_510 = arith.constant 0 : index
    %532 = vector.load %arg23[%c3_508, %c0_509, %c0_510] : memref<9x16x24xf32, #tpu.memory_space<vmem>>, vector<1x16x24xf32>
    %533 = vector.shape_cast %532 : vector<1x16x24xf32> to vector<16x24xf32>
    %cst_511 = arith.constant dense<0.000000e+00> : vector<16x324xf32>
    %534 = tpu.matmul %533, %531, %cst_511 {dimension_numbers = #tpu.dot_dimension_numbers<[1], [0], [0], [1], [0, 0, 1, 1], [], []>} : vector<16x24xf32>, vector<24x324xf32>, vector<16x324xf32> -> vector<16x324xf32>
    %535 = arith.addf %530, %534 : vector<16x324xf32>
    %c0_512 = arith.constant 0 : index
    %c19_513 = arith.constant 19 : index
    %536 = vector.load %arg32[%c0_512, %c19_513] : memref<64x362xf32, #tpu.memory_space<vmem>>, vector<24x324xf32>
    %c4_514 = arith.constant 4 : index
    %c0_515 = arith.constant 0 : index
    %c0_516 = arith.constant 0 : index
    %537 = vector.load %arg23[%c4_514, %c0_515, %c0_516] : memref<9x16x24xf32, #tpu.memory_space<vmem>>, vector<1x16x24xf32>
    %538 = vector.shape_cast %537 : vector<1x16x24xf32> to vector<16x24xf32>
    %cst_517 = arith.constant dense<0.000000e+00> : vector<16x324xf32>
    %539 = tpu.matmul %538, %536, %cst_517 {dimension_numbers = #tpu.dot_dimension_numbers<[1], [0], [0], [1], [0, 0, 1, 1], [], []>} : vector<16x24xf32>, vector<24x324xf32>, vector<16x324xf32> -> vector<16x324xf32>
    %540 = arith.addf %535, %539 : vector<16x324xf32>
    %c0_518 = arith.constant 0 : index
    %c20_519 = arith.constant 20 : index
    %541 = vector.load %arg32[%c0_518, %c20_519] : memref<64x362xf32, #tpu.memory_space<vmem>>, vector<24x324xf32>
    %c5_520 = arith.constant 5 : index
    %c0_521 = arith.constant 0 : index
    %c0_522 = arith.constant 0 : index
    %542 = vector.load %arg23[%c5_520, %c0_521, %c0_522] : memref<9x16x24xf32, #tpu.memory_space<vmem>>, vector<1x16x24xf32>
    %543 = vector.shape_cast %542 : vector<1x16x24xf32> to vector<16x24xf32>
    %cst_523 = arith.constant dense<0.000000e+00> : vector<16x324xf32>
    %544 = tpu.matmul %543, %541, %cst_523 {dimension_numbers = #tpu.dot_dimension_numbers<[1], [0], [0], [1], [0, 0, 1, 1], [], []>} : vector<16x24xf32>, vector<24x324xf32>, vector<16x324xf32> -> vector<16x324xf32>
    %545 = arith.addf %540, %544 : vector<16x324xf32>
    %c0_524 = arith.constant 0 : index
    %c36_525 = arith.constant 36 : index
    %546 = vector.load %arg32[%c0_524, %c36_525] : memref<64x362xf32, #tpu.memory_space<vmem>>, vector<24x324xf32>
    %c6_526 = arith.constant 6 : index
    %c0_527 = arith.constant 0 : index
    %c0_528 = arith.constant 0 : index
    %547 = vector.load %arg23[%c6_526, %c0_527, %c0_528] : memref<9x16x24xf32, #tpu.memory_space<vmem>>, vector<1x16x24xf32>
    %548 = vector.shape_cast %547 : vector<1x16x24xf32> to vector<16x24xf32>
    %cst_529 = arith.constant dense<0.000000e+00> : vector<16x324xf32>
    %549 = tpu.matmul %548, %546, %cst_529 {dimension_numbers = #tpu.dot_dimension_numbers<[1], [0], [0], [1], [0, 0, 1, 1], [], []>} : vector<16x24xf32>, vector<24x324xf32>, vector<16x324xf32> -> vector<16x324xf32>
    %550 = arith.addf %545, %549 : vector<16x324xf32>
    %c0_530 = arith.constant 0 : index
    %c37 = arith.constant 37 : index
    %551 = vector.load %arg32[%c0_530, %c37] : memref<64x362xf32, #tpu.memory_space<vmem>>, vector<24x324xf32>
    %c7_531 = arith.constant 7 : index
    %c0_532 = arith.constant 0 : index
    %c0_533 = arith.constant 0 : index
    %552 = vector.load %arg23[%c7_531, %c0_532, %c0_533] : memref<9x16x24xf32, #tpu.memory_space<vmem>>, vector<1x16x24xf32>
    %553 = vector.shape_cast %552 : vector<1x16x24xf32> to vector<16x24xf32>
    %cst_534 = arith.constant dense<0.000000e+00> : vector<16x324xf32>
    %554 = tpu.matmul %553, %551, %cst_534 {dimension_numbers = #tpu.dot_dimension_numbers<[1], [0], [0], [1], [0, 0, 1, 1], [], []>} : vector<16x24xf32>, vector<24x324xf32>, vector<16x324xf32> -> vector<16x324xf32>
    %555 = arith.addf %550, %554 : vector<16x324xf32>
    %c0_535 = arith.constant 0 : index
    %c38 = arith.constant 38 : index
    %556 = vector.load %arg32[%c0_535, %c38] : memref<64x362xf32, #tpu.memory_space<vmem>>, vector<24x324xf32>
    %c8_536 = arith.constant 8 : index
    %c0_537 = arith.constant 0 : index
    %c0_538 = arith.constant 0 : index
    %557 = vector.load %arg23[%c8_536, %c0_537, %c0_538] : memref<9x16x24xf32, #tpu.memory_space<vmem>>, vector<1x16x24xf32>
    %558 = vector.shape_cast %557 : vector<1x16x24xf32> to vector<16x24xf32>
    %cst_539 = arith.constant dense<0.000000e+00> : vector<16x324xf32>
    %559 = tpu.matmul %558, %556, %cst_539 {dimension_numbers = #tpu.dot_dimension_numbers<[1], [0], [0], [1], [0, 0, 1, 1], [], []>} : vector<16x24xf32>, vector<24x324xf32>, vector<16x324xf32> -> vector<16x324xf32>
    %560 = arith.addf %555, %559 : vector<16x324xf32>
    %c0_540 = arith.constant 0 : index
    %c0_541 = arith.constant 0 : index
    %561 = vector.load %arg24[%c0_540, %c0_541] : memref<16x1xf32, #tpu.memory_space<vmem>>, vector<16x1xf32>
    %562 = vector.broadcast %561 : vector<16x1xf32> to vector<16x324xf32>
    %563 = arith.addf %560, %562 : vector<16x324xf32>
    %564 = vector.broadcast %2 : vector<1x324xf32> to vector<16x324xf32>
    %565 = arith.mulf %563, %564 : vector<16x324xf32>
    %566 = arith.addf %565, %509 : vector<16x324xf32>
    %cst_542 = arith.constant 0.000000e+00 : f32
    %567 = vector.broadcast %cst_542 : f32 to vector<16x324xf32>
    %568 = arith.maximumf %566, %567 : vector<16x324xf32>
    %cst_543 = arith.constant 0.000000e+00 : f32
    %569 = vector.broadcast %cst_543 : f32 to vector<16x19xf32>
    %c0_544 = arith.constant 0 : index
    %c0_545 = arith.constant 0 : index
    %570 = vector.load %arg32[%c0_544, %c0_545] : memref<64x362xf32, #tpu.memory_space<vmem>>, vector<16x19xf32>
    tpu.vector_store %arg32[%c0_544, %c0_545], %569 {strides = array<i32>} : memref<64x362xf32, #tpu.memory_space<vmem>>, vector<16x19xf32>,
    %c0_546 = arith.constant 0 : index
    %c19_547 = arith.constant 19 : index
    %571 = vector.load %arg32[%c0_546, %c19_547] : memref<64x362xf32, #tpu.memory_space<vmem>>, vector<16x324xf32>
    tpu.vector_store %arg32[%c0_546, %c19_547], %568 {strides = array<i32>} : memref<64x362xf32, #tpu.memory_space<vmem>>, vector<16x324xf32>,
    %cst_548 = arith.constant 0.000000e+00 : f32
    %572 = vector.broadcast %cst_548 : f32 to vector<16x19xf32>
    %c0_549 = arith.constant 0 : index
    %c343_550 = arith.constant 343 : index
    %573 = vector.load %arg32[%c0_549, %c343_550] : memref<64x362xf32, #tpu.memory_space<vmem>>, vector<16x19xf32>
    tpu.vector_store %arg32[%c0_549, %c343_550], %572 {strides = array<i32>} : memref<64x362xf32, #tpu.memory_space<vmem>>, vector<16x19xf32>,
    %c0_551 = arith.constant 0 : index
    %c0_552 = arith.constant 0 : index
    %574 = vector.load %arg32[%c0_551, %c0_552] : memref<64x362xf32, #tpu.memory_space<vmem>>, vector<16x324xf32>
    %c0_553 = arith.constant 0 : index
    %c0_554 = arith.constant 0 : index
    %c0_555 = arith.constant 0 : index
    %575 = vector.load %arg25[%c0_553, %c0_554, %c0_555] : memref<9x16x16xf32, #tpu.memory_space<vmem>>, vector<1x16x16xf32>
    %576 = vector.shape_cast %575 : vector<1x16x16xf32> to vector<16x16xf32>
    %cst_556 = arith.constant dense<0.000000e+00> : vector<16x324xf32>
    %577 = tpu.matmul %576, %574, %cst_556 {dimension_numbers = #tpu.dot_dimension_numbers<[1], [0], [0], [1], [0, 0, 1, 1], [], []>} : vector<16x16xf32>, vector<16x324xf32>, vector<16x324xf32> -> vector<16x324xf32>
    %c0_557 = arith.constant 0 : index
    %c1_558 = arith.constant 1 : index
    %578 = vector.load %arg32[%c0_557, %c1_558] : memref<64x362xf32, #tpu.memory_space<vmem>>, vector<16x324xf32>
    %c1_559 = arith.constant 1 : index
    %c0_560 = arith.constant 0 : index
    %c0_561 = arith.constant 0 : index
    %579 = vector.load %arg25[%c1_559, %c0_560, %c0_561] : memref<9x16x16xf32, #tpu.memory_space<vmem>>, vector<1x16x16xf32>
    %580 = vector.shape_cast %579 : vector<1x16x16xf32> to vector<16x16xf32>
    %cst_562 = arith.constant dense<0.000000e+00> : vector<16x324xf32>
    %581 = tpu.matmul %580, %578, %cst_562 {dimension_numbers = #tpu.dot_dimension_numbers<[1], [0], [0], [1], [0, 0, 1, 1], [], []>} : vector<16x16xf32>, vector<16x324xf32>, vector<16x324xf32> -> vector<16x324xf32>
    %582 = arith.addf %577, %581 : vector<16x324xf32>
    %c0_563 = arith.constant 0 : index
    %c2_564 = arith.constant 2 : index
    %583 = vector.load %arg32[%c0_563, %c2_564] : memref<64x362xf32, #tpu.memory_space<vmem>>, vector<16x324xf32>
    %c2_565 = arith.constant 2 : index
    %c0_566 = arith.constant 0 : index
    %c0_567 = arith.constant 0 : index
    %584 = vector.load %arg25[%c2_565, %c0_566, %c0_567] : memref<9x16x16xf32, #tpu.memory_space<vmem>>, vector<1x16x16xf32>
    %585 = vector.shape_cast %584 : vector<1x16x16xf32> to vector<16x16xf32>
    %cst_568 = arith.constant dense<0.000000e+00> : vector<16x324xf32>
    %586 = tpu.matmul %585, %583, %cst_568 {dimension_numbers = #tpu.dot_dimension_numbers<[1], [0], [0], [1], [0, 0, 1, 1], [], []>} : vector<16x16xf32>, vector<16x324xf32>, vector<16x324xf32> -> vector<16x324xf32>
    %587 = arith.addf %582, %586 : vector<16x324xf32>
    %c0_569 = arith.constant 0 : index
    %c18_570 = arith.constant 18 : index
    %588 = vector.load %arg32[%c0_569, %c18_570] : memref<64x362xf32, #tpu.memory_space<vmem>>, vector<16x324xf32>
    %c3_571 = arith.constant 3 : index
    %c0_572 = arith.constant 0 : index
    %c0_573 = arith.constant 0 : index
    %589 = vector.load %arg25[%c3_571, %c0_572, %c0_573] : memref<9x16x16xf32, #tpu.memory_space<vmem>>, vector<1x16x16xf32>
    %590 = vector.shape_cast %589 : vector<1x16x16xf32> to vector<16x16xf32>
    %cst_574 = arith.constant dense<0.000000e+00> : vector<16x324xf32>
    %591 = tpu.matmul %590, %588, %cst_574 {dimension_numbers = #tpu.dot_dimension_numbers<[1], [0], [0], [1], [0, 0, 1, 1], [], []>} : vector<16x16xf32>, vector<16x324xf32>, vector<16x324xf32> -> vector<16x324xf32>
    %592 = arith.addf %587, %591 : vector<16x324xf32>
    %c0_575 = arith.constant 0 : index
    %c19_576 = arith.constant 19 : index
    %593 = vector.load %arg32[%c0_575, %c19_576] : memref<64x362xf32, #tpu.memory_space<vmem>>, vector<16x324xf32>
    %c4_577 = arith.constant 4 : index
    %c0_578 = arith.constant 0 : index
    %c0_579 = arith.constant 0 : index
    %594 = vector.load %arg25[%c4_577, %c0_578, %c0_579] : memref<9x16x16xf32, #tpu.memory_space<vmem>>, vector<1x16x16xf32>
    %595 = vector.shape_cast %594 : vector<1x16x16xf32> to vector<16x16xf32>
    %cst_580 = arith.constant dense<0.000000e+00> : vector<16x324xf32>
    %596 = tpu.matmul %595, %593, %cst_580 {dimension_numbers = #tpu.dot_dimension_numbers<[1], [0], [0], [1], [0, 0, 1, 1], [], []>} : vector<16x16xf32>, vector<16x324xf32>, vector<16x324xf32> -> vector<16x324xf32>
    %597 = arith.addf %592, %596 : vector<16x324xf32>
    %c0_581 = arith.constant 0 : index
    %c20_582 = arith.constant 20 : index
    %598 = vector.load %arg32[%c0_581, %c20_582] : memref<64x362xf32, #tpu.memory_space<vmem>>, vector<16x324xf32>
    %c5_583 = arith.constant 5 : index
    %c0_584 = arith.constant 0 : index
    %c0_585 = arith.constant 0 : index
    %599 = vector.load %arg25[%c5_583, %c0_584, %c0_585] : memref<9x16x16xf32, #tpu.memory_space<vmem>>, vector<1x16x16xf32>
    %600 = vector.shape_cast %599 : vector<1x16x16xf32> to vector<16x16xf32>
    %cst_586 = arith.constant dense<0.000000e+00> : vector<16x324xf32>
    %601 = tpu.matmul %600, %598, %cst_586 {dimension_numbers = #tpu.dot_dimension_numbers<[1], [0], [0], [1], [0, 0, 1, 1], [], []>} : vector<16x16xf32>, vector<16x324xf32>, vector<16x324xf32> -> vector<16x324xf32>
    %602 = arith.addf %597, %601 : vector<16x324xf32>
    %c0_587 = arith.constant 0 : index
    %c36_588 = arith.constant 36 : index
    %603 = vector.load %arg32[%c0_587, %c36_588] : memref<64x362xf32, #tpu.memory_space<vmem>>, vector<16x324xf32>
    %c6_589 = arith.constant 6 : index
    %c0_590 = arith.constant 0 : index
    %c0_591 = arith.constant 0 : index
    %604 = vector.load %arg25[%c6_589, %c0_590, %c0_591] : memref<9x16x16xf32, #tpu.memory_space<vmem>>, vector<1x16x16xf32>
    %605 = vector.shape_cast %604 : vector<1x16x16xf32> to vector<16x16xf32>
    %cst_592 = arith.constant dense<0.000000e+00> : vector<16x324xf32>
    %606 = tpu.matmul %605, %603, %cst_592 {dimension_numbers = #tpu.dot_dimension_numbers<[1], [0], [0], [1], [0, 0, 1, 1], [], []>} : vector<16x16xf32>, vector<16x324xf32>, vector<16x324xf32> -> vector<16x324xf32>
    %607 = arith.addf %602, %606 : vector<16x324xf32>
    %c0_593 = arith.constant 0 : index
    %c37_594 = arith.constant 37 : index
    %608 = vector.load %arg32[%c0_593, %c37_594] : memref<64x362xf32, #tpu.memory_space<vmem>>, vector<16x324xf32>
    %c7_595 = arith.constant 7 : index
    %c0_596 = arith.constant 0 : index
    %c0_597 = arith.constant 0 : index
    %609 = vector.load %arg25[%c7_595, %c0_596, %c0_597] : memref<9x16x16xf32, #tpu.memory_space<vmem>>, vector<1x16x16xf32>
    %610 = vector.shape_cast %609 : vector<1x16x16xf32> to vector<16x16xf32>
    %cst_598 = arith.constant dense<0.000000e+00> : vector<16x324xf32>
    %611 = tpu.matmul %610, %608, %cst_598 {dimension_numbers = #tpu.dot_dimension_numbers<[1], [0], [0], [1], [0, 0, 1, 1], [], []>} : vector<16x16xf32>, vector<16x324xf32>, vector<16x324xf32> -> vector<16x324xf32>
    %612 = arith.addf %607, %611 : vector<16x324xf32>
    %c0_599 = arith.constant 0 : index
    %c38_600 = arith.constant 38 : index
    %613 = vector.load %arg32[%c0_599, %c38_600] : memref<64x362xf32, #tpu.memory_space<vmem>>, vector<16x324xf32>
    %c8_601 = arith.constant 8 : index
    %c0_602 = arith.constant 0 : index
    %c0_603 = arith.constant 0 : index
    %614 = vector.load %arg25[%c8_601, %c0_602, %c0_603] : memref<9x16x16xf32, #tpu.memory_space<vmem>>, vector<1x16x16xf32>
    %615 = vector.shape_cast %614 : vector<1x16x16xf32> to vector<16x16xf32>
    %cst_604 = arith.constant dense<0.000000e+00> : vector<16x324xf32>
    %616 = tpu.matmul %615, %613, %cst_604 {dimension_numbers = #tpu.dot_dimension_numbers<[1], [0], [0], [1], [0, 0, 1, 1], [], []>} : vector<16x16xf32>, vector<16x324xf32>, vector<16x324xf32> -> vector<16x324xf32>
    %617 = arith.addf %612, %616 : vector<16x324xf32>
    %c0_605 = arith.constant 0 : index
    %c0_606 = arith.constant 0 : index
    %618 = vector.load %arg26[%c0_605, %c0_606] : memref<16x1xf32, #tpu.memory_space<vmem>>, vector<16x1xf32>
    %619 = vector.broadcast %618 : vector<16x1xf32> to vector<16x324xf32>
    %620 = arith.addf %617, %619 : vector<16x324xf32>
    %621 = vector.broadcast %2 : vector<1x324xf32> to vector<16x324xf32>
    %622 = arith.mulf %620, %621 : vector<16x324xf32>
    %cst_607 = arith.constant 0.000000e+00 : f32
    %623 = vector.broadcast %cst_607 : f32 to vector<16x324xf32>
    %624 = arith.maximumf %622, %623 : vector<16x324xf32>
    %cst_608 = arith.constant 0.000000e+00 : f32
    %625 = vector.broadcast %cst_608 : f32 to vector<16x19xf32>
    %c0_609 = arith.constant 0 : index
    %c0_610 = arith.constant 0 : index
    %626 = vector.load %arg32[%c0_609, %c0_610] : memref<64x362xf32, #tpu.memory_space<vmem>>, vector<16x19xf32>
    tpu.vector_store %arg32[%c0_609, %c0_610], %625 {strides = array<i32>} : memref<64x362xf32, #tpu.memory_space<vmem>>, vector<16x19xf32>,
    %c0_611 = arith.constant 0 : index
    %c19_612 = arith.constant 19 : index
    %627 = vector.load %arg32[%c0_611, %c19_612] : memref<64x362xf32, #tpu.memory_space<vmem>>, vector<16x324xf32>
    tpu.vector_store %arg32[%c0_611, %c19_612], %624 {strides = array<i32>} : memref<64x362xf32, #tpu.memory_space<vmem>>, vector<16x324xf32>,
    %cst_613 = arith.constant 0.000000e+00 : f32
    %628 = vector.broadcast %cst_613 : f32 to vector<16x19xf32>
    %c0_614 = arith.constant 0 : index
    %c343_615 = arith.constant 343 : index
    %629 = vector.load %arg32[%c0_614, %c343_615] : memref<64x362xf32, #tpu.memory_space<vmem>>, vector<16x19xf32>
    tpu.vector_store %arg32[%c0_614, %c343_615], %628 {strides = array<i32>} : memref<64x362xf32, #tpu.memory_space<vmem>>, vector<16x19xf32>,
    %c0_616 = arith.constant 0 : index
    %c0_617 = arith.constant 0 : index
    %630 = vector.load %arg32[%c0_616, %c0_617] : memref<64x362xf32, #tpu.memory_space<vmem>>, vector<16x324xf32>
    %c0_618 = arith.constant 0 : index
    %c0_619 = arith.constant 0 : index
    %c0_620 = arith.constant 0 : index
    %631 = vector.load %arg27[%c0_618, %c0_619, %c0_620] : memref<9x16x16xf32, #tpu.memory_space<vmem>>, vector<1x16x16xf32>
    %632 = vector.shape_cast %631 : vector<1x16x16xf32> to vector<16x16xf32>
    %cst_621 = arith.constant dense<0.000000e+00> : vector<16x324xf32>
    %633 = tpu.matmul %632, %630, %cst_621 {dimension_numbers = #tpu.dot_dimension_numbers<[1], [0], [0], [1], [0, 0, 1, 1], [], []>} : vector<16x16xf32>, vector<16x324xf32>, vector<16x324xf32> -> vector<16x324xf32>
    %c0_622 = arith.constant 0 : index
    %c1_623 = arith.constant 1 : index
    %634 = vector.load %arg32[%c0_622, %c1_623] : memref<64x362xf32, #tpu.memory_space<vmem>>, vector<16x324xf32>
    %c1_624 = arith.constant 1 : index
    %c0_625 = arith.constant 0 : index
    %c0_626 = arith.constant 0 : index
    %635 = vector.load %arg27[%c1_624, %c0_625, %c0_626] : memref<9x16x16xf32, #tpu.memory_space<vmem>>, vector<1x16x16xf32>
    %636 = vector.shape_cast %635 : vector<1x16x16xf32> to vector<16x16xf32>
    %cst_627 = arith.constant dense<0.000000e+00> : vector<16x324xf32>
    %637 = tpu.matmul %636, %634, %cst_627 {dimension_numbers = #tpu.dot_dimension_numbers<[1], [0], [0], [1], [0, 0, 1, 1], [], []>} : vector<16x16xf32>, vector<16x324xf32>, vector<16x324xf32> -> vector<16x324xf32>
    %638 = arith.addf %633, %637 : vector<16x324xf32>
    %c0_628 = arith.constant 0 : index
    %c2_629 = arith.constant 2 : index
    %639 = vector.load %arg32[%c0_628, %c2_629] : memref<64x362xf32, #tpu.memory_space<vmem>>, vector<16x324xf32>
    %c2_630 = arith.constant 2 : index
    %c0_631 = arith.constant 0 : index
    %c0_632 = arith.constant 0 : index
    %640 = vector.load %arg27[%c2_630, %c0_631, %c0_632] : memref<9x16x16xf32, #tpu.memory_space<vmem>>, vector<1x16x16xf32>
    %641 = vector.shape_cast %640 : vector<1x16x16xf32> to vector<16x16xf32>
    %cst_633 = arith.constant dense<0.000000e+00> : vector<16x324xf32>
    %642 = tpu.matmul %641, %639, %cst_633 {dimension_numbers = #tpu.dot_dimension_numbers<[1], [0], [0], [1], [0, 0, 1, 1], [], []>} : vector<16x16xf32>, vector<16x324xf32>, vector<16x324xf32> -> vector<16x324xf32>
    %643 = arith.addf %638, %642 : vector<16x324xf32>
    %c0_634 = arith.constant 0 : index
    %c18_635 = arith.constant 18 : index
    %644 = vector.load %arg32[%c0_634, %c18_635] : memref<64x362xf32, #tpu.memory_space<vmem>>, vector<16x324xf32>
    %c3_636 = arith.constant 3 : index
    %c0_637 = arith.constant 0 : index
    %c0_638 = arith.constant 0 : index
    %645 = vector.load %arg27[%c3_636, %c0_637, %c0_638] : memref<9x16x16xf32, #tpu.memory_space<vmem>>, vector<1x16x16xf32>
    %646 = vector.shape_cast %645 : vector<1x16x16xf32> to vector<16x16xf32>
    %cst_639 = arith.constant dense<0.000000e+00> : vector<16x324xf32>
    %647 = tpu.matmul %646, %644, %cst_639 {dimension_numbers = #tpu.dot_dimension_numbers<[1], [0], [0], [1], [0, 0, 1, 1], [], []>} : vector<16x16xf32>, vector<16x324xf32>, vector<16x324xf32> -> vector<16x324xf32>
    %648 = arith.addf %643, %647 : vector<16x324xf32>
    %c0_640 = arith.constant 0 : index
    %c19_641 = arith.constant 19 : index
    %649 = vector.load %arg32[%c0_640, %c19_641] : memref<64x362xf32, #tpu.memory_space<vmem>>, vector<16x324xf32>
    %c4_642 = arith.constant 4 : index
    %c0_643 = arith.constant 0 : index
    %c0_644 = arith.constant 0 : index
    %650 = vector.load %arg27[%c4_642, %c0_643, %c0_644] : memref<9x16x16xf32, #tpu.memory_space<vmem>>, vector<1x16x16xf32>
    %651 = vector.shape_cast %650 : vector<1x16x16xf32> to vector<16x16xf32>
    %cst_645 = arith.constant dense<0.000000e+00> : vector<16x324xf32>
    %652 = tpu.matmul %651, %649, %cst_645 {dimension_numbers = #tpu.dot_dimension_numbers<[1], [0], [0], [1], [0, 0, 1, 1], [], []>} : vector<16x16xf32>, vector<16x324xf32>, vector<16x324xf32> -> vector<16x324xf32>
    %653 = arith.addf %648, %652 : vector<16x324xf32>
    %c0_646 = arith.constant 0 : index
    %c20_647 = arith.constant 20 : index
    %654 = vector.load %arg32[%c0_646, %c20_647] : memref<64x362xf32, #tpu.memory_space<vmem>>, vector<16x324xf32>
    %c5_648 = arith.constant 5 : index
    %c0_649 = arith.constant 0 : index
    %c0_650 = arith.constant 0 : index
    %655 = vector.load %arg27[%c5_648, %c0_649, %c0_650] : memref<9x16x16xf32, #tpu.memory_space<vmem>>, vector<1x16x16xf32>
    %656 = vector.shape_cast %655 : vector<1x16x16xf32> to vector<16x16xf32>
    %cst_651 = arith.constant dense<0.000000e+00> : vector<16x324xf32>
    %657 = tpu.matmul %656, %654, %cst_651 {dimension_numbers = #tpu.dot_dimension_numbers<[1], [0], [0], [1], [0, 0, 1, 1], [], []>} : vector<16x16xf32>, vector<16x324xf32>, vector<16x324xf32> -> vector<16x324xf32>
    %658 = arith.addf %653, %657 : vector<16x324xf32>
    %c0_652 = arith.constant 0 : index
    %c36_653 = arith.constant 36 : index
    %659 = vector.load %arg32[%c0_652, %c36_653] : memref<64x362xf32, #tpu.memory_space<vmem>>, vector<16x324xf32>
    %c6_654 = arith.constant 6 : index
    %c0_655 = arith.constant 0 : index
    %c0_656 = arith.constant 0 : index
    %660 = vector.load %arg27[%c6_654, %c0_655, %c0_656] : memref<9x16x16xf32, #tpu.memory_space<vmem>>, vector<1x16x16xf32>
    %661 = vector.shape_cast %660 : vector<1x16x16xf32> to vector<16x16xf32>
    %cst_657 = arith.constant dense<0.000000e+00> : vector<16x324xf32>
    %662 = tpu.matmul %661, %659, %cst_657 {dimension_numbers = #tpu.dot_dimension_numbers<[1], [0], [0], [1], [0, 0, 1, 1], [], []>} : vector<16x16xf32>, vector<16x324xf32>, vector<16x324xf32> -> vector<16x324xf32>
    %663 = arith.addf %658, %662 : vector<16x324xf32>
    %c0_658 = arith.constant 0 : index
    %c37_659 = arith.constant 37 : index
    %664 = vector.load %arg32[%c0_658, %c37_659] : memref<64x362xf32, #tpu.memory_space<vmem>>, vector<16x324xf32>
    %c7_660 = arith.constant 7 : index
    %c0_661 = arith.constant 0 : index
    %c0_662 = arith.constant 0 : index
    %665 = vector.load %arg27[%c7_660, %c0_661, %c0_662] : memref<9x16x16xf32, #tpu.memory_space<vmem>>, vector<1x16x16xf32>
    %666 = vector.shape_cast %665 : vector<1x16x16xf32> to vector<16x16xf32>
    %cst_663 = arith.constant dense<0.000000e+00> : vector<16x324xf32>
    %667 = tpu.matmul %666, %664, %cst_663 {dimension_numbers = #tpu.dot_dimension_numbers<[1], [0], [0], [1], [0, 0, 1, 1], [], []>} : vector<16x16xf32>, vector<16x324xf32>, vector<16x324xf32> -> vector<16x324xf32>
    %668 = arith.addf %663, %667 : vector<16x324xf32>
    %c0_664 = arith.constant 0 : index
    %c38_665 = arith.constant 38 : index
    %669 = vector.load %arg32[%c0_664, %c38_665] : memref<64x362xf32, #tpu.memory_space<vmem>>, vector<16x324xf32>
    %c8_666 = arith.constant 8 : index
    %c0_667 = arith.constant 0 : index
    %c0_668 = arith.constant 0 : index
    %670 = vector.load %arg27[%c8_666, %c0_667, %c0_668] : memref<9x16x16xf32, #tpu.memory_space<vmem>>, vector<1x16x16xf32>
    %671 = vector.shape_cast %670 : vector<1x16x16xf32> to vector<16x16xf32>
    %cst_669 = arith.constant dense<0.000000e+00> : vector<16x324xf32>
    %672 = tpu.matmul %671, %669, %cst_669 {dimension_numbers = #tpu.dot_dimension_numbers<[1], [0], [0], [1], [0, 0, 1, 1], [], []>} : vector<16x16xf32>, vector<16x324xf32>, vector<16x324xf32> -> vector<16x324xf32>
    %673 = arith.addf %668, %672 : vector<16x324xf32>
    %c0_670 = arith.constant 0 : index
    %c0_671 = arith.constant 0 : index
    %674 = vector.load %arg28[%c0_670, %c0_671] : memref<16x1xf32, #tpu.memory_space<vmem>>, vector<16x1xf32>
    %675 = vector.broadcast %674 : vector<16x1xf32> to vector<16x324xf32>
    %676 = arith.addf %673, %675 : vector<16x324xf32>
    %677 = vector.broadcast %2 : vector<1x324xf32> to vector<16x324xf32>
    %678 = arith.mulf %676, %677 : vector<16x324xf32>
    %679 = arith.addf %566, %678 : vector<16x324xf32>
    %cst_672 = arith.constant 0.000000e+00 : f32
    %680 = vector.broadcast %cst_672 : f32 to vector<16x324xf32>
    %681 = arith.maximumf %679, %680 : vector<16x324xf32>
    %cst_673 = arith.constant 0.000000e+00 : f32
    %682 = vector.broadcast %cst_673 : f32 to vector<16x19xf32>
    %c0_674 = arith.constant 0 : index
    %c0_675 = arith.constant 0 : index
    %683 = vector.load %arg32[%c0_674, %c0_675] : memref<64x362xf32, #tpu.memory_space<vmem>>, vector<16x19xf32>
    tpu.vector_store %arg32[%c0_674, %c0_675], %682 {strides = array<i32>} : memref<64x362xf32, #tpu.memory_space<vmem>>, vector<16x19xf32>,
    %c0_676 = arith.constant 0 : index
    %c19_677 = arith.constant 19 : index
    %684 = vector.load %arg32[%c0_676, %c19_677] : memref<64x362xf32, #tpu.memory_space<vmem>>, vector<16x324xf32>
    tpu.vector_store %arg32[%c0_676, %c19_677], %681 {strides = array<i32>} : memref<64x362xf32, #tpu.memory_space<vmem>>, vector<16x324xf32>,
    %cst_678 = arith.constant 0.000000e+00 : f32
    %685 = vector.broadcast %cst_678 : f32 to vector<16x19xf32>
    %c0_679 = arith.constant 0 : index
    %c343_680 = arith.constant 343 : index
    %686 = vector.load %arg32[%c0_679, %c343_680] : memref<64x362xf32, #tpu.memory_space<vmem>>, vector<16x19xf32>
    tpu.vector_store %arg32[%c0_679, %c343_680], %685 {strides = array<i32>} : memref<64x362xf32, #tpu.memory_space<vmem>>, vector<16x19xf32>,
    %c0_681 = arith.constant 0 : index
    %c0_682 = arith.constant 0 : index
    %687 = vector.load %arg32[%c0_681, %c0_682] : memref<64x362xf32, #tpu.memory_space<vmem>>, vector<16x324xf32>
    %c0_683 = arith.constant 0 : index
    %c0_684 = arith.constant 0 : index
    %c0_685 = arith.constant 0 : index
    %688 = vector.load %arg29[%c0_683, %c0_684, %c0_685] : memref<9x1x16xf32, #tpu.memory_space<vmem>>, vector<1x1x16xf32>
    %689 = vector.shape_cast %688 : vector<1x1x16xf32> to vector<1x16xf32>
    %cst_686 = arith.constant dense<0.000000e+00> : vector<1x324xf32>
    %690 = tpu.matmul %689, %687, %cst_686 {dimension_numbers = #tpu.dot_dimension_numbers<[1], [0], [0], [1], [0, 0, 1, 1], [], []>} : vector<1x16xf32>, vector<16x324xf32>, vector<1x324xf32> -> vector<1x324xf32>
    %c0_687 = arith.constant 0 : index
    %c1_688 = arith.constant 1 : index
    %691 = vector.load %arg32[%c0_687, %c1_688] : memref<64x362xf32, #tpu.memory_space<vmem>>, vector<16x324xf32>
    %c1_689 = arith.constant 1 : index
    %c0_690 = arith.constant 0 : index
    %c0_691 = arith.constant 0 : index
    %692 = vector.load %arg29[%c1_689, %c0_690, %c0_691] : memref<9x1x16xf32, #tpu.memory_space<vmem>>, vector<1x1x16xf32>
    %693 = vector.shape_cast %692 : vector<1x1x16xf32> to vector<1x16xf32>
    %cst_692 = arith.constant dense<0.000000e+00> : vector<1x324xf32>
    %694 = tpu.matmul %693, %691, %cst_692 {dimension_numbers = #tpu.dot_dimension_numbers<[1], [0], [0], [1], [0, 0, 1, 1], [], []>} : vector<1x16xf32>, vector<16x324xf32>, vector<1x324xf32> -> vector<1x324xf32>
    %695 = arith.addf %690, %694 : vector<1x324xf32>
    %c0_693 = arith.constant 0 : index
    %c2_694 = arith.constant 2 : index
    %696 = vector.load %arg32[%c0_693, %c2_694] : memref<64x362xf32, #tpu.memory_space<vmem>>, vector<16x324xf32>
    %c2_695 = arith.constant 2 : index
    %c0_696 = arith.constant 0 : index
    %c0_697 = arith.constant 0 : index
    %697 = vector.load %arg29[%c2_695, %c0_696, %c0_697] : memref<9x1x16xf32, #tpu.memory_space<vmem>>, vector<1x1x16xf32>
    %698 = vector.shape_cast %697 : vector<1x1x16xf32> to vector<1x16xf32>
    %cst_698 = arith.constant dense<0.000000e+00> : vector<1x324xf32>
    %699 = tpu.matmul %698, %696, %cst_698 {dimension_numbers = #tpu.dot_dimension_numbers<[1], [0], [0], [1], [0, 0, 1, 1], [], []>} : vector<1x16xf32>, vector<16x324xf32>, vector<1x324xf32> -> vector<1x324xf32>
    %700 = arith.addf %695, %699 : vector<1x324xf32>
    %c0_699 = arith.constant 0 : index
    %c18_700 = arith.constant 18 : index
    %701 = vector.load %arg32[%c0_699, %c18_700] : memref<64x362xf32, #tpu.memory_space<vmem>>, vector<16x324xf32>
    %c3_701 = arith.constant 3 : index
    %c0_702 = arith.constant 0 : index
    %c0_703 = arith.constant 0 : index
    %702 = vector.load %arg29[%c3_701, %c0_702, %c0_703] : memref<9x1x16xf32, #tpu.memory_space<vmem>>, vector<1x1x16xf32>
    %703 = vector.shape_cast %702 : vector<1x1x16xf32> to vector<1x16xf32>
    %cst_704 = arith.constant dense<0.000000e+00> : vector<1x324xf32>
    %704 = tpu.matmul %703, %701, %cst_704 {dimension_numbers = #tpu.dot_dimension_numbers<[1], [0], [0], [1], [0, 0, 1, 1], [], []>} : vector<1x16xf32>, vector<16x324xf32>, vector<1x324xf32> -> vector<1x324xf32>
    %705 = arith.addf %700, %704 : vector<1x324xf32>
    %c0_705 = arith.constant 0 : index
    %c19_706 = arith.constant 19 : index
    %706 = vector.load %arg32[%c0_705, %c19_706] : memref<64x362xf32, #tpu.memory_space<vmem>>, vector<16x324xf32>
    %c4_707 = arith.constant 4 : index
    %c0_708 = arith.constant 0 : index
    %c0_709 = arith.constant 0 : index
    %707 = vector.load %arg29[%c4_707, %c0_708, %c0_709] : memref<9x1x16xf32, #tpu.memory_space<vmem>>, vector<1x1x16xf32>
    %708 = vector.shape_cast %707 : vector<1x1x16xf32> to vector<1x16xf32>
    %cst_710 = arith.constant dense<0.000000e+00> : vector<1x324xf32>
    %709 = tpu.matmul %708, %706, %cst_710 {dimension_numbers = #tpu.dot_dimension_numbers<[1], [0], [0], [1], [0, 0, 1, 1], [], []>} : vector<1x16xf32>, vector<16x324xf32>, vector<1x324xf32> -> vector<1x324xf32>
    %710 = arith.addf %705, %709 : vector<1x324xf32>
    %c0_711 = arith.constant 0 : index
    %c20_712 = arith.constant 20 : index
    %711 = vector.load %arg32[%c0_711, %c20_712] : memref<64x362xf32, #tpu.memory_space<vmem>>, vector<16x324xf32>
    %c5_713 = arith.constant 5 : index
    %c0_714 = arith.constant 0 : index
    %c0_715 = arith.constant 0 : index
    %712 = vector.load %arg29[%c5_713, %c0_714, %c0_715] : memref<9x1x16xf32, #tpu.memory_space<vmem>>, vector<1x1x16xf32>
    %713 = vector.shape_cast %712 : vector<1x1x16xf32> to vector<1x16xf32>
    %cst_716 = arith.constant dense<0.000000e+00> : vector<1x324xf32>
    %714 = tpu.matmul %713, %711, %cst_716 {dimension_numbers = #tpu.dot_dimension_numbers<[1], [0], [0], [1], [0, 0, 1, 1], [], []>} : vector<1x16xf32>, vector<16x324xf32>, vector<1x324xf32> -> vector<1x324xf32>
    %715 = arith.addf %710, %714 : vector<1x324xf32>
    %c0_717 = arith.constant 0 : index
    %c36_718 = arith.constant 36 : index
    %716 = vector.load %arg32[%c0_717, %c36_718] : memref<64x362xf32, #tpu.memory_space<vmem>>, vector<16x324xf32>
    %c6_719 = arith.constant 6 : index
    %c0_720 = arith.constant 0 : index
    %c0_721 = arith.constant 0 : index
    %717 = vector.load %arg29[%c6_719, %c0_720, %c0_721] : memref<9x1x16xf32, #tpu.memory_space<vmem>>, vector<1x1x16xf32>
    %718 = vector.shape_cast %717 : vector<1x1x16xf32> to vector<1x16xf32>
    %cst_722 = arith.constant dense<0.000000e+00> : vector<1x324xf32>
    %719 = tpu.matmul %718, %716, %cst_722 {dimension_numbers = #tpu.dot_dimension_numbers<[1], [0], [0], [1], [0, 0, 1, 1], [], []>} : vector<1x16xf32>, vector<16x324xf32>, vector<1x324xf32> -> vector<1x324xf32>
    %720 = arith.addf %715, %719 : vector<1x324xf32>
    %c0_723 = arith.constant 0 : index
    %c37_724 = arith.constant 37 : index
    %721 = vector.load %arg32[%c0_723, %c37_724] : memref<64x362xf32, #tpu.memory_space<vmem>>, vector<16x324xf32>
    %c7_725 = arith.constant 7 : index
    %c0_726 = arith.constant 0 : index
    %c0_727 = arith.constant 0 : index
    %722 = vector.load %arg29[%c7_725, %c0_726, %c0_727] : memref<9x1x16xf32, #tpu.memory_space<vmem>>, vector<1x1x16xf32>
    %723 = vector.shape_cast %722 : vector<1x1x16xf32> to vector<1x16xf32>
    %cst_728 = arith.constant dense<0.000000e+00> : vector<1x324xf32>
    %724 = tpu.matmul %723, %721, %cst_728 {dimension_numbers = #tpu.dot_dimension_numbers<[1], [0], [0], [1], [0, 0, 1, 1], [], []>} : vector<1x16xf32>, vector<16x324xf32>, vector<1x324xf32> -> vector<1x324xf32>
    %725 = arith.addf %720, %724 : vector<1x324xf32>
    %c0_729 = arith.constant 0 : index
    %c38_730 = arith.constant 38 : index
    %726 = vector.load %arg32[%c0_729, %c38_730] : memref<64x362xf32, #tpu.memory_space<vmem>>, vector<16x324xf32>
    %c8_731 = arith.constant 8 : index
    %c0_732 = arith.constant 0 : index
    %c0_733 = arith.constant 0 : index
    %727 = vector.load %arg29[%c8_731, %c0_732, %c0_733] : memref<9x1x16xf32, #tpu.memory_space<vmem>>, vector<1x1x16xf32>
    %728 = vector.shape_cast %727 : vector<1x1x16xf32> to vector<1x16xf32>
    %cst_734 = arith.constant dense<0.000000e+00> : vector<1x324xf32>
    %729 = tpu.matmul %728, %726, %cst_734 {dimension_numbers = #tpu.dot_dimension_numbers<[1], [0], [0], [1], [0, 0, 1, 1], [], []>} : vector<1x16xf32>, vector<16x324xf32>, vector<1x324xf32> -> vector<1x324xf32>
    %730 = arith.addf %725, %729 : vector<1x324xf32>
    %c0_735 = arith.constant 0 : index
    %c0_736 = arith.constant 0 : index
    %731 = vector.load %arg30[%c0_735, %c0_736] : memref<1x1xf32, #tpu.memory_space<vmem>>, vector<1x1xf32>
    %732 = vector.broadcast %731 : vector<1x1xf32> to vector<1x324xf32>
    %733 = arith.addf %730, %732 : vector<1x324xf32>
    %734 = arith.mulf %733, %2 : vector<1x324xf32>
    %735 = vector.extract_strided_slice %734 {offsets = [0, 18], sizes = [1, 18], strides = [1, 1]} : vector<1x324xf32> to vector<1x18xf32>
    %736 = vector.extract_strided_slice %734 {offsets = [0, 36], sizes = [1, 18], strides = [1, 1]} : vector<1x324xf32> to vector<1x18xf32>
    %737 = vector.extract_strided_slice %734 {offsets = [0, 54], sizes = [1, 18], strides = [1, 1]} : vector<1x324xf32> to vector<1x18xf32>
    %738 = vector.extract_strided_slice %734 {offsets = [0, 72], sizes = [1, 18], strides = [1, 1]} : vector<1x324xf32> to vector<1x18xf32>
    %739 = vector.extract_strided_slice %734 {offsets = [0, 90], sizes = [1, 18], strides = [1, 1]} : vector<1x324xf32> to vector<1x18xf32>
    %740 = vector.extract_strided_slice %734 {offsets = [0, 108], sizes = [1, 18], strides = [1, 1]} : vector<1x324xf32> to vector<1x18xf32>
    %741 = vector.extract_strided_slice %734 {offsets = [0, 126], sizes = [1, 18], strides = [1, 1]} : vector<1x324xf32> to vector<1x18xf32>
    %742 = vector.extract_strided_slice %734 {offsets = [0, 144], sizes = [1, 18], strides = [1, 1]} : vector<1x324xf32> to vector<1x18xf32>
    %743 = vector.extract_strided_slice %734 {offsets = [0, 162], sizes = [1, 18], strides = [1, 1]} : vector<1x324xf32> to vector<1x18xf32>
    %744 = vector.extract_strided_slice %734 {offsets = [0, 180], sizes = [1, 18], strides = [1, 1]} : vector<1x324xf32> to vector<1x18xf32>
    %745 = vector.extract_strided_slice %734 {offsets = [0, 198], sizes = [1, 18], strides = [1, 1]} : vector<1x324xf32> to vector<1x18xf32>
    %746 = vector.extract_strided_slice %734 {offsets = [0, 216], sizes = [1, 18], strides = [1, 1]} : vector<1x324xf32> to vector<1x18xf32>
    %747 = vector.extract_strided_slice %734 {offsets = [0, 234], sizes = [1, 18], strides = [1, 1]} : vector<1x324xf32> to vector<1x18xf32>
    %748 = vector.extract_strided_slice %734 {offsets = [0, 252], sizes = [1, 18], strides = [1, 1]} : vector<1x324xf32> to vector<1x18xf32>
    %749 = vector.extract_strided_slice %734 {offsets = [0, 270], sizes = [1, 18], strides = [1, 1]} : vector<1x324xf32> to vector<1x18xf32>
    %750 = vector.extract_strided_slice %734 {offsets = [0, 288], sizes = [1, 18], strides = [1, 1]} : vector<1x324xf32> to vector<1x18xf32>
    %751 = tpu.concatenate %735, %736, %737, %738, %739, %740, %741, %742, %743, %744, %745, %746, %747, %748, %749, %750 in 0 : vector<1x18xf32>, vector<1x18xf32>, vector<1x18xf32>, vector<1x18xf32>, vector<1x18xf32>, vector<1x18xf32>, vector<1x18xf32>, vector<1x18xf32>, vector<1x18xf32>, vector<1x18xf32>, vector<1x18xf32>, vector<1x18xf32>, vector<1x18xf32>, vector<1x18xf32>, vector<1x18xf32>, vector<1x18xf32> -> vector<16x18xf32>
    %c0_737 = arith.constant 0 : index
    %c0_738 = arith.constant 0 : index
    %752 = vector.load %arg9[%c0_737, %c0_738] : memref<18x64xf32, #tpu.memory_space<vmem>>, vector<18x64xf32>
    %cst_739 = arith.constant dense<0.000000e+00> : vector<16x64xf32>
    %753 = tpu.matmul %751, %752, %cst_739 {dimension_numbers = #tpu.dot_dimension_numbers<[1], [0], [0], [1], [0, 0, 1, 1], [], []>} : vector<16x18xf32>, vector<18x64xf32>, vector<16x64xf32> -> vector<16x64xf32>
    %c0_740 = arith.constant 0 : index
    %c0_741 = arith.constant 0 : index
    %754 = vector.load %arg10[%c0_740, %c0_741] : memref<64x16xf32, #tpu.memory_space<vmem>>, vector<64x16xf32>
    %cst_742 = arith.constant dense<0.000000e+00> : vector<64x64xf32>
    %755 = tpu.matmul %754, %753, %cst_742 {dimension_numbers = #tpu.dot_dimension_numbers<[1], [0], [0], [1], [0, 0, 1, 1], [], []>} : vector<64x16xf32>, vector<16x64xf32>, vector<64x64xf32> -> vector<64x64xf32>
    %c0_743 = arith.constant 0 : index
    %c0_744 = arith.constant 0 : index
    %c0_745 = arith.constant 0 : index
    %756 = vector.load %arg31[%c0_743, %c0_744, %c0_745] : memref<1x64x64xf32, #tpu.memory_space<vmem>>, vector<1x64x64xf32>
    %757 = vector.shape_cast %756 : vector<1x64x64xf32> to vector<64x64xf32>
    %758 = vector.shape_cast %755 : vector<64x64xf32> to vector<1x64x64xf32>
    tpu.vector_store %arg31[%c0_743, %c0_744, %c0_745], %758 {strides = array<i32>} : memref<1x64x64xf32, #tpu.memory_space<vmem>>, vector<1x64x64xf32>,
    return
  }
  func.func @transform_0(%arg0: i32) -> (i32, i32, i32) {
    %c0_i32 = arith.constant 0 : i32
    %c0_i32_0 = arith.constant 0 : i32
    %c0_i32_1 = arith.constant 0 : i32
    return %arg0, %c0_i32, %c0_i32_0 : i32, i32, i32
  }
  func.func @transform_1(%arg0: i32) -> (i32, i32, i32) {
    %c0_i32 = arith.constant 0 : i32
    %c0_i32_0 = arith.constant 0 : i32
    %c0_i32_1 = arith.constant 0 : i32
    return %arg0, %c0_i32, %c0_i32_0 : i32, i32, i32
  }
  func.func @transform_2(%arg0: i32) -> (i32, i32, i32) {
    %c0_i32 = arith.constant 0 : i32
    %c0_i32_0 = arith.constant 0 : i32
    %c0_i32_1 = arith.constant 0 : i32
    return %arg0, %c0_i32, %c0_i32_0 : i32, i32, i32
  }
  func.func @transform_3(%arg0: i32) -> (i32, i32) {
    %c0_i32 = arith.constant 0 : i32
    %c0_i32_0 = arith.constant 0 : i32
    %c0_i32_1 = arith.constant 0 : i32
    return %c0_i32, %c0_i32_0 : i32, i32
  }
  func.func @transform_4(%arg0: i32) -> (i32, i32) {
    %c0_i32 = arith.constant 0 : i32
    %c0_i32_0 = arith.constant 0 : i32
    %c0_i32_1 = arith.constant 0 : i32
    return %c0_i32, %c0_i32_0 : i32, i32
  }
  func.func @transform_5(%arg0: i32) -> (i32, i32) {
    %c0_i32 = arith.constant 0 : i32
    %c0_i32_0 = arith.constant 0 : i32
    %c0_i32_1 = arith.constant 0 : i32
    return %c0_i32, %c0_i32_0 : i32, i32
  }
  func.func @transform_6(%arg0: i32) -> (i32, i32) {
    %c0_i32 = arith.constant 0 : i32
    %c0_i32_0 = arith.constant 0 : i32
    %c0_i32_1 = arith.constant 0 : i32
    return %c0_i32, %c0_i32_0 : i32, i32
  }
  func.func @transform_7(%arg0: i32) -> (i32, i32) {
    %c0_i32 = arith.constant 0 : i32
    %c0_i32_0 = arith.constant 0 : i32
    %c0_i32_1 = arith.constant 0 : i32
    return %c0_i32, %c0_i32_0 : i32, i32
  }
  func.func @transform_8(%arg0: i32) -> (i32, i32) {
    %c0_i32 = arith.constant 0 : i32
    %c0_i32_0 = arith.constant 0 : i32
    %c0_i32_1 = arith.constant 0 : i32
    return %c0_i32, %c0_i32_0 : i32, i32
  }
  func.func @transform_9(%arg0: i32) -> (i32, i32) {
    %c0_i32 = arith.constant 0 : i32
    %c0_i32_0 = arith.constant 0 : i32
    %c0_i32_1 = arith.constant 0 : i32
    return %c0_i32, %c0_i32_0 : i32, i32
  }
  func.func @transform_10(%arg0: i32) -> (i32, i32, i32) {
    %c0_i32 = arith.constant 0 : i32
    %c0_i32_0 = arith.constant 0 : i32
    %c0_i32_1 = arith.constant 0 : i32
    %c0_i32_2 = arith.constant 0 : i32
    return %c0_i32, %c0_i32_0, %c0_i32_1 : i32, i32, i32
  }
  func.func @transform_11(%arg0: i32) -> (i32, i32) {
    %c0_i32 = arith.constant 0 : i32
    %c0_i32_0 = arith.constant 0 : i32
    %c0_i32_1 = arith.constant 0 : i32
    return %c0_i32, %c0_i32_0 : i32, i32
  }
  func.func @transform_12(%arg0: i32) -> (i32, i32, i32) {
    %c0_i32 = arith.constant 0 : i32
    %c0_i32_0 = arith.constant 0 : i32
    %c0_i32_1 = arith.constant 0 : i32
    %c0_i32_2 = arith.constant 0 : i32
    return %c0_i32, %c0_i32_0, %c0_i32_1 : i32, i32, i32
  }
  func.func @transform_13(%arg0: i32) -> (i32, i32) {
    %c0_i32 = arith.constant 0 : i32
    %c0_i32_0 = arith.constant 0 : i32
    %c0_i32_1 = arith.constant 0 : i32
    return %c0_i32, %c0_i32_0 : i32, i32
  }
  func.func @transform_14(%arg0: i32) -> (i32, i32, i32) {
    %c0_i32 = arith.constant 0 : i32
    %c0_i32_0 = arith.constant 0 : i32
    %c0_i32_1 = arith.constant 0 : i32
    %c0_i32_2 = arith.constant 0 : i32
    return %c0_i32, %c0_i32_0, %c0_i32_1 : i32, i32, i32
  }
  func.func @transform_15(%arg0: i32) -> (i32, i32) {
    %c0_i32 = arith.constant 0 : i32
    %c0_i32_0 = arith.constant 0 : i32
    %c0_i32_1 = arith.constant 0 : i32
    return %c0_i32, %c0_i32_0 : i32, i32
  }
  func.func @transform_16(%arg0: i32) -> (i32, i32, i32) {
    %c0_i32 = arith.constant 0 : i32
    %c0_i32_0 = arith.constant 0 : i32
    %c0_i32_1 = arith.constant 0 : i32
    %c0_i32_2 = arith.constant 0 : i32
    return %c0_i32, %c0_i32_0, %c0_i32_1 : i32, i32, i32
  }
  func.func @transform_17(%arg0: i32) -> (i32, i32) {
    %c0_i32 = arith.constant 0 : i32
    %c0_i32_0 = arith.constant 0 : i32
    %c0_i32_1 = arith.constant 0 : i32
    return %c0_i32, %c0_i32_0 : i32, i32
  }
  func.func @transform_18(%arg0: i32) -> (i32, i32, i32) {
    %c0_i32 = arith.constant 0 : i32
    %c0_i32_0 = arith.constant 0 : i32
    %c0_i32_1 = arith.constant 0 : i32
    %c0_i32_2 = arith.constant 0 : i32
    return %c0_i32, %c0_i32_0, %c0_i32_1 : i32, i32, i32
  }
  func.func @transform_19(%arg0: i32) -> (i32, i32) {
    %c0_i32 = arith.constant 0 : i32
    %c0_i32_0 = arith.constant 0 : i32
    %c0_i32_1 = arith.constant 0 : i32
    return %c0_i32, %c0_i32_0 : i32, i32
  }
  func.func @transform_20(%arg0: i32) -> (i32, i32, i32) {
    %c0_i32 = arith.constant 0 : i32
    %c0_i32_0 = arith.constant 0 : i32
    %c0_i32_1 = arith.constant 0 : i32
    %c0_i32_2 = arith.constant 0 : i32
    return %c0_i32, %c0_i32_0, %c0_i32_1 : i32, i32, i32
  }
  func.func @transform_21(%arg0: i32) -> (i32, i32) {
    %c0_i32 = arith.constant 0 : i32
    %c0_i32_0 = arith.constant 0 : i32
    %c0_i32_1 = arith.constant 0 : i32
    return %c0_i32, %c0_i32_0 : i32, i32
  }
  func.func @transform_22(%arg0: i32) -> (i32, i32, i32) {
    %c0_i32 = arith.constant 0 : i32
    %c0_i32_0 = arith.constant 0 : i32
    %c0_i32_1 = arith.constant 0 : i32
    %c0_i32_2 = arith.constant 0 : i32
    return %c0_i32, %c0_i32_0, %c0_i32_1 : i32, i32, i32
  }
  func.func @transform_23(%arg0: i32) -> (i32, i32) {
    %c0_i32 = arith.constant 0 : i32
    %c0_i32_0 = arith.constant 0 : i32
    %c0_i32_1 = arith.constant 0 : i32
    return %c0_i32, %c0_i32_0 : i32, i32
  }
  func.func @transform_24(%arg0: i32) -> (i32, i32, i32) {
    %c0_i32 = arith.constant 0 : i32
    %c0_i32_0 = arith.constant 0 : i32
    %c0_i32_1 = arith.constant 0 : i32
    %c0_i32_2 = arith.constant 0 : i32
    return %c0_i32, %c0_i32_0, %c0_i32_1 : i32, i32, i32
  }
  func.func @transform_25(%arg0: i32) -> (i32, i32) {
    %c0_i32 = arith.constant 0 : i32
    %c0_i32_0 = arith.constant 0 : i32
    %c0_i32_1 = arith.constant 0 : i32
    return %c0_i32, %c0_i32_0 : i32, i32
  }
  func.func @transform_26(%arg0: i32) -> (i32, i32, i32) {
    %c0_i32 = arith.constant 0 : i32
    %c0_i32_0 = arith.constant 0 : i32
    %c0_i32_1 = arith.constant 0 : i32
    %c0_i32_2 = arith.constant 0 : i32
    return %c0_i32, %c0_i32_0, %c0_i32_1 : i32, i32, i32
  }
  func.func @transform_27(%arg0: i32) -> (i32, i32) {
    %c0_i32 = arith.constant 0 : i32
    %c0_i32_0 = arith.constant 0 : i32
    %c0_i32_1 = arith.constant 0 : i32
    return %c0_i32, %c0_i32_0 : i32, i32
  }
  func.func @transform_28(%arg0: i32) -> (i32, i32, i32) {
    %c0_i32 = arith.constant 0 : i32
    %c0_i32_0 = arith.constant 0 : i32
    %c0_i32_1 = arith.constant 0 : i32
    %c0_i32_2 = arith.constant 0 : i32
    return %c0_i32, %c0_i32_0, %c0_i32_1 : i32, i32, i32
  }
  func.func @transform_29(%arg0: i32) -> (i32, i32) {
    %c0_i32 = arith.constant 0 : i32
    %c0_i32_0 = arith.constant 0 : i32
    %c0_i32_1 = arith.constant 0 : i32
    return %c0_i32, %c0_i32_0 : i32, i32
  }
  func.func @transform_30(%arg0: i32) -> (i32, i32, i32) {
    %c0_i32 = arith.constant 0 : i32
    %c0_i32_0 = arith.constant 0 : i32
    %c0_i32_1 = arith.constant 0 : i32
    return %arg0, %c0_i32, %c0_i32_0 : i32, i32, i32
  }
}

</mosaic_0001>

<bundles_post_ra>
// kernel: _lambda_.1
= control target key start
LH: loop header
LB: loop body
LE: loop exit
PB: predicated region body
PF: predicated region fallthrough
CT: control target
= control target key end

     0   :  { %s19679_s6 = smov 1   ;;  %s19680_s10 = smov 2   ;;  %s22017_s0 = inlined_call_operand.smem [shape: u32[31], index: -1, kind: input, shape index: {}] }
   0x1   :  { %s19780_s5 = sld [smem:[%s22017_s0]]   ;;  %s19681_s14 = smov 3  }
   0x2   :  { %s19785_s9 = sld [smem:[%s22017_s0 + %s19679_s6]]   ;;  %s19682_s18 = smov 4  }
   0x3   :  { %s19790_s13 = sld [smem:[%s22017_s0 + %s19680_s10]]   ;;  %s19683_s22 = smov 5  }
   0x4   :  { %s19795_s17 = sld [smem:[%s22017_s0 + %s19681_s14]]   ;;  %s19684_s26 = smov 6  }
   0x5   :  { %s19800_s21 = sld [smem:[%s22017_s0 + %s19682_s18]]   ;;  %s19685_s30 = smov 7  }
   0x6   :  { %s19805_s25 = sld [smem:[%s22017_s0 + %s19683_s22]]   ;;  %s19686_s4 = smov 8  }
   0x7   :  { %22098 = sst [smem:[#allocation8_spill]] %s19780_s5  ;;  %s19687_s10 = smov 9  }
   0x8   :  { %22099 = sst [smem:[#allocation9_spill]] %s19785_s9  ;;  %s19688_s15 = smov 10  }
   0x9   :  { %22100 = sst [smem:[#allocation10_spill]] %s19790_s13  ;;  %s19689_s20 = smov 11  }
   0xa   :  { %s19810_s29 = sld [smem:[%s22017_s0 + %s19684_s26]]   ;;  %s19690_s26 = smov 12  }
   0xb   :  { %s19815_s3 = sld [smem:[%s22017_s0 + %s19685_s30]]   ;;  %s19691_s1 = smov 13  }
   0xc   :  { %22101 = sst [smem:[#allocation11_spill]] %s19805_s25  ;;  %s19692_s7 = smov 14  }
   0xd   :  { %s19820_s8 = sld [smem:[%s22017_s0 + %s19686_s4]]   ;;  %s19694_s22 = smov 16  }
   0xe   :  { %s19825_s14 = sld [smem:[%s22017_s0 + %s19687_s10]]   ;;  %s19695_s28 = smov 17  }
   0xf   :  { %s19830_s19 = sld [smem:[%s22017_s0 + %s19688_s15]]   ;;  %s19693_s15 = smov 15  }
  0x10   :  { %s19835_s24 = sld [smem:[%s22017_s0 + %s19689_s20]]   ;;  %s19708_s10 = smov 30  }
  0x11   :  { %22102 = sst [smem:[#allocation12_spill]] %s19815_s3 }
  0x12   :  { %s19840_s30 = sld [smem:[%s22017_s0 + %s19690_s26]]  }
  0x13   :  { %22103 = sst [smem:[#allocation13_spill]] %s19820_s8 }
  0x14   :  { %22104 = sst [smem:[#allocation14_spill]] %s19825_s14 }
  0x15   :  { %22105 = sst [smem:[#allocation15_spill]] %s19830_s19 }
  0x16   :  { %22106 = sst [smem:[#allocation16_spill]] %s19835_s24 }
  0x17   :  { %s19845_s6 = sld [smem:[%s22017_s0 + %s19691_s1]]  }
  0x18   :  { %s19850_s12 = sld [smem:[%s22017_s0 + %s19692_s7]]   ;;  %s19696_s7 = smov 18  }
  0x19   :  { %s19855_s20 = sld [smem:[%s22017_s0 + %s19693_s15]]   ;;  %s19697_s15 = smov 19  }
  0x1a   :  { %s19860_s27 = sld [smem:[%s22017_s0 + %s19694_s22]]   ;;  %s19698_s22 = smov 20  }
  0x1b   :  { %s19865_s4 = sld [smem:[%s22017_s0 + %s19695_s28]]   ;;  %s19699_s28 = smov 21  }
  0x1c   :  { %s19870_s14 = sld [smem:[%s22017_s0 + %s19696_s7]]   ;;  %s19700_s7 = smov 22  }
  0x1d   :  { %22107 = sst [smem:[#allocation17_spill]] %s19845_s6 }
  0x1e   :  { %22108 = sst [smem:[#allocation18_spill]] %s19850_s12 }
  0x1f   :  { %s19875_s8 = sld [smem:[%s22017_s0 + %s19697_s15]]   ;;  %s19701_s15 = smov 23  }
  0x20   :  { %s19880_s25 = sld [smem:[%s22017_s0 + %s19698_s22]]   ;;  %s19702_s22 = smov 24  }
  0x21   :  { %22109 = sst [smem:[#allocation19_spill]] %s19865_s4 }
  0x22   :  { %22110 = sst [smem:[#allocation20_spill]] %s19870_s14 }
  0x23   :  { %s19885_s3 = sld [smem:[%s22017_s0 + %s19699_s28]]   ;;  %s19703_s28 = smov 25  }
  0x24   :  { %s19890_s13 = sld [smem:[%s22017_s0 + %s19700_s7]]   ;;  %s19704_s7 = smov 26  }
  0x25   :  { %22111 = sst [smem:[#allocation21_spill]] %s19875_s8 }
  0x26   :  { %22112 = sst [smem:[#allocation22_spill]] %s19880_s25 }
  0x27   :  { %s19895_s8 = sld [smem:[%s22017_s0 + %s19701_s15]]   ;;  %s19705_s15 = smov 27  }
  0x28   :  { %s19900_s25 = sld [smem:[%s22017_s0 + %s19702_s22]]   ;;  %s19706_s22 = smov 28  }
  0x29   :  { %22113 = sst [smem:[#allocation23_spill]] %s19885_s3 }
  0x2a   :  { %22114 = sst [smem:[#allocation24_spill]] %s19890_s13 }
  0x2b   :  { %s19905_s3 = sld [smem:[%s22017_s0 + %s19703_s28]]   ;;  %s19707_s28 = smov 29  }
  0x2c   :  { %s19910_s13 = sld [smem:[%s22017_s0 + %s19704_s7]]  }
  0x2d   :  { %22115 = sst [smem:[#allocation25_spill]] %s19895_s8 }
  0x2e   :  { %22116 = sst [smem:[#allocation26_spill]] %s19900_s25 }
  0x2f   :  { %s19915_s8 = sld [smem:[%s22017_s0 + %s19705_s15]]  }
  0x30   :  { %s19920_s25 = sld [smem:[%s22017_s0 + %s19706_s22]]  }
  0x31   :  { %22117 = sst [smem:[#allocation27_spill]] %s19905_s3 }
  0x32   :  { %22118 = sst [smem:[#allocation28_spill]] %s19910_s13 }
  0x33   :  { %s15419_s3 = sld [smem:[%s22017_s0 + %s19707_s28]]  }
  0x34   :  { %s19928_s13 = sld [smem:[%s22017_s0 + %s19708_s10]]  }
  0x39   :  { %v66_v0 = vstv %s15419_s3 }
  0x3a   :  { %67 = vst [vmem:[#allocation4] sm:$0x1] %v66_v0 }
  0x3b   :  { %68 = vsyncpa [#allocation6], 0 }
  0x3c   :  { %70 = vsyncpa [#allocation6 + $0x1], 0  ;;  %s19930_s15 = smov 0   ;;  %s19932_s16 = smov 0  }
  0x3d   :  { %s19934_s18 = smov 0   ;;  %s19936_s22 = smov 0  }
  0x3e LB: > { %s22119_s14 = sld [smem:[#allocation20_spill]]  ;;  %s22120_s12 = sld [smem:[#allocation18_spill]]  ;;  %s19669_s16 = sphi %s19932_s16, %s22211_s16   ;;  %s19665_s15 = sphi %s19930_s15, %s22210_s15   ;;  %s19677_s22 = sphi %s19936_s22, %s22213_s22   ;;  %s19673_s18 = sphi %s19934_s18, %s22212_s18  }
  0x3f   : > { %s22121_s6 = sld [smem:[#allocation17_spill]]  ;;  %s22122_s4 = sld [smem:[#allocation19_spill]] }
  0x40   : > { %s22123_s24 = sld [smem:[#allocation16_spill]]  ;;  %s22124_s19 = sld [smem:[#allocation15_spill]] }
  0x41   : > { %s19951_s0 = sadd.s32 4294967295, %s19677_s22   ;;  %s15422_s3 = sadd.s32 4294967294, %s19677_s22  }
  0x42   : > { %s19955_s23 = sadd.s32 1, %s19677_s22   ;;  %s728_s26 = sadd.s32 1, %s19673_s18 }
  0x43   : > { %s725_s28 = ssub.s32 %s19677_s22, %s19955_s23  ;;  %p738_p0 = scmp.ne.s32.totalorder %s19673_s18, %s19669_s16 }
  0x44   : > { %p726_p1 = scmp.eq.s32.totalorder %s725_s28, 0  ;;  %p739_p2 = scmp.eq.s32.totalorder %s19951_s0, 1 }
  0x45   : > { %p744_p3 = scmp.ne.s32.totalorder %s19669_s16, %s19665_s15  ;;  %p745_p4 = scmp.eq.s32.totalorder %s15422_s3, 1 }
  0x46   : > { %s19966_s1 = scalar_select %p726_p1, %s19673_s18, %s728_s26  }
  0x47   : > { %p19968_p5 = por %p739_p2, %p738_p0  ;;  %p19972_p6 = por %p745_p4, %p744_p3 }
  0x48   : > { %22125 = sst [smem:[#allocation29_spill]] %s19966_s1  ;;  %p15425_p7 = scmp.ge.s32.totalorder %s19677_s22, 1 }
  0x49   : > { %p868_p8 = scmp.lt.s32.totalorder %s19677_s22, 3 }
  0x4b   : > { %p869_p9 = pnand %p15425_p7, %p868_p8 }
  0x4c   : > { %s22128_s5 = sld [smem:[#allocation8_spill]] (!%p869_p9)  ;;  %p956_p10 = scmp.lt.s32.totalorder (!%p869_p9), %s19951_s0, 1  ;;  %vm990_vm0 = vcmask (!%p869_p9), 56320   ;;  %v19709_v1 = vmov (!%p869_p9), 0.0   ;;  %vm1031_vm1 = vcmask (!%p869_p9), 351288   ;;  %vm1040_vm2 = vcmask (!%p869_p9), 408920  }
  0x4d   : > { %872 = sbr.rel (%p869_p9) target bundleno = 5862 (0x16e6), region = 140  ;;  %991 = vst.msk [vmem:[#allocation2] sm:$0xff] (!%p869_p9), %vm990_vm0, %v19709_v1  ;;  %992 = vst.msk [vmem:[#allocation2 + $0x18] sm:$0xff] (!%p869_p9), %vm990_vm0, %v19709_v1  ;;  %s22033_s26 = smov (!%p869_p9), 7   ;;  %v15432_v35 = vld [vmem:[%s22124_s19 + $0x10] sm:$0xff] (!%p869_p9)  ;;  %vm22081_vm3 = vcmask (!%p869_p9), 523264  }
  0x4e   : > { %993 = vst.msk [vmem:[#allocation2 + $0x30] sm:$0xff] (!%p869_p9), %vm990_vm0, %v19709_v1  ;;  %994 = vst.msk [vmem:[#allocation2 + $0x48] sm:$0xff] (!%p869_p9), %vm990_vm0, %v19709_v1  ;;  %s22029_s28 = smov (!%p869_p9), 127   ;;  %16436 = vmatprep.mubr.msk.f32.mxu0 (!%p869_p9), %vm22081_vm3, %v15432_v35  ;;  %v15433_v59 = vld [vmem:[%s22124_s19 + $0x18] sm:$0xff] (!%p869_p9)  ;;  %v1057_v60 = vld [vmem:[%s22124_s19] sm:$0xff] (!%p869_p9)  ;;  %v19719_v63 = vmov (!%p869_p9), 0  }
  0x4f   : > { %995 = vst.msk [vmem:[#allocation2 + $0x60] sm:$0xff] (!%p869_p9), %vm990_vm0, %v19709_v1  ;;  %996 = vst.msk [vmem:[#allocation2 + $0x78] sm:$0xff] (!%p869_p9), %vm990_vm0, %v19709_v1  ;;  %v2028_v61 = vld [vmem:[%s22123_s24 + $0x8] sm:$0xff] (!%p869_p9)  ;;  %v2027_v62 = vld [vmem:[%s22123_s24] sm:$0xff] (!%p869_p9)  ;;  %18773 = vset.pattern.permute.xlu1 (!%p869_p9), %v19719_v63  ;;  %18772 = vset.pattern.permute.xlu0 (!%p869_p9), %v19719_v63  ;;  %vm2080_vm4 = vcmask (!%p869_p9), 130048   ;;  %s22136_s24 = smov (!%p869_p9), 127  }
  0x50   : > { %997 = vst.msk [vmem:[#allocation2 + $0x90] sm:$0xff] (!%p869_p9), %vm990_vm0, %v19709_v1  ;;  %998 = vst.msk [vmem:[#allocation2 + $0xa8] sm:$0xff] (!%p869_p9), %vm990_vm0, %v19709_v1  ;;  %v15439_v35 = vld [vmem:[%s22124_s19 + $0x28] sm:$0xff] (!%p869_p9)  ;;  %s22137_s1 = smov (!%p869_p9), 120   ;;  %s22138_s9 = sld [smem:[#allocation9_spill]] (!%p869_p9)  ;;  %vm4424_vm5 = vcmask (!%p869_p9), 89088  }
  0x51   : > { %vm4445_vm6 = vcmask (!%p869_p9), 908376   ;;  %vm4450_vm7 = vcmask (!%p869_p9), 999288   ;;  %vm22082_vm8 = vcmask (!%p869_p9), 1045504   ;;  %vm3961_vm9 = vcmask (!%p869_p9), 48128  }
  0x52   : > { %vm4480_vm10 = vcmask (!%p869_p9), 261120   ;;  %vm4294_vm11 = vcmask (!%p869_p9), 80896   ;;  %vm4305_vm12 = vcmask (!%p869_p9), 162896   ;;  %vm4322_vm13 = vcmask (!%p869_p9), 244896  }
  0x53   : > { %4296 = vst.msk [vmem:[#allocation3 + $0x18] sm:$0xff] (!%p869_p9), %vm4294_vm11, %v19709_v1  ;;  %4295 = vst.msk [vmem:[#allocation3] sm:$0xff] (!%p869_p9), %vm4294_vm11, %v19709_v1  ;;  %vm4339_vm14 = vcmask (!%p869_p9), 326896   ;;  %vm4354_vm15 = vcmask (!%p869_p9), 408896  }
  0x54   : > { %s19996_s7 = scalar_select %p956_p10, %s19951_s0, 1 }
  0x56   : > { %s15872_s11 = sshll.u32 %s19996_s7, 6 }
  0x57   : > { %s960_s3 = scalar_lea.vmem %s22128_s5, %s15872_s11  ;;  %s22031_s11 = smov 126  }
  0x58   : > { %v20000_v2 = vld [vmem:[%s960_s3] sm:$0xff]  ;;  %v20002_v3 = vld [vmem:[%s960_s3 + $0x10] sm:$0xff]  ;;  %v20004_v4 = vld [vmem:[%s960_s3 + $0x8] sm:$0xff]  ;;  %s22134_s5 = smov 116  }
  0x59   : > { %v982_v5 = vmax.f32 %v20000_v2, 0.0  ;;  %v984_v6 = vmax.f32 %v20002_v3, 0.0  ;;  %v20008_v7 = vld [vmem:[%s960_s3 + $0x18] sm:$0xff]  ;;  %v983_v8 = vmax.f32 %v20004_v4, 0.0  ;;  %v20014_v10 = vld [vmem:[%s960_s3 + $0x28] sm:$0xff]  ;;  %v20016_v11 = vld [vmem:[%s960_s3 + $0x20] sm:$0xff] }
  0x5a   : > { %v985_v9 = vmax.f32 %v20008_v7, 0.0  ;;  %v987_v12 = vmax.f32 %v20014_v10, 0.0  ;;  %v986_v13 = vmax.f32 %v20016_v11, 0.0  ;;  %v20022_v14 = vld [vmem:[%s960_s3 + $0x38] sm:$0xff]  ;;  %v20024_v15 = vld [vmem:[%s960_s3 + $0x30] sm:$0xff]  ;;  %s22035_s3 = smov 122  }
  0x5b   : > { %1007 = vrot.lane.b32.xlu0 %v982_v5, %s22033_s26  ;;  %1011 = vrot.lane.b32.xlu1 %v984_v6, %s22033_s26  ;;  %v989_v16 = vmax.f32 %v20022_v14, 0.0  ;;  %v988_v17 = vmax.f32 %v20024_v15, 0.0 }
  0x5f   : > { %1009 = vrot.lane.b32.xlu0 %v983_v8, %s22033_s26  ;;  %1013 = vrot.lane.b32.xlu1 %v985_v9, %s22033_s26 }
  0x63   : > { %1017 = vrot.lane.b32.xlu1 %v987_v12, %s22033_s26  ;;  %1015 = vrot.lane.b32.xlu0 %v986_v13, %s22033_s26 }
  0x67   : > { %1021 = vrot.lane.b32.xlu1 %v989_v16, %s22033_s26  ;;  %1019 = vrot.lane.b32.xlu0 %v988_v17, %s22033_s26  ;;  %s22041_s26 = smov 116   ;;  %v1058_v17 = vld [vmem:[%s22124_s19 + $0x8] sm:$0xff] }
  0xcd   : > { %v1008_v18 = vpop.permute.xlu0 %1007  ;;  %v1012_v19 = vpop.permute.xlu1 %1011 }
  0xce   : > { %1032 = vst.msk [vmem:[#allocation2] sm:$0xff] %vm1031_vm1, %v1008_v18  ;;  %1034 = vst.msk [vmem:[#allocation2 + $0x30] sm:$0xff] %vm1031_vm1, %v1012_v19 }
  0xcf   : > { %1041 = vst.msk [vmem:[#allocation2] sm:$0xff] %vm1040_vm2, %v19709_v1  ;;  %1043 = vst.msk [vmem:[#allocation2 + $0x30] sm:$0xff] %vm1040_vm2, %v19709_v1 }
  0xd1   : > { %v1010_v20 = vpop.permute.xlu0 %1009  ;;  %v1014_v21 = vpop.permute.xlu1 %1013 }
  0xd2   : > { %1033 = vst.msk [vmem:[#allocation2 + $0x18] sm:$0xff] %vm1031_vm1, %v1010_v20  ;;  %1035 = vst.msk [vmem:[#allocation2 + $0x48] sm:$0xff] %vm1031_vm1, %v1014_v21  ;;  %v15438_v21 = vld [vmem:[%s22124_s19 + $0x20] sm:$0xff] }
  0xd3   : > { %1042 = vst.msk [vmem:[#allocation2 + $0x18] sm:$0xff] %vm1040_vm2, %v19709_v1  ;;  %1044 = vst.msk [vmem:[#allocation2 + $0x48] sm:$0xff] %vm1040_vm2, %v19709_v1 }
  0xd5   : > { %v1018_v22 = vpop.permute.xlu1 %1017  ;;  %v1016_v23 = vpop.permute.xlu0 %1015 }
  0xd6   : > { %1037 = vst.msk [vmem:[#allocation2 + $0x78] sm:$0xff] %vm1031_vm1, %v1018_v22  ;;  %1036 = vst.msk [vmem:[#allocation2 + $0x60] sm:$0xff] %vm1031_vm1, %v1016_v23  ;;  %v1049_v24 = vld [vmem:[#allocation2] sm:$0xff]  ;;  %v1051_v25 = vld [vmem:[#allocation2 + $0x30] sm:$0xff] }
  0xd7   : > { %1046 = vst.msk [vmem:[#allocation2 + $0x78] sm:$0xff] %vm1040_vm2, %v19709_v1  ;;  %1045 = vst.msk [vmem:[#allocation2 + $0x60] sm:$0xff] %vm1040_vm2, %v19709_v1 }
  0xd8   : > { %2051 = vst.msk [vmem:[#allocation2] sm:$0xff] %vm990_vm0, %v19709_v1  ;;  %2905 = vst.msk [vmem:[#allocation2 + $0x30] sm:$0xff] %vm990_vm0, %v19709_v1 }
  0xd9   : > { %v1022_v26 = vpop.permute.xlu1 %1021  ;;  %v1020_v27 = vpop.permute.xlu0 %1019 }
  0xda   : > { %1039 = vst.msk [vmem:[#allocation2 + $0xa8] sm:$0xff] %vm1031_vm1, %v1022_v26  ;;  %v1050_v28 = vld [vmem:[#allocation2 + $0x18] sm:$0xff]  ;;  %1038 = vst.msk [vmem:[#allocation2 + $0x90] sm:$0xff] %vm1031_vm1, %v1020_v27  ;;  %v1052_v29 = vld [vmem:[#allocation2 + $0x48] sm:$0xff] }
  0xdb   : > { %1048 = vst.msk [vmem:[#allocation2 + $0xa8] sm:$0xff] %vm1040_vm2, %v19709_v1  ;;  %v18612_v30 = vpack.i.bf16 %v1050_v28, %v1049_v24  ;;  %1047 = vst.msk [vmem:[#allocation2 + $0x90] sm:$0xff] %vm1040_vm2, %v19709_v1  ;;  %v18617_v31 = vpack.i.bf16 %v1052_v29, %v1051_v25  ;;  %v20072_v36 = vpack.c.bf16 %v1050_v28, %v1049_v24 }
  0xdc   : > { %2052 = vst.msk [vmem:[#allocation2 + $0x18] sm:$0xff] %vm990_vm0, %v19709_v1  ;;  %2906 = vst.msk [vmem:[#allocation2 + $0x48] sm:$0xff] %vm990_vm0, %v19709_v1  ;;  %v20081_v40 = vpack.c.bf16 %v1052_v29, %v1051_v25 }
  0xdd   : > { %18613 = vrot.lane.b32.xlu0 %v18612_v30, %s22029_s28  ;;  %18618 = vrot.lane.b32.xlu1 %v18617_v31, %s22029_s28 }
  0xde   : > { %v1053_v32 = vld [vmem:[#allocation2 + $0x60] sm:$0xff]  ;;  %v1054_v33 = vld [vmem:[#allocation2 + $0x78] sm:$0xff] }
  0xdf   : > { %v18622_v34 = vpack.i.bf16 %v1054_v33, %v1053_v32  ;;  %2907 = vst.msk [vmem:[#allocation2 + $0x60] sm:$0xff] %vm990_vm0, %v19709_v1  ;;  %2908 = vst.msk [vmem:[#allocation2 + $0x78] sm:$0xff] %vm990_vm0, %v19709_v1  ;;  %v20085_v41 = vpack.c.bf16 %v1054_v33, %v1053_v32 }
  0xe1   : > { %18623 = vrot.lane.b32.xlu0 %v18622_v34, %s22029_s28 }
  0xe2   : > { %v1055_v37 = vld [vmem:[#allocation2 + $0x90] sm:$0xff]  ;;  %v1056_v38 = vld [vmem:[#allocation2 + $0xa8] sm:$0xff] }
  0xe3   : > { %v18627_v39 = vpack.i.bf16 %v1056_v38, %v1055_v37  ;;  %2909 = vst.msk [vmem:[#allocation2 + $0x90] sm:$0xff] %vm990_vm0, %v19709_v1  ;;  %2910 = vst.msk [vmem:[#allocation2 + $0xa8] sm:$0xff] %vm990_vm0, %v19709_v1  ;;  %v20089_v42 = vpack.c.bf16 %v1056_v38, %v1055_v37 }
  0xe5   : > { %18628 = vrot.lane.b32.xlu1 %v18627_v39, %s22029_s28  ;;  %18633 = vrot.lane.b32.xlu0 %v18612_v30, %s22031_s11  ;;  %s22037_s28 = smov 121  }
  0xe9   : > { %18638 = vrot.lane.b32.xlu1 %v18617_v31, %s22031_s11  ;;  %18643 = vrot.lane.b32.xlu0 %v18622_v34, %s22031_s11 }
  0xed   : > { %18648 = vrot.lane.b32.xlu1 %v18627_v39, %s22031_s11  ;;  %18653 = vrot.lane.b32.xlu0 %v18612_v30, %s22035_s3  ;;  %s22045_s11 = smov 120  }
  0xf1   : > { %18658 = vrot.lane.b32.xlu1 %v18617_v31, %s22035_s3  ;;  %18663 = vrot.lane.b32.xlu0 %v18622_v34, %s22035_s3 }
  0xf5   : > { %18668 = vrot.lane.b32.xlu1 %v18627_v39, %s22035_s3  ;;  %18673 = vrot.lane.b32.xlu0 %v18612_v30, %s22037_s28  ;;  %s22043_s3 = smov 115  }
  0xf9   : > { %18678 = vrot.lane.b32.xlu1 %v18617_v31, %s22037_s28  ;;  %18683 = vrot.lane.b32.xlu0 %v18622_v34, %s22037_s28 }
  0xfd   : > { %18688 = vrot.lane.b32.xlu1 %v18627_v39, %s22037_s28  ;;  %18693 = vrot.lane.b32.xlu0 %v18612_v30, %s22045_s11  ;;  %s22039_s28 = smov 114  }
 0x101   : > { %18698 = vrot.lane.b32.xlu1 %v18617_v31, %s22045_s11  ;;  %18703 = vrot.lane.b32.xlu0 %v18622_v34, %s22045_s11 }
 0x105   : > { %18708 = vrot.lane.b32.xlu1 %v18627_v39, %s22045_s11  ;;  %18713 = vrot.lane.b32.xlu0 %v18612_v30, %s22041_s26 }
 0x109   : > { %18718 = vrot.lane.b32.xlu1 %v18617_v31, %s22041_s26  ;;  %18723 = vrot.lane.b32.xlu0 %v18622_v34, %s22041_s26 }
 0x10d   : > { %18728 = vrot.lane.b32.xlu1 %v18627_v39, %s22041_s26  ;;  %18733 = vrot.lane.b32.xlu0 %v18612_v30, %s22043_s3  ;;  %s22131_s26 = smov 126  }
 0x111   : > { %18738 = vrot.lane.b32.xlu1 %v18617_v31, %s22043_s3  ;;  %18743 = vrot.lane.b32.xlu0 %v18622_v34, %s22043_s3 }
 0x115   : > { %18748 = vrot.lane.b32.xlu1 %v18627_v39, %s22043_s3  ;;  %18753 = vrot.lane.b32.xlu0 %v18612_v30, %s22039_s28  ;;  %s22132_s3 = smov 121  }
 0x119   : > { %18758 = vrot.lane.b32.xlu1 %v18617_v31, %s22039_s28  ;;  %18763 = vrot.lane.b32.xlu0 %v18622_v34, %s22039_s28 }
 0x11d   : > { %18768 = vrot.lane.b32.xlu1 %v18627_v39, %s22039_s28  ;;  %2031 = vperm.xlu0 %18772, %v2027_v62   ;;  %v15442_v39 = vld [vmem:[%s22124_s19 + $0x30] sm:$0xff]  ;;  %s22129_s28 = smov 7  }
 0x121   : > { %2036 = vperm.xlu1 %18773, %v2028_v61  }
 0x14f   : > { %v18614_v43 = vpop.permute.xlu0 %18613  ;;  %v18619_v44 = vpop.permute.xlu1 %18618 }
 0x150   : > { %v18621_v45 = vunpack.i.h.bf16 %v18619_v44  ;;  %v18620_v46 = vunpack.i.l.bf16 %v18619_v44  ;;  %v18616_v47 = vunpack.i.h.bf16 %v18614_v43  ;;  %v18615_v48 = vunpack.i.l.bf16 %v18614_v43 }
 0x152   : > { %v17421_v49 = vpack.c.bf16 %v18616_v47, %v18615_v48  ;;  %v17425_v50 = vpack.c.bf16 %v18621_v45, %v18620_v46 }
 0x153   : > { %v18624_v51 = vpop.permute.xlu0 %18623 }
 0x154   : > { %17422 = vmatprep.subr.bf16.mxu0 %v17421_v49  ;;  %v18626_v52 = vunpack.i.h.bf16 %v18624_v51  ;;  %v18625_v53 = vunpack.i.l.bf16 %v18624_v51 }
 0x155   : > { %17424 = vmatpush3.bf16.msra.mxu0 %v17421_v49 }
 0x156   : > { %17426 = vmatprep.subr.bf16.mxu0 %v17425_v50  ;;  %v17429_v54 = vpack.c.bf16 %v18626_v52, %v18625_v53  ;;  %v15443_v53 = vld [vmem:[%s22124_s19 + $0x38] sm:$0xff] }
 0x157   : > { %v18629_v55 = vpop.permute.xlu1 %18628  ;;  %v18634_v0 = vpop.permute.xlu0 %18633 }
 0x158   : > { %v18631_v56 = vunpack.i.h.bf16 %v18629_v55  ;;  %v18630_v57 = vunpack.i.l.bf16 %v18629_v55  ;;  %v18636_v5 = vunpack.i.h.bf16 %v18634_v0  ;;  %v18635_v6 = vunpack.i.l.bf16 %v18634_v0 }
 0x159   : > { %17428 = vmatpush3.bf16.msra.mxu0 %v17425_v50 }
 0x15a   : > { %17430 = vmatprep.subr.bf16.mxu0 %v17429_v54  ;;  %v17433_v58 = vpack.c.bf16 %v18631_v56, %v18630_v57  ;;  %v17453_v13 = vpack.c.bf16 %v18636_v5, %v18635_v6  ;;  %v15446_v57 = vld [vmem:[%s22124_s19 + $0x40] sm:$0xff] }
 0x15b   : > { %v18639_v8 = vpop.permute.xlu1 %18638  ;;  %v18644_v16 = vpop.permute.xlu0 %18643 }
 0x15c   : > { %v18641_v9 = vunpack.i.h.bf16 %v18639_v8  ;;  %v18640_v12 = vunpack.i.l.bf16 %v18639_v8  ;;  %v18646_v18 = vunpack.i.h.bf16 %v18644_v16  ;;  %v18645_v19 = vunpack.i.l.bf16 %v18644_v16  ;;  %v15447_v16 = vld [vmem:[%s22124_s19 + $0x48] sm:$0xff] }
 0x15d   : > { %17432 = vmatpush3.bf16.msra.mxu0 %v17429_v54 }
 0x15e   : > { %17434 = vmatprep.subr.bf16.mxu0 %v17433_v58  ;;  %v17457_v20 = vpack.c.bf16 %v18641_v9, %v18640_v12  ;;  %v17461_v25 = vpack.c.bf16 %v18646_v18, %v18645_v19 }
 0x15f   : > { %v18649_v22 = vpop.permute.xlu1 %18648  ;;  %v18654_v26 = vpop.permute.xlu0 %18653 }
 0x160   : > { %v18651_v23 = vunpack.i.h.bf16 %v18649_v22  ;;  %v18650_v24 = vunpack.i.l.bf16 %v18649_v22  ;;  %v18656_v27 = vunpack.i.h.bf16 %v18654_v26  ;;  %v18655_v28 = vunpack.i.l.bf16 %v18654_v26 }
 0x161   : > { %17436 = vmatpush3.bf16.msra.mxu0 %v17433_v58 }
 0x162   : > { %17438 = vmatprep.subr.bf16.mxu0 %v20072_v36  ;;  %v17465_v29 = vpack.c.bf16 %v18651_v23, %v18650_v24  ;;  %v17469_v33 = vpack.c.bf16 %v18656_v27, %v18655_v28 }
 0x163   : > { %v18659_v30 = vpop.permute.xlu1 %18658  ;;  %v18664_v34 = vpop.permute.xlu0 %18663 }
 0x164   : > { %16437 = vmatmul.mubr.msk.f32.vlgmr.msra.gmra.mrb[0].mxu0 %vm22081_vm3, %v15433_v59  ;;  %v18661_v31 = vunpack.i.h.bf16 %v18659_v30  ;;  %v18660_v32 = vunpack.i.l.bf16 %v18659_v30  ;;  %v18665_v37 = vunpack.i.l.bf16 %v18664_v34 }
 0x165   : > { %17440 = vmatpush3.bf16.msra.mxu0 %v20072_v36  ;;  %16455 = vmatprep.mubr.msk.f32.mxu0 %vm22081_vm3, %v1057_v60  ;;  %v18666_v36 = vunpack.i.h.bf16 %v18664_v34  ;;  %v15451_v34 = vld [vmem:[%s22124_s19 + $0x58] sm:$0xff] }
 0x166   : > { %17442 = vmatprep.subr.bf16.mxu0 %v20081_v40  ;;  %v17473_v38 = vpack.c.bf16 %v18661_v31, %v18660_v32 }
 0x167   : > { %v17477_v43 = vpack.c.bf16 %v18666_v36, %v18665_v37  ;;  %v18674_v44 = vpop.permute.xlu0 %18673 }
 0x168   : > { %v18676_v45 = vunpack.i.h.bf16 %v18674_v44  ;;  %v18675_v46 = vunpack.i.l.bf16 %v18674_v44 }
 0x169   : > { %17444 = vmatpush3.bf16.msra.mxu0 %v20081_v40  ;;  %v18669_v40 = vpop.permute.xlu1 %18668 }
 0x16a   : > { %17446 = vmatprep.subr.bf16.mxu0 %v20085_v41  ;;  %v17485_v51 = vpack.c.bf16 %v18676_v45, %v18675_v46 }
 0x16b   : > { %v18684_v52 = vpop.permute.xlu0 %18683 }
 0x16c   : > { %v18686_v54 = vunpack.i.h.bf16 %v18684_v52  ;;  %v18685_v55 = vunpack.i.l.bf16 %v18684_v52  ;;  %v15455_v52 = vld [vmem:[%s22124_s19 + $0x68] sm:$0xff] }
 0x16d   : > { %17448 = vmatpush3.bf16.msra.mxu0 %v20085_v41  ;;  %v18671_v41 = vunpack.i.h.bf16 %v18669_v40  ;;  %v18679_v48 = vpop.permute.xlu1 %18678 }
 0x16e   : > { %17450 = vmatprep.subr.bf16.mxu0 %v20089_v42  ;;  %v18681_v49 = vunpack.i.h.bf16 %v18679_v48  ;;  %v18680_v50 = vunpack.i.l.bf16 %v18679_v48  ;;  %v17493_v61 = vpack.c.bf16 %v18686_v54, %v18685_v55 }
 0x16f   : > { %v18694_v62 = vpop.permute.xlu0 %18693 }
 0x170   : > { %v17489_v56 = vpack.c.bf16 %v18681_v49, %v18680_v50  ;;  %v18696_v63 = vunpack.i.h.bf16 %v18694_v62  ;;  %v18695_v0 = vunpack.i.l.bf16 %v18694_v62 }
 0x171   : > { %17452 = vmatpush3.bf16.msra.mxu0 %v20089_v42  ;;  %v18670_v42 = vunpack.i.l.bf16 %v18669_v40  ;;  %v18689_v58 = vpop.permute.xlu1 %18688 }
 0x172   : > { %17454 = vmatprep.subr.bf16.mxu0 %v17453_v13  ;;  %v18691_v59 = vunpack.i.h.bf16 %v18689_v58  ;;  %v18690_v60 = vunpack.i.l.bf16 %v18689_v58  ;;  %v17501_v12 = vpack.c.bf16 %v18696_v63, %v18695_v0 }
 0x173   : > { %v17481_v47 = vpack.c.bf16 %v18671_v41, %v18670_v42 }
 0x174   : > { %16456 = vmatmul.mubr.msk.f32.vlgmr.msra.gmra.mrb[0].mxu0 %vm22081_vm3, %v1058_v17  ;;  %v17497_v5 = vpack.c.bf16 %v18691_v59, %v18690_v60 }
 0x175   : > { %17456 = vmatpush3.bf16.msra.mxu0 %v17453_v13  ;;  %16474 = vmatprep.mubr.msk.f32.mxu0 %vm22081_vm3, %v15438_v21  ;;  %v18699_v6 = vpop.permute.xlu1 %18698  ;;  %v18704_v13 = vpop.permute.xlu0 %18703 }
 0x176   : > { %17458 = vmatprep.subr.bf16.mxu0 %v17457_v20  ;;  %v18701_v8 = vunpack.i.h.bf16 %v18699_v6  ;;  %v18700_v9 = vunpack.i.l.bf16 %v18699_v6  ;;  %v18706_v17 = vunpack.i.h.bf16 %v18704_v13  ;;  %v18705_v18 = vunpack.i.l.bf16 %v18704_v13  ;;  %v15459_v13 = vld [vmem:[%s22124_s19 + $0x78] sm:$0xff] }
 0x178   : > { %v17505_v19 = vpack.c.bf16 %v18701_v8, %v18700_v9  ;;  %v17509_v24 = vpack.c.bf16 %v18706_v17, %v18705_v18 }
 0x179   : > { %17460 = vmatpush3.bf16.msra.mxu0 %v17457_v20  ;;  %v15450_v20 = vld [vmem:[%s22124_s19 + $0x50] sm:$0xff]  ;;  %v18709_v21 = vpop.permute.xlu1 %18708 }
 0x17a   : > { %17462 = vmatprep.subr.bf16.mxu0 %v17461_v25  ;;  %v18711_v22 = vunpack.i.h.bf16 %v18709_v21  ;;  %v18710_v23 = vunpack.i.l.bf16 %v18709_v21 }
 0x17c   : > { %v17513_v28 = vpack.c.bf16 %v18711_v22, %v18710_v23 }
 0x17d   : > { %17464 = vmatpush3.bf16.msra.mxu0 %v17461_v25  ;;  %v18714_v25 = vpop.permute.xlu0 %18713 }
 0x17e   : > { %17466 = vmatprep.subr.bf16.mxu0 %v17465_v29  ;;  %v18716_v26 = vunpack.i.h.bf16 %v18714_v25  ;;  %v18715_v27 = vunpack.i.l.bf16 %v18714_v25  ;;  %v15463_v25 = vld [vmem:[%s22124_s19 + $0x88] sm:$0xff] }
 0x180   : > { %v17517_v32 = vpack.c.bf16 %v18716_v26, %v18715_v27 }
 0x181   : > { %17468 = vmatpush3.bf16.msra.mxu0 %v17465_v29  ;;  %v18719_v29 = vpop.permute.xlu1 %18718 }
 0x182   : > { %17470 = vmatprep.subr.bf16.mxu0 %v17469_v33  ;;  %v18721_v30 = vunpack.i.h.bf16 %v18719_v29  ;;  %v18720_v31 = vunpack.i.l.bf16 %v18719_v29 }
 0x184   : > { %16475 = vmatmul.mubr.msk.f32.vlgmr.msra.gmra.mrb[0].mxu0 %vm22081_vm3, %v15439_v35  ;;  %v17521_v37 = vpack.c.bf16 %v18721_v30, %v18720_v31 }
 0x185   : > { %17472 = vmatpush3.bf16.msra.mxu0 %v17469_v33  ;;  %16493 = vmatprep.mubr.msk.f32.mxu0 %vm22081_vm3, %v15442_v39  ;;  %v18724_v33 = vpop.permute.xlu0 %18723  ;;  %v18729_v39 = vpop.permute.xlu1 %18728 }
 0x186   : > { %17474 = vmatprep.subr.bf16.mxu0 %v17473_v38  ;;  %v18726_v35 = vunpack.i.h.bf16 %v18724_v33  ;;  %v18725_v36 = vunpack.i.l.bf16 %v18724_v33  ;;  %v18731_v40 = vunpack.i.h.bf16 %v18729_v39  ;;  %v18730_v41 = vunpack.i.l.bf16 %v18729_v39 }
 0x188   : > { %v17525_v42 = vpack.c.bf16 %v18726_v35, %v18725_v36  ;;  %v17529_v46 = vpack.c.bf16 %v18731_v40, %v18730_v41 }
 0x189   : > { %17476 = vmatpush3.bf16.msra.mxu0 %v17473_v38  ;;  %v15454_v38 = vld [vmem:[%s22124_s19 + $0x60] sm:$0xff] }
 0x18a   : > { %17478 = vmatprep.subr.bf16.mxu0 %v17477_v43 }
 0x18d   : > { %17480 = vmatpush3.bf16.msra.mxu0 %v17477_v43  ;;  %v18734_v43 = vpop.permute.xlu0 %18733 }
 0x18e   : > { %17482 = vmatprep.subr.bf16.mxu0 %v17481_v47  ;;  %v18736_v44 = vunpack.i.h.bf16 %v18734_v43  ;;  %v18735_v45 = vunpack.i.l.bf16 %v18734_v43  ;;  %v2068_v43 = vld [vmem:[%s19840_s30 + $0x8] sm:$0xff] }
 0x190   : > { %v17533_v50 = vpack.c.bf16 %v18736_v44, %v18735_v45  ;;  %v15473_v45 = vld [vmem:[%s19840_s30 + $0x20] sm:$0xff] }
 0x191   : > { %17484 = vmatpush3.bf16.msra.mxu0 %v17481_v47  ;;  %v18739_v47 = vpop.permute.xlu1 %18738 }
 0x192   : > { %17486 = vmatprep.subr.bf16.mxu0 %v17485_v51  ;;  %v18741_v48 = vunpack.i.h.bf16 %v18739_v47  ;;  %v18740_v49 = vunpack.i.l.bf16 %v18739_v47 }
 0x194   : > { %16494 = vmatmul.mubr.msk.f32.vlgmr.msra.gmra.mrb[0].mxu0 %vm22081_vm3, %v15443_v53  ;;  %v17537_v55 = vpack.c.bf16 %v18741_v48, %v18740_v49 }
 0x195   : > { %17488 = vmatpush3.bf16.msra.mxu0 %v17485_v51  ;;  %16512 = vmatprep.mubr.msk.f32.mxu0 %vm22081_vm3, %v15446_v57  ;;  %v18744_v51 = vpop.permute.xlu0 %18743  ;;  %v18749_v57 = vpop.permute.xlu1 %18748 }
 0x196   : > { %17490 = vmatprep.subr.bf16.mxu0 %v17489_v56  ;;  %v18746_v53 = vunpack.i.h.bf16 %v18744_v51  ;;  %v18745_v54 = vunpack.i.l.bf16 %v18744_v51  ;;  %v18751_v58 = vunpack.i.h.bf16 %v18749_v57  ;;  %v18750_v59 = vunpack.i.l.bf16 %v18749_v57 }
 0x198   : > { %v17541_v60 = vpack.c.bf16 %v18746_v53, %v18745_v54  ;;  %v17545_v0 = vpack.c.bf16 %v18751_v58, %v18750_v59  ;;  %v15467_v59 = vld [vmem:[%s19840_s30 + $0x10] sm:$0xff] }
 0x199   : > { %17492 = vmatpush3.bf16.msra.mxu0 %v17489_v56  ;;  %v15458_v56 = vld [vmem:[%s22124_s19 + $0x70] sm:$0xff] }
 0x19a   : > { %17494 = vmatprep.subr.bf16.mxu0 %v17493_v61 }
 0x19d   : > { %17496 = vmatpush3.bf16.msra.mxu0 %v17493_v61  ;;  %v18754_v61 = vpop.permute.xlu0 %18753 }
 0x19e   : > { %17498 = vmatprep.subr.bf16.mxu0 %v17497_v5  ;;  %v18756_v62 = vunpack.i.h.bf16 %v18754_v61  ;;  %v18755_v63 = vunpack.i.l.bf16 %v18754_v61  ;;  %v3936_v61 = vld [vmem:[%s19855_s20] sm:$0xff] }
 0x1a0   : > { %v17549_v9 = vpack.c.bf16 %v18756_v62, %v18755_v63  ;;  %v2887_v62 = vld [vmem:[%s22121_s6] sm:$0xff]  ;;  %v3937_v63 = vld [vmem:[%s19855_s20 + $0x8] sm:$0xff] }
 0x1a1   : > { %17500 = vmatpush3.bf16.msra.mxu0 %v17497_v5  ;;  %v18759_v5 = vpop.permute.xlu1 %18758 }
 0x1a2   : > { %17502 = vmatprep.subr.bf16.mxu0 %v17501_v12  ;;  %v18761_v6 = vunpack.i.h.bf16 %v18759_v5  ;;  %v18760_v8 = vunpack.i.l.bf16 %v18759_v5 }
 0x1a4   : > { %16513 = vmatmul.mubr.msk.f32.vlgmr.msra.gmra.mrb[0].mxu0 %vm22081_vm3, %v15447_v16  ;;  %v17553_v18 = vpack.c.bf16 %v18761_v6, %v18760_v8 }
 0x1a5   : > { %17504 = vmatpush3.bf16.msra.mxu0 %v17501_v12  ;;  %16531 = vmatprep.mubr.msk.f32.mxu0 %vm22081_vm3, %v15450_v20  ;;  %v18764_v12 = vpop.permute.xlu0 %18763  ;;  %v18769_v20 = vpop.permute.xlu1 %18768 }
 0x1a6   : > { %17506 = vmatprep.subr.bf16.mxu0 %v17505_v19  ;;  %v18766_v16 = vunpack.i.h.bf16 %v18764_v12  ;;  %v18765_v17 = vunpack.i.l.bf16 %v18764_v12  ;;  %v18771_v21 = vunpack.i.h.bf16 %v18769_v20  ;;  %v18770_v22 = vunpack.i.l.bf16 %v18769_v20 }
 0x1a8   : > { %v17557_v23 = vpack.c.bf16 %v18766_v16, %v18765_v17 }
 0x1a9   : > { %17508 = vmatpush3.bf16.msra.mxu0 %v17505_v19  ;;  %v15462_v19 = vld [vmem:[%s22124_s19 + $0x80] sm:$0xff]  ;;  %v2037_v26 = vpop.permute.xlu1 %2036  ;;  %v2032_v27 = vpop.permute.xlu0 %2031  ;;  %s22135_s19 = smov 114  }
 0x1aa   : > { %17510 = vmatprep.subr.bf16.mxu0 %v17509_v24 }
 0x1ad   : > { %17512 = vmatpush3.bf16.msra.mxu0 %v17509_v24  ;;  %v17561_v24 = vpack.c.bf16 %v18771_v21, %v18770_v22  ;;  %v15474_v21 = vld [vmem:[%s19840_s30 + $0x28] sm:$0xff]  ;;  %v15477_v22 = vld [vmem:[%s19840_s30 + $0x30] sm:$0xff] }
 0x1ae   : > { %17514 = vmatprep.subr.bf16.mxu0 %v17513_v28 }
 0x1b1   : > { %17516 = vmatpush3.bf16.msra.mxu0 %v17513_v28  ;;  %v15466_v28 = vld [vmem:[%s19795_s17] ss:$0 sm:$0xff] }
 0x1b2   : > { %17518 = vmatprep.subr.bf16.mxu0 %v17517_v32 }
 0x1b4   : > { %16532 = vmatmul.mubr.msk.f32.vlgmr.msra.gmra.mrb[0].mxu0 %vm22081_vm3, %v15451_v34 }
 0x1b5   : > { %17520 = vmatpush3.bf16.msra.mxu0 %v17517_v32  ;;  %16550 = vmatprep.mubr.msk.f32.mxu0 %vm22081_vm3, %v15454_v38 }
 0x1b6   : > { %17522 = vmatprep.subr.bf16.mxu0 %v17521_v37 }
 0x1b9   : > { %17524 = vmatpush3.bf16.msra.mxu0 %v17521_v37 }
 0x1ba   : > { %17526 = vmatprep.subr.bf16.mxu0 %v17525_v42 }
 0x1bd   : > { %17528 = vmatpush3.bf16.msra.mxu0 %v17525_v42 }
 0x1be   : > { %17530 = vmatprep.subr.bf16.mxu0 %v17529_v46 }
 0x1c1   : > { %17532 = vmatpush3.bf16.msra.mxu0 %v17529_v46 }
 0x1c2   : > { %17534 = vmatprep.subr.bf16.mxu0 %v17533_v50 }
 0x1c4   : > { %16551 = vmatmul.mubr.msk.f32.vlgmr.msra.gmra.mrb[0].mxu0 %vm22081_vm3, %v15455_v52 }
 0x1c5   : > { %17536 = vmatpush3.bf16.msra.mxu0 %v17533_v50  ;;  %16569 = vmatprep.mubr.msk.f32.mxu0 %vm22081_vm3, %v15458_v56 }
 0x1c6   : > { %17538 = vmatprep.subr.bf16.mxu0 %v17537_v55 }
 0x1c9   : > { %17540 = vmatpush3.bf16.msra.mxu0 %v17537_v55 }
 0x1ca   : > { %17542 = vmatprep.subr.bf16.mxu0 %v17541_v60 }
 0x1cd   : > { %17544 = vmatpush3.bf16.msra.mxu0 %v17541_v60 }
 0x1ce   : > { %17546 = vmatprep.subr.bf16.mxu0 %v17545_v0 }
 0x1d1   : > { %17548 = vmatpush3.bf16.msra.mxu0 %v17545_v0  ;;  %v2888_v0 = vld [vmem:[%s22121_s6 + $0x8] sm:$0xff]  ;;  %s22144_s6 = smov 106  }
 0x1d2   : > { %17550 = vmatprep.subr.bf16.mxu0 %v17549_v9 }
 0x1d4   : > { %16570 = vmatmul.mubr.msk.f32.vlgmr.msra.gmra.mrb[0].mxu0 %vm22081_vm3, %v15459_v13 }
 0x1d5   : > { %17552 = vmatpush3.bf16.msra.mxu0 %v17549_v9  ;;  %16588 = vmatprep.mubr.msk.f32.mxu0 %vm22081_vm3, %v15462_v19 }
 0x1d6   : > { %17554 = vmatprep.subr.bf16.mxu0 %v17553_v18 }
 0x1d9   : > { %17556 = vmatpush3.bf16.msra.mxu0 %v17553_v18 }
 0x1da   : > { %17558 = vmatprep.subr.bf16.mxu0 %v17557_v23 }
 0x1dd   : > { %17560 = vmatpush3.bf16.msra.mxu0 %v17557_v23 }
 0x1de   : > { %17562 = vmatprep.subr.bf16.mxu0 %v17561_v24 }
 0x1e1   : > { %17564 = vmatpush3.bf16.msra.mxu0 %v17561_v24 }
 0x1e4   : > { %16589 = vmatmul.mubr.msk.f32.vlgmr.msra.gmra.mrb[0].mxu0 %vm22081_vm3, %v15463_v25 }
 0x1e5   : > { %16595 = vmatprep.mubr.msk.f32.mxu0 %vm2080_vm4, %v15467_v59 }
 0x2b7   : > { %v16590_v29 = vpop.f32.mrb[0].mxu0 }
 0x2b8   : > { %v2040_v30 = vadd.f32 %v16590_v29, %v2037_v26  ;;  %v2016_v31 = vpop.f32.mrb[1].mxu0  ;;  %v15478_v29 = vld [vmem:[%s19840_s30 + $0x38] sm:$0xff] }
 0x2b9   : > { %v2039_v32 = vadd.f32 %v2032_v27, %v2016_v31 }
 0x2ba   : > { %v2048_v33 = vmul.f32 %v15466_v28, %v2040_v30  ;;  %v15481_v30 = vld [vmem:[%s19840_s30 + $0x40] sm:$0xff] }
 0x2bb   : > { %v2047_v34 = vmul.f32 %v15466_v28, %v2039_v32 }
 0x2bc   : > { %v2050_v35 = vmax.f32 %v2048_v33, 0.0 }
 0x2bd   : > { %v2049_v36 = vmax.f32 %v2047_v34, 0.0 }
 0x2be   : > { %2057 = vrot.lane.b32.xlu0 %v2050_v35, %s22129_s28 }
 0x2bf   : > { %2055 = vrot.lane.b32.xlu1 %v2049_v36, %s22129_s28  ;;  %v15482_v36 = vld [vmem:[%s19840_s30 + $0x48] sm:$0xff] }
 0x2c2   : > { %2921 = vrot.lane.b32.xlu0 %v20004_v4, %s22129_s28  ;;  %v2067_v4 = vld [vmem:[%s19840_s30] sm:$0xff] }
 0x2c3   : > { %2919 = vrot.lane.b32.xlu1 %v20000_v2, %s22129_s28  ;;  %16602 = vmatprep.mubr.msk.f32.mxu1 %vm2080_vm4, %v2067_v4  ;;  %v15485_v4 = vld [vmem:[%s19840_s30 + $0x50] sm:$0xff] }
 0x2c6   : > { %2925 = vrot.lane.b32.xlu0 %v20008_v7, %s22129_s28 }
 0x2c7   : > { %2923 = vrot.lane.b32.xlu1 %v20002_v3, %s22129_s28 }
 0x2ca   : > { %2929 = vrot.lane.b32.xlu0 %v20014_v10, %s22129_s28 }
 0x2cb   : > { %2927 = vrot.lane.b32.xlu1 %v20016_v11, %s22129_s28 }
 0x2ce   : > { %2933 = vrot.lane.b32.xlu0 %v20022_v14, %s22129_s28 }
 0x2cf   : > { %2931 = vrot.lane.b32.xlu1 %v20024_v15, %s22129_s28  ;;  %s22130_s28 = smov 122  }
 0x330   : > { %v2058_v2 = vpop.permute.xlu0 %2057 }
 0x331   : > { %2062 = vst.msk [vmem:[#allocation2 + $0x18] sm:$0xff] %vm1031_vm1, %v2058_v2  ;;  %v2056_v3 = vpop.permute.xlu1 %2055 }
 0x332   : > { %2064 = vst.msk [vmem:[#allocation2 + $0x18] sm:$0xff] %vm1040_vm2, %v19709_v1 }
 0x333   : > { %2061 = vst.msk [vmem:[#allocation2] sm:$0xff] %vm1031_vm1, %v2056_v3 }
 0x334   : > { %2063 = vst.msk [vmem:[#allocation2] sm:$0xff] %vm1040_vm2, %v19709_v1  ;;  %v2922_v7 = vpop.permute.xlu0 %2921 }
 0x335   : > { %v2920_v10 = vpop.permute.xlu1 %2919 }
 0x338   : > { %v2926_v11 = vpop.permute.xlu0 %2925 }
 0x339   : > { %v2066_v14 = vld [vmem:[#allocation2 + $0x18] sm:$0xff]  ;;  %2946 = vst.msk [vmem:[#allocation2 + $0x48] sm:$0xff] %vm1031_vm1, %v2926_v11  ;;  %v2924_v15 = vpop.permute.xlu1 %2923 }
 0x33a   : > { %2904 = vst.msk [vmem:[#allocation2 + $0x18] sm:$0xff] %vm990_vm0, %v19709_v1 }
 0x33b   : > { %v2065_v37 = vld [vmem:[#allocation2] sm:$0xff]  ;;  %2954 = vst.msk [vmem:[#allocation2 + $0x48] sm:$0xff] %vm1040_vm2, %v19709_v1 }
 0x33c   : > { %2945 = vst.msk [vmem:[#allocation2 + $0x30] sm:$0xff] %vm1031_vm1, %v2924_v15  ;;  %2944 = vst.msk [vmem:[#allocation2 + $0x18] sm:$0xff] %vm1031_vm1, %v2922_v7  ;;  %v20194_v38 = vpack.i.bf16 %v2066_v14, %v2065_v37  ;;  %v2930_v39 = vpop.permute.xlu0 %2929  ;;  %v17569_v41 = vpack.c.bf16 %v2066_v14, %v2065_v37  ;;  %v15486_v15 = vld [vmem:[%s19840_s30 + $0x58] sm:$0xff]  ;;  %v15489_v37 = vld [vmem:[%s19840_s30 + $0x60] sm:$0xff] }
 0x33d   : > { %2903 = vst.msk [vmem:[#allocation2] sm:$0xff] %vm990_vm0, %v19709_v1  ;;  %v2928_v40 = vpop.permute.xlu1 %2927  ;;  %vm4369_vm0 = vcmask 490896  }
 0x33e   : > { %2953 = vst.msk [vmem:[#allocation2 + $0x30] sm:$0xff] %vm1040_vm2, %v19709_v1  ;;  %2952 = vst.msk [vmem:[#allocation2 + $0x18] sm:$0xff] %vm1040_vm2, %v19709_v1  ;;  %18780 = vrot.lane.b32.xlu0 %v20194_v38, %s22130_s28  ;;  %18775 = vrot.lane.b32.xlu1 %v20194_v38, %s22131_s26 }
 0x33f   : > { %2943 = vst.msk [vmem:[#allocation2] sm:$0xff] %vm1031_vm1, %v2920_v10  ;;  %2948 = vst.msk [vmem:[#allocation2 + $0x78] sm:$0xff] %vm1031_vm1, %v2930_v39  ;;  %17570 = vmatprep.subr.bf16.mxu1 %v17569_v41 }
 0x340   : > { %2951 = vst.msk [vmem:[#allocation2] sm:$0xff] %vm1040_vm2, %v19709_v1  ;;  %2956 = vst.msk [vmem:[#allocation2 + $0x78] sm:$0xff] %vm1040_vm2, %v19709_v1  ;;  %v2934_v42 = vpop.permute.xlu0 %2933  ;;  %17572 = vmatpush3.bf16.msra.mxu1 %v17569_v41 }
 0x341   : > { %2947 = vst.msk [vmem:[#allocation2 + $0x60] sm:$0xff] %vm1031_vm1, %v2928_v40  ;;  %2950 = vst.msk [vmem:[#allocation2 + $0xa8] sm:$0xff] %vm1031_vm1, %v2934_v42  ;;  %v2932_v44 = vpop.permute.xlu1 %2931 }
 0x342   : > { %2955 = vst.msk [vmem:[#allocation2 + $0x60] sm:$0xff] %vm1040_vm2, %v19709_v1  ;;  %18790 = vrot.lane.b32.xlu0 %v20194_v38, %s22045_s11  ;;  %18785 = vrot.lane.b32.xlu1 %v20194_v38, %s22132_s3  ;;  %2958 = vst.msk [vmem:[#allocation2 + $0xa8] sm:$0xff] %vm1040_vm2, %v19709_v1  ;;  %s22133_s11 = smov 115   ;;  %v20237_v49 = vld [vmem:[#allocation2 + $0x48] sm:$0xff] }
 0x343   : > { %2949 = vst.msk [vmem:[#allocation2 + $0x90] sm:$0xff] %vm1031_vm1, %v2932_v44  ;;  %16603 = vmatmul.mubr.msk.f32.vlgmr.msra.gmra.mrb[0].mxu1 %vm2080_vm4, %v2068_v43  ;;  %v15490_v43 = vld [vmem:[%s19840_s30 + $0x68] sm:$0xff]  ;;  %v15493_v44 = vld [vmem:[%s19840_s30 + $0x70] sm:$0xff]  ;;  %vm4384_vm1 = vcmask 572896  }
 0x344   : > { %2957 = vst.msk [vmem:[#allocation2 + $0x90] sm:$0xff] %vm1040_vm2, %v19709_v1  ;;  %16609 = vmatprep.mubr.msk.f32.mxu1 %vm2080_vm4, %v15473_v45  ;;  %vm4399_vm2 = vcmask 654896  }
 0x345   : > { %v20225_v46 = vld [vmem:[#allocation2 + $0x18] sm:$0xff]  ;;  %v20239_v50 = vld [vmem:[#allocation2 + $0x30] sm:$0xff]  ;;  %4428 = vst.msk [vmem:[#allocation2 + $0x48] sm:$0xff] %vm4424_vm5, %v19709_v1 }
 0x346   : > { %18800 = vrot.lane.b32.xlu0 %v20194_v38, %s22133_s11  ;;  %18795 = vrot.lane.b32.xlu1 %v20194_v38, %s22134_s5  ;;  %v18814_v53 = vpack.i.bf16 %v20237_v49, %v20239_v50  ;;  %4426 = vst.msk [vmem:[#allocation2 + $0x18] sm:$0xff] %vm4424_vm5, %v19709_v1  ;;  %4427 = vst.msk [vmem:[#allocation2 + $0x30] sm:$0xff] %vm4424_vm5, %v19709_v1 }
 0x347   : > { %v20228_v47 = vld [vmem:[#allocation2] sm:$0xff]  ;;  %v2964_v52 = vld [vmem:[#allocation2 + $0x78] sm:$0xff] }
 0x348   : > { %v18809_v48 = vpack.i.bf16 %v20225_v46, %v20228_v47  ;;  %4425 = vst.msk [vmem:[#allocation2] sm:$0xff] %vm4424_vm5, %v19709_v1 }
 0x349   : > { %v2963_v51 = vld [vmem:[#allocation2 + $0x60] sm:$0xff]  ;;  %v2966_v56 = vld [vmem:[#allocation2 + $0xa8] sm:$0xff] }
 0x34a   : > { %18805 = vrot.lane.b32.xlu1 %v20194_v38, %s22135_s19  ;;  %18810 = vrot.lane.b32.xlu0 %v18809_v48, %s22136_s24  ;;  %v18819_v54 = vpack.i.bf16 %v2964_v52, %v2963_v51  ;;  %v20272_v58 = vpack.c.bf16 %v2964_v52, %v2963_v51 }
 0x34b   : > { %v2965_v55 = vld [vmem:[#allocation2 + $0x90] sm:$0xff] }
 0x34c   : > { %v18824_v57 = vpack.i.bf16 %v2966_v56, %v2965_v55  ;;  %v20277_v60 = vpack.c.bf16 %v2966_v56, %v2965_v55  ;;  %v15494_v55 = vld [vmem:[%s19840_s30 + $0x78] sm:$0xff]  ;;  %v15497_v56 = vld [vmem:[%s19840_s30 + $0x80] sm:$0xff] }
 0x34e   : > { %18815 = vrot.lane.b32.xlu1 %v18814_v53, %s22136_s24  ;;  %18820 = vrot.lane.b32.xlu0 %v18819_v54, %s22136_s24 }
 0x352   : > { %18830 = vrot.lane.b32.xlu0 %v18809_v48, %s22131_s26  ;;  %18825 = vrot.lane.b32.xlu1 %v18824_v57, %s22136_s24 }
 0x356   : > { %18840 = vrot.lane.b32.xlu0 %v18819_v54, %s22131_s26  ;;  %18835 = vrot.lane.b32.xlu1 %v18814_v53, %s22131_s26 }
 0x35a   : > { %18850 = vrot.lane.b32.xlu0 %v18809_v48, %s22130_s28  ;;  %18845 = vrot.lane.b32.xlu1 %v18824_v57, %s22131_s26 }
 0x35e   : > { %18860 = vrot.lane.b32.xlu0 %v18819_v54, %s22130_s28  ;;  %18855 = vrot.lane.b32.xlu1 %v18814_v53, %s22130_s28 }
 0x362   : > { %18870 = vrot.lane.b32.xlu0 %v18809_v48, %s22132_s3  ;;  %18865 = vrot.lane.b32.xlu1 %v18824_v57, %s22130_s28 }
 0x366   : > { %18880 = vrot.lane.b32.xlu0 %v18819_v54, %s22132_s3  ;;  %18875 = vrot.lane.b32.xlu1 %v18814_v53, %s22132_s3 }
 0x36a   : > { %18890 = vrot.lane.b32.xlu0 %v18809_v48, %s22137_s1  ;;  %18885 = vrot.lane.b32.xlu1 %v18824_v57, %s22132_s3  ;;  %s22051_s3 = smov 11  }
 0x36e   : > { %18900 = vrot.lane.b32.xlu0 %v18819_v54, %s22137_s1  ;;  %18895 = vrot.lane.b32.xlu1 %v18814_v53, %s22137_s1 }
 0x372   : > { %18910 = vrot.lane.b32.xlu0 %v18809_v48, %s22134_s5  ;;  %18905 = vrot.lane.b32.xlu1 %v18824_v57, %s22137_s1  ;;  %s15873_s1 = sshll.u32 %s19996_s7, 5 }
 0x376   : > { %18920 = vrot.lane.b32.xlu0 %v18819_v54, %s22134_s5  ;;  %18915 = vrot.lane.b32.xlu1 %v18814_v53, %s22134_s5 }
 0x37a   : > { %18930 = vrot.lane.b32.xlu0 %v18809_v48, %s22133_s11  ;;  %18925 = vrot.lane.b32.xlu1 %v18824_v57, %s22134_s5 }
 0x37e   : > { %18940 = vrot.lane.b32.xlu0 %v18819_v54, %s22133_s11  ;;  %18935 = vrot.lane.b32.xlu1 %v18814_v53, %s22133_s11 }
 0x382   : > { %18950 = vrot.lane.b32.xlu0 %v18809_v48, %s22135_s19  ;;  %18945 = vrot.lane.b32.xlu1 %v18824_v57, %s22133_s11  ;;  %s965_s11 = scalar_lea.vmem %s22138_s9, %s15873_s1  ;;  %s22049_s1 = smov 110  }
 0x383   : > { %s22145_s9 = smov 107  }
 0x386   : > { %18960 = vrot.lane.b32.xlu0 %v18819_v54, %s22135_s19  ;;  %18955 = vrot.lane.b32.xlu1 %v18814_v53, %s22135_s19 }
 0x38a   : > { %18970 = vrot.lane.b32.xlu0 %v18824_v57, %s22135_s19  ;;  %18965 = vrot.lane.b32.xlu1 %v20194_v38, %s22136_s24 }
 0x38e   : > { %3940 = vperm.xlu0 %18772, %v3936_v61   ;;  %2891 = vperm.xlu1 %18773, %v2887_v62  }
 0x392   : > { %3945 = vperm.xlu0 %18772, %v3937_v63   ;;  %2896 = vperm.xlu1 %18773, %v2888_v0  }
 0x3b0   : > { %v18776_v5 = vpop.permute.xlu1 %18775  ;;  %v18781_v6 = vpop.permute.xlu0 %18780 }
 0x3b1   : > { %v18778_v8 = vunpack.i.h.bf16 %v18776_v5  ;;  %v18777_v9 = vunpack.i.l.bf16 %v18776_v5  ;;  %v18783_v12 = vunpack.i.h.bf16 %v18781_v6  ;;  %v18782_v13 = vunpack.i.l.bf16 %v18781_v6  ;;  %v15498_v5 = vld [vmem:[%s19840_s30 + $0x88] sm:$0xff] }
 0x3b3   : > { %v17573_v16 = vpack.c.bf16 %v18778_v8, %v18777_v9  ;;  %v17577_v17 = vpack.c.bf16 %v18783_v12, %v18782_v13  ;;  %v15501_v12 = vld [vmem:[%s22120_s12 + $0x10] sm:$0xff] }
 0x3b4   : > { %v18786_v18 = vpop.permute.xlu1 %18785  ;;  %v18791_v25 = vpop.permute.xlu0 %18790 }
 0x3b5   : > { %v18788_v19 = vunpack.i.h.bf16 %v18786_v18  ;;  %v18787_v20 = vunpack.i.l.bf16 %v18786_v18  ;;  %17574 = vmatprep.subr.bf16.mxu1 %v17573_v16  ;;  %v18793_v26 = vunpack.i.h.bf16 %v18791_v25  ;;  %v18792_v27 = vunpack.i.l.bf16 %v18791_v25 }
 0x3b6   : > { %17576 = vmatpush3.bf16.msra.mxu1 %v17573_v16  ;;  %v17621_v25 = vpack.c.bf16 %v20237_v49, %v20239_v50  ;;  %v15468_v50 = vld [vmem:[%s19840_s30 + $0x18] sm:$0xff] }
 0x3b7   : > { %17578 = vmatprep.subr.bf16.mxu1 %v17577_v17  ;;  %v17581_v23 = vpack.c.bf16 %v18788_v19, %v18787_v20  ;;  %v17585_v31 = vpack.c.bf16 %v18793_v26, %v18792_v27  ;;  %v2967_v26 = vld [vmem:[%s22120_s12] sm:$0xff] }
 0x3b8   : > { %v18796_v24 = vpop.permute.xlu1 %18795  ;;  %v18801_v7 = vpop.permute.xlu0 %18800 }
 0x3b9   : > { %16610 = vmatmul.mubr.msk.f32.vlgmr.msra.gmra.mrb[0].mxu1 %vm2080_vm4, %v15474_v21  ;;  %v18798_v33 = vunpack.i.h.bf16 %v18796_v24  ;;  %v18797_v34 = vunpack.i.l.bf16 %v18796_v24  ;;  %v18803_v10 = vunpack.i.h.bf16 %v18801_v7  ;;  %v18802_v11 = vunpack.i.l.bf16 %v18801_v7  ;;  %v15502_v24 = vld [vmem:[%s22120_s12 + $0x18] sm:$0xff] }
 0x3ba   : > { %17580 = vmatpush3.bf16.msra.mxu1 %v17577_v17  ;;  %16616 = vmatprep.mubr.msk.f32.mxu1 %vm2080_vm4, %v15477_v22  ;;  %v17617_v22 = vpack.c.bf16 %v20225_v46, %v20228_v47 }
 0x3bb   : > { %17582 = vmatprep.subr.bf16.mxu1 %v17581_v23  ;;  %v17589_v2 = vpack.c.bf16 %v18798_v33, %v18797_v34  ;;  %v17593_v38 = vpack.c.bf16 %v18803_v10, %v18802_v11 }
 0x3bc   : > { %v18806_v28 = vpop.permute.xlu1 %18805  ;;  %v18811_v51 = vpop.permute.xlu0 %18810 }
 0x3bd   : > { %v18808_v40 = vunpack.i.h.bf16 %v18806_v28  ;;  %v18807_v41 = vunpack.i.l.bf16 %v18806_v28  ;;  %v18813_v52 = vunpack.i.h.bf16 %v18811_v51  ;;  %v18812_v53 = vunpack.i.l.bf16 %v18811_v51 }
 0x3bf   : > { %v17597_v45 = vpack.c.bf16 %v18808_v40, %v18807_v41  ;;  %v17601_v57 = vpack.c.bf16 %v18813_v52, %v18812_v53  ;;  %v15511_v53 = vld [vmem:[%s22120_s12 + $0x30] sm:$0xff] }
 0x3c0   : > { %v18816_v32 = vpop.permute.xlu1 %18815  ;;  %v18821_v0 = vpop.permute.xlu0 %18820 }
 0x3c1   : > { %16617 = vmatmul.mubr.msk.f32.vlgmr.msra.gmra.mrb[0].mxu1 %vm2080_vm4, %v15478_v29  ;;  %v18818_v61 = vunpack.i.h.bf16 %v18816_v32  ;;  %v18817_v62 = vunpack.i.l.bf16 %v18816_v32  ;;  %v18823_v6 = vunpack.i.h.bf16 %v18821_v0  ;;  %v18822_v8 = vunpack.i.l.bf16 %v18821_v0 }
 0x3c2   : > { %17584 = vmatpush3.bf16.msra.mxu1 %v17581_v23  ;;  %16623 = vmatprep.mubr.msk.f32.mxu1 %vm2080_vm4, %v15481_v30 }
 0x3c3   : > { %17586 = vmatprep.subr.bf16.mxu1 %v17585_v31  ;;  %v17605_v9 = vpack.c.bf16 %v18818_v61, %v18817_v62  ;;  %v17609_v18 = vpack.c.bf16 %v18823_v6, %v18822_v8 }
 0x3c4   : > { %v20297_v35 = vpop.permute.xlu1 %18825  ;;  %v18831_v29 = vpop.permute.xlu0 %18830 }
 0x3c5   : > { %v18828_v16 = vunpack.i.h.bf16 %v20297_v35  ;;  %v18827_v17 = vunpack.i.l.bf16 %v20297_v35  ;;  %v18833_v30 = vunpack.i.h.bf16 %v18831_v29 }
 0x3c7   : > { %v17613_v20 = vpack.c.bf16 %v18828_v16, %v18827_v17 }
 0x3c8   : > { %v20301_v3 = vpop.permute.xlu1 %18835  ;;  %v18841_v35 = vpop.permute.xlu0 %18840 }
 0x3c9   : > { %16624 = vmatmul.mubr.msk.f32.vlgmr.msra.gmra.mrb[0].mxu1 %vm2080_vm4, %v15482_v36  ;;  %v18838_v32 = vunpack.i.h.bf16 %v20301_v3  ;;  %v18837_v33 = vunpack.i.l.bf16 %v20301_v3  ;;  %v2968_v36 = vld [vmem:[%s22120_s12 + $0x8] sm:$0xff] }
 0x3ca   : > { %17588 = vmatpush3.bf16.msra.mxu1 %v17585_v31  ;;  %16630 = vmatprep.mubr.msk.f32.mxu1 %vm2080_vm4, %v15485_v4  ;;  %v18832_v31 = vunpack.i.l.bf16 %v18831_v29  ;;  %v18843_v4 = vunpack.i.h.bf16 %v18841_v35 }
 0x3cb   : > { %17590 = vmatprep.subr.bf16.mxu1 %v17589_v2  ;;  %v17637_v7 = vpack.c.bf16 %v18838_v32, %v18837_v33  ;;  %v15519_v32 = vld [vmem:[%s22120_s12 + $0x50] sm:$0xff] }
 0x3cc   : > { %v20305_v14 = vpop.permute.xlu1 %18845  ;;  %v17633_v34 = vpack.c.bf16 %v18833_v30, %v18832_v31 }
 0x3cd   : > { %v18848_v3 = vunpack.i.h.bf16 %v20305_v14  ;;  %v18847_v10 = vunpack.i.l.bf16 %v20305_v14  ;;  %v15508_v14 = vld [vmem:[%s22120_s12 + $0x28] sm:$0xff] }
 0x3d0   : > { %v20309_v39 = vpop.permute.xlu1 %18855 }
 0x3d1   : > { %16631 = vmatmul.mubr.msk.f32.vlgmr.msra.gmra.mrb[0].mxu1 %vm2080_vm4, %v15486_v15  ;;  %v18851_v15 = vpop.permute.xlu0 %18850  ;;  %v18858_v40 = vunpack.i.h.bf16 %v20309_v39  ;;  %v18857_v41 = vunpack.i.l.bf16 %v20309_v39 }
 0x3d2   : > { %17592 = vmatpush3.bf16.msra.mxu1 %v17589_v2  ;;  %16637 = vmatprep.mubr.msk.f32.mxu1 %vm2080_vm4, %v15489_v37  ;;  %v18842_v2 = vunpack.i.l.bf16 %v18841_v35  ;;  %v18852_v37 = vunpack.i.l.bf16 %v18851_v15 }
 0x3d3   : > { %17594 = vmatprep.subr.bf16.mxu1 %v17593_v38  ;;  %v17653_v52 = vpack.c.bf16 %v18858_v40, %v18857_v41 }
 0x3d4   : > { %v20313_v42 = vpop.permute.xlu1 %18865  ;;  %v17641_v11 = vpack.c.bf16 %v18843_v4, %v18842_v2 }
 0x3d8   : > { %v20317_v48 = vpop.permute.xlu1 %18875 }
 0x3d9   : > { %16638 = vmatmul.mubr.msk.f32.vlgmr.msra.gmra.mrb[0].mxu1 %vm2080_vm4, %v15490_v43  ;;  %v18877_v6 = vunpack.i.l.bf16 %v20317_v48 }
 0x3da   : > { %17596 = vmatpush3.bf16.msra.mxu1 %v17593_v38  ;;  %16644 = vmatprep.mubr.msk.f32.mxu1 %vm2080_vm4, %v15493_v44  ;;  %v17645_v38 = vpack.c.bf16 %v18848_v3, %v18847_v10  ;;  %v18861_v44 = vpop.permute.xlu0 %18860 }
 0x3db   : > { %17598 = vmatprep.subr.bf16.mxu1 %v17597_v45  ;;  %v18862_v51 = vunpack.i.l.bf16 %v18861_v44 }
 0x3dc   : > { %v20321_v54 = vpop.permute.xlu1 %18885 }
 0x3e0   : > { %v20325_v59 = vpop.permute.xlu1 %18895 }
 0x3e1   : > { %16645 = vmatmul.mubr.msk.f32.vlgmr.msra.gmra.mrb[0].mxu1 %vm2080_vm4, %v15494_v55  ;;  %v18868_v55 = vunpack.i.h.bf16 %v20313_v42 }
 0x3e2   : > { %17600 = vmatpush3.bf16.msra.mxu1 %v17597_v45  ;;  %16651 = vmatprep.mubr.msk.f32.mxu1 %vm2080_vm4, %v15497_v56  ;;  %v18863_v45 = vunpack.i.h.bf16 %v18861_v44  ;;  %v18867_v56 = vunpack.i.l.bf16 %v20313_v42  ;;  %v15512_v42 = vld [vmem:[%s22120_s12 + $0x38] sm:$0xff] }
 0x3e3   : > { %17602 = vmatprep.subr.bf16.mxu1 %v17601_v57 }
 0x3e4   : > { %v20329_v63 = vpop.permute.xlu1 %18905  ;;  %v17657_v39 = vpack.c.bf16 %v18863_v45, %v18862_v51  ;;  %v17661_v0 = vpack.c.bf16 %v18868_v55, %v18867_v56 }
 0x3e5   : > { %v18908_v33 = vunpack.i.h.bf16 %v20329_v63 }
 0x3e8   : > { %v20333_v13 = vpop.permute.xlu1 %18915 }
 0x3e9   : > { %16652 = vmatmul.mubr.msk.f32.vlgmr.msra.gmra.mrb[0].mxu1 %vm2080_vm4, %v15498_v5  ;;  %v18878_v5 = vunpack.i.h.bf16 %v20317_v48 }
 0x3ea   : > { %17604 = vmatpush3.bf16.msra.mxu1 %v17601_v57  ;;  %16670 = vmatprep.mubr.msk.f32.mxu1 %vm22081_vm3, %v15501_v12  ;;  %v18871_v57 = vpop.permute.xlu0 %18870 }
 0x3eb   : > { %17606 = vmatprep.subr.bf16.mxu1 %v17605_v9  ;;  %v18873_v61 = vunpack.i.h.bf16 %v18871_v57  ;;  %v18872_v62 = vunpack.i.l.bf16 %v18871_v57  ;;  %v17669_v17 = vpack.c.bf16 %v18878_v5, %v18877_v6  ;;  %v15527_v57 = vld [vmem:[%s22120_s12 + $0x70] sm:$0xff] }
 0x3ec   : > { %v20339_v19 = vpop.permute.xlu1 %18925 }
 0x3ed   : > { %v17665_v8 = vpack.c.bf16 %v18873_v61, %v18872_v62  ;;  %v18927_v40 = vunpack.i.l.bf16 %v20339_v19 }
 0x3ee   : > { %17608 = vmatpush3.bf16.msra.mxu1 %v17605_v9  ;;  %v18881_v9 = vpop.permute.xlu0 %18880 }
 0x3ef   : > { %17610 = vmatprep.subr.bf16.mxu1 %v17609_v18  ;;  %v18883_v12 = vunpack.i.h.bf16 %v18881_v9  ;;  %v18882_v16 = vunpack.i.l.bf16 %v18881_v9  ;;  %v4421_v9 = vld [vmem:[%s965_s11 + $0x8] sm:$0xff] }
 0x3f0   : > { %v20341_v21 = vpop.permute.xlu1 %18935  ;;  %4435 = vrot.lane.b32.xlu0 %v4421_v9, %s22051_s3 }
 0x3f1   : > { %v17673_v48 = vpack.c.bf16 %v18883_v12, %v18882_v16  ;;  %v18938_v45 = vunpack.i.h.bf16 %v20341_v21  ;;  %v18937_v51 = vunpack.i.l.bf16 %v20341_v21  ;;  %v4422_v12 = vld [vmem:[%s965_s11 + $0x10] sm:$0xff] }
 0x3f2   : > { %17612 = vmatpush3.bf16.msra.mxu1 %v17609_v18  ;;  %v15515_v18 = vld [vmem:[%s22120_s12 + $0x40] sm:$0xff] }
 0x3f3   : > { %17614 = vmatprep.subr.bf16.mxu1 %v17613_v20 }
 0x3f4   : > { %v20345_v23 = vpop.permute.xlu1 %18945 }
 0x3f5   : > { %v18948_v61 = vunpack.i.h.bf16 %v20345_v23  ;;  %v18947_v21 = vunpack.i.l.bf16 %v20345_v23  ;;  %v4423_v23 = vld [vmem:[%s965_s11 + $0x18] sm:$0xff] }
 0x3f6   : > { %17616 = vmatpush3.bf16.msra.mxu1 %v17613_v20  ;;  %v18888_v20 = vunpack.i.h.bf16 %v20321_v54  ;;  %4439 = vrot.lane.b32.xlu0 %v4423_v23, %s22051_s3 }
 0x3f7   : > { %17618 = vmatprep.subr.bf16.mxu1 %v17617_v22 }
 0x3f8   : > { %v20351_v27 = vpop.permute.xlu1 %18955 }
 0x3f9   : > { %16671 = vmatmul.mubr.msk.f32.vlgmr.msra.gmra.mrb[2].mxu1 %vm22081_vm3, %v15502_v24  ;;  %v18891_v24 = vpop.permute.xlu0 %18890  ;;  %v18958_v16 = vunpack.i.h.bf16 %v20351_v27 }
 0x3fa   : > { %17620 = vmatpush3.bf16.msra.mxu1 %v17617_v22  ;;  %16689 = vmatprep.mubr.msk.f32.mxu1 %vm22081_vm3, %v2967_v26  ;;  %v18887_v22 = vunpack.i.l.bf16 %v20321_v54  ;;  %v18892_v26 = vunpack.i.l.bf16 %v18891_v24  ;;  %v15516_v54 = vld [vmem:[%s22120_s12 + $0x48] sm:$0xff] }
 0x3fb   : > { %17622 = vmatprep.subr.bf16.mxu1 %v17621_v25 }
 0x3fc   : > { %v18966_v28 = vpop.permute.xlu1 %18965 }
 0x3fd   : > { %v18968_v46 = vunpack.i.h.bf16 %v18966_v28  ;;  %v18967_v47 = vunpack.i.l.bf16 %v18966_v28  ;;  %v17677_v28 = vpack.c.bf16 %v18888_v20, %v18887_v22  ;;  %v18901_v30 = vpop.permute.xlu0 %18900  ;;  %v15528_v22 = vld [vmem:[%s22120_s12 + $0x78] sm:$0xff] }
 0x3fe   : > { %17624 = vmatpush3.bf16.msra.mxu1 %v17621_v25  ;;  %v18893_v25 = vunpack.i.h.bf16 %v18891_v24  ;;  %v18903_v31 = vunpack.i.h.bf16 %v18901_v30 }
 0x3ff   : > { %17626 = vmatprep.subr.bf16.mxu1 %v20272_v58  ;;  %v17565_v49 = vpack.c.bf16 %v18968_v46, %v18967_v47  ;;  %v18898_v46 = vunpack.i.h.bf16 %v20325_v59  ;;  %v18897_v47 = vunpack.i.l.bf16 %v20325_v59 }
 0x400   : > { %v17681_v29 = vpack.c.bf16 %v18893_v25, %v18892_v26  ;;  %v15531_v26 = vld [vmem:[%s22120_s12 + $0x80] sm:$0xff] }
 0x401   : > { %17566 = vmatprep.subr.bf16.mxu0 %v17565_v49  ;;  %v18911_v35 = vpop.permute.xlu0 %18910 }
 0x402   : > { %17628 = vmatpush3.bf16.msra.mxu1 %v20272_v58  ;;  %17568 = vmatpush3.bf16.msra.mxu0 %v17565_v49  ;;  %v15507_v58 = vld [vmem:[%s22120_s12 + $0x20] sm:$0xff]  ;;  %v18902_v49 = vunpack.i.l.bf16 %v18901_v30  ;;  %v18912_v4 = vunpack.i.l.bf16 %v18911_v35  ;;  %v15532_v30 = vld [vmem:[%s22120_s12 + $0x88] sm:$0xff] }
 0x403   : > { %17630 = vmatprep.subr.bf16.mxu1 %v20277_v60 }
 0x404   : > { %v17689_v59 = vpack.c.bf16 %v18903_v31, %v18902_v49 }
 0x405   : > { %16596 = vmatmul.mubr.msk.f32.vlgmr.msra.gmra.mrb[2].mxu0 %vm2080_vm4, %v15468_v50  ;;  %v17685_v50 = vpack.c.bf16 %v18898_v46, %v18897_v47  ;;  %v18921_v10 = vpop.permute.xlu0 %18920 }
 0x406   : > { %17632 = vmatpush3.bf16.msra.mxu1 %v20277_v60  ;;  %v18853_v60 = vunpack.i.h.bf16 %v18851_v15  ;;  %v18922_v15 = vunpack.i.l.bf16 %v18921_v10 }
 0x407   : > { %17634 = vmatprep.subr.bf16.mxu1 %v17633_v34 }
 0x408   : > { %v17649_v43 = vpack.c.bf16 %v18853_v60, %v18852_v37  ;;  %v15523_v37 = vld [vmem:[%s22120_s12 + $0x60] sm:$0xff] }
 0x409   : > { %16690 = vmatmul.mubr.msk.f32.vlgmr.msra.gmra.mrb[2].mxu1 %vm22081_vm3, %v2968_v36  ;;  %v18913_v36 = vunpack.i.h.bf16 %v18911_v35  ;;  %v18931_v41 = vpop.permute.xlu0 %18930 }
 0x40a   : > { %17636 = vmatpush3.bf16.msra.mxu1 %v17633_v34  ;;  %16708 = vmatprep.mubr.msk.f32.mxu1 %vm22081_vm3, %v15507_v58  ;;  %v18907_v34 = vunpack.i.l.bf16 %v20329_v63  ;;  %v18917_v58 = vunpack.i.l.bf16 %v20333_v13  ;;  %v15520_v63 = vld [vmem:[%s22120_s12 + $0x58] sm:$0xff]  ;;  %v18932_v44 = vunpack.i.l.bf16 %v18931_v41 }
 0x40b   : > { %17638 = vmatprep.subr.bf16.mxu1 %v17637_v7  ;;  %v17697_v3 = vpack.c.bf16 %v18913_v36, %v18912_v4 }
 0x40c   : > { %v17693_v2 = vpack.c.bf16 %v18908_v33, %v18907_v34 }
 0x40e   : > { %17640 = vmatpush3.bf16.msra.mxu1 %v17637_v7  ;;  %v18918_v7 = vunpack.i.h.bf16 %v20333_v13 }
 0x40f   : > { %17642 = vmatprep.subr.bf16.mxu1 %v17641_v11 }
 0x410   : > { %v17701_v60 = vpack.c.bf16 %v18918_v7, %v18917_v58 }
 0x412   : > { %17644 = vmatpush3.bf16.msra.mxu1 %v17641_v11  ;;  %v18923_v11 = vunpack.i.h.bf16 %v18921_v10 }
 0x413   : > { %17646 = vmatprep.subr.bf16.mxu1 %v17645_v38 }
 0x414   : > { %v17705_v13 = vpack.c.bf16 %v18923_v11, %v18922_v15 }
 0x416   : > { %17648 = vmatpush3.bf16.msra.mxu1 %v17645_v38  ;;  %v18928_v38 = vunpack.i.h.bf16 %v20339_v19  ;;  %v15524_v19 = vld [vmem:[%s22120_s12 + $0x68] sm:$0xff]  ;;  %s22147_s12 = sld [smem:[#allocation23_spill]] }
 0x417   : > { %17650 = vmatprep.subr.bf16.mxu1 %v17649_v43 }
 0x419   : > { %16709 = vmatmul.mubr.msk.f32.vlgmr.msra.gmra.mrb[2].mxu1 %vm22081_vm3, %v15508_v14  ;;  %v17709_v14 = vpack.c.bf16 %v18928_v38, %v18927_v40 }
 0x41a   : > { %17652 = vmatpush3.bf16.msra.mxu1 %v17649_v43  ;;  %16727 = vmatprep.mubr.msk.f32.mxu1 %vm22081_vm3, %v15511_v53  ;;  %v18933_v43 = vunpack.i.h.bf16 %v18931_v41  ;;  %v18941_v53 = vpop.permute.xlu0 %18940 }
 0x41b   : > { %17654 = vmatprep.subr.bf16.mxu1 %v17653_v52  ;;  %v18943_v55 = vunpack.i.h.bf16 %v18941_v53  ;;  %v18942_v56 = vunpack.i.l.bf16 %v18941_v53 }
 0x41d   : > { %v17721_v62 = vpack.c.bf16 %v18943_v55, %v18942_v56  ;;  %v5330_v56 = vld [vmem:[%s22122_s4 + $0x8] sm:$0xff] }
 0x41e   : > { %17656 = vmatpush3.bf16.msra.mxu1 %v17653_v52  ;;  %v17713_v52 = vpack.c.bf16 %v18933_v43, %v18932_v44 }
 0x41f   : > { %17658 = vmatprep.subr.bf16.mxu1 %v17657_v39 }
 0x422   : > { %17660 = vmatpush3.bf16.msra.mxu1 %v17657_v39  ;;  %v17717_v39 = vpack.c.bf16 %v18938_v45, %v18937_v51 }
 0x423   : > { %17662 = vmatprep.subr.bf16.mxu1 %v17661_v0 }
 0x426   : > { %17664 = vmatpush3.bf16.msra.mxu1 %v17661_v0  ;;  %v18951_v0 = vpop.permute.xlu0 %18950 }
 0x427   : > { %17666 = vmatprep.subr.bf16.mxu1 %v17665_v8  ;;  %v18953_v5 = vunpack.i.h.bf16 %v18951_v0  ;;  %v18952_v6 = vunpack.i.l.bf16 %v18951_v0 }
 0x429   : > { %16728 = vmatmul.mubr.msk.f32.vlgmr.msra.gmra.mrb[2].mxu1 %vm22081_vm3, %v15512_v42  ;;  %v4420_v42 = vld [vmem:[%s965_s11] sm:$0xff]  ;;  %s19722_s11 = smov 104  }
 0x42a   : > { %17668 = vmatpush3.bf16.msra.mxu1 %v17665_v8  ;;  %16746 = vmatprep.mubr.msk.f32.mxu1 %vm22081_vm3, %v15515_v18  ;;  %v17725_v8 = vpack.c.bf16 %v18948_v61, %v18947_v21  ;;  %v17729_v18 = vpack.c.bf16 %v18953_v5, %v18952_v6  ;;  %v18961_v20 = vpop.permute.xlu0 %18960 }
 0x42b   : > { %17670 = vmatprep.subr.bf16.mxu1 %v17669_v17  ;;  %4433 = vrot.lane.b32.xlu1 %v4420_v42, %s22051_s3  ;;  %v18962_v24 = vunpack.i.l.bf16 %v18961_v20 }
 0x42e   : > { %17672 = vmatpush3.bf16.msra.mxu1 %v17669_v17  ;;  %v18957_v17 = vunpack.i.l.bf16 %v20351_v27 }
 0x42f   : > { %17674 = vmatprep.subr.bf16.mxu1 %v17673_v48  ;;  %4437 = vrot.lane.b32.xlu1 %v4422_v12, %s22051_s3  ;;  %s22055_s3 = smov 107  }
 0x430   : > { %v17733_v25 = vpack.c.bf16 %v18958_v16, %v18957_v17  ;;  %v15547_v16 = vld [vmem:[%s19860_s27 + $0x10] sm:$0xff] }
 0x432   : > { %17676 = vmatpush3.bf16.msra.mxu1 %v17673_v48  ;;  %v18963_v48 = vunpack.i.h.bf16 %v18961_v20 }
 0x433   : > { %17678 = vmatprep.subr.bf16.mxu1 %v17677_v28 }
 0x434   : > { %v17737_v47 = vpack.c.bf16 %v18963_v48, %v18962_v24 }
 0x436   : > { %17680 = vmatpush3.bf16.msra.mxu1 %v17677_v28  ;;  %v18971_v28 = vpop.permute.xlu0 %18970 }
 0x437   : > { %17682 = vmatprep.subr.bf16.mxu1 %v17681_v29  ;;  %v18973_v27 = vunpack.i.h.bf16 %v18971_v28  ;;  %v18972_v46 = vunpack.i.l.bf16 %v18971_v28 }
 0x439   : > { %16747 = vmatmul.mubr.msk.f32.vlgmr.msra.gmra.mrb[2].mxu1 %vm22081_vm3, %v15516_v54 }
 0x43a   : > { %17684 = vmatpush3.bf16.msra.mxu1 %v17681_v29  ;;  %16765 = vmatprep.mubr.msk.f32.mxu1 %vm22081_vm3, %v15519_v32  ;;  %v17741_v29 = vpack.c.bf16 %v18973_v27, %v18972_v46  ;;  %v3941_v49 = vpop.permute.xlu0 %3940  ;;  %v4459_v46 = vld [vmem:[%s19860_s27] sm:$0xff] }
 0x43b   : > { %17686 = vmatprep.subr.bf16.mxu1 %v17685_v50 }
 0x43e   : > { %17688 = vmatpush3.bf16.msra.mxu1 %v17685_v50  ;;  %v2892_v50 = vpop.permute.xlu1 %2891  ;;  %v3946_v32 = vpop.permute.xlu0 %3945 }
 0x43f   : > { %17690 = vmatprep.subr.bf16.mxu1 %v17689_v59 }
 0x442   : > { %17692 = vmatpush3.bf16.msra.mxu1 %v17689_v59  ;;  %v2897_v33 = vpop.permute.xlu1 %2896 }
 0x443   : > { %17694 = vmatprep.subr.bf16.mxu1 %v17693_v2 }
 0x446   : > { %17696 = vmatpush3.bf16.msra.mxu1 %v17693_v2 }
 0x447   : > { %17698 = vmatprep.subr.bf16.mxu1 %v17697_v3 }
 0x449   : > { %16766 = vmatmul.mubr.msk.f32.vlgmr.msra.gmra.mrb[2].mxu1 %vm22081_vm3, %v15520_v63  ;;  %v20452_v63 = vld [vmem:[%s19810_s29] sm:$0x3f] }
 0x44a   : > { %17700 = vmatpush3.bf16.msra.mxu1 %v17697_v3  ;;  %16784 = vmatprep.mubr.msk.f32.mxu1 %vm22081_vm3, %v15523_v37 }
 0x44b   : > { %17702 = vmatprep.subr.bf16.mxu1 %v17701_v60  ;;  %16825 = vmatprep.subr.msk.mxu0 %vm22082_vm8, %v20452_v63 }
 0x44c   : > { %16826 = vmatpush3.msk.msra.mxu0 %vm22082_vm8, %v20452_v63 }
 0x44d   : > { %16830 = vmatprep.subr.msk.mxu0 %vm22082_vm8, %v20452_v63 }
 0x44e   : > { %17704 = vmatpush3.bf16.msra.mxu1 %v17701_v60 }
 0x44f   : > { %17706 = vmatprep.subr.bf16.mxu1 %v17705_v13 }
 0x452   : > { %17708 = vmatpush3.bf16.msra.mxu1 %v17705_v13  ;;  %v19614_v13 = vld [vmem:[%s19795_s17] ss:$0 sm:$0xff] }
 0x453   : > { %17710 = vmatprep.subr.bf16.mxu1 %v17709_v14 }
 0x456   : > { %17712 = vmatpush3.bf16.msra.mxu1 %v17709_v14 }
 0x457   : > { %17714 = vmatprep.subr.bf16.mxu1 %v17713_v52 }
 0x459   : > { %16785 = vmatmul.mubr.msk.f32.vlgmr.msra.gmra.mrb[2].mxu1 %vm22081_vm3, %v15524_v19 }
 0x45a   : > { %17716 = vmatpush3.bf16.msra.mxu1 %v17713_v52  ;;  %16803 = vmatprep.mubr.msk.f32.mxu1 %vm22081_vm3, %v15527_v57 }
 0x45b   : > { %17718 = vmatprep.subr.bf16.mxu1 %v17717_v39 }
 0x45e   : > { %17720 = vmatpush3.bf16.msra.mxu1 %v17717_v39  ;;  %v5329_v39 = vld [vmem:[%s22122_s4] sm:$0xff]  ;;  %s19735_s4 = smov 80  }
 0x45f   : > { %17722 = vmatprep.subr.bf16.mxu1 %v17721_v62 }
 0x462   : > { %17724 = vmatpush3.bf16.msra.mxu1 %v17721_v62  ;;  %v4436_v34 = vpop.permute.xlu0 %4435 }
 0x463   : > { %17726 = vmatprep.subr.bf16.mxu1 %v17725_v8  ;;  %4447 = vst.msk [vmem:[#allocation2 + $0x18] sm:$0xff] %vm4445_vm6, %v4436_v34  ;;  %v15553_v34 = vld [vmem:[%s19860_s27 + $0x20] sm:$0xff] }
 0x464   : > { %4452 = vst.msk [vmem:[#allocation2 + $0x18] sm:$0xff] %vm4450_vm7, %v19709_v1 }
 0x466   : > { %17728 = vmatpush3.bf16.msra.mxu1 %v17725_v8 }
 0x467   : > { %17730 = vmatprep.subr.bf16.mxu1 %v17729_v18 }
 0x468   : > { %v4440_v35 = vpop.permute.xlu0 %4439 }
 0x469   : > { %16804 = vmatmul.mubr.msk.f32.vlgmr.msra.gmra.mrb[2].mxu1 %vm22081_vm3, %v15528_v22  ;;  %4449 = vst.msk [vmem:[#allocation2 + $0x48] sm:$0xff] %vm4445_vm6, %v4440_v35 }
 0x46a   : > { %17732 = vmatpush3.bf16.msra.mxu1 %v17729_v18  ;;  %16822 = vmatprep.mubr.msk.f32.mxu1 %vm22081_vm3, %v15531_v26  ;;  %4454 = vst.msk [vmem:[#allocation2 + $0x48] sm:$0xff] %vm4450_vm7, %v19709_v1 }
 0x46b   : > { %17734 = vmatprep.subr.bf16.mxu1 %v17733_v25  ;;  %v20445_v10 = vld [vmem:[#allocation2 + $0x18] sm:$0xff] }
 0x46c   : > { %5356 = vst.msk [vmem:[#allocation2 + $0x18] sm:$0xff] %vm4424_vm5, %v19709_v1 }
 0x46e   : > { %17736 = vmatpush3.bf16.msra.mxu1 %v17733_v25  ;;  %v15548_v25 = vld [vmem:[%s19860_s27 + $0x18] sm:$0xff] }
 0x46f   : > { %17738 = vmatprep.subr.bf16.mxu1 %v17737_v47 }
 0x471   : > { %v20471_v19 = vld [vmem:[#allocation2 + $0x48] sm:$0xff] }
 0x472   : > { %17740 = vmatpush3.bf16.msra.mxu1 %v17737_v47 }
 0x473   : > { %17742 = vmatprep.subr.bf16.mxu1 %v17741_v29 }
 0x476   : > { %17744 = vmatpush3.bf16.msra.mxu1 %v17741_v29 }
 0x479   : > { %16823 = vmatmul.mubr.msk.f32.vlgmr.msra.gmra.mrb[2].mxu1 %vm22081_vm3, %v15532_v30  ;;  %vm22094_vm3 = vcmask 736256  }
 0x49d   : > { %v4434_v59 = vpop.permute.xlu1 %4433 }
 0x49e   : > { %4446 = vst.msk [vmem:[#allocation2] sm:$0xff] %vm4445_vm6, %v4434_v59 }
 0x49f   : > { %4451 = vst.msk [vmem:[#allocation2] sm:$0xff] %vm4450_vm7, %v19709_v1 }
 0x4a1   : > { %v4438_v36 = vpop.permute.xlu1 %4437 }
 0x4a2   : > { %4448 = vst.msk [vmem:[#allocation2 + $0x30] sm:$0xff] %vm4445_vm6, %v4438_v36 }
 0x4a3   : > { %4453 = vst.msk [vmem:[#allocation2 + $0x30] sm:$0xff] %vm4450_vm7, %v19709_v1 }
 0x4a6   : > { %v20443_v3 = vld [vmem:[#allocation2] sm:$0xff] }
 0x4a7   : > { %5355 = vst.msk [vmem:[#allocation2] sm:$0xff] %vm4424_vm5, %v19709_v1  ;;  %v18974_v52 = vpack.i.bf16 %v20445_v10, %v20443_v3  ;;  %v17753_v48 = vpack.c.bf16 %v20445_v10, %v20443_v3 }
 0x4aa   : > { %v20469_v53 = vld [vmem:[#allocation2 + $0x30] sm:$0xff] }
 0x4ab   : > { %v18979_v55 = vpack.i.bf16 %v20471_v19, %v20469_v53  ;;  %v17757_v27 = vpack.c.bf16 %v20471_v19, %v20469_v53  ;;  %v15562_v19 = vld [vmem:[%s19860_s27 + $0x48] sm:$0xff] }
 0x4bc   : > { %v16653_v54 = vpop.f32.mrb[0].mxu1 }
 0x4bd   : > { %v2876_v31 = vpop.f32.mrb[1].mxu1 }
 0x4d8   : > { %v16597_v4 = vpop.f32.mrb[2].mxu0 }
 0x4d9   : > { %v18224_v2 = vadd.f32 %v16653_v54, %v16597_v4  ;;  %v2153_v7 = vpop.f32.mrb[3].mxu0 }
 0x4da   : > { %v18225_v58 = vadd.f32 %v2876_v31, %v2153_v7  ;;  %v15554_v7 = vld [vmem:[%s19860_s27 + $0x28] sm:$0xff] }
 0x4db   : > { %v2900_v11 = vadd.f32 %v18224_v2, %v2897_v33 }
 0x4dc   : > { %v2899_v15 = vadd.f32 %v18225_v58, %v2892_v50 }
 0x4dd   : > { %v2902_v41 = vmul.f32 %v19614_v13, %v2900_v11 }
 0x4de   : > { %v2901_v44 = vmul.f32 %v19614_v13, %v2899_v15 }
 0x54c   : > { %v16824_v60 = vpop.f32.mrb[2].mxu1 }
 0x54d   : > { %v3949_v37 = vadd.f32 %v16824_v60, %v3946_v32  ;;  %v3925_v38 = vpop.f32.mrb[3].mxu1 }
 0x54e   : > { %v3948_v40 = vadd.f32 %v3941_v49, %v3925_v38  ;;  %v4460_v49 = vld [vmem:[%s19860_s27 + $0x8] sm:$0xff] }
 0x54f   : > { %v3951_v43 = vmul.f32 %v19614_v13, %v3949_v37 }
 0x550   : > { %v3950_v14 = vmul.f32 %v19614_v13, %v3948_v40  ;;  %v15558_v40 = vld [vmem:[%s19860_s27 + $0x38] sm:$0xff] }
 0x551   : > { %v3953_v45 = vadd.f32 %v3951_v43, %v2902_v41 }
 0x552   : > { %v3952_v51 = vadd.f32 %v3950_v14, %v2901_v44  ;;  %v15561_v44 = vld [vmem:[%s19860_s27 + $0x40] sm:$0xff] }
 0x553   : > { %3959 = vrot.lane.b32.xlu0 %v3953_v45, %s22130_s28 }
 0x554   : > { %3957 = vrot.lane.b32.xlu1 %v3952_v51, %s22130_s28  ;;  %s22053_s28 = smov 118  }
 0x557   : > { %4047 = vrot.lane.b32.xlu0 %v3953_v45, %s22134_s5 }
 0x558   : > { %4045 = vrot.lane.b32.xlu1 %v3952_v51, %s22134_s5 }
 0x55b   : > { %4130 = vrot.lane.b32.xlu0 %v3953_v45, %s22049_s1 }
 0x55c   : > { %4128 = vrot.lane.b32.xlu1 %v3952_v51, %s22049_s1  ;;  %s22063_s1 = smov 117  }
 0x55f   : > { %4211 = vrot.lane.b32.xlu0 %v3952_v51, %s19722_s11 }
 0x560   : > { %18975 = vrot.lane.b32.xlu1 %v18974_v52, %s22136_s24 }
 0x563   : > { %18980 = vrot.lane.b32.xlu0 %v18979_v55, %s22136_s24 }
 0x564   : > { %4213 = vrot.lane.b32.xlu1 %v3953_v45, %s19722_s11  ;;  %s22059_s11 = smov 108  }
 0x567   : > { %18990 = vrot.lane.b32.xlu0 %v18979_v55, %s22131_s26 }
 0x568   : > { %18985 = vrot.lane.b32.xlu1 %v18974_v52, %s22131_s26 }
 0x56b   : > { %19000 = vrot.lane.b32.xlu0 %v18979_v55, %s22053_s28 }
 0x56c   : > { %18995 = vrot.lane.b32.xlu1 %v18974_v52, %s22053_s28  ;;  %s22057_s28 = smov 106  }
 0x56f   : > { %19010 = vrot.lane.b32.xlu0 %v18979_v55, %s22063_s1 }
 0x570   : > { %19005 = vrot.lane.b32.xlu1 %v18974_v52, %s22063_s1  ;;  %s19733_s1 = smov 60  }
 0x573   : > { %19020 = vrot.lane.b32.xlu0 %v18979_v55, %s22134_s5 }
 0x574   : > { %19015 = vrot.lane.b32.xlu1 %v18974_v52, %s22134_s5 }
 0x577   : > { %19030 = vrot.lane.b32.xlu0 %v18979_v55, %s22059_s11 }
 0x578   : > { %19025 = vrot.lane.b32.xlu1 %v18974_v52, %s22059_s11  ;;  %s22066_s11 = smov 40  }
 0x57b   : > { %19040 = vrot.lane.b32.xlu0 %v18979_v55, %s22055_s3 }
 0x57c   : > { %19035 = vrot.lane.b32.xlu1 %v18974_v52, %s22055_s3  ;;  %s19728_s3 = smov 10  }
 0x57f   : > { %19050 = vrot.lane.b32.xlu0 %v18979_v55, %s22057_s28 }
 0x580   : > { %19045 = vrot.lane.b32.xlu1 %v18974_v52, %s22057_s28  ;;  %s22061_s28 = smov 20  }
 0x583   : > { %5338 = vperm.xlu0 %18772, %v5330_v56  }
 0x584   : > { %5333 = vperm.xlu1 %18773, %v5329_v39  }
 0x5c5   : > { %v3960_v57 = vpop.permute.xlu0 %3959 }
 0x5c6   : > { %v3958_v61 = vpop.permute.xlu1 %3957 }
 0x5c7   : > { %16827 = vmatprep.mubr.msk.f32.mxu0 %vm3961_vm9, %v3958_v61 }
 0x5c8   : > { %16828 = vmatmul.mubr.msk.f32.vlgmr.msra.gmra.mrb[4].mxu0 %vm3961_vm9, %v3960_v57  ;;  %v15565_v57 = vld [vmem:[%s19860_s27 + $0x50] sm:$0xff] }
 0x5c9   : > { %v4048_v21 = vpop.permute.xlu0 %4047  ;;  %16831 = vmatpush3.msk.msra.mxu0 %vm22082_vm8, %v20452_v63 }
 0x5ca   : > { %v4046_v62 = vpop.permute.xlu1 %4045  ;;  %16835 = vmatprep.subr.msk.mxu0 %vm22082_vm8, %v20452_v63 }
 0x5cb   : > { %16832 = vmatprep.mubr.msk.f32.mxu0 %vm3961_vm9, %v4046_v62 }
 0x5cc   : > { %16833 = vmatmul.mubr.msk.f32.vlgmr.msra.gmra.mrb[6].mxu0 %vm3961_vm9, %v4048_v21 }
 0x5cd   : > { %v4131_v0 = vpop.permute.xlu0 %4130  ;;  %16836 = vmatpush3.msk.msra.mxu0 %vm22082_vm8, %v20452_v63 }
 0x5ce   : > { %v4129_v5 = vpop.permute.xlu1 %4128  ;;  %16840 = vmatprep.subr.msk.mxu0 %vm22082_vm8, %v20452_v63 }
 0x5cf   : > { %16837 = vmatprep.mubr.msk.f32.mxu0 %vm3961_vm9, %v4129_v5 }
 0x5d0   : > { %16838 = vmatmul.mubr.msk.f32.vlgmr.msra.gmra.mrb[8].mxu0 %vm3961_vm9, %v4131_v0 }
 0x5d1   : > { %v4212_v6 = vpop.permute.xlu0 %4211  ;;  %16841 = vmatpush3.msk.msra.mxu0 %vm22082_vm8, %v20452_v63  ;;  %v15557_v63 = vld [vmem:[%s19860_s27 + $0x30] sm:$0xff]  ;;  %vm22092_vm8 = vcmask 146432  }
 0x5d2   : > { %16842 = vmatprep.mubr.msk.f32.mxu0 %vm3961_vm9, %v4212_v6  ;;  %v18976_v8 = vpop.permute.xlu1 %18975  ;;  %v15566_v6 = vld [vmem:[%s19860_s27 + $0x58] sm:$0xff] }
 0x5d3   : > { %v18978_v9 = vunpack.i.h.bf16 %v18976_v8  ;;  %v18977_v42 = vunpack.i.l.bf16 %v18976_v8 }
 0x5d5   : > { %v18981_v23 = vpop.permute.xlu0 %18980  ;;  %v17745_v12 = vpack.c.bf16 %v18978_v9, %v18977_v42 }
 0x5d6   : > { %v18983_v17 = vunpack.i.h.bf16 %v18981_v23  ;;  %v18982_v18 = vunpack.i.l.bf16 %v18981_v23  ;;  %v4214_v20 = vpop.permute.xlu1 %4213  ;;  %v15569_v23 = vld [vmem:[%s19860_s27 + $0x60] sm:$0xff] }
 0x5d7   : > { %16843 = vmatmul.mubr.msk.f32.vlgmr.msra.gmra.mrb[10].mxu0 %vm3961_vm9, %v4214_v20  ;;  %17746 = vmatprep.subr.bf16.mxu0 %v17745_v12  ;;  %vm4412_vm9 = vcmask 736896  }
 0x5d8   : > { %17748 = vmatpush3.bf16.msra.mxu0 %v17745_v12  ;;  %v17749_v22 = vpack.c.bf16 %v18983_v17, %v18982_v18  ;;  %16853 = vmatprep.mubr.msk.f32.mxu0 %vm4480_vm10, %v15547_v16 }
 0x5d9   : > { %v18991_v47 = vpop.permute.xlu0 %18990 }
 0x5da   : > { %17750 = vmatprep.subr.bf16.mxu0 %v17749_v22  ;;  %v18986_v24 = vpop.permute.xlu1 %18985  ;;  %v18993_v29 = vunpack.i.h.bf16 %v18991_v47  ;;  %v18992_v30 = vunpack.i.l.bf16 %v18991_v47 }
 0x5db   : > { %v18988_v26 = vunpack.i.h.bf16 %v18986_v24  ;;  %v18987_v28 = vunpack.i.l.bf16 %v18986_v24 }
 0x5dc   : > { %17752 = vmatpush3.bf16.msra.mxu0 %v17749_v22  ;;  %v17765_v33 = vpack.c.bf16 %v18993_v29, %v18992_v30  ;;  %v15570_v22 = vld [vmem:[%s19860_s27 + $0x68] sm:$0xff]  ;;  %v15574_v29 = vld [vmem:[%s19860_s27 + $0x78] sm:$0xff] }
 0x5dd   : > { %17754 = vmatprep.subr.bf16.mxu0 %v17753_v48  ;;  %v17761_v54 = vpack.c.bf16 %v18988_v26, %v18987_v28  ;;  %v19001_v59 = vpop.permute.xlu0 %19000  ;;  %v15573_v26 = vld [vmem:[%s19860_s27 + $0x70] sm:$0xff] }
 0x5de   : > { %v18996_v31 = vpop.permute.xlu1 %18995  ;;  %v19003_v35 = vunpack.i.h.bf16 %v19001_v59  ;;  %v19002_v36 = vunpack.i.l.bf16 %v19001_v59 }
 0x5df   : > { %16854 = vmatmul.mubr.msk.f32.vlgmr.msra.gmra.mrb[12].mxu0 %vm4480_vm10, %v15548_v25  ;;  %v18998_v50 = vunpack.i.h.bf16 %v18996_v31  ;;  %v18997_v32 = vunpack.i.l.bf16 %v18996_v31  ;;  %v15578_v31 = vld [vmem:[%s19860_s27 + $0x88] sm:$0xff] }
 0x5e0   : > { %17756 = vmatpush3.bf16.msra.mxu0 %v17753_v48  ;;  %16864 = vmatprep.mubr.msk.f32.mxu0 %vm4480_vm10, %v4459_v46  ;;  %v17773_v10 = vpack.c.bf16 %v19003_v35, %v19002_v36 }
 0x5e1   : > { %17758 = vmatprep.subr.bf16.mxu0 %v17757_v27  ;;  %v17769_v4 = vpack.c.bf16 %v18998_v50, %v18997_v32  ;;  %v19011_v11 = vpop.permute.xlu0 %19010 }
 0x5e2   : > { %v19006_v2 = vpop.permute.xlu1 %19005  ;;  %v19013_v15 = vunpack.i.h.bf16 %v19011_v11  ;;  %v19012_v60 = vunpack.i.l.bf16 %v19011_v11 }
 0x5e3   : > { %v19008_v58 = vunpack.i.h.bf16 %v19006_v2  ;;  %v19007_v3 = vunpack.i.l.bf16 %v19006_v2 }
 0x5e4   : > { %17760 = vmatpush3.bf16.msra.mxu0 %v17757_v27  ;;  %v17781_v43 = vpack.c.bf16 %v19013_v15, %v19012_v60 }
 0x5e5   : > { %17762 = vmatprep.subr.bf16.mxu0 %v17761_v54  ;;  %v17777_v37 = vpack.c.bf16 %v19008_v58, %v19007_v3  ;;  %v19021_v14 = vpop.permute.xlu0 %19020 }
 0x5e6   : > { %v19016_v38 = vpop.permute.xlu1 %19015  ;;  %v19023_v45 = vunpack.i.h.bf16 %v19021_v14  ;;  %v19022_v51 = vunpack.i.l.bf16 %v19021_v14 }
 0x5e7   : > { %16865 = vmatmul.mubr.msk.f32.vlgmr.msra.gmra.mrb[12].mxu0 %vm4480_vm10, %v4460_v49  ;;  %v19018_v13 = vunpack.i.h.bf16 %v19016_v38  ;;  %v19017_v41 = vunpack.i.l.bf16 %v19016_v38 }
 0x5e8   : > { %17764 = vmatpush3.bf16.msra.mxu0 %v17761_v54  ;;  %16875 = vmatprep.mubr.msk.f32.mxu0 %vm4480_vm10, %v15553_v34  ;;  %v17789_v39 = vpack.c.bf16 %v19023_v45, %v19022_v51  ;;  %v15577_v54 = vld [vmem:[%s19860_s27 + $0x80] sm:$0xff] }
 0x5e9   : > { %17766 = vmatprep.subr.bf16.mxu0 %v17765_v33  ;;  %v17785_v52 = vpack.c.bf16 %v19018_v13, %v19017_v41  ;;  %v19031_v61 = vpop.permute.xlu0 %19030 }
 0x5ea   : > { %v19026_v53 = vpop.permute.xlu1 %19025  ;;  %v19033_v21 = vunpack.i.h.bf16 %v19031_v61  ;;  %v19032_v62 = vunpack.i.l.bf16 %v19031_v61 }
 0x5eb   : > { %v19028_v55 = vunpack.i.h.bf16 %v19026_v53  ;;  %v19027_v56 = vunpack.i.l.bf16 %v19026_v53 }
 0x5ec   : > { %17768 = vmatpush3.bf16.msra.mxu0 %v17765_v33  ;;  %v17797_v42 = vpack.c.bf16 %v19033_v21, %v19032_v62 }
 0x5ed   : > { %17770 = vmatprep.subr.bf16.mxu0 %v17769_v4  ;;  %v17793_v0 = vpack.c.bf16 %v19028_v55, %v19027_v56  ;;  %v19041_v12 = vpop.permute.xlu0 %19040 }
 0x5ee   : > { %v19036_v5 = vpop.permute.xlu1 %19035  ;;  %v19043_v16 = vunpack.i.h.bf16 %v19041_v12  ;;  %v19042_v17 = vunpack.i.l.bf16 %v19041_v12 }
 0x5ef   : > { %16876 = vmatmul.mubr.msk.f32.vlgmr.msra.gmra.mrb[12].mxu0 %vm4480_vm10, %v15554_v7  ;;  %v19038_v8 = vunpack.i.h.bf16 %v19036_v5  ;;  %v19037_v9 = vunpack.i.l.bf16 %v19036_v5 }
 0x5f0   : > { %17772 = vmatpush3.bf16.msra.mxu0 %v17769_v4  ;;  %16886 = vmatprep.mubr.msk.f32.mxu0 %vm4480_vm10, %v15557_v63  ;;  %v17805_v25 = vpack.c.bf16 %v19043_v16, %v19042_v17 }
 0x5f1   : > { %17774 = vmatprep.subr.bf16.mxu0 %v17773_v10  ;;  %v17801_v18 = vpack.c.bf16 %v19038_v8, %v19037_v9  ;;  %v19051_v28 = vpop.permute.xlu0 %19050 }
 0x5f2   : > { %v19046_v20 = vpop.permute.xlu1 %19045  ;;  %v19053_v27 = vunpack.i.h.bf16 %v19051_v28  ;;  %v19052_v46 = vunpack.i.l.bf16 %v19051_v28 }
 0x5f3   : > { %v19048_v48 = vunpack.i.h.bf16 %v19046_v20  ;;  %v19047_v24 = vunpack.i.l.bf16 %v19046_v20 }
 0x5f4   : > { %17776 = vmatpush3.bf16.msra.mxu0 %v17773_v10  ;;  %v17813_v30 = vpack.c.bf16 %v19053_v27, %v19052_v46 }
 0x5f5   : > { %17778 = vmatprep.subr.bf16.mxu0 %v17777_v37  ;;  %v17809_v47 = vpack.c.bf16 %v19048_v48, %v19047_v24 }
 0x5f7   : > { %16887 = vmatmul.mubr.msk.f32.vlgmr.msra.gmra.mrb[12].mxu0 %vm4480_vm10, %v15558_v40 }
 0x5f8   : > { %17780 = vmatpush3.bf16.msra.mxu0 %v17777_v37  ;;  %16897 = vmatprep.mubr.msk.f32.mxu0 %vm4480_vm10, %v15561_v44 }
 0x5f9   : > { %17782 = vmatprep.subr.bf16.mxu0 %v17781_v43 }
 0x5fc   : > { %17784 = vmatpush3.bf16.msra.mxu0 %v17781_v43 }
 0x5fd   : > { %17786 = vmatprep.subr.bf16.mxu0 %v17785_v52 }
 0x5ff   : > { %16898 = vmatmul.mubr.msk.f32.vlgmr.msra.gmra.mrb[12].mxu0 %vm4480_vm10, %v15562_v19 }
 0x600   : > { %17788 = vmatpush3.bf16.msra.mxu0 %v17785_v52  ;;  %16908 = vmatprep.mubr.msk.f32.mxu0 %vm4480_vm10, %v15565_v57 }
 0x601   : > { %17790 = vmatprep.subr.bf16.mxu0 %v17789_v39 }
 0x603   : > { %v5334_v8 = vpop.permute.xlu1 %5333 }
 0x604   : > { %17792 = vmatpush3.bf16.msra.mxu0 %v17789_v39 }
 0x605   : > { %17794 = vmatprep.subr.bf16.mxu0 %v17793_v0 }
 0x607   : > { %16909 = vmatmul.mubr.msk.f32.vlgmr.msra.gmra.mrb[12].mxu0 %vm4480_vm10, %v15566_v6  ;;  %v5339_v6 = vpop.permute.xlu0 %5338 }
 0x608   : > { %17796 = vmatpush3.bf16.msra.mxu0 %v17793_v0  ;;  %16919 = vmatprep.mubr.msk.f32.mxu0 %vm4480_vm10, %v15569_v23 }
 0x609   : > { %17798 = vmatprep.subr.bf16.mxu0 %v17797_v42 }
 0x60c   : > { %17800 = vmatpush3.bf16.msra.mxu0 %v17797_v42 }
 0x60d   : > { %17802 = vmatprep.subr.bf16.mxu0 %v17801_v18 }
 0x60f   : > { %16920 = vmatmul.mubr.msk.f32.vlgmr.msra.gmra.mrb[12].mxu0 %vm4480_vm10, %v15570_v22 }
 0x610   : > { %17804 = vmatpush3.bf16.msra.mxu0 %v17801_v18  ;;  %16930 = vmatprep.mubr.msk.f32.mxu0 %vm4480_vm10, %v15573_v26 }
 0x611   : > { %17806 = vmatprep.subr.bf16.mxu0 %v17805_v25 }
 0x614   : > { %17808 = vmatpush3.bf16.msra.mxu0 %v17805_v25 }
 0x615   : > { %17810 = vmatprep.subr.bf16.mxu0 %v17809_v47 }
 0x617   : > { %16931 = vmatmul.mubr.msk.f32.vlgmr.msra.gmra.mrb[12].mxu0 %vm4480_vm10, %v15574_v29  ;;  %v20564_v29 = vld [vmem:[%s19800_s21] ss:$0 sm:$0xff] }
 0x618   : > { %17812 = vmatpush3.bf16.msra.mxu0 %v17809_v47  ;;  %16941 = vmatprep.mubr.msk.f32.mxu0 %vm4480_vm10, %v15577_v54 }
 0x619   : > { %17814 = vmatprep.subr.bf16.mxu0 %v17813_v30 }
 0x61c   : > { %17816 = vmatpush3.bf16.msra.mxu0 %v17813_v30 }
 0x61f   : > { %16942 = vmatmul.mubr.msk.f32.vlgmr.msra.gmra.mrb[12].mxu0 %vm4480_vm10, %v15578_v31  ;;  %vm4415_vm10 = vcmask 818896  }
 0x69b   : > { %v16829_v49 = vpop.f32.mrb[4].mxu0 }
 0x69c   : > { %4301 = vrot.lane.b32.xlu0 %v16829_v49, %s19728_s3  ;;  %v4036_v50 = vpop.f32.mrb[5].mxu0  ;;  %v4309_v33 = vmul.f32 0.75, %v16829_v49  ;;  %v4326_v34 = vmul.f32 0.25, %v16829_v49 }
 0x69d   : > { %4299 = vrot.lane.b32.xlu1 %v4036_v50, %s19728_s3  ;;  %v4308_v4 = vmul.f32 0.75, %v4036_v50  ;;  %v4325_v2 = vmul.f32 0.25, %v4036_v50  ;;  %s19730_s3 = smov 30  }
 0x69f   : > { %v16834_v32 = vpop.f32.mrb[6].mxu0 }
 0x6a0   : > { %v4311_v59 = vmul.f32 0.25, %v16834_v32  ;;  %v4328_v35 = vmul.f32 0.75, %v16834_v32  ;;  %v4119_v36 = vpop.f32.mrb[7].mxu0 }
 0x6a1   : > { %v4310_v7 = vmul.f32 0.25, %v4119_v36  ;;  %v4327_v58 = vmul.f32 0.75, %v4119_v36 }
 0x6a2   : > { %v4313_v3 = vadd.f32 %v4311_v59, %v4309_v33  ;;  %v4330_v10 = vadd.f32 %v4328_v35, %v4326_v34 }
 0x6a3   : > { %v4312_v63 = vadd.f32 %v4310_v7, %v4308_v4  ;;  %v4329_v11 = vadd.f32 %v4327_v58, %v4325_v2  ;;  %v16839_v15 = vpop.f32.mrb[8].mxu0  ;;  %v15582_v4 = vld [vmem:[%s22119_s14 + $0x10] sm:$0xff] }
 0x6a4   : > { %v4343_v60 = vmul.f32 0.25, %v16839_v15  ;;  %v4358_v37 = vmul.f32 0.75, %v16839_v15  ;;  %4318 = vrot.lane.b32.xlu0 %v4313_v3, %s22061_s28  ;;  %v4202_v38 = vpop.f32.mrb[9].mxu0  ;;  %16948 = vmatprep.mubr.msk.f32.mxu1 %vm2080_vm4, %v15582_v4 }
 0x6a5   : > { %v4342_v40 = vmul.f32 0.25, %v4202_v38  ;;  %v4357_v13 = vmul.f32 0.75, %v4202_v38  ;;  %4316 = vrot.lane.b32.xlu1 %v4312_v63, %s22061_s28  ;;  %s19732_s28 = smov 50  }
 0x6a6   : > { %v4345_v41 = vadd.f32 %v4343_v60, %v4328_v35  ;;  %v4360_v43 = vadd.f32 %v4358_v37, %v4311_v59 }
 0x6a7   : > { %v4344_v44 = vadd.f32 %v4342_v40, %v4327_v58  ;;  %v4359_v14 = vadd.f32 %v4357_v13, %v4310_v7 }
 0x6a8   : > { %4335 = vrot.lane.b32.xlu0 %v4330_v10, %s19730_s3 }
 0x6a9   : > { %4333 = vrot.lane.b32.xlu1 %v4329_v11, %s19730_s3  ;;  %s22067_s3 = smov 70  }
 0x6aa   : > { %v16844_v45 = vpop.f32.mrb[10].mxu0 }
 0x6ab   : > { %v4373_v51 = vmul.f32 0.25, %v16844_v45  ;;  %v4388_v52 = vmul.f32 0.75, %v16844_v45  ;;  %v4285_v53 = vpop.f32.mrb[11].mxu0 }
 0x6ac   : > { %v4372_v19 = vmul.f32 0.25, %v4285_v53  ;;  %v4387_v55 = vmul.f32 0.75, %v4285_v53  ;;  %4350 = vrot.lane.b32.xlu0 %v4345_v41, %s22066_s11  ;;  %v15583_v41 = vld [vmem:[%s22119_s14 + $0x18] sm:$0xff]  ;;  %v15588_v53 = vld [vmem:[%s22119_s14 + $0x20] sm:$0xff] }
 0x6ad   : > { %v4375_v56 = vadd.f32 %v4373_v51, %v4358_v37  ;;  %v4390_v39 = vadd.f32 %v4388_v52, %v4343_v60  ;;  %4348 = vrot.lane.b32.xlu1 %v4344_v44, %s22066_s11  ;;  %v4403_v21 = vadd.f32 %v4388_v52, %v4373_v51  ;;  %s22142_s11 = smov 118   ;;  %v5372_v52 = vld [vmem:[%s22119_s14 + $0x8] sm:$0xff] }
 0x6ae   : > { %v4374_v57 = vadd.f32 %v4372_v19, %v4357_v13  ;;  %v4389_v61 = vadd.f32 %v4387_v55, %v4342_v40  ;;  %v4402_v62 = vadd.f32 %v4387_v55, %v4372_v19 }
 0x6b0   : > { %4365 = vrot.lane.b32.xlu0 %v4360_v43, %s19732_s28  ;;  %v5371_v43 = vld [vmem:[%s22119_s14] sm:$0xff] }
 0x6b1   : > { %4363 = vrot.lane.b32.xlu1 %v4359_v14, %s19732_s28  ;;  %s22141_s28 = smov 117  }
 0x6b4   : > { %4380 = vrot.lane.b32.xlu0 %v4375_v56, %s19733_s1 }
 0x6b5   : > { %4378 = vrot.lane.b32.xlu1 %v4374_v57, %s19733_s1  ;;  %s22140_s1 = sld [smem:[#allocation21_spill]]  ;;  %v15589_v57 = vld [vmem:[%s22119_s14 + $0x28] sm:$0xff] }
 0x6b8   : > { %4395 = vrot.lane.b32.xlu0 %v4390_v39, %s22067_s3 }
 0x6b9   : > { %4393 = vrot.lane.b32.xlu1 %v4389_v61, %s22067_s3  ;;  %s22143_s3 = smov 108   ;;  %v15592_v61 = vld [vmem:[%s22119_s14 + $0x30] sm:$0xff] }
 0x6bb   : > { %v6191_v10 = vld [vmem:[%s22140_s1 + $0x8] sm:$0xff]  ;;  %v6190_v63 = vld [vmem:[%s22140_s1] sm:$0xff]  ;;  %s22146_s1 = sld [smem:[#allocation22_spill]] }
 0x6bc   : > { %4408 = vrot.lane.b32.xlu0 %v4403_v21, %s19735_s4 }
 0x6bd   : > { %4406 = vrot.lane.b32.xlu1 %v4402_v62, %s19735_s4  ;;  %s22139_s4 = smov 11  }
 0x6f2   : > { %v16943_v0 = vpop.f32.mrb[12].mxu0 }
 0x6f3   : > { %v5318_v5 = vpop.f32.mrb[13].mxu0  ;;  %v5342_v47 = vadd.f32 %v16943_v0, %v5339_v6  ;;  %v15593_v6 = vld [vmem:[%s22119_s14 + $0x38] sm:$0xff] }
 0x6f4   : > { %v5341_v30 = vadd.f32 %v5334_v8, %v5318_v5  ;;  %v15596_v8 = vld [vmem:[%s22119_s14 + $0x40] sm:$0xff] }
 0x6f5   : > { %v5350_v54 = vmul.f32 %v20564_v29, %v5342_v47  ;;  %v15605_v47 = vld [vmem:[%s22119_s14 + $0x68] sm:$0xff] }
 0x6f6   : > { %v5349_v31 = vmul.f32 %v20564_v29, %v5341_v30  ;;  %v15608_v30 = vld [vmem:[%s22119_s14 + $0x70] sm:$0xff] }
 0x70e   : > { %v4302_v9 = vpop.permute.xlu0 %4301 }
 0x70f   : > { %4307 = vst.msk [vmem:[#allocation3 + $0x18] sm:$0xff] %vm4305_vm12, %v4302_v9  ;;  %v4300_v42 = vpop.permute.xlu1 %4299 }
 0x710   : > { %4306 = vst.msk [vmem:[#allocation3] sm:$0xff] %vm4305_vm12, %v4300_v42  ;;  %vm8043_vm12 = vcmask 1047704  }
 0x716   : > { %v4319_v23 = vpop.permute.xlu0 %4318 }
 0x717   : > { %4324 = vst.msk [vmem:[#allocation3 + $0x18] sm:$0xff] %vm4322_vm13, %v4319_v23  ;;  %v4317_v12 = vpop.permute.xlu1 %4316 }
 0x718   : > { %4323 = vst.msk [vmem:[#allocation3] sm:$0xff] %vm4322_vm13, %v4317_v12  ;;  %vm8099_vm13 = vcmask 1039360  }
 0x71a   : > { %v4336_v16 = vpop.permute.xlu0 %4335 }
 0x71b   : > { %4341 = vst.msk [vmem:[#allocation3 + $0x18] sm:$0xff] %vm4339_vm14, %v4336_v16  ;;  %v4334_v17 = vpop.permute.xlu1 %4333  ;;  %v15597_v16 = vld [vmem:[%s22119_s14 + $0x48] sm:$0xff] }
 0x71c   : > { %4340 = vst.msk [vmem:[#allocation3] sm:$0xff] %vm4339_vm14, %v4334_v17  ;;  %v15600_v17 = vld [vmem:[%s22119_s14 + $0x50] sm:$0xff]  ;;  %vm22093_vm14 = vcmask 1041408  }
 0x71e   : > { %v4351_v18 = vpop.permute.xlu0 %4350 }
 0x71f   : > { %4356 = vst.msk [vmem:[#allocation3 + $0x18] sm:$0xff] %vm4354_vm15, %v4351_v18  ;;  %v4349_v20 = vpop.permute.xlu1 %4348 }
 0x720   : > { %4355 = vst.msk [vmem:[#allocation3] sm:$0xff] %vm4354_vm15, %v4349_v20  ;;  %vm19737_vm15 = vmmov 1  }
 0x722   : > { %v4366_v22 = vpop.permute.xlu0 %4365 }
 0x723   : > { %4371 = vst.msk [vmem:[#allocation3 + $0x18] sm:$0xff] %vm4369_vm0, %v4366_v22  ;;  %v4364_v48 = vpop.permute.xlu1 %4363 }
 0x724   : > { %4370 = vst.msk [vmem:[#allocation3] sm:$0xff] %vm4369_vm0, %v4364_v48  ;;  %vm20815_vm0 = vmpackc.low %vm22093_vm14, %vm19737_vm15  ;;  %vm9257_vm15 = vcmask 752640   ;;  %vm7778_vm14 = vcmask 589232  }
 0x726   : > { %v4381_v24 = vpop.permute.xlu0 %4380 }
 0x727   : > { %4386 = vst.msk [vmem:[#allocation3 + $0x18] sm:$0xff] %vm4384_vm1, %v4381_v24  ;;  %v4379_v25 = vpop.permute.xlu1 %4378  ;;  %v15601_v24 = vld [vmem:[%s22119_s14 + $0x58] sm:$0xff] }
 0x728   : > { %4385 = vst.msk [vmem:[#allocation3] sm:$0xff] %vm4384_vm1, %v4379_v25  ;;  %v15604_v25 = vld [vmem:[%s22119_s14 + $0x60] sm:$0xff]  ;;  %vm8115_vm1 = vcmask 195584  }
 0x72a   : > { %v4396_v26 = vpop.permute.xlu0 %4395 }
 0x72b   : > { %4401 = vst.msk [vmem:[#allocation3 + $0x18] sm:$0xff] %vm4399_vm2, %v4396_v26  ;;  %v4394_v28 = vpop.permute.xlu1 %4393 }
 0x72c   : > { %4400 = vst.msk [vmem:[#allocation3] sm:$0xff] %vm4399_vm2, %v4394_v28  ;;  %vm8453_vm2 = vcmask 1031168  }
 0x72e   : > { %v4409_v27 = vpop.permute.xlu0 %4408 }
 0x72f   : > { %4414 = vst.msk [vmem:[#allocation3 + $0x18] sm:$0xff] %vm4412_vm9, %v4409_v27  ;;  %v4407_v46 = vpop.permute.xlu1 %4406 }
 0x730   : > { %4417 = vst.msk [vmem:[#allocation3 + $0x18] sm:$0xff] %vm4415_vm10, %v19709_v1 }
 0x731   : > { %4413 = vst.msk [vmem:[#allocation3] sm:$0xff] %vm4412_vm9, %v4407_v46  ;;  %vm8654_vm9 = vcmask 900096  }
 0x732   : > { %4416 = vst.msk [vmem:[#allocation3] sm:$0xff] %vm4415_vm10, %v19709_v1  ;;  %vm9056_vm10 = vcmask 883712  }
 0x737   : > { %v4419_v49 = vld [vmem:[#allocation3 + $0x18] sm:$0xff] }
 0x738   : > { %v20568_v50 = vadd.f32 %v5350_v54, %v4419_v49  ;;  %v15612_v49 = vld [vmem:[%s22119_s14 + $0x80] sm:$0xff]  ;;  %7735 = vst.msk [vmem:[#allocation3 + $0x18] sm:$0xff] %vm22092_vm8, %v19709_v1 }
 0x739   : > { %v4418_v32 = vld [vmem:[#allocation3] sm:$0xff] }
 0x73a   : > { %v20570_v33 = vadd.f32 %v5349_v31, %v4418_v32  ;;  %v5354_v34 = vmax.f32 %v20568_v50, 0.0  ;;  %v15609_v31 = vld [vmem:[%s22119_s14 + $0x78] sm:$0xff]  ;;  %v15613_v32 = vld [vmem:[%s22119_s14 + $0x88] sm:$0xff]  ;;  %s18480_s14 = smul.u32 72, %s19996_s7  ;;  %s22075_s7 = smov 58   ;;  %7734 = vst.msk [vmem:[#allocation3] sm:$0xff] %vm22092_vm8, %v19709_v1 }
 0x73b   : > { %vm7761_vm8 = vcmask 441632  }
 0x73c   : > { %v5353_v59 = vmax.f32 %v20570_v33, 0.0  ;;  %5361 = vrot.lane.b32.xlu0 %v5354_v34, %s22139_s4 }
 0x73e   : > { %5359 = vrot.lane.b32.xlu1 %v5353_v59, %s22139_s4 }
 0x7ae   : > { %v5362_v35 = vpop.permute.xlu0 %5361 }
 0x7af   : > { %5366 = vst.msk [vmem:[#allocation2 + $0x18] sm:$0xff] %vm4445_vm6, %v5362_v35 }
 0x7b0   : > { %v5360_v36 = vpop.permute.xlu1 %5359  ;;  %5368 = vst.msk [vmem:[#allocation2 + $0x18] sm:$0xff] %vm4450_vm7, %v19709_v1 }
 0x7b1   : > { %5365 = vst.msk [vmem:[#allocation2] sm:$0xff] %vm4445_vm6, %v5360_v36 }
 0x7b2   : > { %5367 = vst.msk [vmem:[#allocation2] sm:$0xff] %vm4450_vm7, %v19709_v1 }
 0x7b7   : > { %v5370_v2 = vld [vmem:[#allocation2 + $0x18] sm:$0xff] }
 0x7b8   : > { %6209 = vst.msk [vmem:[#allocation2 + $0x18] sm:$0xff] %vm4424_vm5, %v19709_v1 }
 0x7b9   : > { %v5369_v7 = vld [vmem:[#allocation2] sm:$0xff] }
 0x7ba   : > { %v19059_v58 = vpack.i.bf16 %v5370_v2, %v5369_v7  ;;  %6208 = vst.msk [vmem:[#allocation2] sm:$0xff] %vm4424_vm5, %v19709_v1  ;;  %v17821_v3 = vpack.c.bf16 %v5370_v2, %v5369_v7  ;;  %vm7997_vm5 = vcmask 154624  }
 0x7bb   : > { %8000 = vst.msk [vmem:[#allocation2 + $0x30] sm:$0xff] %vm7997_vm5, %v19709_v1 }
 0x7bc   : > { %19060 = vrot.lane.b32.xlu0 %v19059_v58, %s22131_s26  ;;  %19055 = vrot.lane.b32.xlu1 %v19059_v58, %s22136_s24 }
 0x7c0   : > { %19070 = vrot.lane.b32.xlu0 %v19059_v58, %s22141_s28  ;;  %19065 = vrot.lane.b32.xlu1 %v19059_v58, %s22142_s11 }
 0x7c4   : > { %19080 = vrot.lane.b32.xlu0 %v19059_v58, %s22143_s3  ;;  %19075 = vrot.lane.b32.xlu1 %v19059_v58, %s22134_s5 }
 0x7c8   : > { %19090 = vrot.lane.b32.xlu0 %v19059_v58, %s22144_s6  ;;  %19085 = vrot.lane.b32.xlu1 %v19059_v58, %s22145_s9 }
 0x7cc   : > { %6199 = vperm.xlu0 %18772, %v6191_v10   ;;  %6194 = vperm.xlu1 %18773, %v6190_v63  }
 0x82e   : > { %v19056_v11 = vpop.permute.xlu1 %19055  ;;  %v19061_v37 = vpop.permute.xlu0 %19060 }
 0x82f   : > { %v19058_v15 = vunpack.i.h.bf16 %v19056_v11  ;;  %v19057_v60 = vunpack.i.l.bf16 %v19056_v11  ;;  %v19063_v40 = vunpack.i.h.bf16 %v19061_v37  ;;  %v19062_v13 = vunpack.i.l.bf16 %v19061_v37 }
 0x831   : > { %v17817_v38 = vpack.c.bf16 %v19058_v15, %v19057_v60  ;;  %v17825_v44 = vpack.c.bf16 %v19063_v40, %v19062_v13  ;;  %v15616_v15 = vld [vmem:[%s22146_s1 + $0x10] sm:$0xff]  ;;  %v7044_v13 = vld [vmem:[%s22147_s12 + $0x8] sm:$0xff] }
 0x832   : > { %v19066_v14 = vpop.permute.xlu1 %19065  ;;  %v19071_v55 = vpop.permute.xlu0 %19070 }
 0x833   : > { %17818 = vmatprep.subr.bf16.mxu1 %v17817_v38  ;;  %v19068_v45 = vunpack.i.h.bf16 %v19066_v14  ;;  %v19067_v51 = vunpack.i.l.bf16 %v19066_v14  ;;  %v19073_v56 = vunpack.i.h.bf16 %v19071_v55  ;;  %v19072_v39 = vunpack.i.l.bf16 %v19071_v55 }
 0x834   : > { %17820 = vmatpush3.bf16.msra.mxu1 %v17817_v38 }
 0x835   : > { %17822 = vmatprep.subr.bf16.mxu1 %v17821_v3  ;;  %v17829_v19 = vpack.c.bf16 %v19068_v45, %v19067_v51  ;;  %v17833_v21 = vpack.c.bf16 %v19073_v56, %v19072_v39 }
 0x836   : > { %v19076_v62 = vpop.permute.xlu1 %19075  ;;  %v19081_v42 = vpop.permute.xlu0 %19080 }
 0x837   : > { %16949 = vmatmul.mubr.msk.f32.vlgmr.msra.gmra.mrb[4].mxu1 %vm2080_vm4, %v15583_v41  ;;  %v19078_v0 = vunpack.i.h.bf16 %v19076_v62  ;;  %v19077_v5 = vunpack.i.l.bf16 %v19076_v62  ;;  %v19083_v23 = vunpack.i.h.bf16 %v19081_v42  ;;  %v19082_v12 = vunpack.i.l.bf16 %v19081_v42  ;;  %v7043_v41 = vld [vmem:[%s22147_s12] sm:$0xff]  ;;  %s22153_s12 = smov 58  }
 0x838   : > { %17824 = vmatpush3.bf16.msra.mxu1 %v17821_v3  ;;  %16955 = vmatprep.mubr.msk.f32.mxu1 %vm2080_vm4, %v5371_v43 }
 0x839   : > { %17826 = vmatprep.subr.bf16.mxu1 %v17825_v44  ;;  %v17837_v9 = vpack.c.bf16 %v19078_v0, %v19077_v5  ;;  %v17841_v18 = vpack.c.bf16 %v19083_v23, %v19082_v12  ;;  %v15617_v5 = vld [vmem:[%s22146_s1 + $0x18] sm:$0xff]  ;;  %v6225_v12 = vld [vmem:[%s22146_s1 + $0x8] sm:$0xff] }
 0x83a   : > { %v19086_v20 = vpop.permute.xlu1 %19085  ;;  %v19091_v28 = vpop.permute.xlu0 %19090 }
 0x83b   : > { %v19088_v22 = vunpack.i.h.bf16 %v19086_v20  ;;  %v19087_v48 = vunpack.i.l.bf16 %v19086_v20  ;;  %v19093_v27 = vunpack.i.h.bf16 %v19091_v28  ;;  %v19092_v46 = vunpack.i.l.bf16 %v19091_v28 }
 0x83d   : > { %v17845_v26 = vpack.c.bf16 %v19088_v22, %v19087_v48  ;;  %v17849_v54 = vpack.c.bf16 %v19093_v27, %v19092_v46  ;;  %v15623_v48 = vld [vmem:[%s22146_s1 + $0x28] sm:$0xff]  ;;  %v15627_v46 = vld [vmem:[%s22146_s1 + $0x38] sm:$0xff] }
 0x83f   : > { %16956 = vmatmul.mubr.msk.f32.vlgmr.msra.gmra.mrb[4].mxu1 %vm2080_vm4, %v5372_v52 }
 0x840   : > { %17828 = vmatpush3.bf16.msra.mxu1 %v17825_v44  ;;  %16962 = vmatprep.mubr.msk.f32.mxu1 %vm2080_vm4, %v15588_v53 }
 0x841   : > { %17830 = vmatprep.subr.bf16.mxu1 %v17829_v19 }
 0x847   : > { %16963 = vmatmul.mubr.msk.f32.vlgmr.msra.gmra.mrb[4].mxu1 %vm2080_vm4, %v15589_v57 }
 0x848   : > { %17832 = vmatpush3.bf16.msra.mxu1 %v17829_v19  ;;  %16969 = vmatprep.mubr.msk.f32.mxu1 %vm2080_vm4, %v15592_v61 }
 0x849   : > { %17834 = vmatprep.subr.bf16.mxu1 %v17833_v21 }
 0x84b   : > { %v6200_v34 = vpop.permute.xlu0 %6199  ;;  %v6195_v35 = vpop.permute.xlu1 %6194 }
 0x84f   : > { %16970 = vmatmul.mubr.msk.f32.vlgmr.msra.gmra.mrb[4].mxu1 %vm2080_vm4, %v15593_v6  ;;  %v6224_v6 = vld [vmem:[%s22146_s1] sm:$0xff] }
 0x850   : > { %17836 = vmatpush3.bf16.msra.mxu1 %v17833_v21  ;;  %16976 = vmatprep.mubr.msk.f32.mxu1 %vm2080_vm4, %v15596_v8 }
 0x851   : > { %17838 = vmatprep.subr.bf16.mxu1 %v17837_v9 }
 0x857   : > { %16977 = vmatmul.mubr.msk.f32.vlgmr.msra.gmra.mrb[4].mxu1 %vm2080_vm4, %v15597_v16  ;;  %v15622_v16 = vld [vmem:[%s22146_s1 + $0x20] sm:$0xff] }
 0x858   : > { %17840 = vmatpush3.bf16.msra.mxu1 %v17837_v9  ;;  %16983 = vmatprep.mubr.msk.f32.mxu1 %vm2080_vm4, %v15600_v17 }
 0x859   : > { %17842 = vmatprep.subr.bf16.mxu1 %v17841_v18 }
 0x85f   : > { %16984 = vmatmul.mubr.msk.f32.vlgmr.msra.gmra.mrb[4].mxu1 %vm2080_vm4, %v15601_v24  ;;  %v15626_v24 = vld [vmem:[%s22146_s1 + $0x30] sm:$0xff] }
 0x860   : > { %17844 = vmatpush3.bf16.msra.mxu1 %v17841_v18  ;;  %16990 = vmatprep.mubr.msk.f32.mxu1 %vm2080_vm4, %v15604_v25 }
 0x861   : > { %17846 = vmatprep.subr.bf16.mxu1 %v17845_v26 }
 0x867   : > { %16991 = vmatmul.mubr.msk.f32.vlgmr.msra.gmra.mrb[4].mxu1 %vm2080_vm4, %v15605_v47  ;;  %v15630_v47 = vld [vmem:[%s22146_s1 + $0x40] sm:$0xff] }
 0x868   : > { %17848 = vmatpush3.bf16.msra.mxu1 %v17845_v26  ;;  %16997 = vmatprep.mubr.msk.f32.mxu1 %vm2080_vm4, %v15608_v30 }
 0x869   : > { %17850 = vmatprep.subr.bf16.mxu1 %v17849_v54 }
 0x86f   : > { %16998 = vmatmul.mubr.msk.f32.vlgmr.msra.gmra.mrb[4].mxu1 %vm2080_vm4, %v15609_v31 }
 0x870   : > { %17852 = vmatpush3.bf16.msra.mxu1 %v17849_v54  ;;  %17004 = vmatprep.mubr.msk.f32.mxu1 %vm2080_vm4, %v15612_v49 }
 0x877   : > { %17005 = vmatmul.mubr.msk.f32.vlgmr.msra.gmra.mrb[4].mxu1 %vm2080_vm4, %v15613_v32  ;;  %v15631_v32 = vld [vmem:[%s22146_s1 + $0x48] sm:$0xff] }
 0x878   : > { %17011 = vmatprep.mubr.msk.f32.mxu1 %vm2080_vm4, %v15616_v15  ;;  %v15642_v15 = vld [vmem:[%s22146_s1 + $0x70] sm:$0xff] }
 0x94a   : > { %v17006_v59 = vpop.f32.mrb[4].mxu1 }
 0x94b   : > { %v6203_v36 = vadd.f32 %v17006_v59, %v6200_v34  ;;  %v6179_v4 = vpop.f32.mrb[5].mxu1  ;;  %v15634_v34 = vld [vmem:[%s22146_s1 + $0x50] sm:$0xff] }
 0x94c   : > { %v6202_v2 = vadd.f32 %v6195_v35, %v6179_v4 }
 0x94d   : > { %v6205_v7 = vmul.f32 %v20564_v29, %v6203_v36 }
 0x94e   : > { %v6204_v58 = vmul.f32 %v20564_v29, %v6202_v2  ;;  %v15635_v2 = vld [vmem:[%s22146_s1 + $0x58] sm:$0xff] }
 0x94f   : > { %v6207_v3 = vmax.f32 %v6205_v7, 0.0  ;;  %v15638_v7 = vld [vmem:[%s22146_s1 + $0x60] sm:$0xff] }
 0x950   : > { %v6206_v10 = vmax.f32 %v6204_v58, 0.0 }
 0x951   : > { %6214 = vrot.lane.b32.xlu0 %v6207_v3, %s22139_s4 }
 0x952   : > { %6212 = vrot.lane.b32.xlu1 %v6206_v10, %s22139_s4  ;;  %s22148_s4 = sld [smem:[#allocation10_spill]] }
 0x9c3   : > { %v6215_v63 = vpop.permute.xlu0 %6214 }
 0x9c4   : > { %6219 = vst.msk [vmem:[#allocation2 + $0x18] sm:$0xff] %vm4445_vm6, %v6215_v63  ;;  %v6213_v11 = vpop.permute.xlu1 %6212 }
 0x9c5   : > { %6221 = vst.msk [vmem:[#allocation2 + $0x18] sm:$0xff] %vm4450_vm7, %v19709_v1 }
 0x9c6   : > { %6218 = vst.msk [vmem:[#allocation2] sm:$0xff] %vm4445_vm6, %v6213_v11  ;;  %v15639_v11 = vld [vmem:[%s22146_s1 + $0x68] sm:$0xff]  ;;  %vm8046_vm6 = vcmask 711680  }
 0x9c7   : > { %6220 = vst.msk [vmem:[#allocation2] sm:$0xff] %vm4450_vm7, %v19709_v1  ;;  %vm8054_vm7 = vcmask 868024  }
 0x9cc   : > { %v6223_v60 = vld [vmem:[#allocation2 + $0x18] sm:$0xff] }
 0x9cd   : > { %7999 = vst.msk [vmem:[#allocation2 + $0x18] sm:$0xff] %vm7997_vm5, %v19709_v1 }
 0x9ce   : > { %v6222_v37 = vld [vmem:[#allocation2] sm:$0xff] }
 0x9cf   : > { %v19099_v38 = vpack.i.bf16 %v6223_v60, %v6222_v37  ;;  %v17857_v40 = vpack.c.bf16 %v6223_v60, %v6222_v37  ;;  %7998 = vst.msk [vmem:[#allocation2] sm:$0xff] %vm7997_vm5, %v19709_v1 }
 0x9d1   : > { %19100 = vrot.lane.b32.xlu0 %v19099_v38, %s22131_s26  ;;  %19095 = vrot.lane.b32.xlu1 %v19099_v38, %s22136_s24 }
 0x9d5   : > { %19110 = vrot.lane.b32.xlu0 %v19099_v38, %s22141_s28  ;;  %19105 = vrot.lane.b32.xlu1 %v19099_v38, %s22142_s11  ;;  %s22073_s28 = smov 19  }
 0x9d9   : > { %19120 = vrot.lane.b32.xlu0 %v19099_v38, %s22143_s3  ;;  %19115 = vrot.lane.b32.xlu1 %v19099_v38, %s22134_s5  ;;  %s970_s5 = scalar_lea.vmem %s22148_s4, %s18480_s14  ;;  %s22150_s14 = sld [smem:[#allocation12_spill]] }
 0x9da   : > { %v7989_v43 = vld [vmem:[%s970_s5 + $0x8] sm:$0xff]  ;;  %v7990_v44 = vld [vmem:[%s970_s5 + $0x10] sm:$0xff]  ;;  %v7992_v14 = vld [vmem:[%s970_s5 + $0x20] sm:$0xff]  ;;  %s19739_s4 = smov 98  }
 0x9db   : > { %v7993_v45 = vld [vmem:[%s970_s5 + $0x28] sm:$0xff]  ;;  %v7988_v51 = vld [vmem:[%s970_s5] sm:$0xff]  ;;  %v7991_v52 = vld [vmem:[%s970_s5 + $0x18] sm:$0xff] }
 0x9dc   : > { %v7996_v53 = vld [vmem:[%s970_s5 + $0x40] sm:$0xff]  ;;  %v7995_v19 = vld [vmem:[%s970_s5 + $0x38] sm:$0xff]  ;;  %v7994_v55 = vld [vmem:[%s970_s5 + $0x30] sm:$0xff]  ;;  %s22089_s5 = smov 88  }
 0x9dd   : > { %19130 = vrot.lane.b32.xlu0 %v19099_v38, %s22144_s6  ;;  %19125 = vrot.lane.b32.xlu1 %v19099_v38, %s22145_s9  ;;  %s22149_s9 = smov 110  }
 0x9e1   : > { %7052 = vperm.xlu0 %18772, %v7044_v13   ;;  %7047 = vperm.xlu1 %18773, %v7043_v41   ;;  %v15646_v13 = vld [vmem:[%s22146_s1 + $0x80] sm:$0xff] }
 0x9e5   : > { %8012 = vrot.lane.b32.xlu1 %v7989_v43, %s22073_s28  ;;  %8014 = vrot.lane.b32.xlu0 %v7990_v44, %s22073_s28 }
 0x9e9   : > { %8018 = vrot.lane.b32.xlu1 %v7992_v14, %s22073_s28  ;;  %8020 = vrot.lane.b32.xlu0 %v7993_v45, %s22073_s28 }
 0x9ed   : > { %8010 = vrot.lane.b32.xlu1 %v7988_v51, %s22073_s28  ;;  %8016 = vrot.lane.b32.xlu0 %v7991_v52, %s22073_s28  ;;  %v15647_v52 = vld [vmem:[%s22146_s1 + $0x88] sm:$0xff] }
 0x9f1   : > { %8026 = vrot.lane.b32.xlu0 %v7996_v53, %s22073_s28  ;;  %8024 = vrot.lane.b32.xlu1 %v7995_v19, %s22073_s28 }
 0x9f5   : > { %8022 = vrot.lane.b32.xlu1 %v7994_v55, %s22073_s28  ;;  %s19741_s28 = smov 78  }
 0xa43   : > { %v19096_v56 = vpop.permute.xlu1 %19095  ;;  %v19101_v61 = vpop.permute.xlu0 %19100 }
 0xa44   : > { %v19098_v39 = vunpack.i.h.bf16 %v19096_v56  ;;  %v19097_v57 = vunpack.i.l.bf16 %v19096_v56  ;;  %v19103_v62 = vunpack.i.h.bf16 %v19101_v61  ;;  %v19102_v0 = vunpack.i.l.bf16 %v19101_v61 }
 0xa46   : > { %v17853_v21 = vpack.c.bf16 %v19098_v39, %v19097_v57  ;;  %v17861_v8 = vpack.c.bf16 %v19103_v62, %v19102_v0 }
 0xa47   : > { %v19106_v9 = vpop.permute.xlu1 %19105  ;;  %v19111_v18 = vpop.permute.xlu0 %19110 }
 0xa48   : > { %17854 = vmatprep.subr.bf16.mxu1 %v17853_v21  ;;  %v19108_v42 = vunpack.i.h.bf16 %v19106_v9  ;;  %v19107_v23 = vunpack.i.l.bf16 %v19106_v9  ;;  %v19113_v20 = vunpack.i.h.bf16 %v19111_v18  ;;  %v19112_v22 = vunpack.i.l.bf16 %v19111_v18 }
 0xa49   : > { %17856 = vmatpush3.bf16.msra.mxu1 %v17853_v21 }
 0xa4a   : > { %17858 = vmatprep.subr.bf16.mxu1 %v17857_v40  ;;  %v17865_v17 = vpack.c.bf16 %v19108_v42, %v19107_v23  ;;  %v17869_v25 = vpack.c.bf16 %v19113_v20, %v19112_v22 }
 0xa4b   : > { %v19116_v26 = vpop.permute.xlu1 %19115  ;;  %v19121_v54 = vpop.permute.xlu0 %19120 }
 0xa4c   : > { %17012 = vmatmul.mubr.msk.f32.vlgmr.msra.gmra.mrb[6].mxu1 %vm2080_vm4, %v15617_v5  ;;  %v19118_v28 = vunpack.i.h.bf16 %v19116_v26  ;;  %v19117_v27 = vunpack.i.l.bf16 %v19116_v26  ;;  %v19123_v31 = vunpack.i.h.bf16 %v19121_v54  ;;  %v19122_v49 = vunpack.i.l.bf16 %v19121_v54 }
 0xa4d   : > { %17860 = vmatpush3.bf16.msra.mxu1 %v17857_v40  ;;  %17018 = vmatprep.mubr.msk.f32.mxu1 %vm2080_vm4, %v6224_v6  ;;  %v15643_v40 = vld [vmem:[%s22146_s1 + $0x78] sm:$0xff]  ;;  %s19743_s1 = smov 48  }
 0xa4e   : > { %17862 = vmatprep.subr.bf16.mxu1 %v17861_v8  ;;  %v17873_v30 = vpack.c.bf16 %v19118_v28, %v19117_v27  ;;  %v17877_v59 = vpack.c.bf16 %v19123_v31, %v19122_v49 }
 0xa4f   : > { %v19126_v35 = vpop.permute.xlu1 %19125  ;;  %v19131_v3 = vpop.permute.xlu0 %19130 }
 0xa50   : > { %v19128_v36 = vunpack.i.h.bf16 %v19126_v35  ;;  %v19127_v4 = vunpack.i.l.bf16 %v19126_v35  ;;  %v19133_v10 = vunpack.i.h.bf16 %v19131_v3  ;;  %v19132_v63 = vunpack.i.l.bf16 %v19131_v3 }
 0xa52   : > { %v17881_v58 = vpack.c.bf16 %v19128_v36, %v19127_v4  ;;  %v17885_v60 = vpack.c.bf16 %v19133_v10, %v19132_v63 }
 0xa54   : > { %17019 = vmatmul.mubr.msk.f32.vlgmr.msra.gmra.mrb[6].mxu1 %vm2080_vm4, %v6225_v12 }
 0xa55   : > { %17864 = vmatpush3.bf16.msra.mxu1 %v17861_v8  ;;  %17025 = vmatprep.mubr.msk.f32.mxu1 %vm2080_vm4, %v15622_v16 }
 0xa56   : > { %17866 = vmatprep.subr.bf16.mxu1 %v17865_v17 }
 0xa5c   : > { %17026 = vmatmul.mubr.msk.f32.vlgmr.msra.gmra.mrb[6].mxu1 %vm2080_vm4, %v15623_v48 }
 0xa5d   : > { %17868 = vmatpush3.bf16.msra.mxu1 %v17865_v17  ;;  %17032 = vmatprep.mubr.msk.f32.mxu1 %vm2080_vm4, %v15626_v24 }
 0xa5e   : > { %17870 = vmatprep.subr.bf16.mxu1 %v17869_v25 }
 0xa60   : > { %v20699_v37 = vpop.permute.xlu0 %7052  ;;  %v20701_v38 = vpop.permute.xlu1 %7047 }
 0xa64   : > { %17033 = vmatmul.mubr.msk.f32.vlgmr.msra.gmra.mrb[6].mxu1 %vm2080_vm4, %v15627_v46  ;;  %v8013_v41 = vpop.permute.xlu1 %8012  ;;  %v8015_v43 = vpop.permute.xlu0 %8014 }
 0xa65   : > { %17872 = vmatpush3.bf16.msra.mxu1 %v17869_v25  ;;  %17039 = vmatprep.mubr.msk.f32.mxu1 %vm2080_vm4, %v15630_v47  ;;  %v8029_v44 = vsel %vm7997_vm5, %v8013_v41, %v8015_v43 }
 0xa66   : > { %17874 = vmatprep.subr.bf16.mxu1 %v17873_v30  ;;  %8047 = vst.msk [vmem:[#allocation2 + $0x10] sm:$0xff] %vm8046_vm6, %v8029_v44 }
 0xa67   : > { %8055 = vst.msk [vmem:[#allocation2 + $0x10] sm:$0xff] %vm8054_vm7, %v19709_v1 }
 0xa68   : > { %v8019_v14 = vpop.permute.xlu1 %8018  ;;  %v8021_v45 = vpop.permute.xlu0 %8020 }
 0xa69   : > { %v8031_v51 = vsel %vm7997_vm5, %v8019_v14, %v8021_v45 }
 0xa6a   : > { %8050 = vst.msk [vmem:[#allocation2 + $0x28] sm:$0xff] %vm8046_vm6, %v8031_v51 }
 0xa6b   : > { %8056 = vst.msk [vmem:[#allocation2 + $0x28] sm:$0xff] %vm8054_vm7, %v19709_v1 }
 0xa6c   : > { %17040 = vmatmul.mubr.msk.f32.vlgmr.msra.gmra.mrb[6].mxu1 %vm2080_vm4, %v15631_v32  ;;  %v8011_v53 = vpop.permute.xlu1 %8010  ;;  %v8017_v19 = vpop.permute.xlu0 %8016  ;;  %v7061_v32 = vld [vmem:[%s22150_s14] sm:$0xff] }
 0xa6d   : > { %17876 = vmatpush3.bf16.msra.mxu1 %v17873_v30  ;;  %17046 = vmatprep.mubr.msk.f32.mxu1 %vm2080_vm4, %v15634_v34  ;;  %v20717_v55 = vsel %vm7997_vm5, %v8011_v53, %v8013_v41  ;;  %8044 = vst.msk [vmem:[#allocation2] sm:$0xff] %vm8043_vm12, %v8011_v53  ;;  %8048 = vst.msk [vmem:[#allocation2 + $0x18] sm:$0xff] %vm8043_vm12, %v8017_v19  ;;  %v20729_v57 = vsel %vm7997_vm5, %v8017_v19, %v8019_v14  ;;  %v7062_v34 = vld [vmem:[%s22150_s14 + $0x8] sm:$0x3]  ;;  %s22165_s14 = sld [smem:[#allocation26_spill]] }
 0xa6e   : > { %17878 = vmatprep.subr.bf16.mxu1 %v17877_v59  ;;  %v20722_v56 = vld [vmem:[#allocation2 + $0x10] sm:$0xff]  ;;  %v17945_v17 = vpack.c.bf16 %v20729_v57, %v20717_v55  ;;  %v20811_v36 = vpack.c.bf16 %v7062_v34, %v7061_v32 }
 0xa6f   : > { %v20726_v39 = vpack.i.bf16 %v20722_v56, %v20717_v55 }
 0xa70   : > { %v8027_v61 = vpop.permute.xlu0 %8026  ;;  %v8025_v21 = vpop.permute.xlu1 %8024  ;;  %17891 = vmatprep.subr.msk.bf16.mxu0 %vm20815_vm0, %v20811_v36 }
 0xa71   : > { %v8033_v62 = vsel %vm7997_vm5, %v8025_v21, %v8027_v61  ;;  %19135 = vrot.lane.b32.xlu0 %v20726_v39, %s22136_s24  ;;  %17894 = vmatpush3.bf16.msk.msra.mxu0 %vm20815_vm0, %v20811_v36 }
 0xa72   : > { %8053 = vst.msk [vmem:[#allocation2 + $0x40] sm:$0xff] %vm8046_vm6, %v8033_v62  ;;  %v20735_v0 = vld [vmem:[#allocation2 + $0x28] sm:$0xff]  ;;  %17897 = vmatprep.subr.msk.bf16.mxu0 %vm20815_vm0, %v20811_v36 }
 0xa73   : > { %8057 = vst.msk [vmem:[#allocation2 + $0x40] sm:$0xff] %vm8054_vm7, %v19709_v1  ;;  %v20741_v5 = vpack.i.bf16 %v20735_v0, %v20729_v57 }
 0xa74   : > { %17047 = vmatmul.mubr.msk.f32.vlgmr.msra.gmra.mrb[6].mxu1 %vm2080_vm4, %v15635_v2  ;;  %v8023_v6 = vpop.permute.xlu1 %8022  ;;  %v20743_v8 = vld [vmem:[#allocation2] sm:$0xff]  ;;  %v20745_v9 = vld [vmem:[#allocation2 + $0x18] sm:$0xff] }
 0xa75   : > { %17880 = vmatpush3.bf16.msra.mxu1 %v17877_v59  ;;  %17053 = vmatprep.mubr.msk.f32.mxu1 %vm2080_vm4, %v15638_v7  ;;  %v20748_v42 = vsel %vm7997_vm5, %v8023_v6, %v8025_v21  ;;  %8051 = vst.msk [vmem:[#allocation2 + $0x30] sm:$0xff] %vm8043_vm12, %v8023_v6  ;;  %v20783_v16 = vpack.i.bf16 %v20745_v9, %v20743_v8 }
 0xa76   : > { %17882 = vmatprep.subr.bf16.mxu1 %v17881_v58  ;;  %19140 = vrot.lane.b32.xlu1 %v20741_v5, %s22136_s24  ;;  %9891 = vst.msk [vmem:[#allocation2] sm:$0xff] %vm7997_vm5, %v19709_v1  ;;  %9892 = vst.msk [vmem:[#allocation2 + $0x18] sm:$0xff] %vm7997_vm5, %v19709_v1  ;;  %v17947_v18 = vpack.c.bf16 %v20745_v9, %v20743_v8 }
 0xa7a   : > { %8095 = vrot.lane.b32.xlu1 %v20748_v42, %s22136_s24  ;;  %v20759_v23 = vld [vmem:[#allocation2 + $0x40] sm:$0xff] }
 0xa7b   : > { %8097 = vrot.lane.b32.xlu0 %v20759_v23, %s22136_s24 }
 0xa7c   : > { %17054 = vmatmul.mubr.msk.f32.vlgmr.msra.gmra.mrb[6].mxu1 %vm2080_vm4, %v15639_v11  ;;  %v20763_v12 = vld [vmem:[#allocation2 + $0x30] sm:$0xff] }
 0xa7d   : > { %17884 = vmatpush3.bf16.msra.mxu1 %v17881_v58  ;;  %17060 = vmatprep.mubr.msk.f32.mxu1 %vm2080_vm4, %v15642_v15 }
 0xa7e   : > { %17886 = vmatprep.subr.bf16.mxu1 %v17885_v60  ;;  %19150 = vrot.lane.b32.xlu1 %v20741_v5, %s22131_s26 }
 0xa7f   : > { %8093 = vrot.lane.b32.xlu0 %v20763_v12, %s22136_s24 }
 0xa82   : > { %8449 = vrot.lane.b32.xlu1 %v20748_v42, %s22131_s26 }
 0xa83   : > { %19145 = vrot.lane.b32.xlu0 %v20726_v39, %s22131_s26 }
 0xa84   : > { %17061 = vmatmul.mubr.msk.f32.vlgmr.msra.gmra.mrb[6].mxu1 %vm2080_vm4, %v15643_v40 }
 0xa85   : > { %17888 = vmatpush3.bf16.msra.mxu1 %v17885_v60  ;;  %17067 = vmatprep.mubr.msk.f32.mxu1 %vm2080_vm4, %v15646_v13 }
 0xa86   : > { %8447 = vrot.lane.b32.xlu1 %v20763_v12, %s22131_s26  ;;  %17927 = vmatprep.subr.msk.bf16.mxu1 %vm20815_vm0, %v20811_v36 }
 0xa87   : > { %8451 = vrot.lane.b32.xlu0 %v20759_v23, %s22131_s26 }
 0xa8a   : > { %19160 = vrot.lane.b32.xlu1 %v20741_v5, %s22149_s9 }
 0xa8b   : > { %19155 = vrot.lane.b32.xlu0 %v20726_v39, %s22149_s9 }
 0xa8c   : > { %17068 = vmatmul.mubr.msk.f32.vlgmr.msra.gmra.mrb[6].mxu1 %vm2080_vm4, %v15647_v52 }
 0xa8d   : > { %17930 = vmatpush3.bf16.msk.msra.mxu1 %vm20815_vm0, %v20811_v36 }
 0xa8f   : > { %19165 = vrot.lane.b32.xlu0 %v20783_v16, %s22136_s24 }
 0xa93   : > { %19170 = vrot.lane.b32.xlu0 %v20783_v16, %s22131_s26 }
 0xae3   : > { %v19136_v20 = vpop.permute.xlu0 %19135 }
 0xae4   : > { %v19137_v27 = vunpack.i.l.bf16 %v19136_v20  ;;  %v19138_v47 = vunpack.i.h.bf16 %v19136_v20 }
 0xae6   : > { %v8101_v4 = vsel %vm8099_vm13, %v19137_v27, %v19138_v47 }
 0xae8   : > { %v19141_v28 = vpop.permute.xlu1 %19140 }
 0xae9   : > { %v19142_v46 = vunpack.i.l.bf16 %v19141_v28  ;;  %v19143_v54 = vunpack.i.h.bf16 %v19141_v28 }
 0xaeb   : > { %v8103_v7 = vsel %vm8099_vm13, %v19142_v46, %v19143_v54  ;;  %v20828_v10 = vpack.c.bf16 %v19143_v54, %v19138_v47 }
 0xaec   : > { %v17937_v3 = vpack.c.bf16 %v8103_v7, %v8101_v4 }
 0xaed   : > { %v20793_v22 = vpop.permute.xlu0 %8097 }
 0xaee   : > { %17938 = vmatprep.subr.bf16.mxu1 %v17937_v3 }
 0xaf1   : > { %v20795_v48 = vpop.permute.xlu0 %8093 }
 0xaf5   : > { %v20797_v24 = vpop.permute.xlu0 %19145 }
 0xaf6   : > { %v19148_v54 = vunpack.i.h.bf16 %v20797_v24 }
 0xaf9   : > { %v20799_v25 = vpop.permute.xlu0 %8451 }
 0xafd   : > { %v20801_v26 = vpop.permute.xlu0 %19155 }
 0xafe   : > { %v19158_v55 = vunpack.i.h.bf16 %v20801_v26  ;;  %v19157_v57 = vunpack.i.l.bf16 %v20801_v26 }
 0xb01   : > { %v19166_v30 = vpop.permute.xlu0 %19165 }
 0xb02   : > { %v19168_v31 = vunpack.i.h.bf16 %v19166_v30  ;;  %v19167_v49 = vunpack.i.l.bf16 %v19166_v30 }
 0xb04   : > { %v20806_v59 = vsel %vm8099_vm13, %v19168_v31, %v19142_v46  ;;  %v20809_v35 = vsel %vm8099_vm13, %v19167_v49, %v19137_v27  ;;  %v19147_v49 = vunpack.i.l.bf16 %v20797_v24 }
 0xb05   : > { %v17939_v58 = vpack.c.bf16 %v20806_v59, %v20809_v35  ;;  %v20933_v45 = vpop.permute.xlu0 %19170 }
 0xb06   : > { %v19173_v35 = vunpack.i.h.bf16 %v20933_v45  ;;  %v19172_v4 = vunpack.i.l.bf16 %v20933_v45 }
 0xb08   : > { %v8454_v8 = vsel %vm8453_vm2, %v19172_v4, %v19147_v49 }
 0xb5f   : > { %v17069_v63 = vpop.f32.mrb[6].mxu1 }
 0xb60   : > { %v7056_v11 = vadd.f32 %v17069_v63, %v20699_v37  ;;  %v7032_v15 = vpop.f32.mrb[7].mxu1 }
 0xb61   : > { %v7055_v60 = vadd.f32 %v20701_v38, %v7032_v15 }
 0xb62   : > { %v7058_v40 = vmul.f32 %v20564_v29, %v7056_v11 }
 0xb63   : > { %v7057_v41 = vmul.f32 %v20564_v29, %v7055_v60  ;;  %v20909_v29 = vpop.permute.xlu1 %8095 }
 0xb64   : > { %v7060_v13 = vadd.f32 %v7058_v40, %v20568_v50  ;;  %v8105_v46 = vsel %vm8099_vm13, %v20909_v29, %v20793_v22  ;;  %v8104_v59 = vsel %vm8099_vm13, %v20795_v48, %v20909_v29  ;;  %v17949_v29 = vpack.c.bf16 %v20735_v0, %v20722_v56 }
 0xb65   : > { %v7059_v43 = vadd.f32 %v7057_v41, %v20570_v33 }
 0xb66   : > { %7569 = vrot.lane.b32.xlu0 %v7060_v13, %s22075_s7  ;;  %7067 = vrot.lane.b32.xlu1 %v7060_v13, %s22142_s11  ;;  %s19742_s7 = smov 68  }
 0xb67   : > { %v20915_v50 = vpop.permute.xlu1 %19150 }
 0xb68   : > { %v19153_v32 = vunpack.i.h.bf16 %v20915_v50  ;;  %v19152_v34 = vunpack.i.l.bf16 %v20915_v50 }
 0xb6a   : > { %7154 = vrot.lane.b32.xlu1 %v7060_v13, %s22143_s3  ;;  %7065 = vrot.lane.b32.xlu0 %v7059_v43, %s22142_s11  ;;  %s22085_s11 = smov 109   ;;  %v8457_v2 = vsel %vm8453_vm2, %v19152_v34, %v19153_v32 }
 0xb6b   : > { %v20924_v37 = vpop.permute.xlu1 %8449 }
 0xb6e   : > { %7237 = vrot.lane.b32.xlu1 %v7060_v13, %s19739_s4  ;;  %7152 = vrot.lane.b32.xlu0 %v7059_v43, %s22143_s3 }
 0xb6f   : > { %v20929_v44 = vpop.permute.xlu1 %8447 }
 0xb72   : > { %7320 = vrot.lane.b32.xlu1 %v7060_v13, %s22089_s5  ;;  %7235 = vrot.lane.b32.xlu0 %v7059_v43, %s19739_s4  ;;  %s22087_s4 = smov 90  }
 0xb73   : > { %v20931_v14 = vpop.permute.xlu1 %19160 }
 0xb74   : > { %v19163_v3 = vunpack.i.h.bf16 %v20931_v14  ;;  %v19162_v63 = vunpack.i.l.bf16 %v20931_v14 }
 0xb76   : > { %7403 = vrot.lane.b32.xlu1 %v7060_v13, %s19741_s28  ;;  %7318 = vrot.lane.b32.xlu0 %v7059_v43, %s22089_s5  ;;  %s22156_s5 = smov 70  }
 0xb7a   : > { %7486 = vrot.lane.b32.xlu1 %v7060_v13, %s19742_s7  ;;  %7401 = vrot.lane.b32.xlu0 %v7059_v43, %s19741_s28  ;;  %s22154_s28 = sld [smem:[#allocation25_spill]] }
 0xb7e   : > { %7652 = vrot.lane.b32.xlu1 %v7060_v13, %s19743_s1  ;;  %7567 = vrot.lane.b32.xlu0 %v7059_v43, %s22153_s12 }
 0xb80   : > { %v9839_v33 = vld [vmem:[%s22154_s28] sm:$0xff]  ;;  %v9840_v38 = vld [vmem:[%s22154_s28 + $0x8] sm:$0xff] }
 0xb82   : > { %7484 = vrot.lane.b32.xlu1 %v7059_v43, %s19742_s7  ;;  %19175 = vrot.lane.b32.xlu0 %v20783_v16, %s22149_s9  ;;  %s22079_s7 = smov 91  }
 0xb86   : > { %8650 = vrot.lane.b32.xlu1 %v20748_v42, %s22149_s9  ;;  %8652 = vrot.lane.b32.xlu0 %v20759_v23, %s22149_s9 }
 0xb8a   : > { %7650 = vrot.lane.b32.xlu1 %v7059_v43, %s19743_s1  ;;  %19180 = vrot.lane.b32.xlu0 %v20726_v39, %s22085_s11  ;;  %s22083_s1 = smov 92  }
 0xb8e   : > { %8648 = vrot.lane.b32.xlu1 %v20763_v12, %s22149_s9  ;;  %19190 = vrot.lane.b32.xlu0 %v20783_v16, %s22085_s11 }
 0xb92   : > { %19185 = vrot.lane.b32.xlu1 %v20741_v5, %s22085_s11  ;;  %8853 = vrot.lane.b32.xlu0 %v20759_v23, %s22085_s11 }
 0xb96   : > { %8851 = vrot.lane.b32.xlu1 %v20748_v42, %s22085_s11  ;;  %19195 = vrot.lane.b32.xlu0 %v20726_v39, %s22143_s3 }
 0xb9a   : > { %8849 = vrot.lane.b32.xlu1 %v20763_v12, %s22085_s11  ;;  %19205 = vrot.lane.b32.xlu0 %v20783_v16, %s22143_s3  ;;  %s19749_s11 = smov 36  }
 0xb9e   : > { %19200 = vrot.lane.b32.xlu1 %v20741_v5, %s22143_s3  ;;  %9054 = vrot.lane.b32.xlu0 %v20759_v23, %s22143_s3 }
 0xba2   : > { %9052 = vrot.lane.b32.xlu1 %v20748_v42, %s22143_s3  ;;  %19210 = vrot.lane.b32.xlu0 %v20726_v39, %s22083_s1 }
 0xba6   : > { %9050 = vrot.lane.b32.xlu1 %v20763_v12, %s22143_s3  ;;  %19220 = vrot.lane.b32.xlu0 %v20783_v16, %s22083_s1 }
 0xbaa   : > { %19215 = vrot.lane.b32.xlu1 %v20741_v5, %s22083_s1  ;;  %9255 = vrot.lane.b32.xlu0 %v20759_v23, %s22083_s1 }
 0xbae   : > { %9253 = vrot.lane.b32.xlu1 %v20748_v42, %s22083_s1  ;;  %19225 = vrot.lane.b32.xlu0 %v20726_v39, %s22079_s7 }
 0xbb2   : > { %9251 = vrot.lane.b32.xlu1 %v20763_v12, %s22083_s1  ;;  %19235 = vrot.lane.b32.xlu0 %v20783_v16, %s22079_s7  ;;  %s19748_s1 = smov 18  }
 0xbb6   : > { %19230 = vrot.lane.b32.xlu1 %v20741_v5, %s22079_s7  ;;  %9456 = vrot.lane.b32.xlu0 %v20759_v23, %s22079_s7 }
 0xbba   : > { %9454 = vrot.lane.b32.xlu1 %v20748_v42, %s22079_s7  ;;  %19240 = vrot.lane.b32.xlu0 %v20726_v39, %s22087_s4 }
 0xbbe   : > { %9452 = vrot.lane.b32.xlu1 %v20763_v12, %s22079_s7  ;;  %19250 = vrot.lane.b32.xlu0 %v20783_v16, %s22087_s4  ;;  %s22155_s7 = sld [smem:[#allocation24_spill]] }
 0xbc2   : > { %19245 = vrot.lane.b32.xlu1 %v20741_v5, %s22087_s4  ;;  %9657 = vrot.lane.b32.xlu0 %v20759_v23, %s22087_s4 }
 0xbc4   : > { %v15674_v31 = vld [vmem:[%s22155_s7 + $0x10] sm:$0xff]  ;;  %v15675_v48 = vld [vmem:[%s22155_s7 + $0x18] sm:$0xff]  ;;  %v8067_v11 = vld [vmem:[%s22155_s7] sm:$0xff] }
 0xbc5   : > { %v8068_v43 = vld [vmem:[%s22155_s7 + $0x8] sm:$0xff] }
 0xbc6   : > { %9655 = vrot.lane.b32.xlu1 %v20748_v42, %s22087_s4  ;;  %9843 = vperm.xlu0 %18772, %v9839_v33   ;;  %v8658_v33 = vsel %vm8654_vm9, %v19162_v63, %v19163_v3 }
 0xbca   : > { %9653 = vrot.lane.b32.xlu1 %v20763_v12, %s22087_s4 }
 0xbce   : > { %9848 = vperm.xlu1 %18773, %v9840_v38   ;;  %v8458_v38 = vsel %vm8453_vm2, %v20929_v44, %v20924_v37 }
 0xbd8   : > { %v7570_v51 = vpop.permute.xlu0 %7569  ;;  %v7068_v52 = vpop.permute.xlu1 %7067 }
 0xbdc   : > { %v7155_v53 = vpop.permute.xlu1 %7154  ;;  %v7066_v19 = vpop.permute.xlu0 %7065 }
 0xbdd   : > { %17074 = vmatprep.mubr.msk.f32.mxu0 %vm4294_vm11, %v7066_v19 }
 0xbde   : > { %17075 = vmatmul.mubr.msk.f32.vlgmr.msra.gmra.mrb[14].mxu0 %vm4294_vm11, %v7068_v52 }
 0xbdf   : > { %17900 = vmatpush3.bf16.msk.msra.mxu0 %vm20815_vm0, %v20811_v36 }
 0xbe0   : > { %v7238_v39 = vpop.permute.xlu1 %7237  ;;  %v7153_v61 = vpop.permute.xlu0 %7152  ;;  %17903 = vmatprep.subr.msk.bf16.mxu0 %vm20815_vm0, %v20811_v36 }
 0xbe1   : > { %17081 = vmatprep.mubr.msk.f32.mxu0 %vm4294_vm11, %v7153_v61 }
 0xbe2   : > { %17082 = vmatmul.mubr.msk.f32.vlgmr.msra.gmra.mrb[16].mxu0 %vm4294_vm11, %v7155_v53 }
 0xbe3   : > { %17906 = vmatpush3.bf16.msk.msra.mxu0 %vm20815_vm0, %v20811_v36 }
 0xbe4   : > { %v7321_v21 = vpop.permute.xlu1 %7320  ;;  %v7236_v62 = vpop.permute.xlu0 %7235  ;;  %17909 = vmatprep.subr.msk.bf16.mxu0 %vm20815_vm0, %v20811_v36 }
 0xbe5   : > { %17088 = vmatprep.mubr.msk.f32.mxu0 %vm4294_vm11, %v7236_v62 }
 0xbe6   : > { %17089 = vmatmul.mubr.msk.f32.vlgmr.msra.gmra.mrb[18].mxu0 %vm4294_vm11, %v7238_v39 }
 0xbe7   : > { %17912 = vmatpush3.bf16.msk.msra.mxu0 %vm20815_vm0, %v20811_v36 }
 0xbe8   : > { %v7404_v5 = vpop.permute.xlu1 %7403  ;;  %v7319_v6 = vpop.permute.xlu0 %7318  ;;  %17915 = vmatprep.subr.msk.bf16.mxu0 %vm20815_vm0, %v20811_v36 }
 0xbe9   : > { %17095 = vmatprep.mubr.msk.f32.mxu0 %vm4294_vm11, %v7319_v6  ;;  %v15685_v6 = vld [vmem:[%s22155_s7 + $0x28] sm:$0xff] }
 0xbea   : > { %17096 = vmatmul.mubr.msk.f32.vlgmr.msra.gmra.mrb[20].mxu0 %vm4294_vm11, %v7321_v21 }
 0xbeb   : > { %17918 = vmatpush3.bf16.msk.msra.mxu0 %vm20815_vm0, %v20811_v36 }
 0xbec   : > { %v7487_v16 = vpop.permute.xlu1 %7486  ;;  %v7402_v20 = vpop.permute.xlu0 %7401  ;;  %17921 = vmatprep.subr.msk.bf16.mxu0 %vm20815_vm0, %v20811_v36 }
 0xbed   : > { %17102 = vmatprep.mubr.msk.f32.mxu0 %vm4294_vm11, %v7402_v20 }
 0xbee   : > { %17103 = vmatmul.mubr.msk.f32.vlgmr.msra.gmra.mrb[22].mxu0 %vm4294_vm11, %v7404_v5  ;;  %v17957_v5 = vpack.c.bf16 %v19153_v32, %v19148_v54 }
 0xbef   : > { %17924 = vmatpush3.bf16.msk.msra.mxu0 %vm20815_vm0, %v20811_v36 }
 0xbf0   : > { %v7653_v28 = vpop.permute.xlu1 %7652  ;;  %v7568_v27 = vpop.permute.xlu0 %7567  ;;  %17933 = vmatprep.subr.msk.bf16.mxu0 %vm20815_vm0, %v20811_v36 }
 0xbf1   : > { %17116 = vmatprep.mubr.msk.f32.mxu1 %vm4294_vm11, %v7568_v27 }
 0xbf2   : > { %17117 = vmatmul.mubr.msk.f32.vlgmr.msra.gmra.mrb[8].mxu1 %vm4294_vm11, %v7570_v51 }
 0xbf3   : > { %17940 = vmatpush1.bf16.msra.mxu1 %v17939_v58  ;;  %8186 = vmatprep.mubr.f32.mxu1 %v19709_v1 }
 0xbf4   : > { %8126 = vmatprep.subr.mxu1 %v8105_v46  ;;  %v7485_v47 = vpop.permute.xlu1 %7484  ;;  %v20984_v30 = vpop.permute.xlu0 %19175 }
 0xbf5   : > { %17109 = vmatprep.mubr.msk.f32.mxu0 %vm4294_vm11, %v7485_v47  ;;  %v19178_v60 = vunpack.i.h.bf16 %v20984_v30  ;;  %v19177_v40 = vunpack.i.l.bf16 %v20984_v30 }
 0xbf6   : > { %17110 = vmatmul.mubr.msk.f32.vlgmr.msra.gmra.mrb[24].mxu0 %vm4294_vm11, %v7487_v16 }
 0xbf7   : > { %17936 = vmatpush3.bf16.msk.msra.mxu0 %vm20815_vm0, %v20811_v36  ;;  %8127 = vmatpush1.msra.mxu1 %v8104_v59  ;;  %v8455_v36 = vsel %vm8453_vm2, %v19147_v49, %v19148_v54  ;;  %v8657_v45 = vsel %vm8654_vm9, %v19178_v60, %v19162_v63  ;;  %v8655_v51 = vsel %vm8654_vm9, %v19177_v40, %v19157_v57  ;;  %v15696_v63 = vld [vmem:[%s22155_s7 + $0x40] sm:$0xff]  ;;  %vm22095_vm0 = vcmask 744448  }
 0xbf8   : > { %15676 = vmatmul.mubr.msk.f32.vlgmr.msra.gmra.mrb[10].mxu1 %vm8115_vm1, %v15674_v31  ;;  %17942 = vmatprep.subr.bf16.mxu0 %v20828_v10  ;;  %v21003_v7 = vpop.permute.xlu1 %8650  ;;  %v21005_v58 = vpop.permute.xlu0 %8652  ;;  %v17963_v39 = vpack.c.bf16 %v8657_v45, %v8655_v51  ;;  %v15702_v45 = vld [vmem:[%s22155_s7 + $0x50] sm:$0xff] }
 0xbf9   : > { %17946 = vmatprep.subr.bf16.mxu1 %v17945_v17  ;;  %8192 = vmatprep.mubr.f32.mxu1 %v19709_v1  ;;  %v8456_v17 = vsel %vm8453_vm2, %v19173_v35, %v19152_v34  ;;  %v8660_v62 = vsel %vm8654_vm9, %v21003_v7, %v21005_v58  ;;  %v17965_v35 = vpack.c.bf16 %v19163_v3, %v19158_v55 }
 0xbfa   : > { %17948 = vmatpush1.bf16.msra.mxu1 %v17947_v18  ;;  %v17955_v15 = vpack.c.bf16 %v8456_v17, %v8454_v8 }
 0xbfb   : > { %8284 = vmatprep.subr.mxu1 %v20748_v42  ;;  %v17953_v42 = vpack.c.bf16 %v8457_v2, %v8455_v36 }
 0xbfc   : > { %15677 = vmatmul.mubr.msk.f32.gmra.mrb[12].mxu1 %vm8115_vm1, %v15675_v48  ;;  %v7651_v9 = vpop.permute.xlu1 %7650  ;;  %v21027_v18 = vpop.permute.xlu0 %19180 }
 0xbfd   : > { %17123 = vmatprep.mubr.msk.f32.mxu0 %vm4294_vm11, %v7651_v9  ;;  %8344 = vmatprep.mubr.f32.mxu1 %v19709_v1  ;;  %v19183_v44 = vunpack.i.h.bf16 %v21027_v18  ;;  %v19182_v19 = vunpack.i.l.bf16 %v21027_v18 }
 0xbfe   : > { %8285 = vmatpush1.msra.mxu1 %v20763_v12  ;;  %17124 = vmatmul.mubr.msk.f32.vlgmr.msra.gmra.mrb[26].mxu0 %vm4294_vm11, %v7653_v28  ;;  %v8656_v12 = vsel %vm8654_vm9, %v19157_v57, %v19158_v55  ;;  %vm8855_vm11 = vcmask 891904   ;;  %v15691_v57 = vld [vmem:[%s22155_s7 + $0x38] sm:$0xff] }
 0xbff   : > { %17954 = vmatprep.subr.bf16.mxu1 %v17953_v42  ;;  %17944 = vmatpush3.bf16.msra.mxu0 %v20828_v10  ;;  %v8459_v10 = vsel %vm8453_vm2, %v20924_v37, %v20799_v25  ;;  %v17961_v0 = vpack.c.bf16 %v8658_v33, %v8656_v12  ;;  %v8857_v24 = vsel %vm8855_vm11, %v19182_v19, %v19183_v44 }
 0xc00   : > { %17130 = vmatprep.subr.mxu0 %v20793_v22  ;;  %15680 = vmatmul.mubr.msk.f32.vlgmr.msra.gmra.mrb[10].mxu1 %vm8115_vm1, %v8067_v11  ;;  %v8649_v13 = vpop.permute.xlu1 %8648  ;;  %v19191_v41 = vpop.permute.xlu0 %19190 }
 0xc01   : > { %17956 = vmatpush1.bf16.msra.mxu1 %v17955_v15  ;;  %17132 = vmatprep.mubr.msk.f32.mxu0 %vm8115_vm1, %v15674_v31  ;;  %v19193_v20 = vunpack.i.h.bf16 %v19191_v41  ;;  %v19192_v28 = vunpack.i.l.bf16 %v19191_v41  ;;  %v8659_v50 = vsel %vm8654_vm9, %v8649_v13, %v21003_v7  ;;  %v15697_v13 = vld [vmem:[%s22155_s7 + $0x48] sm:$0xff] }
 0xc02   : > { %8479 = vmatprep.subr.mxu1 %v8459_v10  ;;  %8350 = vmatprep.mubr.f32.mxu1 %v19709_v1 }
 0xc03   : > { %17131 = vmatpush3.msra.mxu0 %v20793_v22  ;;  %v15684_v22 = vld [vmem:[%s22155_s7 + $0x20] sm:$0xff]  ;;  %v8856_v54 = vsel %vm8855_vm11, %v19192_v28, %v19182_v19 }
 0xc04   : > { %17133 = vmatmul.mubr.msk.f32.vlgmr.msra.gmra.mrb[28].mxu0 %vm8115_vm1, %v15675_v48  ;;  %15681 = vmatmul.mubr.msk.f32.gmra.mrb[12].mxu1 %vm8115_vm1, %v8068_v43  ;;  %v21063_v56 = vpop.permute.xlu1 %19185  ;;  %v21065_v52 = vpop.permute.xlu0 %8853  ;;  %v15708_v28 = vld [vmem:[%s22155_s7 + $0x60] sm:$0xff] }
 0xc05   : > { %17950 = vmatprep.subr.bf16.mxu0 %v17949_v29  ;;  %8480 = vmatpush1.msra.mxu1 %v8458_v38  ;;  %v19188_v53 = vunpack.i.h.bf16 %v21063_v56  ;;  %v19187_v37 = vunpack.i.l.bf16 %v21063_v56 }
 0xc06   : > { %17952 = vmatpush3.bf16.msra.mxu0 %v17949_v29  ;;  %17962 = vmatprep.subr.bf16.mxu1 %v17961_v0 }
 0xc07   : > { %8539 = vmatprep.mubr.f32.mxu1 %v19709_v1  ;;  %17139 = vmatprep.subr.mxu0 %v20759_v23  ;;  %v8859_v16 = vsel %vm8855_vm11, %v19187_v37, %v19188_v53  ;;  %v8858_v27 = vsel %vm8855_vm11, %v19193_v20, %v19187_v37  ;;  %v17973_v60 = vpack.c.bf16 %v19188_v53, %v19183_v44 }
 0xc08   : > { %15686 = vmatmul.mubr.msk.f32.vlgmr.msra.gmra.mrb[10].mxu1 %vm8115_vm1, %v15684_v22  ;;  %v8852_v61 = vpop.permute.xlu1 %8851  ;;  %v21075_v21 = vpop.permute.xlu0 %19195  ;;  %17141 = vmatprep.mubr.msk.f32.mxu0 %vm8115_vm1, %v8067_v11  ;;  %v17969_v30 = vpack.c.bf16 %v8859_v16, %v8857_v24  ;;  %v17971_v32 = vpack.c.bf16 %v8858_v27, %v8856_v54 }
 0xc09   : > { %17964 = vmatpush1.bf16.msra.mxu1 %v17963_v39  ;;  %8545 = vmatprep.mubr.f32.mxu1 %v19709_v1  ;;  %v19198_v31 = vunpack.i.h.bf16 %v21075_v21  ;;  %v19197_v49 = vunpack.i.l.bf16 %v21075_v21  ;;  %v8861_v2 = vsel %vm8855_vm11, %v8852_v61, %v21065_v52 }
 0xc0a   : > { %17140 = vmatpush3.msra.mxu0 %v20759_v23  ;;  %8680 = vmatprep.subr.mxu1 %v8660_v62  ;;  %v15690_v23 = vld [vmem:[%s22155_s7 + $0x30] sm:$0xff]  ;;  %v15703_v62 = vld [vmem:[%s22155_s7 + $0x58] sm:$0xff] }
 0xc0b   : > { %17958 = vmatprep.subr.bf16.mxu0 %v17957_v5 }
 0xc0c   : > { %17142 = vmatmul.mubr.msk.f32.vlgmr.msra.gmra.mrb[28].mxu0 %vm8115_vm1, %v8068_v43  ;;  %15687 = vmatmul.mubr.msk.f32.gmra.mrb[12].mxu1 %vm8115_vm1, %v15685_v6  ;;  %v8850_v46 = vpop.permute.xlu1 %8849  ;;  %v19206_v47 = vpop.permute.xlu0 %19205 }
 0xc0d   : > { %17960 = vmatpush3.bf16.msra.mxu0 %v17957_v5  ;;  %8681 = vmatpush1.msra.mxu1 %v8659_v50  ;;  %v19207_v34 = vunpack.i.l.bf16 %v19206_v47  ;;  %v19208_v7 = vunpack.i.h.bf16 %v19206_v47  ;;  %v8860_v55 = vsel %vm8855_vm11, %v8850_v46, %v8852_v61 }
 0xc0e   : > { %17148 = vmatprep.subr.mxu0 %v20799_v25  ;;  %17970 = vmatprep.subr.bf16.mxu1 %v17969_v30 }
 0xc0f   : > { %8740 = vmatprep.mubr.f32.mxu1 %v19709_v1  ;;  %17150 = vmatprep.mubr.msk.f32.mxu0 %vm8115_vm1, %v15684_v22  ;;  %v9057_v17 = vsel %vm9056_vm10, %v19207_v34, %v19197_v49 }
 0xc10   : > { %15692 = vmatmul.mubr.msk.f32.vlgmr.msra.gmra.mrb[10].mxu1 %vm8115_vm1, %v15690_v23  ;;  %v21107_v59 = vpop.permute.xlu1 %19200  ;;  %v21113_v4 = vpop.permute.xlu0 %9054 }
 0xc11   : > { %17149 = vmatpush3.msra.mxu0 %v20799_v25  ;;  %17972 = vmatpush1.bf16.msra.mxu1 %v17971_v32  ;;  %v19203_v48 = vunpack.i.h.bf16 %v21107_v59  ;;  %v19202_v36 = vunpack.i.l.bf16 %v21107_v59  ;;  %v9058_v25 = vsel %vm9056_vm10, %v19197_v49, %v19198_v31 }
 0xc12   : > { %17966 = vmatprep.subr.bf16.mxu0 %v17965_v35  ;;  %8881 = vmatprep.subr.mxu1 %v8861_v2 }
 0xc13   : > { %v9059_v26 = vsel %vm9056_vm10, %v19208_v7, %v19202_v36  ;;  %8746 = vmatprep.mubr.f32.mxu1 %v19709_v1  ;;  %v9060_v14 = vsel %vm9056_vm10, %v19202_v36, %v19203_v48  ;;  %v17981_v44 = vpack.c.bf16 %v19203_v48, %v19198_v31 }
 0xc14   : > { %17151 = vmatmul.mubr.msk.f32.vlgmr.msra.gmra.mrb[28].mxu0 %vm8115_vm1, %v15685_v6  ;;  %15693 = vmatmul.mubr.msk.f32.gmra.mrb[12].mxu1 %vm8115_vm1, %v15691_v57  ;;  %v9053_v8 = vpop.permute.xlu1 %9052  ;;  %v21131_v9 = vpop.permute.xlu0 %19210  ;;  %v17977_v3 = vpack.c.bf16 %v9060_v14, %v9058_v25  ;;  %v17979_v42 = vpack.c.bf16 %v9059_v26, %v9057_v17  ;;  %v15714_v26 = vld [vmem:[%s22155_s7 + $0x70] sm:$0xff] }
 0xc15   : > { %17968 = vmatpush3.bf16.msra.mxu0 %v17965_v35  ;;  %8882 = vmatpush1.msra.mxu1 %v8860_v55  ;;  %v9062_v40 = vsel %vm9056_vm10, %v9053_v8, %v21113_v4  ;;  %v19213_v12 = vunpack.i.h.bf16 %v21131_v9  ;;  %v19212_v10 = vunpack.i.l.bf16 %v21131_v9 }
 0xc16   : > { %17157 = vmatprep.subr.mxu0 %v21005_v58  ;;  %8941 = vmatprep.mubr.f32.mxu1 %v19709_v1 }
 0xc17   : > { %17978 = vmatprep.subr.bf16.mxu1 %v17977_v3  ;;  %17159 = vmatprep.mubr.msk.f32.mxu0 %vm8115_vm1, %v15690_v23  ;;  %v9259_v0 = vsel %vm9257_vm15, %v19212_v10, %v19213_v12 }
 0xc18   : > { %15698 = vmatmul.mubr.msk.f32.vlgmr.msra.gmra.mrb[10].mxu1 %vm8115_vm1, %v15696_v63  ;;  %v9051_v11 = vpop.permute.xlu1 %9050  ;;  %v19221_v15 = vpop.permute.xlu0 %19220 }
 0xc19   : > { %17158 = vmatpush3.msra.mxu0 %v21005_v58  ;;  %17980 = vmatpush1.bf16.msra.mxu1 %v17979_v42  ;;  %v9061_v41 = vsel %vm9056_vm10, %v9051_v11, %v9053_v8  ;;  %v19222_v18 = vunpack.i.l.bf16 %v19221_v15  ;;  %v19223_v29 = vunpack.i.h.bf16 %v19221_v15 }
 0xc1a   : > { %17974 = vmatprep.subr.bf16.mxu0 %v17973_v60  ;;  %9082 = vmatprep.subr.mxu1 %v9062_v40 }
 0xc1b   : > { %8947 = vmatprep.mubr.f32.mxu1 %v19709_v1  ;;  %v9258_v51 = vsel %vm9257_vm15, %v19222_v18, %v19212_v10 }
 0xc1c   : > { %17160 = vmatmul.mubr.msk.f32.vlgmr.msra.gmra.mrb[28].mxu0 %vm8115_vm1, %v15691_v57  ;;  %v19216_v58 = vpop.permute.xlu1 %19215  ;;  %v21151_v43 = vpop.permute.xlu0 %9255  ;;  %15699 = vmatmul.mubr.msk.f32.gmra.mrb[12].mxu1 %vm8115_vm1, %v15697_v13 }
 0xc1d   : > { %17976 = vmatpush3.bf16.msra.mxu0 %v17973_v60  ;;  %9083 = vmatpush1.msra.mxu1 %v9061_v41  ;;  %v19218_v33 = vunpack.i.h.bf16 %v19216_v58  ;;  %v19217_v38 = vunpack.i.l.bf16 %v19216_v58 }
 0xc1e   : > { %17166 = vmatprep.subr.mxu0 %v21065_v52  ;;  %17168 = vmatprep.mubr.msk.f32.mxu0 %vm8115_vm1, %v15696_v63  ;;  %v15715_v63 = vld [vmem:[%s22155_s7 + $0x78] sm:$0xff] }
 0xc1f   : > { %v9260_v56 = vsel %vm9257_vm15, %v19223_v29, %v19217_v38  ;;  %9142 = vmatprep.mubr.f32.mxu1 %v19709_v1  ;;  %v9261_v53 = vsel %vm9257_vm15, %v19217_v38, %v19218_v33  ;;  %v17989_v27 = vpack.c.bf16 %v19218_v33, %v19213_v12  ;;  %v15721_v33 = vld [vmem:[%s22155_s7 + $0x88] sm:$0xff] }
 0xc20   : > { %v9254_v37 = vpop.permute.xlu1 %9253  ;;  %v19226_v22 = vpop.permute.xlu0 %19225  ;;  %v17985_v19 = vpack.c.bf16 %v9261_v53, %v9259_v0  ;;  %15704 = vmatmul.mubr.msk.f32.vlgmr.msra.gmra.mrb[10].mxu1 %vm8115_vm1, %v15702_v45  ;;  %v17987_v39 = vpack.c.bf16 %v9260_v56, %v9258_v51 }
 0xc21   : > { %17167 = vmatpush3.msra.mxu0 %v21065_v52  ;;  %9148 = vmatprep.mubr.f32.mxu1 %v19709_v1  ;;  %v9263_v61 = vsel %vm9257_vm15, %v9254_v37, %v21151_v43  ;;  %v19228_v52 = vunpack.i.h.bf16 %v19226_v22  ;;  %v19227_v16 = vunpack.i.l.bf16 %v19226_v22 }
 0xc22   : > { %17982 = vmatprep.subr.bf16.mxu0 %v17981_v44  ;;  %17986 = vmatprep.subr.bf16.mxu1 %v17985_v19 }
 0xc23   : > { %17988 = vmatpush1.bf16.msra.mxu1 %v17987_v39  ;;  %v9460_v31 = vsel %vm22095_vm0, %v19227_v16, %v19228_v52 }
 0xc24   : > { %17169 = vmatmul.mubr.msk.f32.vlgmr.msra.gmra.mrb[28].mxu0 %vm8115_vm1, %v15697_v13  ;;  %v9252_v21 = vpop.permute.xlu1 %9251  ;;  %v19236_v5 = vpop.permute.xlu0 %19235  ;;  %9283 = vmatprep.subr.mxu1 %v9263_v61 }
 0xc25   : > { %17984 = vmatpush3.bf16.msra.mxu0 %v17981_v44  ;;  %v9262_v6 = vsel %vm9257_vm15, %v9252_v21, %v9254_v37  ;;  %17177 = vmatprep.mubr.msk.f32.mxu0 %vm8115_vm1, %v15702_v45  ;;  %v19237_v20 = vunpack.i.l.bf16 %v19236_v5  ;;  %v19238_v46 = vunpack.i.h.bf16 %v19236_v5 }
 0xc26   : > { %17175 = vmatprep.subr.mxu0 %v21113_v4  ;;  %15705 = vmatmul.mubr.msk.f32.gmra.mrb[12].mxu1 %vm8115_vm1, %v15703_v62 }
 0xc27   : > { %9284 = vmatpush1.msra.mxu1 %v9262_v6  ;;  %9343 = vmatprep.mubr.f32.mxu1 %v19709_v1  ;;  %v9459_v23 = vsel %vm22095_vm0, %v19237_v20, %v19227_v16 }
 0xc28   : > { %v19231_v24 = vpop.permute.xlu1 %19230  ;;  %v9457_v50 = vpop.permute.xlu0 %9456 }
 0xc29   : > { %17176 = vmatpush3.msra.mxu0 %v21113_v4  ;;  %v19233_v47 = vunpack.i.h.bf16 %v19231_v24  ;;  %v19232_v30 = vunpack.i.l.bf16 %v19231_v24  ;;  %v15709_v4 = vld [vmem:[%s22155_s7 + $0x68] sm:$0xff] }
 0xc2a   : > { %17990 = vmatprep.subr.bf16.mxu0 %v17989_v27  ;;  %15710 = vmatmul.mubr.msk.f32.vlgmr.msra.gmra.mrb[10].mxu1 %vm8115_vm1, %v15708_v28 }
 0xc2b   : > { %v9461_v54 = vsel %vm22095_vm0, %v19238_v46, %v19232_v30  ;;  %v9462_v49 = vsel %vm22095_vm0, %v19232_v30, %v19233_v47  ;;  %9349 = vmatprep.mubr.f32.mxu1 %v19709_v1  ;;  %v17997_v2 = vpack.c.bf16 %v19233_v47, %v19228_v52 }
 0xc2c   : > { %17178 = vmatmul.mubr.msk.f32.vlgmr.msra.gmra.mrb[28].mxu0 %vm8115_vm1, %v15703_v62  ;;  %v9455_v32 = vpop.permute.xlu1 %9454  ;;  %v19241_v34 = vpop.permute.xlu0 %19240  ;;  %v17993_v59 = vpack.c.bf16 %v9462_v49, %v9460_v31  ;;  %v17995_v35 = vpack.c.bf16 %v9461_v54, %v9459_v23 }
 0xc2d   : > { %17992 = vmatpush3.bf16.msra.mxu0 %v17989_v27  ;;  %17186 = vmatprep.mubr.msk.f32.mxu0 %vm8115_vm1, %v15708_v28  ;;  %v9464_v7 = vsel %vm22095_vm0, %v9455_v32, %v9457_v50  ;;  %v19243_v25 = vunpack.i.h.bf16 %v19241_v34  ;;  %v19242_v14 = vunpack.i.l.bf16 %v19241_v34 }
 0xc2e   : > { %17184 = vmatprep.subr.mxu0 %v21151_v43  ;;  %17994 = vmatprep.subr.bf16.mxu1 %v17993_v59 }
 0xc2f   : > { %17996 = vmatpush1.bf16.msra.mxu1 %v17995_v35  ;;  %v9661_v42 = vsel %vm22094_vm3, %v19242_v14, %v19243_v25 }
 0xc30   : > { %v9453_v48 = vpop.permute.xlu1 %9452  ;;  %v19251_v36 = vpop.permute.xlu0 %19250  ;;  %9484 = vmatprep.subr.mxu1 %v9464_v7  ;;  %15711 = vmatmul.mubr.msk.f32.gmra.mrb[12].mxu1 %vm8115_vm1, %v15709_v4 }
 0xc31   : > { %17185 = vmatpush3.msra.mxu0 %v21151_v43  ;;  %v9463_v57 = vsel %vm22095_vm0, %v9453_v48, %v9455_v32  ;;  %9544 = vmatprep.mubr.f32.mxu1 %v19709_v1  ;;  %v19252_v55 = vunpack.i.l.bf16 %v19251_v36  ;;  %v19253_v8 = vunpack.i.h.bf16 %v19251_v36  ;;  %v15720_v43 = vld [vmem:[%s22155_s7 + $0x80] sm:$0xff]  ;;  %s19756_s7 = smov 14   ;;  %vm7808_vm0 = vcmask 884432  }
 0xc32   : > { %17998 = vmatprep.subr.bf16.mxu0 %v17997_v2 }
 0xc33   : > { %9485 = vmatpush1.msra.mxu1 %v9463_v57  ;;  %v9660_v11 = vsel %vm22094_vm3, %v19252_v55, %v19242_v14 }
 0xc34   : > { %17187 = vmatmul.mubr.msk.f32.vlgmr.msra.gmra.mrb[28].mxu0 %vm8115_vm1, %v15709_v4  ;;  %v19246_v17 = vpop.permute.xlu1 %19245  ;;  %15716 = vmatmul.mubr.msk.f32.vlgmr.msra.gmra.mrb[10].mxu1 %vm8115_vm1, %v15714_v26  ;;  %v9658_v41 = vpop.permute.xlu0 %9657 }
 0xc35   : > { %18000 = vmatpush3.bf16.msra.mxu0 %v17997_v2  ;;  %v19248_v9 = vunpack.i.h.bf16 %v19246_v17  ;;  %v19247_v3 = vunpack.i.l.bf16 %v19246_v17  ;;  %17195 = vmatprep.mubr.msk.f32.mxu0 %vm8115_vm1, %v15714_v26 }
 0xc36   : > { %17193 = vmatprep.subr.mxu0 %v9457_v50  ;;  %9550 = vmatprep.mubr.f32.mxu1 %v19709_v1 }
 0xc37   : > { %v9662_v15 = vsel %vm22094_vm3, %v19253_v8, %v19247_v3  ;;  %v18005_v60 = vpack.c.bf16 %v19248_v9, %v19243_v25  ;;  %v9663_v40 = vsel %vm22094_vm3, %v19247_v3, %v19248_v9 }
 0xc38   : > { %v9656_v13 = vpop.permute.xlu1 %9655  ;;  %v18001_v12 = vpack.c.bf16 %v9663_v40, %v9661_v42  ;;  %v18003_v10 = vpack.c.bf16 %v9662_v15, %v9660_v11  ;;  %15717 = vmatmul.mubr.msk.f32.gmra.mrb[12].mxu1 %vm8115_vm1, %v15715_v63 }
 0xc39   : > { %17194 = vmatpush3.msra.mxu0 %v9457_v50  ;;  %9745 = vmatprep.mubr.f32.mxu1 %v19709_v1  ;;  %v9665_v18 = vsel %vm22094_vm3, %v9656_v13, %v9658_v41 }
 0xc3a   : > { %18006 = vmatprep.subr.bf16.mxu0 %v18005_v60  ;;  %18002 = vmatprep.subr.bf16.mxu1 %v18001_v12 }
 0xc3b   : > { %18004 = vmatpush1.bf16.msra.mxu1 %v18003_v10 }
 0xc3c   : > { %17196 = vmatmul.mubr.msk.f32.vlgmr.msra.gmra.mrb[28].mxu0 %vm8115_vm1, %v15715_v63  ;;  %v9654_v58 = vpop.permute.xlu1 %9653  ;;  %9685 = vmatprep.subr.mxu1 %v9665_v18 }
 0xc3d   : > { %18008 = vmatpush3.bf16.msra.mxu0 %v18005_v60  ;;  %v9664_v29 = vsel %vm22094_vm3, %v9654_v58, %v9656_v13  ;;  %17204 = vmatprep.mubr.msk.f32.mxu0 %vm8115_vm1, %v15720_v43  ;;  %vm7793_vm3 = vcmask 736832  }
 0xc3e   : > { %17202 = vmatprep.subr.mxu0 %v9658_v41 }
 0xc3f   : > { %9686 = vmatpush1.msra.mxu1 %v9664_v29 }
 0xc40   : > { %15722 = vmatmul.mubr.msk.f32.vlgmr.msra.gmra.mrb[10].mxu1 %vm8115_vm1, %v15720_v43 }
 0xc41   : > { %17203 = vmatpush3.msra.mxu0 %v9658_v41  ;;  %9751 = vmatprep.mubr.f32.mxu1 %v19709_v1 }
 0xc44   : > { %17205 = vmatmul.mubr.msk.f32.vlgmr.msra.gmra.mrb[28].mxu0 %vm8115_vm1, %v15721_v33  ;;  %15723 = vmatmul.mubr.msk.f32.gmra.mrb[12].mxu1 %vm8115_vm1, %v15721_v33  ;;  %vm7744_vm1 = vcmask 294032  }
 0xc45   : > { %10038 = vmatprep.mubr.f32.mxu0 %v19709_v1  ;;  %11784 = vmatprep.mubr.f32.mxu1 %v19709_v1 }
 0xcb1   : > { %v17076_v38 = vpop.f32.mrb[14].mxu0 }
 0xcb2   : > { %7740 = vrot.lane.b32.xlu1 %v17076_v38, %s19748_s1  ;;  %v7143_v45 = vpop.f32.mrb[15].mxu0  ;;  %v7748_v56 = vmul.f32 0.75, %v17076_v38  ;;  %v7765_v0 = vmul.f32 0.25, %v17076_v38 }
 0xcb3   : > { %7738 = vrot.lane.b32.xlu0 %v7143_v45, %s19748_s1  ;;  %v7747_v44 = vmul.f32 0.75, %v7143_v45  ;;  %v7764_v19 = vmul.f32 0.25, %v7143_v45  ;;  %s19750_s1 = smov 54  }
 0xcb5   : > { %v17083_v51 = vpop.f32.mrb[16].mxu0 }
 0xcb6   : > { %v7750_v53 = vmul.f32 0.25, %v17083_v51  ;;  %v7767_v37 = vmul.f32 0.75, %v17083_v51  ;;  %v7226_v22 = vpop.f32.mrb[17].mxu0 }
 0xcb7   : > { %v7749_v39 = vmul.f32 0.25, %v7226_v22  ;;  %v7766_v61 = vmul.f32 0.75, %v7226_v22 }
 0xcb8   : > { %v7752_v62 = vadd.f32 %v7750_v53, %v7748_v56  ;;  %v7769_v21 = vadd.f32 %v7767_v37, %v7765_v0 }
 0xcb9   : > { %v7751_v5 = vadd.f32 %v7749_v39, %v7747_v44  ;;  %v7768_v6 = vadd.f32 %v7766_v61, %v7764_v19  ;;  %v17090_v52 = vpop.f32.mrb[18].mxu0 }
 0xcba   : > { %v7782_v16 = vmul.f32 0.25, %v17090_v52  ;;  %v7797_v20 = vmul.f32 0.75, %v17090_v52  ;;  %7757 = vrot.lane.b32.xlu1 %v7752_v62, %s19749_s11  ;;  %v7309_v28 = vpop.f32.mrb[19].mxu0 }
 0xcbb   : > { %v7781_v24 = vmul.f32 0.25, %v7309_v28  ;;  %v7796_v50 = vmul.f32 0.75, %v7309_v28  ;;  %7755 = vrot.lane.b32.xlu0 %v7751_v5, %s19749_s11  ;;  %s19751_s11 = smov 72  }
 0xcbc   : > { %v7784_v27 = vadd.f32 %v7782_v16, %v7767_v37  ;;  %v7799_v46 = vadd.f32 %v7797_v20, %v7750_v53 }
 0xcbd   : > { %v7783_v47 = vadd.f32 %v7781_v24, %v7766_v61  ;;  %v7798_v30 = vadd.f32 %v7796_v50, %v7749_v39  ;;  %v17097_v23 = vpop.f32.mrb[20].mxu0 }
 0xcbe   : > { %v7812_v54 = vmul.f32 0.25, %v17097_v23  ;;  %v7827_v31 = vmul.f32 0.75, %v17097_v23  ;;  %7774 = vrot.lane.b32.xlu1 %v7769_v21, %s19750_s1  ;;  %v7392_v49 = vpop.f32.mrb[21].mxu0 }
 0xcbf   : > { %v7811_v32 = vmul.f32 0.25, %v7392_v49  ;;  %v7826_v34 = vmul.f32 0.75, %v7392_v49  ;;  %7772 = vrot.lane.b32.xlu0 %v7768_v6, %s19750_s1  ;;  %s19752_s1 = smov 16  }
 0xcc0   : > { %v21221_v59 = vadd.f32 %v7812_v54, %v7797_v20  ;;  %v7829_v35 = vadd.f32 %v7827_v31, %v7782_v16 }
 0xcc1   : > { %v21223_v4 = vadd.f32 %v7811_v32, %v7796_v50  ;;  %v7828_v7 = vadd.f32 %v7826_v34, %v7781_v24  ;;  %v17104_v48 = vpop.f32.mrb[22].mxu0  ;;  %v21251_v50 = vpop.permute.xlu1 %9848 }
 0xcc2   : > { %v7844_v36 = vmul.f32 0.25, %v17104_v48  ;;  %v7859_v2 = vmul.f32 0.75, %v17104_v48  ;;  %7789 = vrot.lane.b32.xlu1 %v7784_v27, %s19751_s11  ;;  %v7475_v57 = vpop.f32.mrb[23].mxu0  ;;  %v21253_v27 = vpop.permute.xlu0 %9843 }
 0xcc3   : > { %v7843_v26 = vmul.f32 0.25, %v7475_v57  ;;  %v7858_v25 = vmul.f32 0.75, %v7475_v57  ;;  %7787 = vrot.lane.b32.xlu0 %v7783_v47, %s19751_s11  ;;  %s19753_s11 = smov 34  }
 0xcc4   : > { %v7846_v14 = vadd.f32 %v7844_v36, %v7827_v31  ;;  %v7861_v55 = vadd.f32 %v7859_v2, %v7812_v54 }
 0xcc5   : > { %v7845_v17 = vadd.f32 %v7843_v26, %v7826_v34  ;;  %v7860_v8 = vadd.f32 %v7858_v25, %v7811_v32  ;;  %v17118_v9 = vpop.f32.mrb[8].mxu1 }
 0xcc6   : > { %7804 = vrot.lane.b32.xlu1 %v7799_v46, %s22087_s4  ;;  %v7641_v3 = vpop.f32.mrb[9].mxu1  ;;  %v7904_v42 = vmul.f32 0.25, %v17118_v9  ;;  %v7919_v11 = vmul.f32 0.75, %v17118_v9 }
 0xcc7   : > { %7802 = vrot.lane.b32.xlu0 %v7798_v30, %s22087_s4  ;;  %v7903_v13 = vmul.f32 0.25, %v7641_v3  ;;  %v7918_v41 = vmul.f32 0.75, %v7641_v3  ;;  %s19754_s4 = smov 52  }
 0xcc9   : > { %v17111_v63 = vpop.f32.mrb[24].mxu0 }
 0xcca   : > { %v7874_v15 = vmul.f32 0.25, %v17111_v63  ;;  %v7889_v60 = vmul.f32 0.75, %v17111_v63  ;;  %7834 = vrot.lane.b32.xlu1 %v7829_v35, %s22131_s26  ;;  %v7558_v40 = vpop.f32.mrb[25].mxu0 }
 0xccb   : > { %v7873_v12 = vmul.f32 0.25, %v7558_v40  ;;  %v7888_v10 = vmul.f32 0.75, %v7558_v40  ;;  %7832 = vrot.lane.b32.xlu0 %v7828_v7, %s22131_s26 }
 0xccc   : > { %v7876_v18 = vadd.f32 %v7874_v15, %v7859_v2  ;;  %v7891_v58 = vadd.f32 %v7889_v60, %v7844_v36  ;;  %v7906_v43 = vadd.f32 %v7904_v42, %v7889_v60  ;;  %v7921_v29 = vadd.f32 %v7919_v11, %v7874_v15 }
 0xccd   : > { %v7875_v33 = vadd.f32 %v7873_v12, %v7858_v25  ;;  %v7890_v38 = vadd.f32 %v7888_v10, %v7843_v26  ;;  %v7905_v45 = vadd.f32 %v7903_v13, %v7888_v10  ;;  %v7920_v51 = vadd.f32 %v7918_v41, %v7873_v12 }
 0xcce   : > { %7851 = vrot.lane.b32.xlu1 %v7846_v14, %s19752_s1 }
 0xccf   : > { %7849 = vrot.lane.b32.xlu0 %v7845_v17, %s19752_s1  ;;  %s22157_s1 = smov 88   ;;  %v9858_v17 = vlaneseq }
 0xcd1   : > { %v17125_v56 = vpop.f32.mrb[26].mxu0  ;;  %v21263_v3 = vshrl.u32 %v9858_v17, 7 }
 0xcd2   : > { %v7934_v0 = vmul.f32 0.25, %v17125_v56  ;;  %v7952_v53 = vmul.f32 0.75, %v17125_v56  ;;  %7866 = vrot.lane.b32.xlu1 %v7861_v55, %s19753_s11  ;;  %v7724_v37 = vpop.f32.mrb[27].mxu0 }
 0xcd3   : > { %v7933_v22 = vmul.f32 0.25, %v7724_v37  ;;  %v7951_v44 = vmul.f32 0.75, %v7724_v37  ;;  %7864 = vrot.lane.b32.xlu0 %v7860_v8, %s19753_s11  ;;  %s19755_s11 = smov 124  }
 0xcd4   : > { %v7936_v19 = vadd.f32 %v7934_v0, %v7919_v11  ;;  %v7954_v39 = vadd.f32 %v7952_v53, %v7904_v42  ;;  %v7967_v21 = vadd.f32 %v7952_v53, %v7934_v0  ;;  %v9864_v11 = vsub.s32 1, %v21263_v3 }
 0xcd5   : > { %v7935_v61 = vadd.f32 %v7933_v22, %v7918_v41  ;;  %v7953_v62 = vadd.f32 %v7951_v44, %v7903_v13  ;;  %v7966_v5 = vadd.f32 %v7951_v44, %v7933_v22  ;;  %v9860_v44 = vsub.s32 0, %v21263_v3 }
 0xcd6   : > { %7881 = vrot.lane.b32.xlu1 %v7876_v18, %s19754_s4 }
 0xcd7   : > { %7879 = vrot.lane.b32.xlu0 %v7875_v33, %s19754_s4  ;;  %s19757_s4 = smov 32  }
 0xcda   : > { %7896 = vrot.lane.b32.xlu1 %v7891_v58, %s22156_s5  ;;  %v9868_v58 = vsub.s32 2, %v21263_v3 }
 0xcdb   : > { %7894 = vrot.lane.b32.xlu0 %v7890_v38, %s22156_s5  ;;  %s22159_s5 = smov 19  }
 0xcde   : > { %7911 = vrot.lane.b32.xlu1 %v7906_v43, %s22157_s1 }
 0xcdf   : > { %7909 = vrot.lane.b32.xlu0 %v7905_v45, %s22157_s1  ;;  %s22161_s1 = sld [smem:[#allocation27_spill]] }
 0xce2   : > { %7926 = vrot.lane.b32.xlu1 %v7921_v29, %s22144_s6 }
 0xce3   : > { %7924 = vrot.lane.b32.xlu0 %v7920_v51, %s22144_s6  ;;  %s22158_s6 = sld [smem:[#allocation11_spill]] }
 0xce6   : > { %7941 = vrot.lane.b32.xlu1 %v7936_v19, %s19755_s11 }
 0xce7   : > { %7939 = vrot.lane.b32.xlu0 %v7935_v61, %s19755_s11  ;;  %s22162_s11 = smov 92  }
 0xce9   : > { %v973_v60 = vld [vmem:[%s22158_s6] sm:$0x7]  ;;  %s22164_s6 = smov 90  }
 0xcea   : > { %7959 = vrot.lane.b32.xlu1 %v7954_v39, %s19756_s7  ;;  %v21271_v12 = vrot.slane %v973_v60, %v9864_v11  ;;  %v21285_v37 = vrot.slane %v973_v60, %v9868_v58 }
 0xceb   : > { %7957 = vrot.lane.b32.xlu0 %v7953_v62, %s19756_s7  ;;  %s22160_s7 = smov 109  }
 0xcee   : > { %7972 = vrot.lane.b32.xlu1 %v7967_v21, %s19757_s4 }
 0xcef   : > { %7970 = vrot.lane.b32.xlu0 %v7966_v5, %s19757_s4  ;;  %v21299_v5 = vrot.slane %v973_v60, %v9860_v44  ;;  %s22163_s4 = smov 91   ;;  %v11607_v60 = vld [vmem:[%s22161_s1] sm:$0xff] }
 0xcf2   : > { %7819 = vrot.lane.b32.xlu1 %v21221_v59, %s22143_s3 }
 0xcf3   : > { %7817 = vrot.lane.b32.xlu0 %v21223_v4, %s22143_s3 }
 0xd13   : > { %v21239_v6 = vpop.f32.mrb[10].mxu1 }
 0xd14   : > { %v21241_v52 = vpop.f32.mrb[11].mxu1  ;;  %v9851_v21 = vadd.f32 %v21253_v27, %v21239_v6 }
 0xd15   : > { %v9852_v41 = vadd.f32 %v21253_v27, %v21241_v52 }
 0xd16   : > { %v9873_v6 = vmul.f32 %v21299_v5, %v9851_v21 }
 0xd17   : > { %v21243_v16 = vpop.f32.mrb[28].mxu0  ;;  %v21245_v20 = vpop.f32.mrb[12].mxu1  ;;  %v9874_v33 = vmul.f32 %v21271_v12, %v9852_v41 }
 0xd18   : > { %v21247_v28 = vpop.f32.mrb[29].mxu0  ;;  %v21249_v24 = vpop.f32.mrb[13].mxu1  ;;  %v9856_v53 = vadd.f32 %v21243_v16, %v21251_v50  ;;  %v9854_v16 = vadd.f32 %v21251_v50, %v21245_v20 }
 0xd19   : > { %v9855_v40 = vadd.f32 %v21251_v50, %v21249_v24  ;;  %v9853_v39 = vadd.f32 %v21253_v27, %v21247_v28 }
 0xd1a   : > { %v9878_v62 = vmul.f32 %v21285_v37, %v9856_v53 }
 0xd1b   : > { %v9877_v18 = vmul.f32 %v21271_v12, %v9855_v40  ;;  %v9875_v28 = vmul.f32 %v21285_v37, %v9853_v39 }
 0xd24   : > { %v7741_v46 = vpop.permute.xlu1 %7740 }
 0xd25   : > { %7746 = vst.msk [vmem:[#allocation3 + $0x18] sm:$0xff] %vm7744_vm1, %v7741_v46  ;;  %v7739_v47 = vpop.permute.xlu0 %7738 }
 0xd26   : > { %7745 = vst.msk [vmem:[#allocation3] sm:$0xff] %vm7744_vm1, %v7739_v47  ;;  %vm7915_vm1 = vcmask 868032  }
 0xd2c   : > { %v7758_v30 = vpop.permute.xlu1 %7757 }
 0xd2d   : > { %7763 = vst.msk [vmem:[#allocation3 + $0x18] sm:$0xff] %vm7761_vm8, %v7758_v30  ;;  %v7756_v23 = vpop.permute.xlu0 %7755 }
 0xd2e   : > { %7762 = vst.msk [vmem:[#allocation3] sm:$0xff] %vm7761_vm8, %v7756_v23  ;;  %vm7855_vm8 = vcmask 277632   ;;  %v9876_v23 = vmul.f32 %v21299_v5, %v9854_v16 }
 0xd30   : > { %v7775_v54 = vpop.permute.xlu1 %7774 }
 0xd31   : > { %7780 = vst.msk [vmem:[#allocation3 + $0x18] sm:$0xff] %vm7778_vm14, %v7775_v54  ;;  %v7773_v31 = vpop.permute.xlu0 %7772 }
 0xd32   : > { %7779 = vst.msk [vmem:[#allocation3] sm:$0xff] %vm7778_vm14, %v7773_v31  ;;  %vm7885_vm14 = vcmask 572832  }
 0xd34   : > { %v7790_v49 = vpop.permute.xlu1 %7789 }
 0xd35   : > { %7795 = vst.msk [vmem:[#allocation3 + $0x18] sm:$0xff] %vm7793_vm3, %v7790_v49  ;;  %v7788_v32 = vpop.permute.xlu0 %7787 }
 0xd36   : > { %7794 = vst.msk [vmem:[#allocation3] sm:$0xff] %vm7793_vm3, %v7788_v32  ;;  %vm7870_vm3 = vcmask 425232  }
 0xd38   : > { %v7805_v34 = vpop.permute.xlu1 %7804 }
 0xd39   : > { %7810 = vst.msk [vmem:[#allocation3 + $0x18] sm:$0xff] %vm7808_vm0, %v7805_v34  ;;  %v7803_v59 = vpop.permute.xlu0 %7802 }
 0xd3a   : > { %7809 = vst.msk [vmem:[#allocation3] sm:$0xff] %vm7808_vm0, %v7803_v59  ;;  %vm7900_vm0 = vcmask 720432  }
 0xd3c   : > { %v21255_v35 = vpop.permute.xlu1 %7834 }
 0xd3d   : > { %7842 = vst.msk [vmem:[#allocation3 + $0x20] sm:$0xff] %vm2080_vm4, %v21255_v35  ;;  %v21259_v4 = vpop.permute.xlu0 %7832 }
 0xd3e   : > { %7840 = vst.msk [vmem:[#allocation3 + $0x8] sm:$0xff] %vm2080_vm4, %v21259_v4 }
 0xd40   : > { %v7852_v7 = vpop.permute.xlu1 %7851 }
 0xd41   : > { %7857 = vst.msk [vmem:[#allocation3 + $0x20] sm:$0xff] %vm7855_vm8, %v7852_v7  ;;  %v7850_v48 = vpop.permute.xlu0 %7849 }
 0xd42   : > { %7856 = vst.msk [vmem:[#allocation3 + $0x8] sm:$0xff] %vm7855_vm8, %v7850_v48  ;;  %vm7930_vm8 = vcmask 1015632  }
 0xd44   : > { %v7867_v36 = vpop.permute.xlu1 %7866 }
 0xd45   : > { %7872 = vst.msk [vmem:[#allocation3 + $0x20] sm:$0xff] %vm7870_vm3, %v7867_v36  ;;  %v7865_v2 = vpop.permute.xlu0 %7864 }
 0xd46   : > { %7871 = vst.msk [vmem:[#allocation3 + $0x8] sm:$0xff] %vm7870_vm3, %v7865_v2  ;;  %vm7945_vm3 = vcmask 1048544  }
 0xd48   : > { %v7882_v57 = vpop.permute.xlu1 %7881 }
 0xd49   : > { %7887 = vst.msk [vmem:[#allocation3 + $0x20] sm:$0xff] %vm7885_vm14, %v7882_v57  ;;  %v7880_v26 = vpop.permute.xlu0 %7879 }
 0xd4a   : > { %7886 = vst.msk [vmem:[#allocation3 + $0x8] sm:$0xff] %vm7885_vm14, %v7880_v26  ;;  %vm7947_vm14 = vcmask 113664  }
 0xd4c   : > { %v7897_v25 = vpop.permute.xlu1 %7896 }
 0xd4d   : > { %7902 = vst.msk [vmem:[#allocation3 + $0x20] sm:$0xff] %vm7900_vm0, %v7897_v25  ;;  %v7895_v14 = vpop.permute.xlu0 %7894 }
 0xd4e   : > { %7901 = vst.msk [vmem:[#allocation3 + $0x8] sm:$0xff] %vm7900_vm0, %v7895_v14  ;;  %vm7963_vm0 = vcmask 261232  }
 0xd50   : > { %v7912_v55 = vpop.permute.xlu1 %7911 }
 0xd51   : > { %7917 = vst.msk [vmem:[#allocation3 + $0x20] sm:$0xff] %vm7915_vm1, %v7912_v55  ;;  %v7910_v8 = vpop.permute.xlu0 %7909 }
 0xd52   : > { %7916 = vst.msk [vmem:[#allocation3 + $0x8] sm:$0xff] %vm7915_vm1, %v7910_v8  ;;  %vm7976_vm1 = vcmask 408832  }
 0xd54   : > { %v7927_v9 = vpop.permute.xlu1 %7926 }
 0xd55   : > { %7932 = vst.msk [vmem:[#allocation3 + $0x20] sm:$0xff] %vm7930_vm8, %v7927_v9  ;;  %v7925_v63 = vpop.permute.xlu0 %7924 }
 0xd56   : > { %7931 = vst.msk [vmem:[#allocation3 + $0x8] sm:$0xff] %vm7930_vm8, %v7925_v63  ;;  %vm7979_vm8 = vcmask 556432  }
 0xd58   : > { %v7942_v42 = vpop.permute.xlu1 %7941 }
 0xd59   : > { %7949 = vst.msk [vmem:[#allocation3 + $0x20] sm:$0xff] %vm7945_vm3, %v7942_v42  ;;  %v7940_v15 = vpop.permute.xlu0 %7939 }
 0xd5a   : > { %7950 = vst.msk [vmem:[#allocation3 + $0x28] sm:$0xff] %vm7947_vm14, %v7942_v42  ;;  %7948 = vst.msk [vmem:[#allocation3 + $0x10] sm:$0xff] %vm7947_vm14, %v7940_v15  ;;  %vm7838_vm14 = vcmask 1048560  }
 0xd5b   : > { %7946 = vst.msk [vmem:[#allocation3 + $0x8] sm:$0xff] %vm7945_vm3, %v7940_v15  ;;  %vm7823_vm3 = vcmask 1032032   ;;  %v11608_v15 = vld [vmem:[%s22161_s1 + $0x8] sm:$0xff]  ;;  %s22174_s1 = sld [smem:[#allocation28_spill]] }
 0xd5c   : > { %v7960_v13 = vpop.permute.xlu1 %7959 }
 0xd5d   : > { %7965 = vst.msk [vmem:[#allocation3 + $0x28] sm:$0xff] %vm7963_vm0, %v7960_v13  ;;  %v7958_v10 = vpop.permute.xlu0 %7957 }
 0xd5e   : > { %7964 = vst.msk [vmem:[#allocation3 + $0x10] sm:$0xff] %vm7963_vm0, %v7958_v10  ;;  %vm22166_vm0 = vcmask 744448  }
 0xd60   : > { %v7973_v43 = vpop.permute.xlu1 %7972  ;;  %v7986_v29 = vld [vmem:[#allocation3 + $0x20] sm:$0xff] }
 0xd61   : > { %7978 = vst.msk [vmem:[#allocation3 + $0x28] sm:$0xff] %vm7976_vm1, %v7973_v43  ;;  %v7971_v38 = vpop.permute.xlu0 %7970  ;;  %v21276_v45 = vadd.f32 %v9877_v18, %v7986_v29 }
 0xd62   : > { %v7983_v51 = vld [vmem:[#allocation3 + $0x8] sm:$0xff]  ;;  %7981 = vst.msk [vmem:[#allocation3 + $0x28] sm:$0xff] %vm7979_vm8, %v19709_v1 }
 0xd63   : > { %7977 = vst.msk [vmem:[#allocation3 + $0x10] sm:$0xff] %vm7976_vm1, %v7971_v38  ;;  %v9889_v56 = vmax.f32 %v21276_v45, 0.0  ;;  %v21281_v0 = vadd.f32 %v9874_v33, %v7983_v51  ;;  %vm22167_vm1 = vmmov %vm22166_vm0 }
 0xd64   : > { %7980 = vst.msk [vmem:[#allocation3 + $0x10] sm:$0xff] %vm7979_vm8, %v19709_v1  ;;  %v7820_v22 = vpop.permute.xlu1 %7819  ;;  %vm22168_vm8 = vmmov %vm22166_vm0 }
 0xd65   : > { %7825 = vst.msk [vmem:[#allocation3 + $0x18] sm:$0xff] %vm7823_vm3, %v7820_v22  ;;  %v7818_v19 = vpop.permute.xlu0 %7817  ;;  %9907 = vrot.lane.b32.xlu0 %v9889_v56, %s22159_s5  ;;  %v9886_v61 = vmax.f32 %v21281_v0, 0.0 }
 0xd66   : > { %7841 = vst.msk [vmem:[#allocation3 + $0x18] sm:$0xff] %vm7838_vm14, %v21255_v35 }
 0xd67   : > { %7824 = vst.msk [vmem:[#allocation3] sm:$0xff] %vm7823_vm3, %v7818_v19  ;;  %vm22169_vm3 = vmmov %vm22166_vm0 }
 0xd68   : > { %7839 = vst.msk [vmem:[#allocation3] sm:$0xff] %vm7838_vm14, %v21259_v4  ;;  %vm22170_vm14 = vcmask 736256  }
 0xd69   : > { %9901 = vrot.lane.b32.xlu0 %v9886_v61, %s22159_s5  ;;  %v7987_v52 = vld [vmem:[#allocation3 + $0x28] sm:$0xff]  ;;  %v15726_v61 = vld [vmem:[%s22165_s14 + $0x10] sm:$0xff] }
 0xd6a   : > { %v21305_v24 = vadd.f32 %v9878_v62, %v7987_v52  ;;  %v15727_v62 = vld [vmem:[%s22165_s14 + $0x18] sm:$0xff] }
 0xd6b   : > { %v7984_v46 = vld [vmem:[#allocation3 + $0x10] sm:$0xff] }
 0xd6c   : > { %v9890_v47 = vmax.f32 %v21305_v24, 0.0  ;;  %v21308_v30 = vadd.f32 %v9875_v28, %v7984_v46 }
 0xd6d   : > { %v7985_v27 = vld [vmem:[#allocation3 + $0x18] sm:$0xff] }
 0xd6e   : > { %9909 = vrot.lane.b32.xlu1 %v9890_v47, %s22159_s5  ;;  %v9887_v20 = vmax.f32 %v21308_v30, 0.0  ;;  %v21316_v50 = vadd.f32 %v9876_v23, %v7985_v27  ;;  %v9935_v27 = vld [vmem:[%s22165_s14] sm:$0xff] }
 0xd6f   : > { %v7982_v54 = vld [vmem:[#allocation3] sm:$0xff] }
 0xd70   : > { %v21313_v31 = vadd.f32 %v9873_v6, %v7982_v54  ;;  %v9888_v32 = vmax.f32 %v21316_v50, 0.0 }
 0xd72   : > { %v9885_v49 = vmax.f32 %v21313_v31, 0.0  ;;  %9903 = vrot.lane.b32.xlu1 %v9887_v20, %s22159_s5 }
 0xd74   : > { %9899 = vrot.lane.b32.xlu0 %v9885_v49, %s22159_s5 }
 0xd76   : > { %9905 = vrot.lane.b32.xlu1 %v9888_v32, %s22159_s5  ;;  %v9936_v32 = vld [vmem:[%s22165_s14 + $0x8] sm:$0xff] }
 0xdd7   : > { %v9908_v34 = vpop.permute.xlu0 %9907 }
 0xddb   : > { %v9902_v35 = vpop.permute.xlu0 %9901 }
 0xde0   : > { %v9910_v59 = vpop.permute.xlu1 %9909 }
 0xde1   : > { %v9914_v4 = vsel %vm7997_vm5, %v9908_v34, %v9910_v59 }
 0xde2   : > { %9926 = vst.msk [vmem:[#allocation2 + $0x28] sm:$0xff] %vm8046_vm6, %v9914_v4 }
 0xde3   : > { %9928 = vst.msk [vmem:[#allocation2 + $0x28] sm:$0xff] %vm8054_vm7, %v19709_v1 }
 0xde4   : > { %v9904_v7 = vpop.permute.xlu1 %9903 }
 0xde5   : > { %v9912_v48 = vsel %vm7997_vm5, %v9902_v35, %v9904_v7 }
 0xde6   : > { %v9900_v36 = vpop.permute.xlu0 %9899  ;;  %9923 = vst.msk [vmem:[#allocation2 + $0x10] sm:$0xff] %vm8046_vm6, %v9912_v48 }
 0xde7   : > { %9921 = vst.msk [vmem:[#allocation2] sm:$0xff] %vm8043_vm12, %v9900_v36  ;;  %v21333_v57 = vsel %vm7997_vm5, %v9900_v36, %v9902_v35 }
 0xde8   : > { %9927 = vst.msk [vmem:[#allocation2 + $0x10] sm:$0xff] %vm8054_vm7, %v19709_v1  ;;  %v9906_v2 = vpop.permute.xlu1 %9905 }
 0xde9   : > { %v21336_v26 = vsel %vm7997_vm5, %v9906_v2, %v9908_v34  ;;  %9924 = vst.msk [vmem:[#allocation2 + $0x18] sm:$0xff] %vm8043_vm12, %v9906_v2 }
 0xdea   : > { %v21339_v25 = vld [vmem:[#allocation2 + $0x28] sm:$0xff]  ;;  %v18017_v14 = vpack.c.bf16 %v21336_v26, %v21333_v57 }
 0xdeb   : > { %v19254_v55 = vpack.i.bf16 %v21339_v25, %v21336_v26 }
 0xded   : > { %19255 = vrot.lane.b32.xlu1 %v19254_v55, %s22136_s24 }
 0xdee   : > { %v21346_v17 = vld [vmem:[#allocation2] sm:$0xff] }
 0xdef   : > { %v21348_v8 = vld [vmem:[#allocation2 + $0x10] sm:$0xff]  ;;  %11637 = vst.msk [vmem:[#allocation2] sm:$0xff] %vm7997_vm5, %v19709_v1 }
 0xdf0   : > { %v19259_v9 = vpack.i.bf16 %v21348_v8, %v21333_v57  ;;  %v21354_v63 = vld [vmem:[#allocation2 + $0x18] sm:$0xff]  ;;  %v18021_v46 = vpack.c.bf16 %v21339_v25, %v21348_v8 }
 0xdf1   : > { %11638 = vst.msk [vmem:[#allocation2 + $0x18] sm:$0xff] %vm7997_vm5, %v19709_v1  ;;  %v19264_v42 = vpack.i.bf16 %v21354_v63, %v21346_v17  ;;  %v18019_v11 = vpack.c.bf16 %v21354_v63, %v21346_v17  ;;  %v15736_v17 = vld [vmem:[%s22165_s14 + $0x20] sm:$0xff] }
 0xdf2   : > { %19260 = vrot.lane.b32.xlu0 %v19259_v9, %s22136_s24  ;;  %19275 = vrot.lane.b32.xlu1 %v19259_v9, %s22131_s26 }
 0xdf6   : > { %19265 = vrot.lane.b32.xlu0 %v19264_v42, %s22136_s24  ;;  %19280 = vrot.lane.b32.xlu1 %v19264_v42, %s22131_s26 }
 0xdfa   : > { %19270 = vrot.lane.b32.xlu0 %v19254_v55, %s22131_s26  ;;  %19285 = vrot.lane.b32.xlu1 %v19254_v55, %s22149_s9 }
 0xdfe   : > { %19290 = vrot.lane.b32.xlu0 %v19259_v9, %s22149_s9  ;;  %19305 = vrot.lane.b32.xlu1 %v19259_v9, %s22160_s7 }
 0xe02   : > { %19295 = vrot.lane.b32.xlu0 %v19264_v42, %s22149_s9  ;;  %19310 = vrot.lane.b32.xlu1 %v19264_v42, %s22160_s7 }
 0xe06   : > { %19300 = vrot.lane.b32.xlu0 %v19254_v55, %s22160_s7  ;;  %19315 = vrot.lane.b32.xlu1 %v19254_v55, %s22143_s3 }
 0xe0a   : > { %19320 = vrot.lane.b32.xlu0 %v19259_v9, %s22143_s3  ;;  %19335 = vrot.lane.b32.xlu1 %v19259_v9, %s22162_s11 }
 0xe0e   : > { %19325 = vrot.lane.b32.xlu0 %v19264_v42, %s22143_s3  ;;  %19340 = vrot.lane.b32.xlu1 %v19264_v42, %s22162_s11 }
 0xe12   : > { %19330 = vrot.lane.b32.xlu0 %v19254_v55, %s22162_s11  ;;  %19345 = vrot.lane.b32.xlu1 %v19254_v55, %s22163_s4 }
 0xe16   : > { %19350 = vrot.lane.b32.xlu0 %v19259_v9, %s22163_s4  ;;  %19365 = vrot.lane.b32.xlu1 %v19259_v9, %s22164_s6 }
 0xe1a   : > { %19355 = vrot.lane.b32.xlu0 %v19264_v42, %s22163_s4  ;;  %19370 = vrot.lane.b32.xlu1 %v19264_v42, %s22164_s6 }
 0xe1e   : > { %19360 = vrot.lane.b32.xlu0 %v19254_v55, %s22164_s6  ;;  %11616 = vperm.xlu1 %18773, %v11608_v15   ;;  %v15737_v15 = vld [vmem:[%s22165_s14 + $0x28] sm:$0xff] }
 0xe22   : > { %11611 = vperm.xlu0 %18772, %v11607_v60  }
 0xe5f   : > { %v19256_v40 = vpop.permute.xlu1 %19255 }
 0xe60   : > { %v19258_v13 = vunpack.i.h.bf16 %v19256_v40  ;;  %v19257_v41 = vunpack.i.l.bf16 %v19256_v40 }
 0xe62   : > { %v9961_v29 = vsel %vm8099_vm13, %v19257_v41, %v19258_v13 }
 0xe64   : > { %v19261_v10 = vpop.permute.xlu0 %19260  ;;  %v19276_v52 = vpop.permute.xlu1 %19275 }
 0xe65   : > { %v19263_v18 = vunpack.i.h.bf16 %v19261_v10  ;;  %v19262_v58 = vunpack.i.l.bf16 %v19261_v10  ;;  %v19278_v47 = vunpack.i.h.bf16 %v19276_v52  ;;  %v19277_v6 = vunpack.i.l.bf16 %v19276_v52 }
 0xe67   : > { %v9959_v43 = vsel %vm8099_vm13, %v19262_v58, %v19263_v18  ;;  %v18013_v39 = vpack.c.bf16 %v19258_v13, %v19263_v18  ;;  %v10300_v20 = vsel %vm8453_vm2, %v19277_v6, %v19278_v47 }
 0xe68   : > { %v19266_v33 = vpop.permute.xlu0 %19265  ;;  %v18009_v38 = vpack.c.bf16 %v9961_v29, %v9959_v43  ;;  %v19281_v54 = vpop.permute.xlu1 %19280 }
 0xe69   : > { %v19268_v51 = vunpack.i.h.bf16 %v19266_v33  ;;  %v19267_v56 = vunpack.i.l.bf16 %v19266_v33  ;;  %v19283_v34 = vunpack.i.h.bf16 %v19281_v54  ;;  %v19282_v59 = vunpack.i.l.bf16 %v19281_v54 }
 0xe6a   : > { %18010 = vmatprep.subr.bf16.mxu0 %v18009_v38  ;;  %v15742_v38 = vld [vmem:[%s22165_s14 + $0x30] sm:$0xff] }
 0xe6b   : > { %v9960_v53 = vsel %vm8099_vm13, %v19268_v51, %v19257_v41  ;;  %v9958_v22 = vsel %vm8099_vm13, %v19267_v56, %v19262_v58  ;;  %v10299_v2 = vsel %vm8453_vm2, %v19282_v59, %v19277_v6 }
 0xe6c   : > { %v18011_v19 = vpack.c.bf16 %v9960_v53, %v9958_v22  ;;  %v19271_v21 = vpop.permute.xlu0 %19270  ;;  %v19286_v7 = vpop.permute.xlu1 %19285 }
 0xe6d   : > { %v19273_v16 = vunpack.i.h.bf16 %v19271_v21  ;;  %v19272_v28 = vunpack.i.l.bf16 %v19271_v21  ;;  %v19288_v57 = vunpack.i.h.bf16 %v19286_v7  ;;  %v19287_v26 = vunpack.i.l.bf16 %v19286_v7 }
 0xe6e   : > { %18012 = vmatpush1.bf16.msra.mxu0 %v18011_v19  ;;  %v15743_v19 = vld [vmem:[%s22165_s14 + $0x38] sm:$0xff] }
 0xe6f   : > { %18014 = vmatprep.subr.bf16.mxu0 %v18013_v39  ;;  %v10302_v23 = vsel %vm8453_vm2, %v19272_v28, %v19273_v16  ;;  %v10301_v4 = vsel %vm8453_vm2, %v19283_v34, %v19272_v28  ;;  %v18029_v55 = vpack.c.bf16 %v19273_v16, %v19278_v47  ;;  %v10491_v9 = vsel %vm8654_vm9, %v19287_v26, %v19288_v57 }
 0xe70   : > { %v18025_v49 = vpack.c.bf16 %v10302_v23, %v10300_v20  ;;  %v19291_v35 = vpop.permute.xlu0 %19290  ;;  %v18027_v25 = vpack.c.bf16 %v10301_v4, %v10299_v2  ;;  %v19306_v41 = vpop.permute.xlu1 %19305  ;;  %v15748_v20 = vld [vmem:[%s22165_s14 + $0x40] sm:$0xff]  ;;  %v15749_v4 = vld [vmem:[%s22165_s14 + $0x48] sm:$0xff] }
 0xe71   : > { %15728 = vmatmul.mubr.msk.f32.vlgmr.msra.gmra.mrb[30].mxu0 %vm2080_vm4, %v15726_v61  ;;  %v19293_v48 = vunpack.i.h.bf16 %v19291_v35  ;;  %v19292_v36 = vunpack.i.l.bf16 %v19291_v35  ;;  %v19308_v58 = vunpack.i.h.bf16 %v19306_v41  ;;  %v19307_v43 = vunpack.i.l.bf16 %v19306_v41 }
 0xe72   : > { %18016 = vmatpush3.bf16.msra.mxu0 %v18013_v39  ;;  %10044 = vmatprep.mubr.f32.mxu0 %v19709_v1 }
 0xe73   : > { %18018 = vmatprep.subr.bf16.mxu0 %v18017_v14  ;;  %v10489_v8 = vsel %vm8654_vm9, %v19292_v36, %v19293_v48  ;;  %v18037_v33 = vpack.c.bf16 %v19288_v57, %v19293_v48  ;;  %v10678_v53 = vsel %vm8855_vm11, %v19307_v43, %v19308_v58 }
 0xe74   : > { %v19296_v14 = vpop.permute.xlu0 %19295  ;;  %v19311_v56 = vpop.permute.xlu1 %19310 }
 0xe75   : > { %15729 = vmatmul.mubr.msk.f32.gmra.mrb[32].mxu0 %vm2080_vm4, %v15727_v62  ;;  %v19298_v63 = vunpack.i.h.bf16 %v19296_v14  ;;  %v19297_v42 = vunpack.i.l.bf16 %v19296_v14  ;;  %v19313_v39 = vunpack.i.h.bf16 %v19311_v56 }
 0xe76   : > { %17211 = vmatprep.mubr.msk.f32.mxu0 %vm2080_vm4, %v15726_v61  ;;  %v19312_v61 = vunpack.i.l.bf16 %v19311_v56 }
 0xe77   : > { %v10490_v40 = vsel %vm8654_vm9, %v19298_v63, %v19287_v26  ;;  %v10488_v13 = vsel %vm8654_vm9, %v19297_v42, %v19292_v36 }
 0xe78   : > { %v19301_v60 = vpop.permute.xlu0 %19300  ;;  %v18035_v29 = vpack.c.bf16 %v10490_v40, %v10488_v13  ;;  %v19316_v52 = vpop.permute.xlu1 %19315 }
 0xe79   : > { %17212 = vmatmul.mubr.msk.f32.vlgmr.msra.gmra.mrb[34].mxu0 %vm2080_vm4, %v15727_v62  ;;  %v19303_v10 = vunpack.i.h.bf16 %v19301_v60  ;;  %v19302_v18 = vunpack.i.l.bf16 %v19301_v60  ;;  %v19318_v6 = vunpack.i.h.bf16 %v19316_v52 }
 0xe7a   : > { %18020 = vmatpush1.bf16.msra.mxu0 %v18019_v11  ;;  %10196 = vmatprep.mubr.f32.mxu0 %v19709_v1  ;;  %v18033_v11 = vpack.c.bf16 %v10491_v9, %v10489_v8  ;;  %v15754_v8 = vld [vmem:[%s22165_s14 + $0x50] sm:$0xff] }
 0xe7b   : > { %18022 = vmatprep.subr.bf16.mxu0 %v18021_v46  ;;  %v10680_v51 = vsel %vm8855_vm11, %v19302_v18, %v19303_v10  ;;  %v10679_v21 = vsel %vm8855_vm11, %v19313_v39, %v19302_v18  ;;  %v18045_v23 = vpack.c.bf16 %v19303_v10, %v19308_v58 }
 0xe7c   : > { %v18041_v22 = vpack.c.bf16 %v10680_v51, %v10678_v53  ;;  %v19321_v62 = vpop.permute.xlu0 %19320  ;;  %v19336_v2 = vpop.permute.xlu1 %19335  ;;  %v15760_v53 = vld [vmem:[%s22165_s14 + $0x60] sm:$0xff] }
 0xe7d   : > { %15732 = vmatmul.mubr.msk.f32.vlgmr.msra.gmra.mrb[30].mxu0 %vm2080_vm4, %v9935_v27  ;;  %v19323_v16 = vunpack.i.h.bf16 %v19321_v62  ;;  %v19322_v28 = vunpack.i.l.bf16 %v19321_v62  ;;  %v19338_v14 = vunpack.i.h.bf16 %v19336_v2 }
 0xe7e   : > { %18024 = vmatpush3.bf16.msra.mxu0 %v18021_v46  ;;  %10202 = vmatprep.mubr.f32.mxu0 %v19709_v1  ;;  %v10677_v46 = vsel %vm8855_vm11, %v19312_v61, %v19307_v43 }
 0xe7f   : > { %18026 = vmatprep.subr.bf16.mxu0 %v18025_v49  ;;  %v18043_v47 = vpack.c.bf16 %v10679_v21, %v10677_v46  ;;  %v10867_v49 = vsel %vm9056_vm10, %v19322_v28, %v19323_v16  ;;  %v15761_v21 = vld [vmem:[%s22165_s14 + $0x68] sm:$0xff] }
 0xe80   : > { %v19326_v54 = vpop.permute.xlu0 %19325  ;;  %v19341_v63 = vpop.permute.xlu1 %19340 }
 0xe81   : > { %15733 = vmatmul.mubr.msk.f32.gmra.mrb[32].mxu0 %vm2080_vm4, %v9936_v32  ;;  %v19328_v34 = vunpack.i.h.bf16 %v19326_v54  ;;  %v19327_v59 = vunpack.i.l.bf16 %v19326_v54  ;;  %v19343_v60 = vunpack.i.h.bf16 %v19341_v63  ;;  %v19342_v40 = vunpack.i.l.bf16 %v19341_v63 }
 0xe82   : > { %17218 = vmatprep.mubr.msk.f32.mxu0 %vm2080_vm4, %v9935_v27  ;;  %v19317_v27 = vunpack.i.l.bf16 %v19316_v52 }
 0xe83   : > { %v10866_v36 = vsel %vm9056_vm10, %v19327_v59, %v19322_v28 }
 0xe84   : > { %v19331_v7 = vpop.permute.xlu0 %19330  ;;  %v10868_v48 = vsel %vm9056_vm10, %v19328_v34, %v19317_v27  ;;  %v19346_v10 = vpop.permute.xlu1 %19345 }
 0xe85   : > { %17219 = vmatmul.mubr.msk.f32.vlgmr.msra.gmra.mrb[34].mxu0 %vm2080_vm4, %v9936_v32  ;;  %v10869_v32 = vsel %vm9056_vm10, %v19317_v27, %v19318_v6  ;;  %v19333_v57 = vunpack.i.h.bf16 %v19331_v7  ;;  %v19332_v26 = vunpack.i.l.bf16 %v19331_v7 }
 0xe86   : > { %18028 = vmatpush1.bf16.msra.mxu0 %v18027_v25  ;;  %10379 = vmatprep.mubr.f32.mxu0 %v19709_v1  ;;  %v18049_v35 = vpack.c.bf16 %v10869_v32, %v10867_v49  ;;  %v18051_v25 = vpack.c.bf16 %v10868_v48, %v10866_v36  ;;  %v15766_v49 = vld [vmem:[%s22165_s14 + $0x70] sm:$0xff] }
 0xe87   : > { %18030 = vmatprep.subr.bf16.mxu0 %v18029_v55  ;;  %v11058_v9 = vsel %vm9257_vm15, %v19332_v26, %v19333_v57  ;;  %v11057_v41 = vsel %vm9257_vm15, %v19343_v60, %v19332_v26  ;;  %v18061_v51 = vpack.c.bf16 %v19333_v57, %v19338_v14 }
 0xe88   : > { %v19351_v13 = vpop.permute.xlu0 %19350  ;;  %v19366_v46 = vpop.permute.xlu1 %19365 }
 0xe89   : > { %15738 = vmatmul.mubr.msk.f32.vlgmr.msra.gmra.mrb[30].mxu0 %vm2080_vm4, %v15736_v17  ;;  %v19353_v18 = vunpack.i.h.bf16 %v19351_v13  ;;  %v19352_v58 = vunpack.i.l.bf16 %v19351_v13  ;;  %v19367_v54 = vunpack.i.l.bf16 %v19366_v46 }
 0xe8a   : > { %18032 = vmatpush3.bf16.msra.mxu0 %v18029_v55  ;;  %10385 = vmatprep.mubr.f32.mxu0 %v19709_v1  ;;  %v19337_v55 = vunpack.i.l.bf16 %v19336_v2 }
 0xe8b   : > { %18034 = vmatprep.subr.bf16.mxu0 %v18033_v11 }
 0xe8c   : > { %v11056_v42 = vsel %vm9257_vm15, %v19337_v55, %v19338_v14  ;;  %v11055_v43 = vsel %vm9257_vm15, %v19342_v40, %v19337_v55  ;;  %v19356_v56 = vpop.permute.xlu0 %19355  ;;  %v19371_v34 = vpop.permute.xlu1 %19370  ;;  %v15773_v14 = vld [vmem:[%s22165_s14 + $0x88] sm:$0xff] }
 0xe8d   : > { %15739 = vmatmul.mubr.msk.f32.gmra.mrb[32].mxu0 %vm2080_vm4, %v15737_v15  ;;  %v18057_v11 = vpack.c.bf16 %v11058_v9, %v11056_v42  ;;  %v19358_v39 = vunpack.i.h.bf16 %v19356_v56  ;;  %v19357_v61 = vunpack.i.l.bf16 %v19356_v56  ;;  %v19373_v7 = vunpack.i.h.bf16 %v19371_v34 }
 0xe8e   : > { %17225 = vmatprep.mubr.msk.f32.mxu0 %vm2080_vm4, %v15736_v17  ;;  %v18053_v17 = vpack.c.bf16 %v19318_v6, %v19323_v16  ;;  %v19372_v48 = vunpack.i.l.bf16 %v19371_v34 }
 0xe8f   : > { %v11244_v28 = vsel %vm22169_vm3, %v19357_v61, %v19352_v58 }
 0xe90   : > { %v19361_v52 = vpop.permute.xlu0 %19360 }
 0xe91   : > { %17226 = vmatmul.mubr.msk.f32.vlgmr.msra.gmra.mrb[34].mxu0 %vm2080_vm4, %v15737_v15  ;;  %v15755_v15 = vld [vmem:[%s22165_s14 + $0x58] sm:$0xff]  ;;  %v19362_v6 = vunpack.i.l.bf16 %v19361_v52 }
 0xe92   : > { %18036 = vmatpush1.bf16.msra.mxu0 %v18035_v29  ;;  %10568 = vmatprep.mubr.f32.mxu0 %v19709_v1  ;;  %v18059_v29 = vpack.c.bf16 %v11057_v41, %v11055_v43 }
 0xe93   : > { %18038 = vmatprep.subr.bf16.mxu0 %v18037_v33 }
 0xe95   : > { %15744 = vmatmul.mubr.msk.f32.vlgmr.msra.gmra.mrb[30].mxu0 %vm2080_vm4, %v15742_v38 }
 0xe96   : > { %18040 = vmatpush3.bf16.msra.mxu0 %v18037_v33  ;;  %10574 = vmatprep.mubr.f32.mxu0 %v19709_v1  ;;  %v19348_v33 = vunpack.i.h.bf16 %v19346_v10 }
 0xe97   : > { %18042 = vmatprep.subr.bf16.mxu0 %v18041_v22  ;;  %v11245_v22 = vsel %vm22166_vm0, %v19352_v58, %v19353_v18  ;;  %vm22171_vm0 = vmmov %vm22170_vm14 }
 0xe99   : > { %15745 = vmatmul.mubr.msk.f32.gmra.mrb[32].mxu0 %vm2080_vm4, %v15743_v19 }
 0xe9a   : > { %17232 = vmatprep.mubr.msk.f32.mxu0 %vm2080_vm4, %v15742_v38  ;;  %v19347_v38 = vunpack.i.l.bf16 %v19346_v10 }
 0xe9c   : > { %v11246_v16 = vsel %vm22168_vm8, %v19358_v39, %v19347_v38  ;;  %vm22173_vm8 = vmmov %vm22171_vm0 }
 0xe9d   : > { %17233 = vmatmul.mubr.msk.f32.vlgmr.msra.gmra.mrb[34].mxu0 %vm2080_vm4, %v15743_v19  ;;  %v11247_v19 = vsel %vm22167_vm1, %v19347_v38, %v19348_v33  ;;  %v18067_v27 = vpack.c.bf16 %v11246_v16, %v11244_v28  ;;  %vm22172_vm1 = vmmov %vm22171_vm0  ;;  %v11433_v2 = vsel %vm22173_vm8, %v19372_v48, %v19367_v54  ;;  %v13354_v48 = vld [vmem:[%s19915_s8 + $0x8] sm:$0xff] }
 0xe9e   : > { %18044 = vmatpush1.bf16.msra.mxu0 %v18043_v47  ;;  %10757 = vmatprep.mubr.f32.mxu0 %v19709_v1  ;;  %v18065_v62 = vpack.c.bf16 %v11247_v19, %v11245_v22  ;;  %v19363_v47 = vunpack.i.h.bf16 %v19361_v52  ;;  %v11435_v36 = vsel %vm22172_vm1, %v19373_v7, %v19362_v6 }
 0xe9f   : > { %18046 = vmatprep.subr.bf16.mxu0 %v18045_v23  ;;  %v18075_v57 = vpack.c.bf16 %v11435_v36, %v11433_v2  ;;  %v13353_v36 = vld [vmem:[%s19915_s8] sm:$0xff] }
 0xea0   : > { %v11436_v32 = vsel %vm22170_vm14, %v19362_v6, %v19363_v47  ;;  %vm22175_vm14 = vmmov %vm22169_vm3 }
 0xea1   : > { %15750 = vmatmul.mubr.msk.f32.vlgmr.msra.gmra.mrb[30].mxu0 %vm2080_vm4, %v15748_v20 }
 0xea2   : > { %18048 = vmatpush3.bf16.msra.mxu0 %v18045_v23  ;;  %10763 = vmatprep.mubr.f32.mxu0 %v19709_v1  ;;  %v19368_v23 = vunpack.i.h.bf16 %v19366_v46 }
 0xea3   : > { %18050 = vmatprep.subr.bf16.mxu0 %v18049_v35 }
 0xea4   : > { %v11434_v59 = vsel %vm22171_vm0, %v19367_v54, %v19368_v23  ;;  %v18077_v26 = vpack.c.bf16 %v19363_v47, %v19368_v23  ;;  %vm22176_vm0 = vmmov %vm22169_vm3 }
 0xea5   : > { %15751 = vmatmul.mubr.msk.f32.gmra.mrb[32].mxu0 %vm2080_vm4, %v15749_v4  ;;  %v18073_v35 = vpack.c.bf16 %v11436_v32, %v11434_v59  ;;  %vm22177_vm1 = vmmov %vm22176_vm0 }
 0xea6   : > { %17239 = vmatprep.mubr.msk.f32.mxu0 %vm2080_vm4, %v15748_v20  ;;  %v18069_v20 = vpack.c.bf16 %v19348_v33, %v19353_v18 }
 0xea9   : > { %17240 = vmatmul.mubr.msk.f32.vlgmr.msra.gmra.mrb[34].mxu0 %vm2080_vm4, %v15749_v4  ;;  %v15767_v4 = vld [vmem:[%s22165_s14 + $0x78] sm:$0xff] }
 0xeaa   : > { %18052 = vmatpush1.bf16.msra.mxu0 %v18051_v25  ;;  %10946 = vmatprep.mubr.f32.mxu0 %v19709_v1  ;;  %v15772_v25 = vld [vmem:[%s22165_s14 + $0x80] sm:$0xff] }
 0xeab   : > { %18054 = vmatprep.subr.bf16.mxu0 %v18053_v17 }
 0xead   : > { %15756 = vmatmul.mubr.msk.f32.vlgmr.msra.gmra.mrb[30].mxu0 %vm2080_vm4, %v15754_v8 }
 0xeae   : > { %18056 = vmatpush3.bf16.msra.mxu0 %v18053_v17  ;;  %10952 = vmatprep.mubr.f32.mxu0 %v19709_v1  ;;  %v11612_v17 = vpop.permute.xlu0 %11611 }
 0xeaf   : > { %18058 = vmatprep.subr.bf16.mxu0 %v18057_v11  ;;  %v11617_v11 = vpop.permute.xlu1 %11616 }
 0xeb1   : > { %15757 = vmatmul.mubr.msk.f32.gmra.mrb[32].mxu0 %vm2080_vm4, %v15755_v15 }
 0xeb2   : > { %17246 = vmatprep.mubr.msk.f32.mxu0 %vm2080_vm4, %v15754_v8 }
 0xeb5   : > { %17247 = vmatmul.mubr.msk.f32.vlgmr.msra.gmra.mrb[34].mxu0 %vm2080_vm4, %v15755_v15 }
 0xeb6   : > { %18060 = vmatpush1.bf16.msra.mxu0 %v18059_v29  ;;  %11135 = vmatprep.mubr.f32.mxu0 %v19709_v1 }
 0xeb7   : > { %18062 = vmatprep.subr.bf16.mxu0 %v18061_v51 }
 0xeb9   : > { %15762 = vmatmul.mubr.msk.f32.vlgmr.msra.gmra.mrb[30].mxu0 %vm2080_vm4, %v15760_v53 }
 0xeba   : > { %18064 = vmatpush3.bf16.msra.mxu0 %v18061_v51  ;;  %11141 = vmatprep.mubr.f32.mxu0 %v19709_v1 }
 0xebb   : > { %18066 = vmatprep.subr.bf16.mxu0 %v18065_v62 }
 0xebd   : > { %15763 = vmatmul.mubr.msk.f32.gmra.mrb[32].mxu0 %vm2080_vm4, %v15761_v21 }
 0xebe   : > { %17253 = vmatprep.mubr.msk.f32.mxu0 %vm2080_vm4, %v15760_v53 }
 0xec1   : > { %17254 = vmatmul.mubr.msk.f32.vlgmr.msra.gmra.mrb[34].mxu0 %vm2080_vm4, %v15761_v21 }
 0xec2   : > { %18068 = vmatpush1.bf16.msra.mxu0 %v18067_v27  ;;  %11324 = vmatprep.mubr.f32.mxu0 %v19709_v1 }
 0xec3   : > { %18070 = vmatprep.subr.bf16.mxu0 %v18069_v20 }
 0xec5   : > { %15768 = vmatmul.mubr.msk.f32.vlgmr.msra.gmra.mrb[30].mxu0 %vm2080_vm4, %v15766_v49 }
 0xec6   : > { %18072 = vmatpush3.bf16.msra.mxu0 %v18069_v20  ;;  %11330 = vmatprep.mubr.f32.mxu0 %v19709_v1 }
 0xec7   : > { %18074 = vmatprep.subr.bf16.mxu0 %v18073_v35 }
 0xec9   : > { %15769 = vmatmul.mubr.msk.f32.gmra.mrb[32].mxu0 %vm2080_vm4, %v15767_v4 }
 0xeca   : > { %17260 = vmatprep.mubr.msk.f32.mxu0 %vm2080_vm4, %v15766_v49 }
 0xecd   : > { %17261 = vmatmul.mubr.msk.f32.vlgmr.msra.gmra.mrb[34].mxu0 %vm2080_vm4, %v15767_v4 }
 0xece   : > { %18076 = vmatpush1.bf16.msra.mxu0 %v18075_v57  ;;  %11513 = vmatprep.mubr.f32.mxu0 %v19709_v1 }
 0xecf   : > { %18078 = vmatprep.subr.bf16.mxu0 %v18077_v26 }
 0xed1   : > { %15774 = vmatmul.mubr.msk.f32.vlgmr.msra.gmra.mrb[30].mxu0 %vm2080_vm4, %v15772_v25 }
 0xed2   : > { %18080 = vmatpush3.bf16.msra.mxu0 %v18077_v26  ;;  %11519 = vmatprep.mubr.f32.mxu0 %v19709_v1 }
 0xed5   : > { %15775 = vmatmul.mubr.msk.f32.gmra.mrb[32].mxu0 %vm2080_vm4, %v15773_v14 }
 0xed6   : > { %17267 = vmatprep.mubr.msk.f32.mxu0 %vm2080_vm4, %v15772_v25 }
 0xed9   : > { %17268 = vmatmul.mubr.msk.f32.vlgmr.msra.gmra.mrb[34].mxu0 %vm2080_vm4, %v15773_v14 }
 0xeda   : > { %13531 = vmatprep.mubr.f32.mxu0 %v19709_v1 }
 0xfa4   : > { %v11515_v55 = vpop.f32.mrb[30].mxu0 }
 0xfa5   : > { %v11517_v8 = vpop.f32.mrb[31].mxu0  ;;  %v11619_v60 = vadd.f32 %v11612_v17, %v11515_v55 }
 0xfa6   : > { %v11620_v9 = vadd.f32 %v11612_v17, %v11517_v8 }
 0xfa7   : > { %v11625_v43 = vmul.f32 %v11619_v60, %v21299_v5 }
 0xfa8   : > { %v11626_v63 = vmul.f32 %v11620_v9, %v21271_v12  ;;  %v11521_v42 = vpop.f32.mrb[32].mxu0 }
 0xfa9   : > { %v11523_v15 = vpop.f32.mrb[33].mxu0  ;;  %v11622_v51 = vadd.f32 %v11617_v11, %v11521_v42  ;;  %v11631_v22 = vmax.f32 %v11625_v43, 0.0 }
 0xfaa   : > { %v11632_v40 = vmax.f32 %v11626_v63, 0.0  ;;  %v11623_v13 = vadd.f32 %v11617_v11, %v11523_v15 }
 0xfab   : > { %v11628_v19 = vmul.f32 %v11622_v51, %v21299_v5 }
 0xfac   : > { %v11629_v41 = vmul.f32 %v11623_v13, %v21271_v12  ;;  %11647 = vrot.lane.b32.xlu0 %v11632_v40, %s22159_s5  ;;  %v17269_v10 = vpop.f32.mrb[34].mxu0 }
 0xfad   : > { %v11624_v18 = vadd.f32 %v17269_v10, %v11617_v11  ;;  %v11592_v58 = vpop.f32.mrb[35].mxu0  ;;  %v11634_v61 = vmax.f32 %v11628_v19, 0.0  ;;  %v15779_v10 = vld [vmem:[%s22174_s1 + $0x18] sm:$0xff] }
 0xfae   : > { %v11635_v29 = vmax.f32 %v11629_v41, 0.0  ;;  %v11621_v33 = vadd.f32 %v11612_v17, %v11592_v58  ;;  %v15778_v41 = vld [vmem:[%s22174_s1 + $0x10] sm:$0xff] }
 0xfaf   : > { %v11630_v38 = vmul.f32 %v11624_v18, %v21285_v37 }
 0xfb0   : > { %11653 = vrot.lane.b32.xlu0 %v11635_v29, %s22159_s5  ;;  %v11627_v53 = vmul.f32 %v11621_v33, %v21285_v37 }
 0xfb1   : > { %v11636_v56 = vmax.f32 %v11630_v38, 0.0 }
 0xfb2   : > { %v11633_v39 = vmax.f32 %v11627_v53, 0.0 }
 0xfb3   : > { %11655 = vrot.lane.b32.xlu1 %v11636_v56, %s22159_s5  ;;  %v11681_v56 = vld [vmem:[%s22174_s1] sm:$0xff] }
 0xfb4   : > { %11645 = vrot.lane.b32.xlu0 %v11631_v22, %s22159_s5 }
 0xfb7   : > { %11649 = vrot.lane.b32.xlu1 %v11633_v39, %s22159_s5 }
 0xfbb   : > { %11651 = vrot.lane.b32.xlu1 %v11634_v61, %s22159_s5  ;;  %v11682_v61 = vld [vmem:[%s22174_s1 + $0x8] sm:$0xff] }
0x101e   : > { %v11648_v62 = vpop.permute.xlu0 %11647 }
0x1022   : > { %v11654_v21 = vpop.permute.xlu0 %11653 }
0x1025   : > { %v11656_v52 = vpop.permute.xlu1 %11655 }
0x1026   : > { %v11660_v16 = vsel %vm7997_vm5, %v11654_v21, %v11656_v52  ;;  %v11646_v28 = vpop.permute.xlu0 %11645 }
0x1027   : > { %11672 = vst.msk [vmem:[#allocation2 + $0x28] sm:$0xff] %vm8046_vm6, %v11660_v16  ;;  %v21515_v27 = vsel %vm7997_vm5, %v11646_v28, %v11648_v62 }
0x1028   : > { %11667 = vst.msk [vmem:[#allocation2] sm:$0xff] %vm8043_vm12, %v11646_v28 }
0x1029   : > { %11674 = vst.msk [vmem:[#allocation2 + $0x28] sm:$0xff] %vm8054_vm7, %v19709_v1  ;;  %v11650_v46 = vpop.permute.xlu1 %11649 }
0x102a   : > { %v11658_v47 = vsel %vm7997_vm5, %v11648_v62, %v11650_v46 }
0x102b   : > { %11669 = vst.msk [vmem:[#allocation2 + $0x10] sm:$0xff] %vm8046_vm6, %v11658_v47 }
0x102c   : > { %11673 = vst.msk [vmem:[#allocation2 + $0x10] sm:$0xff] %vm8054_vm7, %v19709_v1 }
0x102d   : > { %v11652_v6 = vpop.permute.xlu1 %11651 }
0x102e   : > { %v21518_v23 = vsel %vm7997_vm5, %v11652_v6, %v11654_v21  ;;  %11670 = vst.msk [vmem:[#allocation2 + $0x18] sm:$0xff] %vm8043_vm12, %v11652_v6 }
0x102f   : > { %v21521_v54 = vld [vmem:[#allocation2] sm:$0xff]  ;;  %v18089_v49 = vpack.c.bf16 %v21518_v23, %v21515_v27 }
0x1030   : > { %v21523_v20 = vld [vmem:[#allocation2 + $0x28] sm:$0xff]  ;;  %13389 = vst.msk [vmem:[#allocation2] sm:$0xff] %vm7997_vm5, %v19709_v1 }
0x1031   : > { %v19374_v32 = vpack.i.bf16 %v21523_v20, %v21518_v23 }
0x1033   : > { %19375 = vrot.lane.b32.xlu1 %v19374_v32, %s22136_s24  ;;  %v21532_v34 = vld [vmem:[#allocation2 + $0x10] sm:$0xff] }
0x1034   : > { %v19379_v59 = vpack.i.bf16 %v21532_v34, %v21515_v27  ;;  %v18093_v33 = vpack.c.bf16 %v21523_v20, %v21532_v34 }
0x1035   : > { %v21536_v35 = vld [vmem:[#allocation2 + $0x18] sm:$0xff] }
0x1036   : > { %19380 = vrot.lane.b32.xlu0 %v19379_v59, %s22136_s24  ;;  %13390 = vst.msk [vmem:[#allocation2 + $0x18] sm:$0xff] %vm7997_vm5, %v19709_v1  ;;  %v19384_v4 = vpack.i.bf16 %v21536_v35, %v21521_v54  ;;  %v18091_v7 = vpack.c.bf16 %v21536_v35, %v21521_v54 }
0x1037   : > { %19395 = vrot.lane.b32.xlu1 %v19379_v59, %s22131_s26 }
0x103a   : > { %19385 = vrot.lane.b32.xlu0 %v19384_v4, %s22136_s24 }
0x103b   : > { %19400 = vrot.lane.b32.xlu1 %v19384_v4, %s22131_s26 }
0x103e   : > { %19390 = vrot.lane.b32.xlu0 %v19374_v32, %s22131_s26 }
0x103f   : > { %19405 = vrot.lane.b32.xlu1 %v19374_v32, %s22149_s9 }
0x1042   : > { %19410 = vrot.lane.b32.xlu0 %v19379_v59, %s22149_s9 }
0x1043   : > { %19425 = vrot.lane.b32.xlu1 %v19379_v59, %s22160_s7 }
0x1046   : > { %19415 = vrot.lane.b32.xlu0 %v19384_v4, %s22149_s9 }
0x1047   : > { %19430 = vrot.lane.b32.xlu1 %v19384_v4, %s22160_s7 }
0x104a   : > { %19420 = vrot.lane.b32.xlu0 %v19374_v32, %s22160_s7 }
0x104b   : > { %19435 = vrot.lane.b32.xlu1 %v19374_v32, %s22143_s3 }
0x104e   : > { %19440 = vrot.lane.b32.xlu0 %v19379_v59, %s22143_s3 }
0x104f   : > { %19455 = vrot.lane.b32.xlu1 %v19379_v59, %s22162_s11 }
0x1052   : > { %19445 = vrot.lane.b32.xlu0 %v19384_v4, %s22143_s3 }
0x1053   : > { %19460 = vrot.lane.b32.xlu1 %v19384_v4, %s22162_s11 }
0x1056   : > { %19450 = vrot.lane.b32.xlu0 %v19374_v32, %s22162_s11 }
0x1057   : > { %19465 = vrot.lane.b32.xlu1 %v19374_v32, %s22163_s4 }
0x105a   : > { %19470 = vrot.lane.b32.xlu0 %v19379_v59, %s22163_s4 }
0x105b   : > { %19485 = vrot.lane.b32.xlu1 %v19379_v59, %s22164_s6 }
0x105e   : > { %19475 = vrot.lane.b32.xlu0 %v19384_v4, %s22163_s4 }
0x105f   : > { %19490 = vrot.lane.b32.xlu1 %v19384_v4, %s22164_s6 }
0x1062   : > { %19480 = vrot.lane.b32.xlu0 %v19374_v32, %s22164_s6  ;;  %v15788_v32 = vld [vmem:[%s22174_s1 + $0x20] sm:$0xff] }
0x1063   : > { %13362 = vperm.xlu1 %18773, %v13354_v48   ;;  %v15789_v48 = vld [vmem:[%s22174_s1 + $0x28] sm:$0xff] }
0x1066   : > { %13357 = vperm.xlu0 %18772, %v13353_v36  }
0x10a5   : > { %v19376_v2 = vpop.permute.xlu1 %19375 }
0x10a6   : > { %v19378_v57 = vunpack.i.h.bf16 %v19376_v2  ;;  %v19377_v26 = vunpack.i.l.bf16 %v19376_v2 }
0x10a8   : > { %v19381_v25 = vpop.permute.xlu0 %19380  ;;  %v11707_v8 = vsel %vm8099_vm13, %v19377_v26, %v19378_v57 }
0x10a9   : > { %v19383_v14 = vunpack.i.h.bf16 %v19381_v25  ;;  %v19382_v55 = vunpack.i.l.bf16 %v19381_v25  ;;  %v19396_v58 = vpop.permute.xlu1 %19395 }
0x10aa   : > { %v19398_v38 = vunpack.i.h.bf16 %v19396_v58  ;;  %v19397_v51 = vunpack.i.l.bf16 %v19396_v58 }
0x10ab   : > { %v11705_v17 = vsel %vm8099_vm13, %v19382_v55, %v19383_v14  ;;  %v18085_v13 = vpack.c.bf16 %v19378_v57, %v19383_v14 }
0x10ac   : > { %v19386_v9 = vpop.permute.xlu0 %19385  ;;  %v18081_v63 = vpack.c.bf16 %v11707_v8, %v11705_v17  ;;  %v12046_v19 = vsel %vm8453_vm2, %v19397_v51, %v19398_v38 }
0x10ad   : > { %v19388_v42 = vunpack.i.h.bf16 %v19386_v9  ;;  %v19387_v11 = vunpack.i.l.bf16 %v19386_v9  ;;  %v19401_v22 = vpop.permute.xlu1 %19400 }
0x10ae   : > { %18082 = vmatprep.subr.bf16.mxu1 %v18081_v63  ;;  %v19403_v62 = vunpack.i.h.bf16 %v19401_v22  ;;  %v19402_v21 = vunpack.i.l.bf16 %v19401_v22  ;;  %v15794_v63 = vld [vmem:[%s22174_s1 + $0x30] sm:$0xff] }
0x10af   : > { %v11704_v15 = vsel %vm8099_vm13, %v19387_v11, %v19382_v55  ;;  %v11706_v60 = vsel %vm8099_vm13, %v19388_v42, %v19377_v26 }
0x10b0   : > { %v18083_v40 = vpack.c.bf16 %v11706_v60, %v11704_v15  ;;  %v19391_v18 = vpop.permute.xlu0 %19390  ;;  %v12045_v6 = vsel %vm8453_vm2, %v19402_v21, %v19397_v51 }
0x10b1   : > { %v19393_v43 = vunpack.i.h.bf16 %v19391_v18  ;;  %v19392_v29 = vunpack.i.l.bf16 %v19391_v18  ;;  %v19406_v28 = vpop.permute.xlu1 %19405 }
0x10b2   : > { %18084 = vmatpush1.bf16.msra.mxu1 %v18083_v40  ;;  %v19408_v23 = vunpack.i.h.bf16 %v19406_v28  ;;  %v19407_v54 = vunpack.i.l.bf16 %v19406_v28  ;;  %v15795_v40 = vld [vmem:[%s22174_s1 + $0x38] sm:$0xff] }
0x10b3   : > { %18086 = vmatprep.subr.bf16.mxu1 %v18085_v13  ;;  %v12048_v53 = vsel %vm8453_vm2, %v19392_v29, %v19393_v43  ;;  %v12047_v16 = vsel %vm8453_vm2, %v19403_v62, %v19392_v29  ;;  %v18101_v20 = vpack.c.bf16 %v19393_v43, %v19398_v38 }
0x10b4   : > { %v18097_v39 = vpack.c.bf16 %v12048_v53, %v12046_v19  ;;  %v19411_v52 = vpop.permute.xlu0 %19410  ;;  %v18099_v27 = vpack.c.bf16 %v12047_v16, %v12045_v6  ;;  %v12237_v59 = vsel %vm8654_vm9, %v19407_v54, %v19408_v23  ;;  %v15800_v19 = vld [vmem:[%s22174_s1 + $0x40] sm:$0xff]  ;;  %v15801_v16 = vld [vmem:[%s22174_s1 + $0x48] sm:$0xff] }
0x10b5   : > { %15780 = vmatmul.mubr.msk.f32.vlgmr.msra.gmra.mrb[14].mxu1 %vm2080_vm4, %v15778_v41  ;;  %v19413_v46 = vunpack.i.h.bf16 %v19411_v52  ;;  %v19412_v47 = vunpack.i.l.bf16 %v19411_v52  ;;  %v19426_v26 = vpop.permute.xlu1 %19425 }
0x10b6   : > { %18088 = vmatpush3.bf16.msra.mxu1 %v18085_v13  ;;  %11790 = vmatprep.mubr.f32.mxu1 %v19709_v1  ;;  %v19428_v17 = vunpack.i.h.bf16 %v19426_v26  ;;  %v19427_v8 = vunpack.i.l.bf16 %v19426_v26 }
0x10b7   : > { %18090 = vmatprep.subr.bf16.mxu1 %v18089_v49  ;;  %v12235_v34 = vsel %vm8654_vm9, %v19412_v47, %v19413_v46  ;;  %v18109_v9 = vpack.c.bf16 %v19408_v23, %v19413_v46 }
0x10b8   : > { %v19416_v49 = vpop.permute.xlu0 %19415  ;;  %v12424_v15 = vsel %vm8855_vm11, %v19427_v8, %v19428_v17 }
0x10b9   : > { %15781 = vmatmul.mubr.msk.f32.gmra.mrb[16].mxu1 %vm2080_vm4, %v15779_v10  ;;  %v19418_v35 = vunpack.i.h.bf16 %v19416_v49  ;;  %v19417_v4 = vunpack.i.l.bf16 %v19416_v49  ;;  %v19431_v11 = vpop.permute.xlu1 %19430 }
0x10ba   : > { %17274 = vmatprep.mubr.msk.f32.mxu1 %vm2080_vm4, %v15778_v41  ;;  %v19433_v13 = vunpack.i.h.bf16 %v19431_v11  ;;  %v19432_v41 = vunpack.i.l.bf16 %v19431_v11 }
0x10bb   : > { %v12234_v2 = vsel %vm8654_vm9, %v19417_v4, %v19412_v47  ;;  %v12236_v57 = vsel %vm8654_vm9, %v19418_v35, %v19407_v54 }
0x10bc   : > { %v19421_v36 = vpop.permute.xlu0 %19420  ;;  %v18107_v55 = vpack.c.bf16 %v12236_v57, %v12234_v2 }
0x10bd   : > { %17275 = vmatmul.mubr.msk.f32.vlgmr.msra.gmra.mrb[18].mxu1 %vm2080_vm4, %v15779_v10  ;;  %v19423_v25 = vunpack.i.h.bf16 %v19421_v36  ;;  %v19422_v14 = vunpack.i.l.bf16 %v19421_v36  ;;  %v19436_v58 = vpop.permute.xlu1 %19435 }
0x10be   : > { %18092 = vmatpush1.bf16.msra.mxu1 %v18091_v7  ;;  %11942 = vmatprep.mubr.f32.mxu1 %v19709_v1  ;;  %v18105_v7 = vpack.c.bf16 %v12237_v59, %v12235_v34  ;;  %v19438_v51 = vunpack.i.h.bf16 %v19436_v58  ;;  %v15806_v34 = vld [vmem:[%s22174_s1 + $0x50] sm:$0xff] }
0x10bf   : > { %18094 = vmatprep.subr.bf16.mxu1 %v18093_v33  ;;  %v12426_v42 = vsel %vm8855_vm11, %v19422_v14, %v19423_v25  ;;  %v12425_v18 = vsel %vm8855_vm11, %v19433_v13, %v19422_v14  ;;  %v18117_v53 = vpack.c.bf16 %v19423_v25, %v19428_v17 }
0x10c0   : > { %v18113_v60 = vpack.c.bf16 %v12426_v42, %v12424_v15  ;;  %v19441_v10 = vpop.permute.xlu0 %19440  ;;  %v15812_v15 = vld [vmem:[%s22174_s1 + $0x60] sm:$0xff] }
0x10c1   : > { %15784 = vmatmul.mubr.msk.f32.vlgmr.msra.gmra.mrb[14].mxu1 %vm2080_vm4, %v11681_v56  ;;  %v19443_v43 = vunpack.i.h.bf16 %v19441_v10  ;;  %v19442_v29 = vunpack.i.l.bf16 %v19441_v10  ;;  %v19456_v6 = vpop.permute.xlu1 %19455 }
0x10c2   : > { %18096 = vmatpush3.bf16.msra.mxu1 %v18093_v33  ;;  %11948 = vmatprep.mubr.f32.mxu1 %v19709_v1  ;;  %v12423_v33 = vsel %vm8855_vm11, %v19432_v41, %v19427_v8  ;;  %v19457_v49 = vunpack.i.l.bf16 %v19456_v6 }
0x10c3   : > { %18098 = vmatprep.subr.bf16.mxu1 %v18097_v39  ;;  %v18115_v38 = vpack.c.bf16 %v12425_v18, %v12423_v33  ;;  %v12613_v39 = vsel %vm9056_vm10, %v19442_v29, %v19443_v43  ;;  %v15813_v18 = vld [vmem:[%s22174_s1 + $0x68] sm:$0xff] }
0x10c4   : > { %v19446_v22 = vpop.permute.xlu0 %19445 }
0x10c5   : > { %15785 = vmatmul.mubr.msk.f32.gmra.mrb[16].mxu1 %vm2080_vm4, %v11682_v61  ;;  %v19448_v62 = vunpack.i.h.bf16 %v19446_v22  ;;  %v19447_v21 = vunpack.i.l.bf16 %v19446_v22  ;;  %v19461_v35 = vpop.permute.xlu1 %19460 }
0x10c6   : > { %17281 = vmatprep.mubr.msk.f32.mxu1 %vm2080_vm4, %v11681_v56  ;;  %v19437_v56 = vunpack.i.l.bf16 %v19436_v58  ;;  %v19463_v36 = vunpack.i.h.bf16 %v19461_v35  ;;  %v19462_v2 = vunpack.i.l.bf16 %v19461_v35 }
0x10c7   : > { %v12612_v46 = vsel %vm9056_vm10, %v19447_v21, %v19442_v29 }
0x10c8   : > { %v19451_v28 = vpop.permute.xlu0 %19450  ;;  %v12614_v47 = vsel %vm9056_vm10, %v19448_v62, %v19437_v56  ;;  %v12801_v17 = vsel %vm9257_vm15, %v19462_v2, %v19457_v49 }
0x10c9   : > { %17282 = vmatmul.mubr.msk.f32.vlgmr.msra.gmra.mrb[18].mxu1 %vm2080_vm4, %v11682_v61  ;;  %v12615_v61 = vsel %vm9056_vm10, %v19437_v56, %v19438_v51  ;;  %v19452_v23 = vunpack.i.l.bf16 %v19451_v28  ;;  %v18123_v54 = vpack.c.bf16 %v12614_v47, %v12612_v46  ;;  %v19466_v25 = vpop.permute.xlu1 %19465 }
0x10ca   : > { %18100 = vmatpush1.bf16.msra.mxu1 %v18099_v27  ;;  %12125 = vmatprep.mubr.f32.mxu1 %v19709_v1  ;;  %v18121_v52 = vpack.c.bf16 %v12615_v61, %v12613_v39  ;;  %v19453_v27 = vunpack.i.h.bf16 %v19451_v28  ;;  %v15818_v39 = vld [vmem:[%s22174_s1 + $0x70] sm:$0xff] }
0x10cb   : > { %18102 = vmatprep.subr.bf16.mxu1 %v18101_v20  ;;  %v12803_v26 = vsel %vm9257_vm15, %v19463_v36, %v19452_v23 }
0x10cc   : > { %v12804_v59 = vsel %vm9257_vm15, %v19452_v23, %v19453_v27  ;;  %v19471_v57 = vpop.permute.xlu0 %19470  ;;  %v18131_v8 = vpack.c.bf16 %v12803_v26, %v12801_v17 }
0x10cd   : > { %15790 = vmatmul.mubr.msk.f32.vlgmr.msra.gmra.mrb[14].mxu1 %vm2080_vm4, %v15788_v32  ;;  %v19473_v14 = vunpack.i.h.bf16 %v19471_v57  ;;  %v19486_v33 = vpop.permute.xlu1 %19485 }
0x10ce   : > { %18104 = vmatpush3.bf16.msra.mxu1 %v18101_v20  ;;  %12131 = vmatprep.mubr.f32.mxu1 %v19709_v1  ;;  %v19458_v20 = vunpack.i.h.bf16 %v19456_v6  ;;  %v19487_v22 = vunpack.i.l.bf16 %v19486_v33 }
0x10cf   : > { %18106 = vmatprep.subr.bf16.mxu1 %v18105_v7 }
0x10d0   : > { %v12802_v4 = vsel %vm9257_vm15, %v19457_v49, %v19458_v20  ;;  %v18133_v42 = vpack.c.bf16 %v19453_v27, %v19458_v20  ;;  %v19476_v11 = vpop.permute.xlu0 %19475  ;;  %v15825_v20 = vld [vmem:[%s22174_s1 + $0x88] sm:$0xff] }
0x10d1   : > { %15791 = vmatmul.mubr.msk.f32.gmra.mrb[16].mxu1 %vm2080_vm4, %v15789_v48  ;;  %v18129_v7 = vpack.c.bf16 %v12804_v59, %v12802_v4  ;;  %v19478_v13 = vunpack.i.h.bf16 %v19476_v11  ;;  %v19477_v41 = vunpack.i.l.bf16 %v19476_v11  ;;  %v19491_v62 = vpop.permute.xlu1 %19490 }
0x10d2   : > { %17288 = vmatprep.mubr.msk.f32.mxu1 %vm2080_vm4, %v15788_v32  ;;  %v18125_v32 = vpack.c.bf16 %v19438_v51, %v19443_v43  ;;  %v19493_v28 = vunpack.i.h.bf16 %v19491_v62  ;;  %v19492_v46 = vunpack.i.l.bf16 %v19491_v62 }
0x10d4   : > { %v19481_v58 = vpop.permute.xlu0 %19480 }
0x10d5   : > { %17289 = vmatmul.mubr.msk.f32.vlgmr.msra.gmra.mrb[18].mxu1 %vm2080_vm4, %v15789_v48  ;;  %v15807_v48 = vld [vmem:[%s22174_s1 + $0x58] sm:$0xff]  ;;  %v19482_v51 = vunpack.i.l.bf16 %v19481_v58 }
0x10d6   : > { %18108 = vmatpush1.bf16.msra.mxu1 %v18107_v55  ;;  %12314 = vmatprep.mubr.f32.mxu1 %v19709_v1  ;;  %v19472_v55 = vunpack.i.l.bf16 %v19471_v57 }
0x10d7   : > { %18110 = vmatprep.subr.bf16.mxu1 %v18109_v9 }
0x10d8   : > { %v12990_v43 = vsel %vm22176_vm0, %v19477_v41, %v19472_v55 }
0x10d9   : > { %15796 = vmatmul.mubr.msk.f32.vlgmr.msra.gmra.mrb[14].mxu1 %vm2080_vm4, %v15794_v63 }
0x10da   : > { %18112 = vmatpush3.bf16.msra.mxu1 %v18109_v9  ;;  %12320 = vmatprep.mubr.f32.mxu1 %v19709_v1  ;;  %v19468_v9 = vunpack.i.h.bf16 %v19466_v25 }
0x10db   : > { %18114 = vmatprep.subr.bf16.mxu1 %v18113_v60  ;;  %v12991_v60 = vsel %vm22169_vm3, %v19472_v55, %v19473_v14  ;;  %vm22178_vm3 = vmmov %vm22173_vm8 }
0x10dc   : > { %vm22180_vm0 = vmmov %vm22178_vm3 }
0x10dd   : > { %15797 = vmatmul.mubr.msk.f32.gmra.mrb[16].mxu1 %vm2080_vm4, %v15795_v40  ;;  %v13179_v6 = vsel %vm22180_vm0, %v19492_v46, %v19487_v22 }
0x10de   : > { %17295 = vmatprep.mubr.msk.f32.mxu1 %vm2080_vm4, %v15794_v63  ;;  %v19467_v63 = vunpack.i.l.bf16 %v19466_v25 }
0x10e0   : > { %v12992_v29 = vsel %vm22177_vm1, %v19478_v13, %v19467_v63 }
0x10e1   : > { %17296 = vmatmul.mubr.msk.f32.vlgmr.msra.gmra.mrb[18].mxu1 %vm2080_vm4, %v15795_v40  ;;  %v12993_v40 = vsel %vm22175_vm14, %v19467_v63, %v19468_v9  ;;  %v18139_v56 = vpack.c.bf16 %v12992_v29, %v12990_v43  ;;  %vm22179_vm14 = vmmov %vm22178_vm3 }
0x10e2   : > { %18116 = vmatpush1.bf16.msra.mxu1 %v18115_v38  ;;  %12503 = vmatprep.mubr.f32.mxu1 %v19709_v1  ;;  %v18137_v10 = vpack.c.bf16 %v12993_v40, %v12991_v60  ;;  %v19483_v38 = vunpack.i.h.bf16 %v19481_v58  ;;  %v13181_v47 = vsel %vm22179_vm14, %v19493_v28, %v19482_v51  ;;  %vm14993_vm14 = vcmask 162816  }
0x10e3   : > { %18118 = vmatprep.subr.bf16.mxu1 %v18117_v53  ;;  %v18147_v27 = vpack.c.bf16 %v13181_v47, %v13179_v6  ;;  %v14949_v6 = vld [vmem:[#allocation4] sm:$0x1] }
0x10e4   : > { %v13182_v61 = vsel %vm22173_vm8, %v19482_v51, %v19483_v38 }
0x10e5   : > { %15802 = vmatmul.mubr.msk.f32.vlgmr.msra.gmra.mrb[14].mxu1 %vm2080_vm4, %v15800_v19 }
0x10e6   : > { %18120 = vmatpush3.bf16.msra.mxu1 %v18117_v53  ;;  %12509 = vmatprep.mubr.f32.mxu1 %v19709_v1  ;;  %v19488_v53 = vunpack.i.h.bf16 %v19486_v33 }
0x10e7   : > { %18122 = vmatprep.subr.bf16.mxu1 %v18121_v52 }
0x10e8   : > { %v13180_v21 = vsel %vm22178_vm3, %v19487_v22, %v19488_v53  ;;  %v18149_v23 = vpack.c.bf16 %v19483_v38, %v19488_v53  ;;  %vm15040_vm3 = vcmask 1042432  }
0x10e9   : > { %15803 = vmatmul.mubr.msk.f32.gmra.mrb[16].mxu1 %vm2080_vm4, %v15801_v16  ;;  %v18145_v52 = vpack.c.bf16 %v13182_v61, %v13180_v21 }
0x10ea   : > { %17302 = vmatprep.mubr.msk.f32.mxu1 %vm2080_vm4, %v15800_v19  ;;  %v18141_v19 = vpack.c.bf16 %v19468_v9, %v19473_v14 }
0x10ed   : > { %17303 = vmatmul.mubr.msk.f32.vlgmr.msra.gmra.mrb[18].mxu1 %vm2080_vm4, %v15801_v16  ;;  %v15819_v16 = vld [vmem:[%s22174_s1 + $0x78] sm:$0xff] }
0x10ee   : > { %18124 = vmatpush1.bf16.msra.mxu1 %v18123_v54  ;;  %12692 = vmatprep.mubr.f32.mxu1 %v19709_v1  ;;  %v15824_v54 = vld [vmem:[%s22174_s1 + $0x80] sm:$0xff] }
0x10ef   : > { %18126 = vmatprep.subr.bf16.mxu1 %v18125_v32 }
0x10f1   : > { %15808 = vmatmul.mubr.msk.f32.vlgmr.msra.gmra.mrb[14].mxu1 %vm2080_vm4, %v15806_v34 }
0x10f2   : > { %18128 = vmatpush3.bf16.msra.mxu1 %v18125_v32  ;;  %12698 = vmatprep.mubr.f32.mxu1 %v19709_v1  ;;  %v13358_v32 = vpop.permute.xlu0 %13357 }
0x10f3   : > { %18130 = vmatprep.subr.bf16.mxu1 %v18129_v7 }
0x10f5   : > { %15809 = vmatmul.mubr.msk.f32.gmra.mrb[16].mxu1 %vm2080_vm4, %v15807_v48 }
0x10f6   : > { %17309 = vmatprep.mubr.msk.f32.mxu1 %vm2080_vm4, %v15806_v34 }
0x10f9   : > { %17310 = vmatmul.mubr.msk.f32.vlgmr.msra.gmra.mrb[18].mxu1 %vm2080_vm4, %v15807_v48  ;;  %v13363_v48 = vpop.permute.xlu1 %13362 }
0x10fa   : > { %18132 = vmatpush1.bf16.msra.mxu1 %v18131_v8  ;;  %12881 = vmatprep.mubr.f32.mxu1 %v19709_v1 }
0x10fb   : > { %18134 = vmatprep.subr.bf16.mxu1 %v18133_v42 }
0x10fd   : > { %15814 = vmatmul.mubr.msk.f32.vlgmr.msra.gmra.mrb[14].mxu1 %vm2080_vm4, %v15812_v15 }
0x10fe   : > { %18136 = vmatpush3.bf16.msra.mxu1 %v18133_v42  ;;  %12887 = vmatprep.mubr.f32.mxu1 %v19709_v1 }
0x10ff   : > { %18138 = vmatprep.subr.bf16.mxu1 %v18137_v10 }
0x1101   : > { %15815 = vmatmul.mubr.msk.f32.gmra.mrb[16].mxu1 %vm2080_vm4, %v15813_v18 }
0x1102   : > { %17316 = vmatprep.mubr.msk.f32.mxu1 %vm2080_vm4, %v15812_v15 }
0x1105   : > { %17317 = vmatmul.mubr.msk.f32.vlgmr.msra.gmra.mrb[18].mxu1 %vm2080_vm4, %v15813_v18 }
0x1106   : > { %18140 = vmatpush1.bf16.msra.mxu1 %v18139_v56  ;;  %13070 = vmatprep.mubr.f32.mxu1 %v19709_v1 }
0x1107   : > { %18142 = vmatprep.subr.bf16.mxu1 %v18141_v19 }
0x1109   : > { %15820 = vmatmul.mubr.msk.f32.vlgmr.msra.gmra.mrb[14].mxu1 %vm2080_vm4, %v15818_v39 }
0x110a   : > { %18144 = vmatpush3.bf16.msra.mxu1 %v18141_v19  ;;  %13076 = vmatprep.mubr.f32.mxu1 %v19709_v1 }
0x110b   : > { %18146 = vmatprep.subr.bf16.mxu1 %v18145_v52  ;;  %v19758_v52 = vmov 0.0|0.0  }
0x110d   : > { %15821 = vmatmul.mubr.msk.f32.gmra.mrb[16].mxu1 %vm2080_vm4, %v15819_v16 }
0x110e   : > { %17323 = vmatprep.mubr.msk.f32.mxu1 %vm2080_vm4, %v15818_v39 }
0x1111   : > { %17324 = vmatmul.mubr.msk.f32.vlgmr.msra.gmra.mrb[18].mxu1 %vm2080_vm4, %v15819_v16 }
0x1112   : > { %18148 = vmatpush1.bf16.msra.mxu1 %v18147_v27  ;;  %13259 = vmatprep.mubr.f32.mxu1 %v19709_v1 }
0x1113   : > { %18150 = vmatprep.subr.bf16.mxu1 %v18149_v23 }
0x1115   : > { %15826 = vmatmul.mubr.msk.f32.vlgmr.msra.gmra.mrb[14].mxu1 %vm2080_vm4, %v15824_v54 }
0x1116   : > { %18152 = vmatpush3.bf16.msra.mxu1 %v18149_v23  ;;  %13265 = vmatprep.mubr.f32.mxu1 %v19709_v1 }
0x1117   : > { %18171 = vmatprep.subr.bf16.mxu1 %v19758_v52 }
0x1119   : > { %15827 = vmatmul.mubr.msk.f32.gmra.mrb[16].mxu1 %vm2080_vm4, %v15825_v20 }
0x111a   : > { %17330 = vmatprep.mubr.msk.f32.mxu1 %vm2080_vm4, %v15824_v54 }
0x111d   : > { %17331 = vmatmul.mubr.msk.f32.vlgmr.msra.gmra.mrb[18].mxu1 %vm2080_vm4, %v15825_v20 }
0x11e8   : > { %v13261_v49 = vpop.f32.mrb[14].mxu1 }
0x11e9   : > { %v13263_v34 = vpop.f32.mrb[15].mxu1  ;;  %v13365_v35 = vadd.f32 %v13358_v32, %v13261_v49 }
0x11ea   : > { %v13366_v59 = vadd.f32 %v13358_v32, %v13263_v34 }
0x11eb   : > { %v13371_v26 = vmul.f32 %v13365_v35, %v21299_v5 }
0x11ec   : > { %v13372_v4 = vmul.f32 %v13366_v59, %v21271_v12  ;;  %v13267_v7 = vpop.f32.mrb[16].mxu1 }
0x11ed   : > { %v13269_v36 = vpop.f32.mrb[17].mxu1  ;;  %v13368_v42 = vadd.f32 %v13363_v48, %v13267_v7  ;;  %v13377_v15 = vadd.f32 %v13371_v26, %v21313_v31 }
0x11ee   : > { %v13378_v2 = vadd.f32 %v13372_v4, %v21281_v0  ;;  %v13369_v57 = vadd.f32 %v13363_v48, %v13269_v36 }
0x11ef   : > { %v13374_v13 = vmul.f32 %v13368_v42, %v21299_v5  ;;  %v13383_v10 = vmax.f32 %v13377_v15, 0.0 }
0x11f0   : > { %v13384_v25 = vmax.f32 %v13378_v2, 0.0  ;;  %v13375_v14 = vmul.f32 %v13369_v57, %v21271_v12  ;;  %v17332_v55 = vpop.f32.mrb[18].mxu1 }
0x11f1   : > { %v13370_v17 = vadd.f32 %v17332_v55, %v13363_v48  ;;  %v13338_v8 = vpop.f32.mrb[19].mxu1  ;;  %v13380_v18 = vadd.f32 %v13374_v13, %v21316_v50  ;;  %v21773_v13 = vld [vmem:[%s19920_s25 + $0x2] sm:$0x1] }
0x11f2   : > { %v13381_v9 = vadd.f32 %v13375_v14, %v21276_v45  ;;  %v13367_v63 = vadd.f32 %v13358_v32, %v13338_v8  ;;  %13399 = vrot.lane.b32.xlu0 %v13384_v25, %s22159_s5 }
0x11f3   : > { %v13376_v11 = vmul.f32 %v13370_v17, %v21285_v37  ;;  %v13386_v58 = vmax.f32 %v13380_v18, 0.0 }
0x11f4   : > { %v13387_v0 = vmax.f32 %v13381_v9, 0.0  ;;  %v13373_v60 = vmul.f32 %v13367_v63, %v21285_v37  ;;  %v15830_v9 = vld [vmem:[%s19920_s25 + $0x1] sm:$0x1] }
0x11f5   : > { %v13382_v40 = vadd.f32 %v13376_v11, %v21305_v24 }
0x11f6   : > { %13405 = vrot.lane.b32.xlu0 %v13387_v0, %s22159_s5  ;;  %v13379_v45 = vadd.f32 %v13373_v60, %v21308_v30 }
0x11f7   : > { %v13388_v41 = vmax.f32 %v13382_v40, 0.0 }
0x11f8   : > { %v13385_v31 = vmax.f32 %v13379_v45, 0.0 }
0x11f9   : > { %13407 = vrot.lane.b32.xlu1 %v13388_v41, %s22159_s5 }
0x11fa   : > { %13397 = vrot.lane.b32.xlu0 %v13383_v10, %s22159_s5 }
0x11fd   : > { %13401 = vrot.lane.b32.xlu1 %v13385_v31, %s22159_s5 }
0x1201   : > { %13403 = vrot.lane.b32.xlu1 %v13386_v58, %s22159_s5  ;;  %s19762_s5 = smov 74  }
0x1264   : > { %v13400_v24 = vpop.permute.xlu0 %13399 }
0x1268   : > { %v13406_v43 = vpop.permute.xlu0 %13405 }
0x126b   : > { %v13408_v29 = vpop.permute.xlu1 %13407 }
0x126c   : > { %v13412_v33 = vsel %vm7997_vm5, %v13406_v43, %v13408_v29  ;;  %v13398_v38 = vpop.permute.xlu0 %13397  ;;  %v13433_v29 = vld [vmem:[%s19920_s25] sm:$0x1] }
0x126d   : > { %13424 = vst.msk [vmem:[#allocation2 + $0x28] sm:$0xff] %vm8046_vm6, %v13412_v33  ;;  %v21695_v30 = vsel %vm7997_vm5, %v13398_v38, %v13400_v24 }
0x126e   : > { %13419 = vst.msk [vmem:[#allocation2] sm:$0xff] %vm8043_vm12, %v13398_v38 }
0x126f   : > { %13426 = vst.msk [vmem:[#allocation2 + $0x28] sm:$0xff] %vm8054_vm7, %v19709_v1  ;;  %v13402_v50 = vpop.permute.xlu1 %13401 }
0x1270   : > { %v13410_v51 = vsel %vm7997_vm5, %v13400_v24, %v13402_v50  ;;  %v21789_v24 = vld [vmem:[%s19920_s25 + $0x3] sm:$0x1] }
0x1271   : > { %13421 = vst.msk [vmem:[#allocation2 + $0x10] sm:$0xff] %vm8046_vm6, %v13410_v51  ;;  %vm22181_vm6 = vmmov %vm22177_vm1 }
0x1272   : > { %13425 = vst.msk [vmem:[#allocation2 + $0x10] sm:$0xff] %vm8054_vm7, %v19709_v1  ;;  %vm22182_vm7 = vmmov %vm22177_vm1 }
0x1273   : > { %v13404_v56 = vpop.permute.xlu1 %13403 }
0x1274   : > { %v21705_v53 = vsel %vm7997_vm5, %v13404_v56, %v13406_v43  ;;  %13422 = vst.msk [vmem:[#allocation2 + $0x18] sm:$0xff] %vm8043_vm12, %v13404_v56  ;;  %vm19759_vm5 = vmmov 0   ;;  %vm22183_vm12 = vmmov %vm22177_vm1 }
0x1275   : > { %v18160_v19 = vpack.c.bf16 %v21705_v53, %v21695_v30  ;;  %v21724_v16 = vld [vmem:[#allocation2] sm:$0xff]  ;;  %17351 = vmatprep.mubr.msk.f32.mxu1 %vm19759_vm5, %v19709_v1 }
0x1276   : > { %v21708_v22 = vld [vmem:[#allocation2 + $0x28] sm:$0xff] }
0x1277   : > { %v19494_v39 = vpack.i.bf16 %v21708_v22, %v21705_v53 }
0x1279   : > { %19495 = vrot.lane.b32.xlu1 %v19494_v39, %s22136_s24  ;;  %v21715_v61 = vld [vmem:[#allocation2 + $0x10] sm:$0xff] }
0x127a   : > { %v19499_v62 = vpack.i.bf16 %v21715_v61, %v21695_v30  ;;  %v18165_v47 = vpack.c.bf16 %v21708_v22, %v21715_v61 }
0x127b   : > { %v21719_v21 = vld [vmem:[#allocation2 + $0x18] sm:$0xff] }
0x127c   : > { %19500 = vrot.lane.b32.xlu0 %v19499_v62, %s22136_s24  ;;  %v19504_v28 = vpack.i.bf16 %v21719_v21, %v21724_v16  ;;  %v18162_v46 = vpack.c.bf16 %v21719_v21, %v21724_v16 }
0x127d   : > { %19515 = vrot.lane.b32.xlu1 %v19499_v62, %s22131_s26 }
0x1280   : > { %19505 = vrot.lane.b32.xlu0 %v19504_v28, %s22136_s24  ;;  %s19760_s24 = smov 22  }
0x1281   : > { %19520 = vrot.lane.b32.xlu1 %v19504_v28, %s22131_s26 }
0x1284   : > { %19510 = vrot.lane.b32.xlu0 %v19494_v39, %s22131_s26  ;;  %s19761_s26 = smov 112  }
0x1285   : > { %19525 = vrot.lane.b32.xlu1 %v19494_v39, %s22149_s9 }
0x1288   : > { %19530 = vrot.lane.b32.xlu0 %v19499_v62, %s22149_s9 }
0x1289   : > { %19545 = vrot.lane.b32.xlu1 %v19499_v62, %s22160_s7 }
0x128c   : > { %19535 = vrot.lane.b32.xlu0 %v19504_v28, %s22149_s9 }
0x128d   : > { %19550 = vrot.lane.b32.xlu1 %v19504_v28, %s22160_s7 }
0x1290   : > { %19540 = vrot.lane.b32.xlu0 %v19494_v39, %s22160_s7  ;;  %s19763_s7 = smov 94  }
0x1291   : > { %19555 = vrot.lane.b32.xlu1 %v19494_v39, %s22143_s3 }
0x1294   : > { %19560 = vrot.lane.b32.xlu0 %v19499_v62, %s22143_s3 }
0x1295   : > { %19575 = vrot.lane.b32.xlu1 %v19499_v62, %s22162_s11 }
0x1298   : > { %19565 = vrot.lane.b32.xlu0 %v19504_v28, %s22143_s3  ;;  %s22189_s3 = smov 20  }
0x1299   : > { %19580 = vrot.lane.b32.xlu1 %v19504_v28, %s22162_s11 }
0x129c   : > { %19570 = vrot.lane.b32.xlu0 %v19494_v39, %s22162_s11 }
0x129d   : > { %19585 = vrot.lane.b32.xlu1 %v19494_v39, %s22163_s4 }
0x12a0   : > { %19590 = vrot.lane.b32.xlu0 %v19499_v62, %s22163_s4 }
0x12a1   : > { %19605 = vrot.lane.b32.xlu1 %v19499_v62, %s22164_s6 }
0x12a4   : > { %19595 = vrot.lane.b32.xlu0 %v19504_v28, %s22163_s4  ;;  %s22190_s4 = sld [smem:[#allocation13_spill]] }
0x12a5   : > { %19610 = vrot.lane.b32.xlu1 %v19504_v28, %s22164_s6 }
0x12a8   : > { %19600 = vrot.lane.b32.xlu0 %v19494_v39, %s22164_s6  ;;  %s19765_s6 = smov 76  }
0x12ac   : > { %14952 = vperm.xlu0 %18772, %v14949_v6  }
0x12eb   : > { %v19496_v27 = vpop.permute.xlu1 %19495 }
0x12ec   : > { %v19498_v23 = vunpack.i.h.bf16 %v19496_v27  ;;  %v19497_v54 = vunpack.i.l.bf16 %v19496_v27 }
0x12ee   : > { %v19501_v20 = vpop.permute.xlu0 %19500  ;;  %v13457_v35 = vsel %vm8099_vm13, %v19497_v54, %v19498_v23 }
0x12ef   : > { %v21755_v49 = vpop.permute.xlu1 %19515  ;;  %v19503_v32 = vunpack.i.h.bf16 %v19501_v20  ;;  %v19502_v34 = vunpack.i.l.bf16 %v19501_v20 }
0x12f0   : > { %v19518_v17 = vunpack.i.h.bf16 %v21755_v49  ;;  %v19517_v41 = vunpack.i.l.bf16 %v21755_v49 }
0x12f1   : > { %v13455_v59 = vsel %vm8099_vm13, %v19502_v34, %v19503_v32  ;;  %v18158_v42 = vpack.c.bf16 %v19498_v23, %v19503_v32 }
0x12f2   : > { %v19506_v4 = vpop.permute.xlu0 %19505  ;;  %v18153_v7 = vpack.c.bf16 %v13457_v35, %v13455_v59  ;;  %v13767_v30 = vsel %vm8453_vm2, %v19517_v41, %v19518_v17  ;;  %v21832_v59 = vld [vmem:[%s19920_s25 + $0x4] sm:$0x1] }
0x12f3   : > { %v21759_v48 = vpop.permute.xlu1 %19520  ;;  %v19508_v36 = vunpack.i.h.bf16 %v19506_v4  ;;  %v19507_v2 = vunpack.i.l.bf16 %v19506_v4 }
0x12f4   : > { %18154 = vmatprep.subr.bf16.mxu0 %v18153_v7  ;;  %v19523_v43 = vunpack.i.h.bf16 %v21759_v48  ;;  %v19522_v33 = vunpack.i.l.bf16 %v21759_v48 }
0x12f5   : > { %v13454_v57 = vsel %vm8099_vm13, %v19507_v2, %v19502_v34  ;;  %v13456_v26 = vsel %vm8099_vm13, %v19508_v36, %v19497_v54  ;;  %vm22184_vm13 = vmmov %vm22177_vm1  ;;  %vm22192_vm1 = vcmask 1041408  }
0x12f6   : > { %v18155_v25 = vpack.c.bf16 %v13456_v26, %v13454_v57  ;;  %v19511_v14 = vpop.permute.xlu0 %19510  ;;  %vm22193_vm8 = vmmov %vm22192_vm1 }
0x12f7   : > { %v21763_v55 = vpop.permute.xlu1 %19525  ;;  %v19513_v8 = vunpack.i.h.bf16 %v19511_v14  ;;  %v19512_v0 = vunpack.i.l.bf16 %v19511_v14 }
0x12f8   : > { %18156 = vmatpush1.bf16.msra.mxu0 %v18155_v25  ;;  %v19528_v40 = vunpack.i.h.bf16 %v21763_v55  ;;  %v19527_v38 = vunpack.i.l.bf16 %v21763_v55  ;;  %v21846_v25 = vld [vmem:[%s19920_s25 + $0x5] sm:$0x1] }
0x12f9   : > { %v18172_v63 = vpack.c.bf16 %v19513_v8, %v19518_v17  ;;  %18157 = vmatprep.subr.bf16.mxu0 %v19758_v52  ;;  %v13769_v58 = vsel %vm8453_vm2, %v19512_v0, %v19513_v8  ;;  %v13768_v50 = vsel %vm8453_vm2, %v19523_v43, %v19512_v0  ;;  %v15847_v43 = vld [vmem:[%s19920_s25 + $0x6] sm:$0x1] }
0x12fa   : > { %v19531_v11 = vpop.permute.xlu0 %19530  ;;  %v18167_v53 = vpack.c.bf16 %v13769_v58, %v13767_v30  ;;  %v13940_v27 = vsel %vm8654_vm9, %v19527_v38, %v19528_v40 }
0x12fb   : > { %v21768_v15 = vpop.permute.xlu1 %19545  ;;  %v19533_v60 = vunpack.i.h.bf16 %v19531_v11  ;;  %15831 = vmatmul.mubr.msk.f32.vlgmr.msra.gmra.mrb[36].mxu0 %vm2080_vm4, %v15830_v9  ;;  %18173 = vmatpush3.bf16.msra.mxu1 %v18172_v63  ;;  %v19532_v31 = vunpack.i.l.bf16 %v19531_v11 }
0x12fc   : > { %18159 = vmatpush3.bf16.msra.mxu0 %v18158_v42  ;;  %17337 = vmatprep.mubr.msk.f32.mxu0 %vm19759_vm5, %v19709_v1  ;;  %v19548_v51 = vunpack.i.h.bf16 %v21768_v15  ;;  %v19547_v54 = vunpack.i.l.bf16 %v21768_v15 }
0x12fd   : > { %v18179_v45 = vpack.c.bf16 %v19528_v40, %v19533_v60  ;;  %18161 = vmatprep.subr.bf16.mxu0 %v18160_v19  ;;  %18178 = vmatprep.subr.bf16.mxu1 %v19758_v52  ;;  %v13938_v16 = vsel %vm8654_vm9, %v19532_v31, %v19533_v60 }
0x12fe   : > { %v19536_v10 = vpop.permute.xlu0 %19535  ;;  %17352 = vmatmul.mubr.msk.f32.vlgmr.msra.gmra.mrb[20].mxu1 %vm2080_vm4, %v21773_v13  ;;  %v18174_v49 = vpack.c.bf16 %v13940_v27, %v13938_v16  ;;  %v14109_v36 = vsel %vm8855_vm11, %v19547_v54, %v19548_v51 }
0x12ff   : > { %v21784_v18 = vpop.permute.xlu1 %19550  ;;  %17338 = vmatmul.mubr.msk.f32.vlgmr.msra.gmra.mrb[38].mxu0 %vm2080_vm4, %v15830_v9  ;;  %18180 = vmatpush3.bf16.msra.mxu1 %v18179_v45  ;;  %v19538_v39 = vunpack.i.h.bf16 %v19536_v10  ;;  %v19537_v62 = vunpack.i.l.bf16 %v19536_v10 }
0x1300   : > { %18163 = vmatpush1.bf16.msra.mxu0 %v18162_v46  ;;  %13675 = vmatprep.mubr.f32.mxu0 %v19709_v1  ;;  %v13766_v46 = vsel %vm8453_vm2, %v19522_v33, %v19517_v41  ;;  %v19553_v14 = vunpack.i.h.bf16 %v21784_v18  ;;  %v19552_v55 = vunpack.i.l.bf16 %v21784_v18  ;;  %vm22185_vm2 = vmmov %vm22180_vm0 }
0x1301   : > { %18164 = vmatprep.subr.bf16.mxu0 %v19758_v52  ;;  %17358 = vmatprep.mubr.msk.f32.mxu1 %vm19759_vm5, %v19709_v1  ;;  %v18169_v23 = vpack.c.bf16 %v13768_v50, %v13766_v46  ;;  %v13937_v22 = vsel %vm8654_vm9, %v19537_v62, %v19532_v31  ;;  %v13939_v61 = vsel %vm8654_vm9, %v19538_v39, %v19527_v38  ;;  %vm22186_vm9 = vmmov %vm22180_vm0 }
0x1302   : > { %v19541_v56 = vpop.permute.xlu0 %19540  ;;  %18185 = vmatprep.subr.bf16.mxu1 %v19758_v52  ;;  %17359 = vmatmul.mubr.msk.f32.vlgmr.msra.gmra.mrb[22].mxu1 %vm2080_vm4, %v21789_v24  ;;  %v18176_v7 = vpack.c.bf16 %v13939_v61, %v13937_v22  ;;  %v14108_v0 = vsel %vm8855_vm11, %v19552_v55, %v19547_v54 }
0x1303   : > { %v21808_v19 = vpop.permute.xlu1 %19555  ;;  %v19543_v21 = vunpack.i.h.bf16 %v19541_v56  ;;  %15833 = vmatmul.mubr.msk.f32.vlgmr.msra.gmra.mrb[36].mxu0 %vm2080_vm4, %v13433_v29  ;;  %17365 = vmatprep.mubr.msk.f32.mxu1 %vm19759_vm5, %v19709_v1  ;;  %v19542_v28 = vunpack.i.l.bf16 %v19541_v56 }
0x1304   : > { %18166 = vmatpush3.bf16.msra.mxu0 %v18165_v47  ;;  %17344 = vmatprep.mubr.msk.f32.mxu0 %vm19759_vm5, %v19709_v1  ;;  %v19558_v34 = vunpack.i.h.bf16 %v21808_v19  ;;  %v19557_v17 = vunpack.i.l.bf16 %v21808_v19 }
0x1305   : > { %v18186_v6 = vpack.c.bf16 %v19543_v21, %v19548_v51  ;;  %18168 = vmatprep.subr.bf16.mxu0 %v18167_v53  ;;  %v14111_v35 = vsel %vm8855_vm11, %v19542_v28, %v19543_v21  ;;  %v14110_v9 = vsel %vm8855_vm11, %v19553_v14, %v19542_v28  ;;  %v15850_v51 = vld [vmem:[%s19920_s25 + $0x7] sm:$0x1]  ;;  %vm22187_vm11 = vmmov %vm22180_vm0 }
0x1306   : > { %v21822_v20 = vpop.permute.xlu0 %19560  ;;  %v18181_v26 = vpack.c.bf16 %v14111_v35, %v14109_v36  ;;  %v14282_v40 = vsel %vm9056_vm10, %v19557_v17, %v19558_v34 }
0x1307   : > { %v21824_v32 = vpop.permute.xlu1 %19575  ;;  %v19563_v47 = vunpack.i.h.bf16 %v21822_v20  ;;  %17345 = vmatmul.mubr.msk.f32.vlgmr.msra.gmra.mrb[40].mxu0 %vm2080_vm4, %v13433_v29  ;;  %18187 = vmatpush3.bf16.msra.mxu1 %v18186_v6  ;;  %v19562_v57 = vunpack.i.l.bf16 %v21822_v20  ;;  %v15853_v20 = vld [vmem:[%s19920_s25 + $0x8] sm:$0x1] }
0x1308   : > { %18170 = vmatpush1.bf16.msra.mxu0 %v18169_v23  ;;  %13843 = vmatprep.mubr.f32.mxu0 %v19709_v1  ;;  %v19578_v63 = vunpack.i.h.bf16 %v21824_v32  ;;  %v19577_v38 = vunpack.i.l.bf16 %v21824_v32 }
0x1309   : > { %v18193_v4 = vpack.c.bf16 %v19558_v34, %v19563_v47  ;;  %18175 = vmatprep.subr.bf16.mxu0 %v18174_v49  ;;  %18192 = vmatprep.subr.bf16.mxu1 %v19758_v52  ;;  %v14280_v11 = vsel %vm9056_vm10, %v19562_v57, %v19563_v47 }
0x130a   : > { %v19566_v48 = vpop.permute.xlu0 %19565  ;;  %17366 = vmatmul.mubr.msk.f32.vlgmr.msra.gmra.mrb[24].mxu1 %vm2080_vm4, %v21832_v59  ;;  %v18188_v45 = vpack.c.bf16 %v14282_v40, %v14280_v11  ;;  %v14451_v62 = vsel %vm9257_vm15, %v19577_v38, %v19578_v63 }
0x130b   : > { %v21840_v2 = vpop.permute.xlu1 %19580  ;;  %15836 = vmatmul.mubr.msk.f32.vlgmr.msra.gmra.mrb[36].mxu0 %vm2080_vm4, %v21773_v13  ;;  %18194 = vmatpush3.bf16.msra.mxu1 %v18193_v4  ;;  %v18183_v13 = vpack.c.bf16 %v14110_v9, %v14108_v0  ;;  %v19568_v10 = vunpack.i.h.bf16 %v19566_v48  ;;  %v19567_v18 = vunpack.i.l.bf16 %v19566_v48 }
0x130c   : > { %18177 = vmatpush1.bf16.msra.mxu0 %v18176_v7  ;;  %17372 = vmatprep.mubr.msk.f32.mxu1 %vm19759_vm5, %v19709_v1  ;;  %v19582_v6 = vunpack.i.l.bf16 %v21840_v2 }
0x130d   : > { %18182 = vmatprep.subr.bf16.mxu0 %v18181_v26  ;;  %14014 = vmatprep.mubr.f32.mxu0 %v19709_v1  ;;  %v14281_v50 = vsel %vm9056_vm10, %v19568_v10, %v19557_v17 }
0x130e   : > { %v19571_v8 = vpop.permute.xlu0 %19570  ;;  %17373 = vmatmul.mubr.msk.f32.vlgmr.msra.gmra.mrb[26].mxu1 %vm2080_vm4, %v21846_v25  ;;  %18199 = vmatprep.subr.bf16.mxu1 %v19758_v52  ;;  %v14450_v32 = vsel %vm9257_vm15, %v19582_v6, %v19577_v38 }
0x130f   : > { %v19573_v42 = vunpack.i.h.bf16 %v19571_v8  ;;  %17379 = vmatprep.mubr.msk.f32.mxu1 %vm19759_vm5, %v19709_v1  ;;  %v21862_v15 = vpop.permute.xlu1 %19585  ;;  %v19572_v29 = vunpack.i.l.bf16 %v19571_v8 }
0x1310   : > { %v19588_v58 = vunpack.i.h.bf16 %v21862_v15  ;;  %v19587_v23 = vunpack.i.l.bf16 %v21862_v15 }
0x1311   : > { %v18200_v60 = vpack.c.bf16 %v19573_v42, %v19578_v63  ;;  %v14453_v53 = vsel %vm9257_vm15, %v19572_v29, %v19573_v42 }
0x1312   : > { %v19591_v41 = vpop.permute.xlu0 %19590  ;;  %v18195_v28 = vpack.c.bf16 %v14453_v53, %v14451_v62  ;;  %v14624_v61 = vsel %vm22182_vm7, %v19587_v23, %v19588_v58  ;;  %vm15044_vm7 = vcmask 1044480  }
0x1313   : > { %v19593_v31 = vunpack.i.h.bf16 %v19591_v41  ;;  %15839 = vmatmul.mubr.msk.f32.vlgmr.msra.gmra.mrb[36].mxu0 %vm2080_vm4, %v21789_v24  ;;  %18201 = vmatpush3.bf16.msra.mxu1 %v18200_v60  ;;  %v14279_v24 = vsel %vm9056_vm10, %v19567_v18, %v19562_v57  ;;  %v19606_v56 = vpop.permute.xlu1 %19605  ;;  %v19592_v46 = vunpack.i.l.bf16 %v19591_v41  ;;  %vm22188_vm10 = vmmov %vm22180_vm0  ;;  %vm15042_vm0 = vcmask 1043456  }
0x1314   : > { %18184 = vmatpush1.bf16.msra.mxu0 %v18183_v13  ;;  %18206 = vmatprep.subr.bf16.mxu1 %v19758_v52  ;;  %v18190_v19 = vpack.c.bf16 %v14281_v50, %v14279_v24  ;;  %v19608_v21 = vunpack.i.h.bf16 %v19606_v56  ;;  %v19607_v4 = vunpack.i.l.bf16 %v19606_v56 }
0x1315   : > { %18189 = vmatprep.subr.bf16.mxu0 %v18188_v45  ;;  %v18207_v33 = vpack.c.bf16 %v19588_v58, %v19593_v31  ;;  %14185 = vmatprep.mubr.f32.mxu0 %v19709_v1  ;;  %v14622_v49 = vsel %vm22181_vm6, %v19592_v46, %v19593_v31  ;;  %vm22194_vm6 = vmmov %vm22192_vm1 }
0x1316   : > { %v19596_v30 = vpop.permute.xlu0 %19595  ;;  %17380 = vmatmul.mubr.msk.f32.vlgmr.msra.gmra.mrb[28].mxu1 %vm2080_vm4, %v15847_v43  ;;  %v14793_v26 = vsel %vm22186_vm9, %v19607_v4, %v19608_v21 }
0x1317   : > { %18208 = vmatpush3.bf16.msra.mxu1 %v18207_v33  ;;  %17386 = vmatprep.mubr.msk.f32.mxu1 %vm19759_vm5, %v19709_v1  ;;  %v19598_v47 = vunpack.i.h.bf16 %v19596_v30  ;;  %v19597_v34 = vunpack.i.l.bf16 %v19596_v30  ;;  %v19611_v57 = vpop.permute.xlu1 %19610 }
0x1318   : > { %18213 = vmatprep.subr.bf16.mxu1 %v19758_v52  ;;  %v19583_v52 = vunpack.i.h.bf16 %v21840_v2  ;;  %v19613_v14 = vunpack.i.h.bf16 %v19611_v57  ;;  %v19612_v55 = vunpack.i.l.bf16 %v19611_v57 }
0x1319   : > { %v14621_v7 = vsel %vm22183_vm12, %v19597_v34, %v19592_v46  ;;  %v14623_v48 = vsel %vm22184_vm13, %v19598_v47, %v19587_v23  ;;  %v15056_v34 = vld [vmem:[%s22190_s4] sm:$0xff]  ;;  %vm22195_vm12 = vmmov %vm22192_vm1  ;;  %vm15047_vm13 = vcmask 1046528  }
0x131a   : > { %v19601_v39 = vpop.permute.xlu0 %19600  ;;  %17387 = vmatmul.mubr.msk.f32.vlgmr.msra.gmra.mrb[30].mxu1 %vm2080_vm4, %v15850_v51  ;;  %v14452_v54 = vsel %vm9257_vm15, %v19583_v52, %v19572_v29  ;;  %v18204_v2 = vpack.c.bf16 %v14623_v48, %v14621_v7  ;;  %v14792_v8 = vsel %vm22188_vm10, %v19612_v55, %v19607_v4  ;;  %vm15037_vm15 = vcmask 1040384  }
0x131b   : > { %v19603_v16 = vunpack.i.h.bf16 %v19601_v39  ;;  %15842 = vmatmul.mubr.msk.f32.vlgmr.msra.gmra.mrb[36].mxu0 %vm2080_vm4, %v21832_v59  ;;  %17393 = vmatprep.mubr.msk.f32.mxu1 %vm19759_vm5, %v19709_v1  ;;  %v18197_v22 = vpack.c.bf16 %v14452_v54, %v14450_v32  ;;  %v18202_v59 = vpack.c.bf16 %v14624_v61, %v14622_v49  ;;  %v19602_v35 = vunpack.i.l.bf16 %v19601_v39 }
0x131c   : > { %18191 = vmatpush1.bf16.msra.mxu0 %v18190_v19  ;;  %14356 = vmatprep.mubr.f32.mxu0 %v19709_v1  ;;  %vm15026_vm5 = vcmask 179200  }
0x131d   : > { %v18214_v27 = vpack.c.bf16 %v19603_v16, %v19608_v21  ;;  %18196 = vmatprep.subr.bf16.mxu0 %v18195_v28  ;;  %v14795_v36 = vsel %vm22185_vm2, %v19602_v35, %v19603_v16  ;;  %v14794_v17 = vsel %vm22187_vm11, %v19613_v14, %v19602_v35  ;;  %vm22197_vm2 = vcmask 1045504  }
0x131e   : > { %v18211_v9 = vpack.c.bf16 %v14794_v17, %v14792_v8  ;;  %vm22198_vm9 = vmmov %vm22197_vm2  ;;  %vm22199_vm11 = vcmask 146432  }
0x131f   : > { %18215 = vmatpush3.bf16.msra.mxu1 %v18214_v27  ;;  %vm22200_vm10 = vmmov %vm22199_vm11 }
0x1322   : > { %17394 = vmatmul.mubr.msk.f32.vlgmr.msra.gmra.mrb[32].mxu1 %vm2080_vm4, %v15853_v20 }
0x1323   : > { %15845 = vmatmul.mubr.msk.f32.vlgmr.msra.gmra.mrb[36].mxu0 %vm2080_vm4, %v21846_v25  ;;  %v18209_v25 = vpack.c.bf16 %v14795_v36, %v14793_v26 }
0x1324   : > { %18198 = vmatpush1.bf16.msra.mxu0 %v18197_v22  ;;  %14527 = vmatprep.mubr.f32.mxu0 %v19709_v1 }
0x1325   : > { %18203 = vmatprep.subr.bf16.mxu0 %v18202_v59  ;;  %v15057_v59 = vld [vmem:[%s22190_s4 + $0x8] sm:$0xff] }
0x1326   : > { %v18216_v35 = vpack.c.bf16 %v15057_v59, %v15056_v34 }
0x132b   : > { %15848 = vmatmul.mubr.msk.f32.vlgmr.msra.gmra.mrb[36].mxu0 %vm2080_vm4, %v15847_v43  ;;  %v14953_v56 = vpop.permute.xlu0 %14952 }
0x132c   : > { %18205 = vmatpush1.bf16.msra.mxu0 %v18204_v2  ;;  %14698 = vmatprep.mubr.f32.mxu0 %v19709_v1  ;;  %v14958_v19 = vrot.slane %v14953_v56, %v9860_v44 }
0x132d   : > { %18210 = vmatprep.subr.bf16.mxu0 %v18209_v25 }
0x1333   : > { %15851 = vmatmul.mubr.msk.f32.vlgmr.msra.gmra.mrb[36].mxu0 %vm2080_vm4, %v15850_v51 }
0x1334   : > { %18212 = vmatpush1.bf16.msra.mxu0 %v18211_v9  ;;  %14869 = vmatprep.mubr.f32.mxu0 %v19709_v1 }
0x1335   : > { %18217 = vmatprep.subr.bf16.mxu0 %v18216_v35 }
0x133b   : > { %15854 = vmatmul.mubr.msk.f32.vlgmr.msra.gmra.mrb[36].mxu0 %vm2080_vm4, %v15853_v20 }
0x133c   : > { %18219 = vmatpush3.bf16.msra.mxu0 %v18216_v35 }
0x13d1   : > { %v13916_v63 = vpop.f32.mrb[20].mxu1 }
0x13d2   : > { %v13604_v42 = vpop.f32.mrb[38].mxu0  ;;  %v17353_v11 = vpop.f32.mrb[21].mxu1 }
0x13d3   : > { %v17339_v15 = vpop.f32.mrb[39].mxu0  ;;  %v15058_v11 = vld [vmem:[%s22190_s4 + $0x10] sm:$0x3] }
0x13d4   : > { %17400 = vmatprep.subr.msk.mxu0 %vm22192_vm1, %v15058_v11 }
0x13d5   : > { %v14087_v0 = vpop.f32.mrb[22].mxu1  ;;  %17401 = vmatpush3.msk.msra.mxu0 %vm22193_vm8, %v15058_v11 }
0x13d6   : > { %v17360_v60 = vpop.f32.mrb[23].mxu1 }
0x13da   : > { %v13748_v40 = vpop.f32.mrb[40].mxu0 }
0x13db   : > { %v13749_v13 = vadd.f32 %v13748_v40, %v13604_v42  ;;  %v17346_v41 = vpop.f32.mrb[41].mxu0 }
0x13dd   : > { %v13922_v45 = vadd.f32 %v13916_v63, %v13749_v13  ;;  %v14258_v10 = vpop.f32.mrb[24].mxu1 }
0x13de   : > { %v17367_v18 = vpop.f32.mrb[25].mxu1 }
0x13df   : > { %v14093_v31 = vadd.f32 %v14087_v0, %v13922_v45 }
0x13e1   : > { %v14264_v58 = vadd.f32 %v14258_v10, %v14093_v31  ;;  %v14429_v43 = vpop.f32.mrb[26].mxu1 }
0x13e2   : > { %v17374_v29 = vpop.f32.mrb[27].mxu1 }
0x13e3   : > { %v14435_v33 = vadd.f32 %v14429_v43, %v14264_v58 }
0x13e9   : > { %v14600_v1 = vpop.f32.mrb[28].mxu1 }
0x13ea   : > { %v14606_v38 = vadd.f32 %v14600_v1, %v14435_v33  ;;  %v17381_v30 = vpop.f32.mrb[29].mxu1 }
0x13ed   : > { %v14771_v24 = vpop.f32.mrb[30].mxu1 }
0x13ee   : > { %v14777_v50 = vadd.f32 %v14771_v24, %v14606_v38  ;;  %v17388_v51 = vpop.f32.mrb[31].mxu1 }
0x13f5   : > { %v14942_v53 = vpop.f32.mrb[32].mxu1 }
0x13f6   : > { %v14948_v39 = vadd.f32 %v14942_v53, %v14777_v50  ;;  %v17395_v62 = vpop.f32.mrb[33].mxu1 }
0x13f8   : > { %v14961_v21 = vadd.f32 %v14958_v19, %v14948_v39 }
0x13fa   : > { %v14964_v16 = vmul.f32 %v14961_v21, %v21285_v37 }
0x13fc   : > { %v15021_v28 = vrot.slane %v14964_v16, 3  ;;  %v15029_v7 = vrot.slane %v14964_v16, 2  ;;  %v15033_v36 = vrot.slane %v14964_v16, 1 }
0x13fe   : > { %15024 = vrot.lane.b32.xlu0 %v15021_v28, %s19760_s24 }
0x140e   : > { %v14871_v46 = vpop.f32.mrb[36].mxu0 }
0x140f   : > { %v14959_v52 = vadd.f32 %v14958_v19, %v14871_v46  ;;  %v14873_v6 = vpop.f32.mrb[37].mxu0 }
0x1410   : > { %v14960_v27 = vadd.f32 %v14958_v19, %v14873_v6 }
0x1411   : > { %v21916_v23 = vmul.f32 %v14959_v52, %v21299_v5 }
0x1412   : > { %v14963_v54 = vmul.f32 %v14960_v27, %v21271_v12 }
0x1413   : > { %v14970_v3 = vrot.slane %v21916_v23, 6  ;;  %v14966_v37 = vrot.slane %v21916_v23, 7  ;;  %v14987_v44 = vrot.slane %v21916_v23, 2  ;;  %v14974_v20 = vrot.slane %v21916_v23, 5 }
0x1414   : > { %15000 = vrot.lane.b32.xlu1 %v14963_v54, %s19761_s26  ;;  %v15003_v5 = vrot.slane %v14963_v54, 7  ;;  %v14978_v12 = vrot.slane %v21916_v23, 4  ;;  %v15007_v49 = vrot.slane %v14963_v54, 6  ;;  %v14982_v32 = vrot.slane %v21916_v23, 3  ;;  %s19766_s26 = smov 38  }
0x1415   : > { %14971 = vrot.lane.b32.xlu0 %v14970_v3, %s22162_s11  ;;  %s19764_s11 = smov 56   ;;  %v15011_v22 = vrot.slane %v14963_v54, 5  ;;  %v14988_v61 = vrot.slane %v14963_v54, 2  ;;  %v15015_v47 = vrot.slane %v14963_v54, 4  ;;  %v15020_v4 = vrot.slane %v14963_v54, 3 }
0x1416   : > { %v14996_v48 = vrot.slane %v14963_v54, 1 }
0x1418   : > { %14967 = vrot.lane.b32.xlu1 %v14966_v37, %s22149_s9 }
0x1419   : > { %14989 = vrot.lane.b32.xlu0 %v14987_v44, %s22189_s3 }
0x141c   : > { %14975 = vrot.lane.b32.xlu1 %v14974_v20, %s19762_s5  ;;  %s22191_s5 = smov 40  }
0x141d   : > { %15004 = vrot.lane.b32.xlu0 %v15003_v5, %s19763_s7  ;;  %s19767_s7 = smov 4  }
0x1420   : > { %14979 = vrot.lane.b32.xlu1 %v14978_v12, %s19764_s11  ;;  %s15874_s11 = sshll.u32 %s19951_s0, 10 }
0x1421   : > { %15008 = vrot.lane.b32.xlu0 %v15007_v49, %s19765_s6 }
0x1424   : > { %14983 = vrot.lane.b32.xlu1 %v14982_v32, %s19766_s26  ;;  %s21974_s26 = scalar_lea.hbm %s19928_s13, %s15874_s11 }
0x1425   : > { %15012 = vrot.lane.b32.xlu0 %v15011_v22, %s22153_s12  ;;  %s19768_s12 = smov 2  }
0x1428   : > { %14991 = vrot.lane.b32.xlu1 %v14988_v61, %s22189_s3 }
0x1429   : > { %15016 = vrot.lane.b32.xlu0 %v15015_v47, %s22191_s5 }
0x142c   : > { %15022 = vrot.lane.b32.xlu1 %v15020_v4, %s19760_s24 }
0x142d   : > { %15030 = vrot.lane.b32.xlu0 %v15029_v7, %s19767_s7  ;;  %s19769_s7 = smov [#allocation5]  }
0x1430   : > { %14997 = vrot.lane.b32.xlu1 %v14996_v48, %s19768_s12  ;;  %s19619_s12 = sshll.u32 %s19769_s7, 4  ;;  %s19620_s12 = int_to_ptr.vmem [resolvable:$false] %s19619_s12 }
0x1434   : > { %15034 = vrot.lane.b32.xlu1 %v15033_v36, %s22135_s19  ;;  %s22196_s19 = sld [smem:[#allocation14_spill]] }
0x143a   : > { %v15147_v62 = vld [vmem:[%s22196_s19] sm:$0xff]  ;;  %v15148_v46 = vld [vmem:[%s22196_s19 + $0x8] sm:$0xff]  ;;  %v15149_v52 = vld [vmem:[%s22196_s19 + $0x10] sm:$0xff] }
0x143b   : > { %17409 = vmatprep.mubr.msk.f32.mxu1 %vm2080_vm4, %v15147_v62  ;;  %v15150_v6 = vld [vmem:[%s22196_s19 + $0x18] sm:$0xff]  ;;  %v15151_v27 = vld [vmem:[%s22196_s19 + $0x20] sm:$0xff]  ;;  %v15153_v54 = vld [vmem:[%s22196_s19 + $0x30] sm:$0xff] }
0x143c   : > { %v15154_v3 = vld [vmem:[%s22196_s19 + $0x38] sm:$0xff] }
0x1470   : > { %v15025_v2 = vpop.permute.xlu0 %15024 }
0x1486   : > { %v15001_v57 = vpop.permute.xlu1 %15000 }
0x1487   : > { %v14972_v26 = vpop.permute.xlu0 %14971 }
0x148a   : > { %v14968_v25 = vpop.permute.xlu1 %14967 }
0x148b   : > { %v14990_v14 = vpop.permute.xlu0 %14989  ;;  %v15038_v0 = vsel %vm15037_vm15, %v21916_v23, %v14968_v25  ;;  %v15152_v23 = vld [vmem:[%s22196_s19 + $0x28] sm:$0xff] }
0x148c   : > { %v15039_v40 = vsel %vm22194_vm6, %v15038_v0, %v14972_v26 }
0x148e   : > { %v14976_v55 = vpop.permute.xlu1 %14975 }
0x148f   : > { %v15005_v17 = vpop.permute.xlu0 %15004  ;;  %v15041_v41 = vsel %vm15040_vm3, %v15039_v40, %v14976_v55 }
0x1490   : > { %v15049_v45 = vsel %vm15037_vm15, %v15001_v57, %v15005_v17  ;;  %vm22201_vm15 = vcmask 523264  }
0x1491   : > { %vm22202_vm1 = vmmov %vm22201_vm15 }
0x1492   : > { %v14980_v8 = vpop.permute.xlu1 %14979  ;;  %vm22203_vm8 = vmmov %vm22202_vm1 }
0x1493   : > { %v15009_v9 = vpop.permute.xlu0 %15008  ;;  %v15043_v18 = vsel %vm15042_vm0, %v15041_v41, %v14980_v8 }
0x1494   : > { %v15050_v31 = vsel %vm22195_vm12, %v15049_v45, %v15009_v9 }
0x1496   : > { %v14984_v63 = vpop.permute.xlu1 %14983 }
0x1497   : > { %v15013_v42 = vpop.permute.xlu0 %15012  ;;  %v15045_v43 = vsel %vm15044_vm7, %v15043_v18, %v14984_v63 }
0x1498   : > { %v15051_v29 = vsel %vm15040_vm3, %v15050_v31, %v15013_v42  ;;  %vm22204_vm3 = vmmov %vm22202_vm1 }
0x149a   : > { %v14992_v15 = vpop.permute.xlu1 %14991 }
0x149b   : > { %v15017_v60 = vpop.permute.xlu0 %15016  ;;  %v14994_v10 = vsel %vm14993_vm14, %v14990_v14, %v14992_v15  ;;  %vm22206_vm14 = vmmov %vm22202_vm1 }
0x149c   : > { %v15052_v33 = vsel %vm15042_vm0, %v15051_v29, %v15017_v60  ;;  %v15046_v1 = vsel %vm22197_vm2, %v15045_v43, %v14994_v10  ;;  %vm22207_vm0 = vmmov %vm22202_vm1 }
0x149e   : > { %v15023_v13 = vpop.permute.xlu1 %15022 }
0x149f   : > { %v15027_v58 = vsel %vm15026_vm5, %v15023_v13, %v15025_v2  ;;  %v15031_v30 = vpop.permute.xlu0 %15030  ;;  %vm22208_vm5 = vmmov %vm22207_vm0 }
0x14a0   : > { %v15053_v24 = vsel %vm15044_vm7, %v15052_v33, %v15027_v58 }
0x14a1   : > { %v15054_v51 = vsel %vm22198_vm9, %v15053_v24, %v15031_v30 }
0x14a2   : > { %v14998_v38 = vpop.permute.xlu1 %14997 }
0x14a3   : > { %v15048_v50 = vsel %vm15047_vm13, %v15046_v1, %v14998_v38 }
0x14a4   : > { %15061 = vrot.lane.b32.xlu0 %v15048_v50, %s22149_s9 }
0x14a6   : > { %v15035_v56 = vpop.permute.xlu1 %15034 }
0x14a7   : > { %v15055_v53 = vsel %vm15047_vm13, %v15054_v51, %v15035_v56 }
0x14a8   : > { %15063 = vrot.lane.b32.xlu1 %v15055_v53, %s22149_s9  ;;  %s953_s9 = sand.u32 1, %s19669_s16  }
0x14a9   : > { %s15426_s24 = sshll.u32 %s953_s9, 6  ;;  %s21980_s0 = scalar_lea.sflag [#allocation6], %s953_s9 }
0x14aa   : > { %s955_s3 = scalar_lea.vmem [#allocation5], %s15426_s24  ;;  %s19621_s24 = scalar_lea.vmem %s19620_s12, 2048 }
0x14ab   : > { %s15306_s6 = sshll.u32 %s955_s3, 4  ;;  %s21976_s6 = int_to_ptr.vmem [resolvable:$true] %s15306_s6 }
0x14ac   : > { %s19615_s5 = scalar_lea.vmem %s21976_s6, 1024  ;;  %p19622_p0 = scmp.lt.s32.totalorder %s21976_s6, %s19620_s12 }
0x14ad   : > { %p19616_p11 = scmp.ne.s32.totalorder %s21976_s6, %s19615_s5  ;;  %p19623_p1 = scmp.lt.s32.totalorder %s19621_s24, %s19615_s5 }
0x14af   : > { %p19617_p12 = pnand %p19616_p11, %p19968_p5  ;;  %p19624_p2 = por %p19623_p1, %p19622_p0 }
0x14b1   : > { %p19618_p13 = pneg %p19617_p12 }
0x14b3   : > { %p19625_p3 = pnand %p19624_p2, %p19618_p13 }
0x1516   : > { %v15062_v19 = vpop.permute.xlu0 %15061 }
0x1517   : > { %17402 = vmatprep.mubr.msk.f32.mxu0 %vm22199_vm11, %v15062_v19 }
0x151a   : > { %v15064_v39 = vpop.permute.xlu1 %15063 }
0x151b   : > { %17403 = vmatmul.mubr.msk.f32.vlgmr.msra.gmra.mrb[42].mxu0 %vm22200_vm10, %v15064_v39 }
0x15ee   : > { %v17404_v21 = vpop.f32.mrb[42].mxu0 }
0x15ef   : > { %v15138_v16 = vpop.f32.mrb[43].mxu0 }
0x15f0   : > { %v18220_v28 = vpack.c.bf16 %v17404_v21, %v15138_v16 }
0x15f2   : > { %18221 = vmatprep.subr.bf16.mxu1 %v18220_v28 }
0x15f3   : > { %18223 = vmatpush3.bf16.msra.mxu1 %v18220_v28 }
0x15f6   : > { %17410 = vmatmul.mubr.msk.f32.vlgmr.msra.gmra.mrb[34].mxu1 %vm2080_vm4, %v15148_v46 }
0x15f7   : > { %17412 = vmatprep.mubr.msk.f32.mxu1 %vm2080_vm4, %v15149_v52 }
0x15fa   : > { %17413 = vmatmul.mubr.msk.f32.gmra.mrb[36].mxu1 %vm2080_vm4, %v15150_v6 }
0x15fb   : > { %17415 = vmatprep.mubr.msk.f32.mxu1 %vm2080_vm4, %v15151_v27 }
0x15fe   : > { %17416 = vmatmul.mubr.msk.f32.gmra.mrb[38].mxu1 %vm2080_vm4, %v15152_v23 }
0x15ff   : > { %17418 = vmatprep.mubr.msk.f32.mxu1 %vm2080_vm4, %v15153_v54 }
0x1602   : > { %17419 = vmatmul.mubr.msk.f32.gmra.mrb[40].mxu1 %vm2080_vm4, %v15154_v3  ;;  %vm22205_vm4 = vmmov %vm22202_vm1 }
0x16c9   : > { %v17411_v37 = vpop.f32.mrb[34].mxu1 }
0x16ca   : > { %15285 = vst.msk [vmem:[%s955_s3 + $0x8] sm:$0xff] %vm22201_vm15, %v17411_v37  ;;  %v15245_v44 = vpop.f32.mrb[35].mxu1 }
0x16cb   : > { %15284 = vst.msk [vmem:[%s955_s3] sm:$0xff] %vm22202_vm1, %v15245_v44 }
0x16cd   : > { %v17414_v20 = vpop.f32.mrb[36].mxu1 }
0x16ce   : > { %15287 = vst.msk [vmem:[%s955_s3 + $0x18] sm:$0xff] %vm22203_vm8, %v17414_v20  ;;  %v15255_v5 = vpop.f32.mrb[37].mxu1 }
0x16cf   : > { %15286 = vst.msk [vmem:[%s955_s3 + $0x10] sm:$0xff] %vm22204_vm3, %v15255_v5 }
0x16d1   : > { %v17417_v12 = vpop.f32.mrb[38].mxu1 }
0x16d2   : > { %15289 = vst.msk [vmem:[%s955_s3 + $0x28] sm:$0xff] %vm22205_vm4, %v17417_v12  ;;  %v15265_v49 = vpop.f32.mrb[39].mxu1 }
0x16d3   : > { %15288 = vst.msk [vmem:[%s955_s3 + $0x20] sm:$0xff] %vm22206_vm14, %v15265_v49 }
0x16d5   : > { %v17420_v32 = vpop.f32.mrb[40].mxu1 }
0x16d6   : > { %15291 = vst.msk [vmem:[%s955_s3 + $0x38] sm:$0xff] %vm22207_vm0, %v17420_v32  ;;  %v15275_v22 = vpop.f32.mrb[41].mxu1 }
0x16d7   : > { %15290 = vst.msk [vmem:[%s955_s3 + $0x30] sm:$0xff] %vm22208_vm5, %v15275_v22 }
0x16d8   : > { %19628 = shalt.err (!%p19625_p3)
}
0x16d9   : > { %s19629_s9 = scalar_lea.hbm %s21974_s26, 1024  ;;  %s19633_s3 = scalar_lea.hbm %s19928_s13, 2048 }
0x16da   : > { %p19630_p4 = scmp.ne.s32.totalorder %s21974_s26, %s19629_s9  ;;  %p19634_p9 = scmp.lt.u32.totalorder %s21974_s26, %s19928_s13 }
0x16db   : > { %p19635_p10 = scmp.lt.u32.totalorder %s19633_s3, %s19629_s9  ;;  %p19637_p12 = scmp.lt.u32.totalorder %s19629_s9, %s21974_s26 }
0x16dc   : > { %p19631_p7 = pnand %p19630_p4, %p19968_p5 }
0x16dd   : > { %p19636_p11 = por %p19635_p10, %p19634_p9 }
0x16de   : > { %p19632_p8 = pneg %p19631_p7 }
0x16df   : > { %p19638_p0 = por %p19637_p12, %p19636_p11 }
0x16e1   : > { %p19639_p13 = pnand %p19638_p0, %p19632_p8 }
0x16e3   : > { %19642 = shalt.err (!%p19639_p13)
}
0x16e4   : > { %s19770_s11 = smov 128   ;;  %s19771_s5 = smov 8  }
0x16e5   : > { %18481 = dma.vmem_to_hbm [thread:$0]  (%p19968_p5), %s21976_s6, 1024, %s21974_s26, %s21980_s0, %s19770_s11, %s19770_s11, %s19771_s5  }
0x16e6 PF: > { %p18487_p1 = scmp.ge.s32.totalorder %s19677_s22, 2  ;;  %s15321_s7 = sand.u32 1, %s19665_s15  }
0x16e7   : > { %s15322_s12 = scalar_lea.sflag [#allocation6], %s15321_s7 }
0x16e8   : > { %p18484_p2 = pnand %p18487_p1, %p19972_p6 }
0x16ea   : > { %19660 = dma.done.wait (!%p18484_p2), %s15322_s12, 1024  }
0x16eb   : > { %19662 = vsyncadd (!%p18484_p2), %s15322_s12, 4294966272  ;;  %s22209_s24 = sld [smem:[#allocation29_spill]]  ;;  %p73_p3 = scmp.ge.s32.totalorder %s19955_s23, 4  }
0x16ec   : > { %s22210_s15 = smov %s19669_s16  ;;  %s22211_s16 = smov %s19673_s18 }
0x16ed   : > { %s22213_s22 = smov %s19955_s23  ;;  %75 = sbr.rel (!%p73_p3) target bundleno = 62 (0x3e), region = 291 }
0x16f1   : > { %s22212_s18 = smov %s22209_s24 }
0x16f4   :  { %15327 = vsyncpa [#allocation6], 1 }
0x16f5   :  { %15329 = vsyncpa [#allocation6 + $0x1], 1 }

</bundles_post_ra>
